<compile_context>
chip_gen: v5e
topology: v5e:2x2
jax: 0.10.0
libtpu: 0.0.40
codegen_flags: <defaults>
</compile_context>

<pallas_src>
import functools

import jax
import jax.numpy as jnp
from jax import lax
from jax.experimental import pallas as pl
from jax.experimental.pallas import tpu as pltpu


# Scoped-VMEM budget: above the 16/32 MiB scoped defaults on v5e/v6e, with
# headroom below v7x's 64 MiB physical VMEM per TensorCore.
# TODO(synk): raise toward ~96 MiB on v5e/v6e (128 MiB physical) for long S.
_VMEM_LIMIT_BYTES = 48 * 1024 * 1024
_ATTN_BLOCK_BUDGET_BYTES = 40 * 1024 * 1024


# --------------------------- tile-size helpers -------------------------------

def _pick_tile(dim, pref, align):
    """Largest tile <= pref that divides `dim` and is `align`-aligned; falls
    back to the smallest aligned divisor, then to the full dimension."""
    if dim <= pref:
        return dim
    divisors = [d for d in range(align, dim + 1, align) if dim % d == 0]
    small = [d for d in divisors if d <= pref]
    if small:
        return small[-1]
    if divisors:
        return divisors[0]
    # TODO(synk): pad awkward dims instead of using one full-size block.
    return dim


def _pick_heads_tile(num_heads, head_dim):
    """Heads per attention grid step.  Constraints:
      * divides num_heads,
      * multiple of 8 or == num_heads (sublane tiling of the (th, Dh) blocks),
      * th * Dh multiple of 128 or th == num_heads (lane-dense ctx block).
    The smallest valid tile is preferred (bounds per-step VMEM / live ranges);
    total K/V HBM traffic is independent of th."""
    cands = [t for t in range(8, num_heads, 8) if num_heads % t == 0]
    cands.append(num_heads)
    ok = [t for t in cands if (t * head_dim) % 128 == 0 or t == num_heads]
    return min(ok)


def _pick_attn_tiles(s_q, s_kv, num_heads, head_dim,
                     budget=_ATTN_BLOCK_BUDGET_BYTES):
    """Pick (tq, th) so the per-step VMEM working set fits `budget`.
    K/V are streamed full-length per (batch, head-block) step, so the query
    tile tq is the main K/V-restreaming lever: prefer the largest tq that fits.
    TODO(synk): kv-blocked online softmax for very long s_kv (eventually the
    full-length K/V block itself exceeds the budget)."""
    th = _pick_heads_tile(num_heads, head_dim)

    def fits(tq):
        blocks = 2 * (tq * th * head_dim          # q block (double-buffered)
                      + 2 * s_kv * th * head_dim  # k + v blocks
                      + tq * th * head_dim        # ctx output block
                      + tq * s_kv)                # averaged-weights block
        temps = 2 * tq * s_kv + th * tq * head_dim  # scores/probs + ctx parts
        return 4 * (blocks + temps) <= budget       # f32 accounting

    cands = [t for t in (1024, 512, 256, 128, 64, 32, 16, 8)
             if t <= s_q and s_q % t == 0]
    if not cands:
        cands = [s_q]
    for tq in cands:
        if fits(tq):
            return tq, th
    return cands[-1], th


# ----------------------- tiled GEMM (projections) ----------------------------

def _matmul_kernel(x_ref, w_ref, o_ref, acc_ref):
    @pl.when(pl.program_id(2) == 0)
    def _():
        acc_ref[...] = jnp.zeros_like(acc_ref)

    acc_ref[...] += jnp.dot(x_ref[...], w_ref[...],
                            preferred_element_type=jnp.float32)

    @pl.when(pl.program_id(2) == pl.num_programs(2) - 1)
    def _():
        o_ref[...] = acc_ref[...].astype(o_ref.dtype)


def _matmul_bias_kernel(x_ref, w_ref, b_ref, o_ref, acc_ref):
    @pl.when(pl.program_id(2) == 0)
    def _():
        acc_ref[...] = jnp.zeros_like(acc_ref)

    acc_ref[...] += jnp.dot(x_ref[...], w_ref[...],
                            preferred_element_type=jnp.float32)

    @pl.when(pl.program_id(2) == pl.num_programs(2) - 1)
    def _():
        o_ref[...] = (acc_ref[...] + b_ref[...]).astype(o_ref.dtype)


def pallas_matmul(x, w, bias=None, *, tm=512, tn=512, tk=512):
    """o = x @ w (+ bias).  x:(M,K), w:(K,N), bias:(1,N) or None."""
    M, K = x.shape
    K2, N = w.shape
    assert K == K2
    tm = _pick_tile(M, tm, 8)
    tn = _pick_tile(N, tn, 128)
    tk = _pick_tile(K, tk, 128)
    grid = (M // tm, N // tn, K // tk)

    in_specs = [pl.BlockSpec((tm, tk), lambda i, j, k: (i, k)),
                pl.BlockSpec((tk, tn), lambda i, j, k: (k, j))]
    args = (x, w)
    kernel = _matmul_kernel
    if bias is not None:
        in_specs = in_specs + [pl.BlockSpec((1, tn), lambda i, j, k: (0, j))]
        args = (x, w, bias)
        kernel = _matmul_bias_kernel

    return pl.pallas_call(
        kernel,
        out_shape=jax.ShapeDtypeStruct((M, N), x.dtype),
        grid=grid,
        in_specs=in_specs,
        out_specs=pl.BlockSpec((tm, tn), lambda i, j, k: (i, j)),
        scratch_shapes=[pltpu.VMEM((tm, tn), jnp.float32)],
        compiler_params=pltpu.CompilerParams(
            dimension_semantics=("parallel", "parallel", "arbitrary"),
            vmem_limit_bytes=_VMEM_LIMIT_BYTES),
    )(*args)


# -------------------- multi-head attention (per-batch) -----------------------

def _attn_kernel(q_ref, k_ref, v_ref, o_ref, w_ref, *,
                 heads_per_block, inv_heads):
    # q_ref: (tq, th, Dh)  (q is pre-scaled by 1/sqrt(Dh) via the folded weight)
    # k_ref, v_ref: (S_kv, th, Dh)
    # o_ref: (tq, th*Dh)   lane-dense ctx block of the (B, S, E) output
    # w_ref: (tq, S_kv)    head-summed attention probs (averaged at finalize)
    hi = pl.program_id(2)

    @pl.when(hi == 0)
    def _():
        w_ref[...] = jnp.zeros_like(w_ref)

    ctx_parts = []
    # Static unroll over a small head block; per-head (tq, S) temporaries are
    # consumed before the next head (probs are added straight into w_ref).
    for h in range(heads_per_block):
        qh = q_ref[:, h, :]                      # (tq, Dh)
        kh = k_ref[:, h, :]                      # (S , Dh)
        vh = v_ref[:, h, :]                      # (S , Dh)
        # Contract the last dims of q and k directly (no k.T relayout).
        s = lax.dot_general(qh, kh, (((1,), (1,)), ((), ())),
                            preferred_element_type=jnp.float32)       # (tq, S)
        m = jnp.max(s, axis=-1, keepdims=True)
        p = jnp.exp(s - m)
        denom = jnp.sum(p, axis=-1, keepdims=True)
        p = p * pl.reciprocal(denom)             # exact: weight rows sum to 1
        w_ref[...] += p                          # head-sum accumulator
        ctx_parts.append(
            lax.dot_general(p.astype(vh.dtype), vh, (((1,), (0,)), ((), ())),
                            preferred_element_type=jnp.float32))      # (tq, Dh)

    # Single, lane-dense full-block store of the context for this head block.
    o_ref[...] = jnp.concatenate(ctx_parts, axis=-1).astype(o_ref.dtype)

    @pl.when(hi == pl.num_programs(2) - 1)
    def _():
        # Apply 1/num_heads once per (batch, query-tile) instead of per step.
        w_ref[...] = w_ref[...] * inv_heads


def _run_attention(in_arrays, in_specs, *, batch, s_q, s_kv, num_heads,
                   head_dim, tq, th, out_dtype):
    grid = (batch, s_q // tq, num_heads // th)
    o_spec = pl.BlockSpec((None, tq, th * head_dim),
                          lambda b, qi, hi: (b, qi, hi))
    w_spec = pl.BlockSpec((None, tq, s_kv),
                          lambda b, qi, hi: (b, qi, 0))
    return pl.pallas_call(
        functools.partial(_attn_kernel, heads_per_block=th,
                          inv_heads=1.0 / num_heads),
        out_shape=(jax.ShapeDtypeStruct((batch, s_q, num_heads * head_dim),
                                        out_dtype),
                   jax.ShapeDtypeStruct((batch, s_q, s_kv), jnp.float32)),
        grid=grid,
        in_specs=in_specs,
        out_specs=(o_spec, w_spec),
        compiler_params=pltpu.CompilerParams(
            dimension_semantics=("parallel", "parallel", "arbitrary"),
            vmem_limit_bytes=_VMEM_LIMIT_BYTES),
    )(*in_arrays)


def pallas_attention_fused(qkv5):
    """qkv5: (S, B, 3, H, Dh) fused projection output (q pre-scaled).
    Returns ctx:(B, S, E) and head-averaged weights:(B, S, S)."""
    S, B, _, H, Dh = qkv5.shape
    tq, th = _pick_attn_tiles(S, S, H, Dh)
    q_spec = pl.BlockSpec((tq, None, None, th, Dh),
                          lambda b, qi, hi: (qi, b, 0, hi, 0))
    k_spec = pl.BlockSpec((S, None, None, th, Dh),
                          lambda b, qi, hi: (0, b, 1, hi, 0))
    v_spec = pl.BlockSpec((S, None, None, th, Dh),
                          lambda b, qi, hi: (0, b, 2, hi, 0))
    return _run_attention((qkv5, qkv5, qkv5), [q_spec, k_spec, v_spec],
                          batch=B, s_q=S, s_kv=S, num_heads=H, head_dim=Dh,
                          tq=tq, th=th, out_dtype=qkv5.dtype)


def pallas_attention_separate(q4, k4, v4):
    """q4:(S,B,H,Dh), k4/v4:(Sk,B,H,Dh); q pre-scaled.  No HBM re-pack needed:
    head split handled purely by BlockSpec index maps on the three arrays."""
    S, B, H, Dh = q4.shape
    Sk = k4.shape[0]
    tq, th = _pick_attn_tiles(S, Sk, H, Dh)
    q_spec = pl.BlockSpec((tq, None, th, Dh), lambda b, qi, hi: (qi, b, hi, 0))
    k_spec = pl.BlockSpec((Sk, None, th, Dh), lambda b, qi, hi: (0, b, hi, 0))
    v_spec = pl.BlockSpec((Sk, None, th, Dh), lambda b, qi, hi: (0, b, hi, 0))
    return _run_attention((q4, k4, v4), [q_spec, k_spec, v_spec],
                          batch=B, s_q=S, s_kv=Sk, num_heads=H, head_dim=Dh,
                          tq=tq, th=th, out_dtype=q4.dtype)


# --------------------------- Module-equivalent --------------------------------

class SelfMultiheadAttentionPallas:
    """JAX/Pallas equivalent of the PyTorch SelfMultiheadAttention module
    (bias=False, add_bias_kv=False, add_zero_attn=False, dropout=0)."""

    def __init__(self, embed_dim, num_heads, key):
        assert embed_dim % num_heads == 0
        self.embed_dim = embed_dim
        self.num_heads = num_heads
        self.head_dim = embed_dim // num_heads

        k1, k2, k3, k4, k5 = jax.random.split(key, 5)

        def xavier_uniform(k, shape):
            fan_out, fan_in = shape
            a = (6.0 / (fan_in + fan_out)) ** 0.5
            return jax.random.uniform(k, shape, jnp.float32, -a, a)

        # PyTorch convention: weight shape is (out_features, in_features)
        self.q_proj_weight = xavier_uniform(k1, (embed_dim, embed_dim))
        self.k_proj_weight = xavier_uniform(k2, (embed_dim, embed_dim))
        self.v_proj_weight = xavier_uniform(k3, (embed_dim, embed_dim))
        # out_proj = _LinearWithBias(embed_dim, embed_dim) (default Linear init)
        bound = 1.0 / (embed_dim ** 0.5)
        self.out_proj_weight = jax.random.uniform(
            k4, (embed_dim, embed_dim), jnp.float32, -bound, bound)
        self.out_proj_bias = jax.random.uniform(
            k5, (embed_dim,), jnp.float32, -bound, bound)

        scaling = float(self.head_dim) ** -0.5
        # Fused (E, 3E) QKV weight with 1/sqrt(head_dim) folded into q.
        self.qkv_weight = jnp.concatenate(
            [self.q_proj_weight.T * scaling,
             self.k_proj_weight.T,
             self.v_proj_weight.T], axis=1)
        # Pre-transposed weights for the non-fused (cross-attention) path.
        self.q_weight_scaled_t = self.q_proj_weight.T * scaling
        self.k_weight_t = self.k_proj_weight.T
        self.v_weight_t = self.v_proj_weight.T
        self.out_weight_t = self.out_proj_weight.T
        self.out_bias_2d = self.out_proj_bias.reshape(1, embed_dim)

    def __call__(self, query, key, value):
        # query/key/value: (S, B, E)   [seq-first, like PyTorch MHA]
        S, B, E = query.shape
        H, Dh = self.num_heads, self.head_dim
        assert key.shape[1:] == (B, E) and value.shape == key.shape

        # NOTE: fast path keys off Python object identity; equal-but-distinct
        # arrays take the (now stack-free) separate-projection path.
        if (query is key) and (key is value):
            # Self-attention fast path: one fused QKV GEMM (x read once).
            qkv = pallas_matmul(query.reshape(S * B, E), self.qkv_weight)
            qkv5 = qkv.reshape(S, B, 3, H, Dh)            # free reshape
            ctx_bse, attn_avg = pallas_attention_fused(qkv5)
        else:
            Sk = key.shape[0]
            q = pallas_matmul(query.reshape(S * B, E), self.q_weight_scaled_t)
            k = pallas_matmul(key.reshape(Sk * B, E), self.k_weight_t)
            v = pallas_matmul(value.reshape(Sk * B, E), self.v_weight_t)
            ctx_bse, attn_avg = pallas_attention_separate(
                q.reshape(S, B, H, Dh), k.reshape(Sk, B, H, Dh),
                v.reshape(Sk, B, H, Dh))

        # Out projection on the contiguous (B*S, E) context; transpose the
        # final (small) output back to PyTorch's (S, B, E) layout.
        out = pallas_matmul(ctx_bse.reshape(B * S, E), self.out_weight_t,
                            bias=self.out_bias_2d)
        out = jnp.transpose(out.reshape(B, S, E), (1, 0, 2))
        return out, attn_avg


# ------------------------------ Reference -------------------------------------

def reference_forward(m, query, key, value):
    S, B, E = query.shape
    Sk = key.shape[0]
    H, Dh = m.num_heads, m.head_dim
    scaling = float(Dh) ** -0.5
    q = (query.reshape(S * B, E) @ m.q_proj_weight.T) * scaling
    k = key.reshape(Sk * B, E) @ m.k_proj_weight.T
    v = value.reshape(Sk * B, E) @ m.v_proj_weight.T
    qh = q.reshape(S, B * H, Dh).transpose(1, 0, 2)
    kh = k.reshape(Sk, B * H, Dh).transpose(1, 0, 2)
    vh = v.reshape(Sk, B * H, Dh).transpose(1, 0, 2)
    s = jnp.einsum('bqd,bkd->bqk', qh, kh)
    p = jax.nn.softmax(s, axis=-1)
    o = jnp.einsum('bqk,bkd->bqd', p, vh)
    merged = o.transpose(1, 0, 2).reshape(S * B, E)
    out = (merged @ m.out_proj_weight.T + m.out_proj_bias).reshape(S, B, E)
    return out, p.reshape(B, H, S, Sk).mean(axis=1)


# --------------------------------- Main ----------------------------------------

if __name__ == "__main__":
    # Small but representative: Dh=32, heads_per_block*Dh = 128 lanes.
    S, B, E, H = 64, 2, 128, 4

    root = jax.random.PRNGKey(0)
    k_param, k_x = jax.random.split(root)
    module = SelfMultiheadAttentionPallas(E, H, k_param)

    x = jax.random.normal(k_x, (S, B, E), jnp.float32)

    ref_out, ref_w = reference_forward(module, x, x, x)

    # Fused self-attention path (q is k is v inside the trace).
    fwd = jax.jit(lambda t: module(t, t, t))
    out, attn_w = fwd(x)
    out = jax.block_until_ready(out)
    attn_w = jax.block_until_ready(attn_w)

    assert out.shape == (S, B, E) and attn_w.shape == (B, S, S)
    # Tolerances allow for the TPU's default (fast) f32 MXU matmul precision.
    assert jnp.allclose(out, ref_out, atol=1e-2, rtol=1e-2), \
        float(jnp.max(jnp.abs(out - ref_out)))
    assert jnp.allclose(attn_w, ref_w, atol=5e-3, rtol=5e-3), \
        float(jnp.max(jnp.abs(attn_w - ref_w)))

    # Separate-projection path (distinct tracer args -> 3-GEMM path).
    fwd_sep = jax.jit(lambda a, b, c: module(a, b, c))
    out2, attn_w2 = fwd_sep(x, x, x)
    out2 = jax.block_until_ready(out2)
    attn_w2 = jax.block_until_ready(attn_w2)
    assert jnp.allclose(out2, ref_out, atol=1e-2, rtol=1e-2), \
        float(jnp.max(jnp.abs(out2 - ref_out)))
    assert jnp.allclose(attn_w2, ref_w, atol=5e-3, rtol=5e-3), \
        float(jnp.max(jnp.abs(attn_w2 - ref_w)))

    print("KERNEL_OK")
</pallas_src>

<mosaic_0001>
module attributes {stable_mosaic.version = 11 : i64} {
  func.func @_matmul_kernel(%arg0: i32, %arg1: i32, %arg2: i32, %arg3: memref<128x128xf32, #tpu.memory_space<vmem>>, %arg4: memref<128x384xf32, #tpu.memory_space<vmem>>, %arg5: memref<128x384xf32, #tpu.memory_space<vmem>>, %arg6: memref<128x384xf32, #tpu.memory_space<vmem>>) attributes {dimension_semantics = [#tpu.dimension_semantics<parallel>, #tpu.dimension_semantics<parallel>, #tpu.dimension_semantics<arbitrary>], iteration_bounds = array<i64: 1, 1, 1>, scalar_prefetch = 0 : i64, scratch_operands = 1 : i64, tpu.core_type = #tpu.core_type<tc>, window_params = [{transform_indices = @transform_0, window_bounds = array<i64: 128, 128>}, {transform_indices = @transform_1, window_bounds = array<i64: 128, 384>}, {transform_indices = @transform_2, window_bounds = array<i64: 128, 384>}]} {
    %c0_i32 = arith.constant 0 : i32
    %0 = arith.cmpi eq, %arg2, %c0_i32 : i32
    %1 = arith.extui %0 : i1 to i32
    %c0_i32_0 = arith.constant 0 : i32
    %2 = arith.cmpi ne, %1, %c0_i32_0 : i32
    scf.if %2 {
      %cst_10 = arith.constant 0.000000e+00 : f32
      %12 = vector.broadcast %cst_10 : f32 to vector<128x384xf32>
      %c0_11 = arith.constant 0 : index
      %c0_12 = arith.constant 0 : index
      %13 = vector.load %arg6[%c0_11, %c0_12] : memref<128x384xf32, #tpu.memory_space<vmem>>, vector<128x384xf32>
      tpu.vector_store %arg6[%c0_11, %c0_12], %12 {strides = array<i32>} : memref<128x384xf32, #tpu.memory_space<vmem>>, vector<128x384xf32>,
    } else {
    }
    %c0 = arith.constant 0 : index
    %c0_1 = arith.constant 0 : index
    %3 = vector.load %arg6[%c0, %c0_1] : memref<128x384xf32, #tpu.memory_space<vmem>>, vector<128x384xf32>
    %c0_2 = arith.constant 0 : index
    %c0_3 = arith.constant 0 : index
    %4 = vector.load %arg3[%c0_2, %c0_3] : memref<128x128xf32, #tpu.memory_space<vmem>>, vector<128x128xf32>
    %c0_4 = arith.constant 0 : index
    %c0_5 = arith.constant 0 : index
    %5 = vector.load %arg4[%c0_4, %c0_5] : memref<128x384xf32, #tpu.memory_space<vmem>>, vector<128x384xf32>
    %cst = arith.constant dense<0.000000e+00> : vector<128x384xf32>
    %6 = tpu.matmul %4, %5, %cst {dimension_numbers = #tpu.dot_dimension_numbers<[1], [0], [0], [1], [0, 0, 1, 1], [], []>} : vector<128x128xf32>, vector<128x384xf32>, vector<128x384xf32> -> vector<128x384xf32>
    %7 = arith.addf %3, %6 : vector<128x384xf32>
    %c0_6 = arith.constant 0 : index
    %c0_7 = arith.constant 0 : index
    %8 = vector.load %arg6[%c0_6, %c0_7] : memref<128x384xf32, #tpu.memory_space<vmem>>, vector<128x384xf32>
    tpu.vector_store %arg6[%c0_6, %c0_7], %7 {strides = array<i32>} : memref<128x384xf32, #tpu.memory_space<vmem>>, vector<128x384xf32>,
    %c0_i32_8 = arith.constant 0 : i32
    %9 = arith.cmpi eq, %arg2, %c0_i32_8 : i32
    %10 = arith.extui %9 : i1 to i32
    %c0_i32_9 = arith.constant 0 : i32
    %11 = arith.cmpi ne, %10, %c0_i32_9 : i32
    scf.if %11 {
      %c0_10 = arith.constant 0 : index
      %c0_11 = arith.constant 0 : index
      %12 = vector.load %arg6[%c0_10, %c0_11] : memref<128x384xf32, #tpu.memory_space<vmem>>, vector<128x384xf32>
      %c0_12 = arith.constant 0 : index
      %c0_13 = arith.constant 0 : index
      %13 = vector.load %arg5[%c0_12, %c0_13] : memref<128x384xf32, #tpu.memory_space<vmem>>, vector<128x384xf32>
      tpu.vector_store %arg5[%c0_12, %c0_13], %12 {strides = array<i32>} : memref<128x384xf32, #tpu.memory_space<vmem>>, vector<128x384xf32>,
    } else {
    }
    return
  }
  func.func @transform_0(%arg0: i32, %arg1: i32, %arg2: i32) -> (i32, i32) {
    %c0_i32 = arith.constant 0 : i32
    return %arg0, %arg2 : i32, i32
  }
  func.func @transform_1(%arg0: i32, %arg1: i32, %arg2: i32) -> (i32, i32) {
    %c0_i32 = arith.constant 0 : i32
    return %arg2, %arg1 : i32, i32
  }
  func.func @transform_2(%arg0: i32, %arg1: i32, %arg2: i32) -> (i32, i32) {
    %c0_i32 = arith.constant 0 : i32
    return %arg0, %arg1 : i32, i32
  }
}

module attributes {stable_mosaic.version = 11 : i64} {
  func.func @_attn_kernel(%arg0: i32, %arg1: i32, %arg2: i32, %arg3: memref<64x1x1x4x32xf32, #tpu.memory_space<vmem>>, %arg4: memref<64x1x1x4x32xf32, #tpu.memory_space<vmem>>, %arg5: memref<64x1x1x4x32xf32, #tpu.memory_space<vmem>>, %arg6: memref<1x64x128xf32, #tpu.memory_space<vmem>>, %arg7: memref<1x64x64xf32, #tpu.memory_space<vmem>>) attributes {dimension_semantics = [#tpu.dimension_semantics<parallel>, #tpu.dimension_semantics<parallel>, #tpu.dimension_semantics<arbitrary>], iteration_bounds = array<i64: 2, 1, 1>, scalar_prefetch = 0 : i64, scratch_operands = 0 : i64, tpu.core_type = #tpu.core_type<tc>, window_params = [{transform_indices = @transform_0, window_bounds = array<i64: 64, 1, 1, 4, 32>}, {transform_indices = @transform_1, window_bounds = array<i64: 64, 1, 1, 4, 32>}, {transform_indices = @transform_2, window_bounds = array<i64: 64, 1, 1, 4, 32>}, {transform_indices = @transform_3, window_bounds = array<i64: 1, 64, 128>}, {transform_indices = @transform_4, window_bounds = array<i64: 1, 64, 64>}]} {
    %c0_i32 = arith.constant 0 : i32
    %0 = arith.cmpi eq, %arg2, %c0_i32 : i32
    %1 = arith.extui %0 : i1 to i32
    %c0_i32_0 = arith.constant 0 : i32
    %2 = arith.cmpi ne, %1, %c0_i32_0 : i32
    scf.if %2 {
      %cst_101 = arith.constant 0.000000e+00 : f32
      %106 = vector.broadcast %cst_101 : f32 to vector<64x64xf32>
      %c0_102 = arith.constant 0 : index
      %c0_103 = arith.constant 0 : index
      %c0_104 = arith.constant 0 : index
      %107 = vector.load %arg7[%c0_102, %c0_103, %c0_104] : memref<1x64x64xf32, #tpu.memory_space<vmem>>, vector<1x64x64xf32>
      %108 = vector.shape_cast %107 : vector<1x64x64xf32> to vector<64x64xf32>
      %109 = vector.shape_cast %106 : vector<64x64xf32> to vector<1x64x64xf32>
      tpu.vector_store %arg7[%c0_102, %c0_103, %c0_104], %109 {strides = array<i32>} : memref<1x64x64xf32, #tpu.memory_space<vmem>>, vector<1x64x64xf32>,
    } else {
    }
    %c0 = arith.constant 0 : index
    %c0_1 = arith.constant 0 : index
    %c0_2 = arith.constant 0 : index
    %c0_3 = arith.constant 0 : index
    %c0_4 = arith.constant 0 : index
    %3 = vector.load %arg3[%c0, %c0_1, %c0_2, %c0_3, %c0_4] : memref<64x1x1x4x32xf32, #tpu.memory_space<vmem>>, vector<64x1x1x1x32xf32>
    %4 = vector.shape_cast %3 : vector<64x1x1x1x32xf32> to vector<64x32xf32>
    %c0_5 = arith.constant 0 : index
    %c0_6 = arith.constant 0 : index
    %c0_7 = arith.constant 0 : index
    %c0_8 = arith.constant 0 : index
    %c0_9 = arith.constant 0 : index
    %5 = vector.load %arg4[%c0_5, %c0_6, %c0_7, %c0_8, %c0_9] : memref<64x1x1x4x32xf32, #tpu.memory_space<vmem>>, vector<64x1x1x1x32xf32>
    %6 = vector.shape_cast %5 : vector<64x1x1x1x32xf32> to vector<64x32xf32>
    %c0_10 = arith.constant 0 : index
    %c0_11 = arith.constant 0 : index
    %c0_12 = arith.constant 0 : index
    %c0_13 = arith.constant 0 : index
    %c0_14 = arith.constant 0 : index
    %7 = vector.load %arg5[%c0_10, %c0_11, %c0_12, %c0_13, %c0_14] : memref<64x1x1x4x32xf32, #tpu.memory_space<vmem>>, vector<64x1x1x1x32xf32>
    %8 = vector.shape_cast %7 : vector<64x1x1x1x32xf32> to vector<64x32xf32>
    %cst = arith.constant dense<0.000000e+00> : vector<64x64xf32>
    %9 = tpu.matmul %4, %6, %cst {dimension_numbers = #tpu.dot_dimension_numbers<[1], [1], [0], [0], [0, 0, 1, 0], [], []>} : vector<64x32xf32>, vector<64x32xf32>, vector<64x64xf32> -> vector<64x64xf32>
    %cst_15 = arith.constant dense<0xFF800000> : vector<64xf32>
    %10 = vector.multi_reduction <maximumf>, %9, %cst_15 [1] : vector<64x64xf32> to vector<64xf32>
    %11 = vector.shape_cast %10 : vector<64xf32> to vector<64x1xf32>
    %12 = vector.broadcast %11 : vector<64x1xf32> to vector<64x64xf32>
    %13 = arith.subf %9, %12 : vector<64x64xf32>
    %14 = math.exp %13 : vector<64x64xf32>
    %cst_16 = arith.constant dense<0.000000e+00> : vector<64xf32>
    %15 = vector.multi_reduction <add>, %14, %cst_16 [1] : vector<64x64xf32> to vector<64xf32>
    %16 = vector.shape_cast %15 : vector<64xf32> to vector<64x1xf32>
    %17 = tpu.reciprocal %16 : vector<64x1xf32> -> vector<64x1xf32>
    %18 = vector.broadcast %17 : vector<64x1xf32> to vector<64x64xf32>
    %19 = arith.mulf %14, %18 : vector<64x64xf32>
    %c0_17 = arith.constant 0 : index
    %c0_18 = arith.constant 0 : index
    %c0_19 = arith.constant 0 : index
    %20 = vector.load %arg7[%c0_17, %c0_18, %c0_19] : memref<1x64x64xf32, #tpu.memory_space<vmem>>, vector<1x64x64xf32>
    %21 = vector.shape_cast %20 : vector<1x64x64xf32> to vector<64x64xf32>
    %22 = arith.addf %21, %19 : vector<64x64xf32>
    %c0_20 = arith.constant 0 : index
    %c0_21 = arith.constant 0 : index
    %c0_22 = arith.constant 0 : index
    %23 = vector.load %arg7[%c0_20, %c0_21, %c0_22] : memref<1x64x64xf32, #tpu.memory_space<vmem>>, vector<1x64x64xf32>
    %24 = vector.shape_cast %23 : vector<1x64x64xf32> to vector<64x64xf32>
    %25 = vector.shape_cast %22 : vector<64x64xf32> to vector<1x64x64xf32>
    tpu.vector_store %arg7[%c0_20, %c0_21, %c0_22], %25 {strides = array<i32>} : memref<1x64x64xf32, #tpu.memory_space<vmem>>, vector<1x64x64xf32>,
    %cst_23 = arith.constant dense<0.000000e+00> : vector<64x32xf32>
    %26 = tpu.matmul %19, %8, %cst_23 {dimension_numbers = #tpu.dot_dimension_numbers<[1], [0], [0], [1], [0, 0, 1, 1], [], []>} : vector<64x64xf32>, vector<64x32xf32>, vector<64x32xf32> -> vector<64x32xf32>
    %c0_24 = arith.constant 0 : index
    %c0_25 = arith.constant 0 : index
    %c0_26 = arith.constant 0 : index
    %c1 = arith.constant 1 : index
    %c0_27 = arith.constant 0 : index
    %27 = vector.load %arg3[%c0_24, %c0_25, %c0_26, %c1, %c0_27] : memref<64x1x1x4x32xf32, #tpu.memory_space<vmem>>, vector<64x1x1x1x32xf32>
    %28 = vector.shape_cast %27 : vector<64x1x1x1x32xf32> to vector<64x32xf32>
    %c0_28 = arith.constant 0 : index
    %c0_29 = arith.constant 0 : index
    %c0_30 = arith.constant 0 : index
    %c1_31 = arith.constant 1 : index
    %c0_32 = arith.constant 0 : index
    %29 = vector.load %arg4[%c0_28, %c0_29, %c0_30, %c1_31, %c0_32] : memref<64x1x1x4x32xf32, #tpu.memory_space<vmem>>, vector<64x1x1x1x32xf32>
    %30 = vector.shape_cast %29 : vector<64x1x1x1x32xf32> to vector<64x32xf32>
    %c0_33 = arith.constant 0 : index
    %c0_34 = arith.constant 0 : index
    %c0_35 = arith.constant 0 : index
    %c1_36 = arith.constant 1 : index
    %c0_37 = arith.constant 0 : index
    %31 = vector.load %arg5[%c0_33, %c0_34, %c0_35, %c1_36, %c0_37] : memref<64x1x1x4x32xf32, #tpu.memory_space<vmem>>, vector<64x1x1x1x32xf32>
    %32 = vector.shape_cast %31 : vector<64x1x1x1x32xf32> to vector<64x32xf32>
    %cst_38 = arith.constant dense<0.000000e+00> : vector<64x64xf32>
    %33 = tpu.matmul %28, %30, %cst_38 {dimension_numbers = #tpu.dot_dimension_numbers<[1], [1], [0], [0], [0, 0, 1, 0], [], []>} : vector<64x32xf32>, vector<64x32xf32>, vector<64x64xf32> -> vector<64x64xf32>
    %cst_39 = arith.constant dense<0xFF800000> : vector<64xf32>
    %34 = vector.multi_reduction <maximumf>, %33, %cst_39 [1] : vector<64x64xf32> to vector<64xf32>
    %35 = vector.shape_cast %34 : vector<64xf32> to vector<64x1xf32>
    %36 = vector.broadcast %35 : vector<64x1xf32> to vector<64x64xf32>
    %37 = arith.subf %33, %36 : vector<64x64xf32>
    %38 = math.exp %37 : vector<64x64xf32>
    %cst_40 = arith.constant dense<0.000000e+00> : vector<64xf32>
    %39 = vector.multi_reduction <add>, %38, %cst_40 [1] : vector<64x64xf32> to vector<64xf32>
    %40 = vector.shape_cast %39 : vector<64xf32> to vector<64x1xf32>
    %41 = tpu.reciprocal %40 : vector<64x1xf32> -> vector<64x1xf32>
    %42 = vector.broadcast %41 : vector<64x1xf32> to vector<64x64xf32>
    %43 = arith.mulf %38, %42 : vector<64x64xf32>
    %c0_41 = arith.constant 0 : index
    %c0_42 = arith.constant 0 : index
    %c0_43 = arith.constant 0 : index
    %44 = vector.load %arg7[%c0_41, %c0_42, %c0_43] : memref<1x64x64xf32, #tpu.memory_space<vmem>>, vector<1x64x64xf32>
    %45 = vector.shape_cast %44 : vector<1x64x64xf32> to vector<64x64xf32>
    %46 = arith.addf %45, %43 : vector<64x64xf32>
    %c0_44 = arith.constant 0 : index
    %c0_45 = arith.constant 0 : index
    %c0_46 = arith.constant 0 : index
    %47 = vector.load %arg7[%c0_44, %c0_45, %c0_46] : memref<1x64x64xf32, #tpu.memory_space<vmem>>, vector<1x64x64xf32>
    %48 = vector.shape_cast %47 : vector<1x64x64xf32> to vector<64x64xf32>
    %49 = vector.shape_cast %46 : vector<64x64xf32> to vector<1x64x64xf32>
    tpu.vector_store %arg7[%c0_44, %c0_45, %c0_46], %49 {strides = array<i32>} : memref<1x64x64xf32, #tpu.memory_space<vmem>>, vector<1x64x64xf32>,
    %cst_47 = arith.constant dense<0.000000e+00> : vector<64x32xf32>
    %50 = tpu.matmul %43, %32, %cst_47 {dimension_numbers = #tpu.dot_dimension_numbers<[1], [0], [0], [1], [0, 0, 1, 1], [], []>} : vector<64x64xf32>, vector<64x32xf32>, vector<64x32xf32> -> vector<64x32xf32>
    %c0_48 = arith.constant 0 : index
    %c0_49 = arith.constant 0 : index
    %c0_50 = arith.constant 0 : index
    %c2 = arith.constant 2 : index
    %c0_51 = arith.constant 0 : index
    %51 = vector.load %arg3[%c0_48, %c0_49, %c0_50, %c2, %c0_51] : memref<64x1x1x4x32xf32, #tpu.memory_space<vmem>>, vector<64x1x1x1x32xf32>
    %52 = vector.shape_cast %51 : vector<64x1x1x1x32xf32> to vector<64x32xf32>
    %c0_52 = arith.constant 0 : index
    %c0_53 = arith.constant 0 : index
    %c0_54 = arith.constant 0 : index
    %c2_55 = arith.constant 2 : index
    %c0_56 = arith.constant 0 : index
    %53 = vector.load %arg4[%c0_52, %c0_53, %c0_54, %c2_55, %c0_56] : memref<64x1x1x4x32xf32, #tpu.memory_space<vmem>>, vector<64x1x1x1x32xf32>
    %54 = vector.shape_cast %53 : vector<64x1x1x1x32xf32> to vector<64x32xf32>
    %c0_57 = arith.constant 0 : index
    %c0_58 = arith.constant 0 : index
    %c0_59 = arith.constant 0 : index
    %c2_60 = arith.constant 2 : index
    %c0_61 = arith.constant 0 : index
    %55 = vector.load %arg5[%c0_57, %c0_58, %c0_59, %c2_60, %c0_61] : memref<64x1x1x4x32xf32, #tpu.memory_space<vmem>>, vector<64x1x1x1x32xf32>
    %56 = vector.shape_cast %55 : vector<64x1x1x1x32xf32> to vector<64x32xf32>
    %cst_62 = arith.constant dense<0.000000e+00> : vector<64x64xf32>
    %57 = tpu.matmul %52, %54, %cst_62 {dimension_numbers = #tpu.dot_dimension_numbers<[1], [1], [0], [0], [0, 0, 1, 0], [], []>} : vector<64x32xf32>, vector<64x32xf32>, vector<64x64xf32> -> vector<64x64xf32>
    %cst_63 = arith.constant dense<0xFF800000> : vector<64xf32>
    %58 = vector.multi_reduction <maximumf>, %57, %cst_63 [1] : vector<64x64xf32> to vector<64xf32>
    %59 = vector.shape_cast %58 : vector<64xf32> to vector<64x1xf32>
    %60 = vector.broadcast %59 : vector<64x1xf32> to vector<64x64xf32>
    %61 = arith.subf %57, %60 : vector<64x64xf32>
    %62 = math.exp %61 : vector<64x64xf32>
    %cst_64 = arith.constant dense<0.000000e+00> : vector<64xf32>
    %63 = vector.multi_reduction <add>, %62, %cst_64 [1] : vector<64x64xf32> to vector<64xf32>
    %64 = vector.shape_cast %63 : vector<64xf32> to vector<64x1xf32>
    %65 = tpu.reciprocal %64 : vector<64x1xf32> -> vector<64x1xf32>
    %66 = vector.broadcast %65 : vector<64x1xf32> to vector<64x64xf32>
    %67 = arith.mulf %62, %66 : vector<64x64xf32>
    %c0_65 = arith.constant 0 : index
    %c0_66 = arith.constant 0 : index
    %c0_67 = arith.constant 0 : index
    %68 = vector.load %arg7[%c0_65, %c0_66, %c0_67] : memref<1x64x64xf32, #tpu.memory_space<vmem>>, vector<1x64x64xf32>
    %69 = vector.shape_cast %68 : vector<1x64x64xf32> to vector<64x64xf32>
    %70 = arith.addf %69, %67 : vector<64x64xf32>
    %c0_68 = arith.constant 0 : index
    %c0_69 = arith.constant 0 : index
    %c0_70 = arith.constant 0 : index
    %71 = vector.load %arg7[%c0_68, %c0_69, %c0_70] : memref<1x64x64xf32, #tpu.memory_space<vmem>>, vector<1x64x64xf32>
    %72 = vector.shape_cast %71 : vector<1x64x64xf32> to vector<64x64xf32>
    %73 = vector.shape_cast %70 : vector<64x64xf32> to vector<1x64x64xf32>
    tpu.vector_store %arg7[%c0_68, %c0_69, %c0_70], %73 {strides = array<i32>} : memref<1x64x64xf32, #tpu.memory_space<vmem>>, vector<1x64x64xf32>,
    %cst_71 = arith.constant dense<0.000000e+00> : vector<64x32xf32>
    %74 = tpu.matmul %67, %56, %cst_71 {dimension_numbers = #tpu.dot_dimension_numbers<[1], [0], [0], [1], [0, 0, 1, 1], [], []>} : vector<64x64xf32>, vector<64x32xf32>, vector<64x32xf32> -> vector<64x32xf32>
    %c0_72 = arith.constant 0 : index
    %c0_73 = arith.constant 0 : index
    %c0_74 = arith.constant 0 : index
    %c3 = arith.constant 3 : index
    %c0_75 = arith.constant 0 : index
    %75 = vector.load %arg3[%c0_72, %c0_73, %c0_74, %c3, %c0_75] : memref<64x1x1x4x32xf32, #tpu.memory_space<vmem>>, vector<64x1x1x1x32xf32>
    %76 = vector.shape_cast %75 : vector<64x1x1x1x32xf32> to vector<64x32xf32>
    %c0_76 = arith.constant 0 : index
    %c0_77 = arith.constant 0 : index
    %c0_78 = arith.constant 0 : index
    %c3_79 = arith.constant 3 : index
    %c0_80 = arith.constant 0 : index
    %77 = vector.load %arg4[%c0_76, %c0_77, %c0_78, %c3_79, %c0_80] : memref<64x1x1x4x32xf32, #tpu.memory_space<vmem>>, vector<64x1x1x1x32xf32>
    %78 = vector.shape_cast %77 : vector<64x1x1x1x32xf32> to vector<64x32xf32>
    %c0_81 = arith.constant 0 : index
    %c0_82 = arith.constant 0 : index
    %c0_83 = arith.constant 0 : index
    %c3_84 = arith.constant 3 : index
    %c0_85 = arith.constant 0 : index
    %79 = vector.load %arg5[%c0_81, %c0_82, %c0_83, %c3_84, %c0_85] : memref<64x1x1x4x32xf32, #tpu.memory_space<vmem>>, vector<64x1x1x1x32xf32>
    %80 = vector.shape_cast %79 : vector<64x1x1x1x32xf32> to vector<64x32xf32>
    %cst_86 = arith.constant dense<0.000000e+00> : vector<64x64xf32>
    %81 = tpu.matmul %76, %78, %cst_86 {dimension_numbers = #tpu.dot_dimension_numbers<[1], [1], [0], [0], [0, 0, 1, 0], [], []>} : vector<64x32xf32>, vector<64x32xf32>, vector<64x64xf32> -> vector<64x64xf32>
    %cst_87 = arith.constant dense<0xFF800000> : vector<64xf32>
    %82 = vector.multi_reduction <maximumf>, %81, %cst_87 [1] : vector<64x64xf32> to vector<64xf32>
    %83 = vector.shape_cast %82 : vector<64xf32> to vector<64x1xf32>
    %84 = vector.broadcast %83 : vector<64x1xf32> to vector<64x64xf32>
    %85 = arith.subf %81, %84 : vector<64x64xf32>
    %86 = math.exp %85 : vector<64x64xf32>
    %cst_88 = arith.constant dense<0.000000e+00> : vector<64xf32>
    %87 = vector.multi_reduction <add>, %86, %cst_88 [1] : vector<64x64xf32> to vector<64xf32>
    %88 = vector.shape_cast %87 : vector<64xf32> to vector<64x1xf32>
    %89 = tpu.reciprocal %88 : vector<64x1xf32> -> vector<64x1xf32>
    %90 = vector.broadcast %89 : vector<64x1xf32> to vector<64x64xf32>
    %91 = arith.mulf %86, %90 : vector<64x64xf32>
    %c0_89 = arith.constant 0 : index
    %c0_90 = arith.constant 0 : index
    %c0_91 = arith.constant 0 : index
    %92 = vector.load %arg7[%c0_89, %c0_90, %c0_91] : memref<1x64x64xf32, #tpu.memory_space<vmem>>, vector<1x64x64xf32>
    %93 = vector.shape_cast %92 : vector<1x64x64xf32> to vector<64x64xf32>
    %94 = arith.addf %93, %91 : vector<64x64xf32>
    %c0_92 = arith.constant 0 : index
    %c0_93 = arith.constant 0 : index
    %c0_94 = arith.constant 0 : index
    %95 = vector.load %arg7[%c0_92, %c0_93, %c0_94] : memref<1x64x64xf32, #tpu.memory_space<vmem>>, vector<1x64x64xf32>
    %96 = vector.shape_cast %95 : vector<1x64x64xf32> to vector<64x64xf32>
    %97 = vector.shape_cast %94 : vector<64x64xf32> to vector<1x64x64xf32>
    tpu.vector_store %arg7[%c0_92, %c0_93, %c0_94], %97 {strides = array<i32>} : memref<1x64x64xf32, #tpu.memory_space<vmem>>, vector<1x64x64xf32>,
    %cst_95 = arith.constant dense<0.000000e+00> : vector<64x32xf32>
    %98 = tpu.matmul %91, %80, %cst_95 {dimension_numbers = #tpu.dot_dimension_numbers<[1], [0], [0], [1], [0, 0, 1, 1], [], []>} : vector<64x64xf32>, vector<64x32xf32>, vector<64x32xf32> -> vector<64x32xf32>
    %99 = tpu.concatenate %26, %50, %74, %98 in 1 : vector<64x32xf32>, vector<64x32xf32>, vector<64x32xf32>, vector<64x32xf32> -> vector<64x128xf32>
    %c0_96 = arith.constant 0 : index
    %c0_97 = arith.constant 0 : index
    %c0_98 = arith.constant 0 : index
    %100 = vector.load %arg6[%c0_96, %c0_97, %c0_98] : memref<1x64x128xf32, #tpu.memory_space<vmem>>, vector<1x64x128xf32>
    %101 = vector.shape_cast %100 : vector<1x64x128xf32> to vector<64x128xf32>
    %102 = vector.shape_cast %99 : vector<64x128xf32> to vector<1x64x128xf32>
    tpu.vector_store %arg6[%c0_96, %c0_97, %c0_98], %102 {strides = array<i32>} : memref<1x64x128xf32, #tpu.memory_space<vmem>>, vector<1x64x128xf32>,
    %c0_i32_99 = arith.constant 0 : i32
    %103 = arith.cmpi eq, %arg2, %c0_i32_99 : i32
    %104 = arith.extui %103 : i1 to i32
    %c0_i32_100 = arith.constant 0 : i32
    %105 = arith.cmpi ne, %104, %c0_i32_100 : i32
    scf.if %105 {
      %c0_101 = arith.constant 0 : index
      %c0_102 = arith.constant 0 : index
      %c0_103 = arith.constant 0 : index
      %106 = vector.load %arg7[%c0_101, %c0_102, %c0_103] : memref<1x64x64xf32, #tpu.memory_space<vmem>>, vector<1x64x64xf32>
      %107 = vector.shape_cast %106 : vector<1x64x64xf32> to vector<64x64xf32>
      %cst_104 = arith.constant 2.500000e-01 : f32
      %108 = vector.broadcast %cst_104 : f32 to vector<64x64xf32>
      %109 = arith.mulf %107, %108 : vector<64x64xf32>
      %c0_105 = arith.constant 0 : index
      %c0_106 = arith.constant 0 : index
      %c0_107 = arith.constant 0 : index
      %110 = vector.load %arg7[%c0_105, %c0_106, %c0_107] : memref<1x64x64xf32, #tpu.memory_space<vmem>>, vector<1x64x64xf32>
      %111 = vector.shape_cast %110 : vector<1x64x64xf32> to vector<64x64xf32>
      %112 = vector.shape_cast %109 : vector<64x64xf32> to vector<1x64x64xf32>
      tpu.vector_store %arg7[%c0_105, %c0_106, %c0_107], %112 {strides = array<i32>} : memref<1x64x64xf32, #tpu.memory_space<vmem>>, vector<1x64x64xf32>,
    } else {
    }
    return
  }
  func.func @transform_0(%arg0: i32, %arg1: i32, %arg2: i32) -> (i32, i32, i32, i32, i32) {
    %c0_i32 = arith.constant 0 : i32
    %c0_i32_0 = arith.constant 0 : i32
    %c0_i32_1 = arith.constant 0 : i32
    return %arg1, %arg0, %c0_i32, %arg2, %c0_i32_0 : i32, i32, i32, i32, i32
  }
  func.func @transform_1(%arg0: i32, %arg1: i32, %arg2: i32) -> (i32, i32, i32, i32, i32) {
    %c0_i32 = arith.constant 0 : i32
    %c1_i32 = arith.constant 1 : i32
    %c0_i32_0 = arith.constant 0 : i32
    %c0_i32_1 = arith.constant 0 : i32
    return %c0_i32, %arg0, %c1_i32, %arg2, %c0_i32_0 : i32, i32, i32, i32, i32
  }
  func.func @transform_2(%arg0: i32, %arg1: i32, %arg2: i32) -> (i32, i32, i32, i32, i32) {
    %c0_i32 = arith.constant 0 : i32
    %c2_i32 = arith.constant 2 : i32
    %c0_i32_0 = arith.constant 0 : i32
    %c0_i32_1 = arith.constant 0 : i32
    return %c0_i32, %arg0, %c2_i32, %arg2, %c0_i32_0 : i32, i32, i32, i32, i32
  }
  func.func @transform_3(%arg0: i32, %arg1: i32, %arg2: i32) -> (i32, i32, i32) {
    %c0_i32 = arith.constant 0 : i32
    return %arg0, %arg1, %arg2 : i32, i32, i32
  }
  func.func @transform_4(%arg0: i32, %arg1: i32, %arg2: i32) -> (i32, i32, i32) {
    %c0_i32 = arith.constant 0 : i32
    %c0_i32_0 = arith.constant 0 : i32
    return %arg0, %arg1, %c0_i32 : i32, i32, i32
  }
}

module attributes {stable_mosaic.version = 11 : i64} {
  func.func @_matmul_bias_kernel(%arg0: i32, %arg1: i32, %arg2: i32, %arg3: memref<128x128xf32, #tpu.memory_space<vmem>>, %arg4: memref<128x128xf32, #tpu.memory_space<vmem>>, %arg5: memref<1x128xf32, #tpu.memory_space<vmem>>, %arg6: memref<128x128xf32, #tpu.memory_space<vmem>>, %arg7: memref<128x128xf32, #tpu.memory_space<vmem>>) attributes {dimension_semantics = [#tpu.dimension_semantics<parallel>, #tpu.dimension_semantics<parallel>, #tpu.dimension_semantics<arbitrary>], iteration_bounds = array<i64: 1, 1, 1>, scalar_prefetch = 0 : i64, scratch_operands = 1 : i64, tpu.core_type = #tpu.core_type<tc>, window_params = [{transform_indices = @transform_0, window_bounds = array<i64: 128, 128>}, {transform_indices = @transform_1, window_bounds = array<i64: 128, 128>}, {transform_indices = @transform_2, window_bounds = array<i64: 1, 128>}, {transform_indices = @transform_3, window_bounds = array<i64: 128, 128>}]} {
    %c0_i32 = arith.constant 0 : i32
    %0 = arith.cmpi eq, %arg2, %c0_i32 : i32
    %1 = arith.extui %0 : i1 to i32
    %c0_i32_0 = arith.constant 0 : i32
    %2 = arith.cmpi ne, %1, %c0_i32_0 : i32
    scf.if %2 {
      %cst_10 = arith.constant 0.000000e+00 : f32
      %12 = vector.broadcast %cst_10 : f32 to vector<128x128xf32>
      %c0_11 = arith.constant 0 : index
      %c0_12 = arith.constant 0 : index
      %13 = vector.load %arg7[%c0_11, %c0_12] : memref<128x128xf32, #tpu.memory_space<vmem>>, vector<128x128xf32>
      tpu.vector_store %arg7[%c0_11, %c0_12], %12 {strides = array<i32>} : memref<128x128xf32, #tpu.memory_space<vmem>>, vector<128x128xf32>,
    } else {
    }
    %c0 = arith.constant 0 : index
    %c0_1 = arith.constant 0 : index
    %3 = vector.load %arg7[%c0, %c0_1] : memref<128x128xf32, #tpu.memory_space<vmem>>, vector<128x128xf32>
    %c0_2 = arith.constant 0 : index
    %c0_3 = arith.constant 0 : index
    %4 = vector.load %arg3[%c0_2, %c0_3] : memref<128x128xf32, #tpu.memory_space<vmem>>, vector<128x128xf32>
    %c0_4 = arith.constant 0 : index
    %c0_5 = arith.constant 0 : index
    %5 = vector.load %arg4[%c0_4, %c0_5] : memref<128x128xf32, #tpu.memory_space<vmem>>, vector<128x128xf32>
    %cst = arith.constant dense<0.000000e+00> : vector<128x128xf32>
    %6 = tpu.matmul %4, %5, %cst {dimension_numbers = #tpu.dot_dimension_numbers<[1], [0], [0], [1], [0, 0, 1, 1], [], []>} : vector<128x128xf32>, vector<128x128xf32>, vector<128x128xf32> -> vector<128x128xf32>
    %7 = arith.addf %3, %6 : vector<128x128xf32>
    %c0_6 = arith.constant 0 : index
    %c0_7 = arith.constant 0 : index
    %8 = vector.load %arg7[%c0_6, %c0_7] : memref<128x128xf32, #tpu.memory_space<vmem>>, vector<128x128xf32>
    tpu.vector_store %arg7[%c0_6, %c0_7], %7 {strides = array<i32>} : memref<128x128xf32, #tpu.memory_space<vmem>>, vector<128x128xf32>,
    %c0_i32_8 = arith.constant 0 : i32
    %9 = arith.cmpi eq, %arg2, %c0_i32_8 : i32
    %10 = arith.extui %9 : i1 to i32
    %c0_i32_9 = arith.constant 0 : i32
    %11 = arith.cmpi ne, %10, %c0_i32_9 : i32
    scf.if %11 {
      %c0_10 = arith.constant 0 : index
      %c0_11 = arith.constant 0 : index
      %12 = vector.load %arg7[%c0_10, %c0_11] : memref<128x128xf32, #tpu.memory_space<vmem>>, vector<128x128xf32>
      %c0_12 = arith.constant 0 : index
      %c0_13 = arith.constant 0 : index
      %13 = vector.load %arg5[%c0_12, %c0_13] : memref<1x128xf32, #tpu.memory_space<vmem>>, vector<1x128xf32>
      %14 = vector.broadcast %13 : vector<1x128xf32> to vector<128x128xf32>
      %15 = arith.addf %12, %14 : vector<128x128xf32>
      %c0_14 = arith.constant 0 : index
      %c0_15 = arith.constant 0 : index
      %16 = vector.load %arg6[%c0_14, %c0_15] : memref<128x128xf32, #tpu.memory_space<vmem>>, vector<128x128xf32>
      tpu.vector_store %arg6[%c0_14, %c0_15], %15 {strides = array<i32>} : memref<128x128xf32, #tpu.memory_space<vmem>>, vector<128x128xf32>,
    } else {
    }
    return
  }
  func.func @transform_0(%arg0: i32, %arg1: i32, %arg2: i32) -> (i32, i32) {
    %c0_i32 = arith.constant 0 : i32
    return %arg0, %arg2 : i32, i32
  }
  func.func @transform_1(%arg0: i32, %arg1: i32, %arg2: i32) -> (i32, i32) {
    %c0_i32 = arith.constant 0 : i32
    return %arg2, %arg1 : i32, i32
  }
  func.func @transform_2(%arg0: i32, %arg1: i32, %arg2: i32) -> (i32, i32) {
    %c0_i32 = arith.constant 0 : i32
    %c0_i32_0 = arith.constant 0 : i32
    return %c0_i32, %arg1 : i32, i32
  }
  func.func @transform_3(%arg0: i32, %arg1: i32, %arg2: i32) -> (i32, i32) {
    %c0_i32 = arith.constant 0 : i32
    return %arg0, %arg1 : i32, i32
  }
}

</mosaic_0001>

<bundles_post_ra>
// kernel: _lambda_.5
= control target key start
LH: loop header
LB: loop body
LE: loop exit
PB: predicated region body
PF: predicated region fallthrough
CT: control target
= control target key end

     0   :  { %s454_s1 = inlined_call_operand.vmem [shape: f32[128,128], index: 1, kind: input, shape index: {}]   ;;  %s455_s2 = inlined_call_operand.vmem [shape: f32[1,128], index: 2, kind: input, shape index: {}]   ;;  %s456_s0 = inlined_call_operand.vmem [shape: f32[128,128], index: 0, kind: input, shape index: {}]   ;;  %s457_s3 = inlined_call_operand.vmem [shape: f32[128,128], index: 3, kind: output, shape index: {}]  }
   0x1   :  { %v81_v0 = vld [vmem:[%s454_s1 + $0x78] sm:$0xff]  ;;  %v80_v1 = vld [vmem:[%s454_s1 + $0x70] sm:$0xff]  ;;  %v79_v2 = vld [vmem:[%s454_s1 + $0x68] sm:$0xff] }
   0x2   :  { %239 = vmatpush.msra.mxu2 %v81_v0  ;;  %240 = vmatpush.msra.mxu3 %v81_v0  ;;  %v78_v3 = vld [vmem:[%s454_s1 + $0x60] sm:$0xff]  ;;  %v77_v4 = vld [vmem:[%s454_s1 + $0x58] sm:$0xff]  ;;  %v76_v5 = vld [vmem:[%s454_s1 + $0x50] sm:$0xff] }
   0x3   :  { %82 = vmatpush.msra.mxu0 %v81_v0  ;;  %238 = vmatpush.msra.mxu1 %v81_v0  ;;  %v75_v6 = vld [vmem:[%s454_s1 + $0x48] sm:$0xff]  ;;  %v74_v7 = vld [vmem:[%s454_s1 + $0x40] sm:$0xff]  ;;  %v73_v8 = vld [vmem:[%s454_s1 + $0x38] sm:$0xff] }
   0x4   :  { %242 = vmatpush.msra.mxu2 %v80_v1  ;;  %243 = vmatpush.msra.mxu3 %v80_v1  ;;  %v72_v9 = vld [vmem:[%s454_s1 + $0x30] sm:$0xff]  ;;  %v71_v10 = vld [vmem:[%s454_s1 + $0x28] sm:$0xff]  ;;  %v70_v11 = vld [vmem:[%s454_s1 + $0x20] sm:$0xff] }
   0x5   :  { %83 = vmatpush.msra.mxu0 %v80_v1  ;;  %241 = vmatpush.msra.mxu1 %v80_v1  ;;  %v69_v12 = vld [vmem:[%s454_s1 + $0x18] sm:$0xff]  ;;  %v68_v13 = vld [vmem:[%s454_s1 + $0x10] sm:$0xff]  ;;  %v67_v14 = vld [vmem:[%s454_s1 + $0x8] sm:$0xff] }
   0x6   :  { %245 = vmatpush.msra.mxu2 %v79_v2  ;;  %246 = vmatpush.msra.mxu3 %v79_v2  ;;  %v66_v15 = vld [vmem:[%s454_s1] sm:$0xff]  ;;  %v59_v20 = vld [vmem:[%s456_s0 + $0x48] sm:$0xff]  ;;  %v60_v24 = vld [vmem:[%s456_s0 + $0x50] sm:$0xff] }
   0x7   :  { %84 = vmatpush.msra.mxu0 %v79_v2  ;;  %244 = vmatpush.msra.mxu1 %v79_v2  ;;  %v58_v16 = vld [vmem:[%s456_s0 + $0x40] sm:$0xff]  ;;  %v63_v21 = vld [vmem:[%s456_s0 + $0x68] sm:$0xff]  ;;  %v64_v25 = vld [vmem:[%s456_s0 + $0x70] sm:$0xff] }
   0x8   :  { %248 = vmatpush.msra.mxu2 %v78_v3  ;;  %249 = vmatpush.msra.mxu3 %v78_v3  ;;  %v62_v17 = vld [vmem:[%s456_s0 + $0x60] sm:$0xff]  ;;  %v51_v22 = vld [vmem:[%s456_s0 + $0x8] sm:$0xff]  ;;  %v52_v26 = vld [vmem:[%s456_s0 + $0x10] sm:$0xff] }
   0x9   :  { %85 = vmatpush.msra.mxu0 %v78_v3  ;;  %247 = vmatpush.msra.mxu1 %v78_v3  ;;  %v50_v18 = vld [vmem:[%s456_s0] sm:$0xff]  ;;  %v55_v23 = vld [vmem:[%s456_s0 + $0x28] sm:$0xff]  ;;  %v56_v27 = vld [vmem:[%s456_s0 + $0x30] sm:$0xff] }
   0xa   :  { %251 = vmatpush.msra.mxu2 %v77_v4  ;;  %252 = vmatpush.msra.mxu3 %v77_v4  ;;  %v54_v19 = vld [vmem:[%s456_s0 + $0x20] sm:$0xff]  ;;  %v61_v28 = vld [vmem:[%s456_s0 + $0x58] sm:$0xff] }
   0xb   :  { %86 = vmatpush.msra.mxu0 %v77_v4  ;;  %250 = vmatpush.msra.mxu1 %v77_v4  ;;  %v65_v29 = vld [vmem:[%s456_s0 + $0x78] sm:$0xff]  ;;  %v286_v32 = vld [vmem:[%s455_s2] ss:$0 sm:$0xff] }
   0xc   :  { %254 = vmatpush.msra.mxu2 %v76_v5  ;;  %255 = vmatpush.msra.mxu3 %v76_v5  ;;  %v53_v30 = vld [vmem:[%s456_s0 + $0x18] sm:$0xff] }
   0xd   :  { %87 = vmatpush.msra.mxu0 %v76_v5  ;;  %253 = vmatpush.msra.mxu1 %v76_v5  ;;  %v57_v31 = vld [vmem:[%s456_s0 + $0x38] sm:$0xff] }
   0xe   :  { %257 = vmatpush.msra.mxu2 %v75_v6  ;;  %258 = vmatpush.msra.mxu3 %v75_v6 }
   0xf   :  { %88 = vmatpush.msra.mxu0 %v75_v6  ;;  %256 = vmatpush.msra.mxu1 %v75_v6 }
  0x10   :  { %260 = vmatpush.msra.mxu2 %v74_v7  ;;  %261 = vmatpush.msra.mxu3 %v74_v7 }
  0x11   :  { %89 = vmatpush.msra.mxu0 %v74_v7  ;;  %259 = vmatpush.msra.mxu1 %v74_v7 }
  0x12   :  { %263 = vmatpush.msra.mxu2 %v73_v8  ;;  %264 = vmatpush.msra.mxu3 %v73_v8 }
  0x13   :  { %90 = vmatpush.msra.mxu0 %v73_v8  ;;  %262 = vmatpush.msra.mxu1 %v73_v8 }
  0x14   :  { %266 = vmatpush.msra.mxu2 %v72_v9  ;;  %267 = vmatpush.msra.mxu3 %v72_v9 }
  0x15   :  { %91 = vmatpush.msra.mxu0 %v72_v9  ;;  %265 = vmatpush.msra.mxu1 %v72_v9 }
  0x16   :  { %269 = vmatpush.msra.mxu2 %v71_v10  ;;  %270 = vmatpush.msra.mxu3 %v71_v10 }
  0x17   :  { %92 = vmatpush.msra.mxu0 %v71_v10  ;;  %268 = vmatpush.msra.mxu1 %v71_v10 }
  0x18   :  { %272 = vmatpush.msra.mxu2 %v70_v11  ;;  %273 = vmatpush.msra.mxu3 %v70_v11 }
  0x19   :  { %93 = vmatpush.msra.mxu0 %v70_v11  ;;  %271 = vmatpush.msra.mxu1 %v70_v11 }
  0x1a   :  { %275 = vmatpush.msra.mxu2 %v69_v12  ;;  %276 = vmatpush.msra.mxu3 %v69_v12 }
  0x1b   :  { %94 = vmatpush.msra.mxu0 %v69_v12  ;;  %274 = vmatpush.msra.mxu1 %v69_v12 }
  0x1c   :  { %278 = vmatpush.msra.mxu2 %v68_v13  ;;  %279 = vmatpush.msra.mxu3 %v68_v13 }
  0x1d   :  { %95 = vmatpush.msra.mxu0 %v68_v13  ;;  %277 = vmatpush.msra.mxu1 %v68_v13 }
  0x1e   :  { %281 = vmatpush.msra.mxu2 %v67_v14  ;;  %282 = vmatpush.msra.mxu3 %v67_v14 }
  0x1f   :  { %96 = vmatpush.msra.mxu0 %v67_v14  ;;  %280 = vmatpush.msra.mxu1 %v67_v14 }
  0x20   :  { %284 = vmatpush.msra.mxu2 %v66_v15  ;;  %285 = vmatpush.msra.mxu3 %v66_v15 }
  0x21   :  { %122 = vmatmul.f32.vlgmr.msra.gmra.mxu2 %v58_v16  ;;  %134 = vmatmul.f32.vlgmr.msra.gmra.mxu3 %v62_v17 }
  0x22   :  { %97 = vmatpush.msra.mxu0 %v66_v15  ;;  %283 = vmatpush.msra.mxu1 %v66_v15 }
  0x23   :  { %98 = vmatmul.f32.vlgmr.msra.gmra.mxu0 %v50_v18  ;;  %110 = vmatmul.f32.vlgmr.msra.gmra.mxu1 %v54_v19 }
  0x29   :  { %125 = vmatmul.f32.gmra.mxu2 %v59_v20  ;;  %137 = vmatmul.f32.gmra.mxu3 %v63_v21 }
  0x2b   :  { %101 = vmatmul.f32.gmra.mxu0 %v51_v22  ;;  %113 = vmatmul.f32.gmra.mxu1 %v55_v23 }
  0x31   :  { %128 = vmatmul.f32.gmra.mxu2 %v60_v24  ;;  %140 = vmatmul.f32.gmra.mxu3 %v64_v25 }
  0x33   :  { %104 = vmatmul.f32.gmra.mxu0 %v52_v26  ;;  %116 = vmatmul.f32.gmra.mxu1 %v56_v27 }
  0x39   :  { %131 = vmatmul.f32.gmra.mxu2 %v61_v28  ;;  %143 = vmatmul.f32.gmra.mxu3 %v65_v29 }
  0x3b   :  { %107 = vmatmul.f32.gmra.mxu0 %v53_v30  ;;  %119 = vmatmul.f32.gmra.mxu1 %v57_v31 }
  0xa0   :  { %v99_v33 = vpop.f32.mrf.mxu0  ;;  %v111_v34 = vpop.f32.mrf.mxu1 }
  0xa1   :  { %v202_v35 = vadd.f32 %v286_v32, %v99_v33  ;;  %v206_v36 = vadd.f32 %v286_v32, %v111_v34 }
  0xa3   :  { %218 = vst [vmem:[%s457_s3] sm:$0xff] %v202_v35 }
  0xa4   :  { %222 = vst [vmem:[%s457_s3 + $0x20] sm:$0xff] %v206_v36  ;;  %v123_v37 = vpop.f32.mrf.mxu2  ;;  %v135_v38 = vpop.f32.mrf.mxu3 }
  0xa5   :  { %v210_v39 = vadd.f32 %v286_v32, %v123_v37  ;;  %v214_v40 = vadd.f32 %v286_v32, %v135_v38 }
  0xa7   :  { %226 = vst [vmem:[%s457_s3 + $0x40] sm:$0xff] %v210_v39 }
  0xa8   :  { %230 = vst [vmem:[%s457_s3 + $0x60] sm:$0xff] %v214_v40  ;;  %v102_v41 = vpop.f32.mrf.mxu0  ;;  %v114_v42 = vpop.f32.mrf.mxu1 }
  0xa9   :  { %v203_v43 = vadd.f32 %v286_v32, %v102_v41  ;;  %v207_v44 = vadd.f32 %v286_v32, %v114_v42 }
  0xab   :  { %219 = vst [vmem:[%s457_s3 + $0x8] sm:$0xff] %v203_v43 }
  0xac   :  { %223 = vst [vmem:[%s457_s3 + $0x28] sm:$0xff] %v207_v44  ;;  %v126_v45 = vpop.f32.mrf.mxu2  ;;  %v138_v46 = vpop.f32.mrf.mxu3 }
  0xad   :  { %v211_v47 = vadd.f32 %v286_v32, %v126_v45  ;;  %v215_v48 = vadd.f32 %v286_v32, %v138_v46 }
  0xaf   :  { %227 = vst [vmem:[%s457_s3 + $0x48] sm:$0xff] %v211_v47 }
  0xb0   :  { %231 = vst [vmem:[%s457_s3 + $0x68] sm:$0xff] %v215_v48  ;;  %v105_v49 = vpop.f32.mrf.mxu0  ;;  %v117_v50 = vpop.f32.mrf.mxu1 }
  0xb1   :  { %v204_v51 = vadd.f32 %v286_v32, %v105_v49  ;;  %v208_v52 = vadd.f32 %v286_v32, %v117_v50 }
  0xb3   :  { %220 = vst [vmem:[%s457_s3 + $0x10] sm:$0xff] %v204_v51 }
  0xb4   :  { %224 = vst [vmem:[%s457_s3 + $0x30] sm:$0xff] %v208_v52  ;;  %v129_v53 = vpop.f32.mrf.mxu2  ;;  %v141_v54 = vpop.f32.mrf.mxu3 }
  0xb5   :  { %v212_v55 = vadd.f32 %v286_v32, %v129_v53  ;;  %v216_v56 = vadd.f32 %v286_v32, %v141_v54 }
  0xb7   :  { %228 = vst [vmem:[%s457_s3 + $0x50] sm:$0xff] %v212_v55 }
  0xb8   :  { %232 = vst [vmem:[%s457_s3 + $0x70] sm:$0xff] %v216_v56  ;;  %v108_v57 = vpop.f32.mrf.mxu0  ;;  %v120_v58 = vpop.f32.mrf.mxu1 }
  0xb9   :  { %v205_v59 = vadd.f32 %v286_v32, %v108_v57  ;;  %v209_v60 = vadd.f32 %v286_v32, %v120_v58 }
  0xbb   :  { %221 = vst [vmem:[%s457_s3 + $0x18] sm:$0xff] %v205_v59 }
  0xbc   :  { %225 = vst [vmem:[%s457_s3 + $0x38] sm:$0xff] %v209_v60  ;;  %v132_v61 = vpop.f32.mrf.mxu2  ;;  %v144_v62 = vpop.f32.mrf.mxu3 }
  0xbd   :  { %v213_v63 = vadd.f32 %v286_v32, %v132_v61  ;;  %v217_v0 = vadd.f32 %v286_v32, %v144_v62 }
  0xbf   :  { %229 = vst [vmem:[%s457_s3 + $0x58] sm:$0xff] %v213_v63 }
  0xc0   :  { %233 = vst [vmem:[%s457_s3 + $0x78] sm:$0xff] %v217_v0 }

// kernel: _lambda_.3
= control target key start
LH: loop header
LB: loop body
LE: loop exit
PB: predicated region body
PF: predicated region fallthrough
CT: control target
= control target key end

     0   :  { %7 = vsyncpa [#allocation4], 0  ;;  %s1008_s0 = inlined_call_operand.hbm [shape: f32[128,128], index: 0, kind: input, shape index: {}]   ;;  %s1009_s1 = inlined_call_operand.hbm [shape: f32[128,384], index: 1, kind: input, shape index: {}]   ;;  %s1010_s2 = inlined_call_operand.vmem [shape: f32[128,384], index: 2, kind: output, shape index: {}]  }
   0x1   :  { %s13_s11 = sshll.u32 %s1008_s0, 4  ;;  %s14_s11 = int_to_ptr.hbm [resolvable:$true] %s13_s11 }
   0x2   :  { %8 = vsyncpa [#allocation6], 0  ;;  %s709_s12 = smov [#allocation3]   ;;  %s26_s16 = sshll.u32 %s1009_s1, 4  ;;  %s27_s16 = int_to_ptr.hbm [resolvable:$true] %s26_s16 }
   0x3   :  { %s15_s13 = sshll.u32 %s709_s12, 4  ;;  %s710_s17 = smov 128   ;;  %s16_s13 = int_to_ptr.vmem [resolvable:$true] %s15_s13 }
   0x4   :  { %s711_s18 = smov 8   ;;  %s712_s19 = smov [#allocation5]  }
   0x5   :  { %21 = dma.hbm_to_vmem [thread:$0]  %s14_s11, 2048, %s16_s13, [#allocation4], %s710_s17, %s710_s17, %s711_s18  }
   0x6   :  { %s28_s20 = sshll.u32 %s712_s19, 4  ;;  %s713_s21 = smov 384   ;;  %s29_s20 = int_to_ptr.vmem [resolvable:$true] %s28_s20 }
   0x7   :  { %s714_s22 = smov 24  }
   0x8   :  { %34 = dma.hbm_to_vmem [thread:$0]  %s27_s16, 6144, %s29_s20, [#allocation6], %s713_s21, %s713_s21, %s714_s22  }
   0x9   :  { %705 = dma.done.wait [#allocation4], 2048  }
   0xa   :  { %706 = vsyncadd [#allocation4], 4294965248 }
   0xb   :  { %707 = dma.done.wait [#allocation6], 6144  }
   0xc   :  { %708 = vsyncadd [#allocation6], 4294961152  ;;  %v204_v0 = vld [vmem:[#allocation5 + $0x168] sm:$0xff]  ;;  %v736_v1 = vld [vmem:[#allocation5 + $0x178] sm:$0xff] }
   0xd   :  { %v201_v2 = vld [vmem:[#allocation5 + $0x150] sm:$0xff]  ;;  %603 = vmatpush.msra.mxu3 %v204_v0  ;;  %337 = vmatpush.msra.mxu2 %v736_v1  ;;  %v739_v3 = vld [vmem:[#allocation5 + $0x160] sm:$0xff]  ;;  %v198_v4 = vld [vmem:[#allocation5 + $0x138] sm:$0xff] }
   0xe   :  { %v741_v5 = vld [vmem:[#allocation5 + $0x148] sm:$0xff]  ;;  %207 = vmatpush.msra.mxu0 %v204_v0  ;;  %v743_v6 = vld [vmem:[#allocation5 + $0x170] sm:$0xff]  ;;  %v746_v7 = vld [vmem:[#allocation5 + $0x158] sm:$0xff] }
   0xf   :  { %604 = vmatpush.msra.mxu3 %v201_v2  ;;  %338 = vmatpush.msra.mxu2 %v739_v3  ;;  %v195_v8 = vld [vmem:[#allocation5 + $0x120] sm:$0xff]  ;;  %v749_v9 = vld [vmem:[#allocation5 + $0x130] sm:$0xff]  ;;  %v192_v11 = vld [vmem:[#allocation5 + $0x108] sm:$0xff] }
  0x10   :  { %272 = vmatpush.msra.mxu1 %v743_v6  ;;  %208 = vmatpush.msra.mxu0 %v201_v2  ;;  %v752_v10 = vld [vmem:[#allocation5 + $0x140] sm:$0xff]  ;;  %v755_v12 = vld [vmem:[#allocation5 + $0x118] sm:$0xff]  ;;  %v758_v13 = vld [vmem:[#allocation5 + $0x128] sm:$0xff] }
  0x11   :  { %605 = vmatpush.msra.mxu3 %v198_v4  ;;  %339 = vmatpush.msra.mxu2 %v741_v5  ;;  %v189_v14 = vld [vmem:[#allocation5 + $0xf0] sm:$0xff]  ;;  %v761_v15 = vld [vmem:[#allocation5 + $0x100] sm:$0xff]  ;;  %v186_v17 = vld [vmem:[#allocation5 + $0xd8] sm:$0xff] }
  0x12   :  { %273 = vmatpush.msra.mxu1 %v746_v7  ;;  %209 = vmatpush.msra.mxu0 %v198_v4  ;;  %v764_v16 = vld [vmem:[#allocation5 + $0x110] sm:$0xff]  ;;  %v767_v18 = vld [vmem:[#allocation5 + $0xe8] sm:$0xff]  ;;  %v770_v19 = vld [vmem:[#allocation5 + $0xf8] sm:$0xff] }
  0x13   :  { %606 = vmatpush.msra.mxu3 %v195_v8  ;;  %340 = vmatpush.msra.mxu2 %v749_v9  ;;  %v183_v20 = vld [vmem:[#allocation5 + $0xc0] sm:$0xff]  ;;  %v773_v21 = vld [vmem:[#allocation5 + $0xd0] sm:$0xff]  ;;  %v180_v23 = vld [vmem:[#allocation5 + $0xa8] sm:$0xff] }
  0x14   :  { %274 = vmatpush.msra.mxu1 %v752_v10  ;;  %210 = vmatpush.msra.mxu0 %v195_v8  ;;  %v776_v22 = vld [vmem:[#allocation5 + $0xe0] sm:$0xff]  ;;  %v779_v24 = vld [vmem:[#allocation5 + $0xb8] sm:$0xff]  ;;  %v782_v25 = vld [vmem:[#allocation5 + $0xc8] sm:$0xff] }
  0x15   :  { %607 = vmatpush.msra.mxu3 %v192_v11  ;;  %341 = vmatpush.msra.mxu2 %v755_v12  ;;  %v177_v26 = vld [vmem:[#allocation5 + $0x90] sm:$0xff]  ;;  %v785_v27 = vld [vmem:[#allocation5 + $0xa0] sm:$0xff]  ;;  %v174_v29 = vld [vmem:[#allocation5 + $0x78] sm:$0xff] }
  0x16   :  { %275 = vmatpush.msra.mxu1 %v758_v13  ;;  %211 = vmatpush.msra.mxu0 %v192_v11  ;;  %v788_v28 = vld [vmem:[#allocation5 + $0xb0] sm:$0xff]  ;;  %v791_v30 = vld [vmem:[#allocation5 + $0x88] sm:$0xff]  ;;  %v794_v31 = vld [vmem:[#allocation5 + $0x98] sm:$0xff] }
  0x17   :  { %608 = vmatpush.msra.mxu3 %v189_v14  ;;  %342 = vmatpush.msra.mxu2 %v761_v15  ;;  %v171_v32 = vld [vmem:[#allocation5 + $0x60] sm:$0xff]  ;;  %v797_v33 = vld [vmem:[#allocation5 + $0x70] sm:$0xff]  ;;  %v168_v35 = vld [vmem:[#allocation5 + $0x48] sm:$0xff] }
  0x18   :  { %276 = vmatpush.msra.mxu1 %v764_v16  ;;  %212 = vmatpush.msra.mxu0 %v189_v14  ;;  %v800_v34 = vld [vmem:[#allocation5 + $0x80] sm:$0xff]  ;;  %v803_v36 = vld [vmem:[#allocation5 + $0x58] sm:$0xff]  ;;  %v172_v37 = vld [vmem:[#allocation5 + $0x68] sm:$0xff] }
  0x19   :  { %609 = vmatpush.msra.mxu3 %v186_v17  ;;  %343 = vmatpush.msra.mxu2 %v767_v18  ;;  %v165_v38 = vld [vmem:[#allocation5 + $0x30] sm:$0xff]  ;;  %v807_v39 = vld [vmem:[#allocation5 + $0x40] sm:$0xff]  ;;  %v162_v41 = vld [vmem:[#allocation5 + $0x18] sm:$0xff] }
  0x1a   :  { %277 = vmatpush.msra.mxu1 %v770_v19  ;;  %213 = vmatpush.msra.mxu0 %v186_v17  ;;  %v169_v40 = vld [vmem:[#allocation5 + $0x50] sm:$0xff]  ;;  %v810_v42 = vld [vmem:[#allocation5 + $0x28] sm:$0xff]  ;;  %v166_v43 = vld [vmem:[#allocation5 + $0x38] sm:$0xff] }
  0x1b   :  { %610 = vmatpush.msra.mxu3 %v183_v20  ;;  %344 = vmatpush.msra.mxu2 %v773_v21  ;;  %v159_v44 = vld [vmem:[#allocation5] sm:$0xff]  ;;  %v813_v45 = vld [vmem:[#allocation5 + $0x10] sm:$0xff]  ;;  %v160_v49 = vld [vmem:[#allocation5 + $0x8] sm:$0xff] }
  0x1c   :  { %278 = vmatpush.msra.mxu1 %v776_v22  ;;  %214 = vmatpush.msra.mxu0 %v183_v20  ;;  %v816_v46 = vld [vmem:[#allocation3 + $0x60] sm:$0xff]  ;;  %v823_v50 = vld [vmem:[#allocation3 + $0x68] sm:$0xff]  ;;  %v830_v52 = vld [vmem:[#allocation3 + $0x70] sm:$0xff] }
  0x1d   :  { %611 = vmatpush.msra.mxu3 %v180_v23  ;;  %345 = vmatpush.msra.mxu2 %v779_v24  ;;  %v143_v47 = vld [vmem:[#allocation3] sm:$0xff]  ;;  %v144_v51 = vld [vmem:[#allocation3 + $0x8] sm:$0xff]  ;;  %v145_v53 = vld [vmem:[#allocation3 + $0x10] sm:$0xff] }
  0x1e   :  { %279 = vmatpush.msra.mxu1 %v782_v25  ;;  %215 = vmatpush.msra.mxu0 %v180_v23  ;;  %v163_v48 = vld [vmem:[#allocation5 + $0x20] sm:$0xff]  ;;  %v837_v54 = vld [vmem:[#allocation3 + $0x78] sm:$0xff]  ;;  %v148_v57 = vld [vmem:[#allocation3 + $0x28] sm:$0xff] }
  0x1f   :  { %612 = vmatpush.msra.mxu3 %v177_v26  ;;  %346 = vmatpush.msra.mxu2 %v785_v27  ;;  %v146_v55 = vld [vmem:[#allocation3 + $0x18] sm:$0xff]  ;;  %v147_v56 = vld [vmem:[#allocation3 + $0x20] sm:$0xff]  ;;  %v149_v58 = vld [vmem:[#allocation3 + $0x30] sm:$0xff] }
  0x20   :  { %280 = vmatpush.msra.mxu1 %v788_v28  ;;  %216 = vmatpush.msra.mxu0 %v177_v26  ;;  %v150_v59 = vld [vmem:[#allocation3 + $0x38] sm:$0xff]  ;;  %v151_v60 = vld [vmem:[#allocation3 + $0x40] sm:$0xff]  ;;  %v152_v61 = vld [vmem:[#allocation3 + $0x48] sm:$0xff] }
  0x21   :  { %613 = vmatpush.msra.mxu3 %v174_v29  ;;  %347 = vmatpush.msra.mxu2 %v791_v30  ;;  %v153_v62 = vld [vmem:[#allocation3 + $0x50] sm:$0xff]  ;;  %v154_v63 = vld [vmem:[#allocation3 + $0x58] sm:$0xff] }
  0x22   :  { %281 = vmatpush.msra.mxu1 %v794_v31  ;;  %217 = vmatpush.msra.mxu0 %v174_v29 }
  0x23   :  { %614 = vmatpush.msra.mxu3 %v171_v32  ;;  %348 = vmatpush.msra.mxu2 %v797_v33 }
  0x24   :  { %282 = vmatpush.msra.mxu1 %v800_v34  ;;  %218 = vmatpush.msra.mxu0 %v171_v32 }
  0x25   :  { %615 = vmatpush.msra.mxu3 %v168_v35  ;;  %349 = vmatpush.msra.mxu2 %v803_v36 }
  0x26   :  { %283 = vmatpush.msra.mxu1 %v172_v37  ;;  %219 = vmatpush.msra.mxu0 %v168_v35 }
  0x27   :  { %616 = vmatpush.msra.mxu3 %v165_v38  ;;  %350 = vmatpush.msra.mxu2 %v807_v39 }
  0x28   :  { %284 = vmatpush.msra.mxu1 %v169_v40  ;;  %220 = vmatpush.msra.mxu0 %v165_v38 }
  0x29   :  { %617 = vmatpush.msra.mxu3 %v162_v41  ;;  %351 = vmatpush.msra.mxu2 %v810_v42 }
  0x2a   :  { %285 = vmatpush.msra.mxu1 %v166_v43  ;;  %221 = vmatpush.msra.mxu0 %v162_v41 }
  0x2b   :  { %618 = vmatpush.msra.mxu3 %v159_v44  ;;  %352 = vmatpush.msra.mxu2 %v813_v45 }
  0x2c   :  { %259 = vmatmul.f32.vlgmr.msra.gmra.mxu3 %v816_v46  ;;  %353 = vmatmul.f32.vlgmr.msra.gmra.mxu2 %v143_v47 }
  0x2d   :  { %619 = vmatpush.msrb.mxu3 %v743_v6  ;;  %286 = vmatpush.msra.mxu1 %v163_v48 }
  0x2e   :  { %222 = vmatpush.msra.mxu0 %v159_v44 }
  0x2f   :  { %620 = vmatpush.msrb.mxu3 %v746_v7  ;;  %287 = vmatpush.msra.mxu1 %v160_v49 }
  0x30   :  { %223 = vmatmul.f32.vlgmr.msra.gmra.mxu0 %v143_v47  ;;  %288 = vmatmul.f32.vlgmr.msra.gmra.mxu1 %v143_v47 }
  0x31   :  { %621 = vmatpush.msrb.mxu3 %v752_v10 }
  0x33   :  { %622 = vmatpush.msrb.mxu3 %v758_v13 }
  0x34   :  { %262 = vmatmul.f32.gmra.mxu3 %v823_v50  ;;  %356 = vmatmul.f32.gmra.mxu2 %v144_v51 }
  0x35   :  { %623 = vmatpush.msrb.mxu3 %v764_v16 }
  0x37   :  { %624 = vmatpush.msrb.mxu3 %v770_v19 }
  0x38   :  { %226 = vmatmul.f32.gmra.mxu0 %v144_v51  ;;  %291 = vmatmul.f32.gmra.mxu1 %v144_v51 }
  0x39   :  { %625 = vmatpush.msrb.mxu3 %v776_v22 }
  0x3b   :  { %626 = vmatpush.msrb.mxu3 %v782_v25 }
  0x3c   :  { %265 = vmatmul.f32.gmra.mxu3 %v830_v52  ;;  %359 = vmatmul.f32.gmra.mxu2 %v145_v53 }
  0x3d   :  { %627 = vmatpush.msrb.mxu3 %v788_v28 }
  0x3f   :  { %628 = vmatpush.msrb.mxu3 %v794_v31 }
  0x40   :  { %229 = vmatmul.f32.gmra.mxu0 %v145_v53  ;;  %294 = vmatmul.f32.gmra.mxu1 %v145_v53 }
  0x41   :  { %629 = vmatpush.msrb.mxu3 %v800_v34 }
  0x43   :  { %630 = vmatpush.msrb.mxu3 %v172_v37 }
  0x44   :  { %268 = vmatmul.f32.gmra.mxu3 %v837_v54  ;;  %362 = vmatmul.f32.gmra.mxu2 %v146_v55 }
  0x45   :  { %631 = vmatpush.msrb.mxu3 %v169_v40 }
  0x47   :  { %632 = vmatpush.msrb.mxu3 %v166_v43 }
  0x48   :  { %232 = vmatmul.f32.gmra.mxu0 %v146_v55  ;;  %297 = vmatmul.f32.gmra.mxu1 %v146_v55 }
  0x49   :  { %633 = vmatpush.msrb.mxu3 %v163_v48 }
  0x4b   :  { %634 = vmatpush.msrb.mxu3 %v160_v49 }
  0x4c   :  { %324 = vmatmul.f32.vlgmr.msrb.gmra.mxu3 %v816_v46  ;;  %365 = vmatmul.f32.gmra.mxu2 %v147_v56 }
  0x4d   :  { %635 = vmatpush.msra.mxu3 %v736_v1 }
  0x4f   :  { %636 = vmatpush.msra.mxu3 %v739_v3 }
  0x50   :  { %235 = vmatmul.f32.gmra.mxu0 %v147_v56  ;;  %300 = vmatmul.f32.gmra.mxu1 %v147_v56 }
  0x51   :  { %637 = vmatpush.msra.mxu3 %v741_v5 }
  0x53   :  { %638 = vmatpush.msra.mxu3 %v749_v9 }
  0x54   :  { %327 = vmatmul.f32.gmra.mxu3 %v823_v50  ;;  %368 = vmatmul.f32.gmra.mxu2 %v148_v57 }
  0x55   :  { %639 = vmatpush.msra.mxu3 %v755_v12 }
  0x57   :  { %640 = vmatpush.msra.mxu3 %v761_v15 }
  0x58   :  { %238 = vmatmul.f32.gmra.mxu0 %v148_v57  ;;  %303 = vmatmul.f32.gmra.mxu1 %v148_v57 }
  0x59   :  { %641 = vmatpush.msra.mxu3 %v767_v18 }
  0x5b   :  { %642 = vmatpush.msra.mxu3 %v773_v21 }
  0x5c   :  { %330 = vmatmul.f32.gmra.mxu3 %v830_v52  ;;  %371 = vmatmul.f32.gmra.mxu2 %v149_v58 }
  0x5d   :  { %643 = vmatpush.msra.mxu3 %v779_v24 }
  0x5f   :  { %644 = vmatpush.msra.mxu3 %v785_v27 }
  0x60   :  { %241 = vmatmul.f32.gmra.mxu0 %v149_v58  ;;  %306 = vmatmul.f32.gmra.mxu1 %v149_v58 }
  0x61   :  { %645 = vmatpush.msra.mxu3 %v791_v30 }
  0x63   :  { %646 = vmatpush.msra.mxu3 %v797_v33 }
  0x64   :  { %333 = vmatmul.f32.gmra.mxu3 %v837_v54  ;;  %374 = vmatmul.f32.gmra.mxu2 %v150_v59 }
  0x65   :  { %647 = vmatpush.msra.mxu3 %v803_v36 }
  0x67   :  { %648 = vmatpush.msra.mxu3 %v807_v39 }
  0x68   :  { %244 = vmatmul.f32.gmra.mxu0 %v150_v59  ;;  %309 = vmatmul.f32.gmra.mxu1 %v150_v59 }
  0x69   :  { %649 = vmatpush.msra.mxu3 %v810_v42 }
  0x6b   :  { %650 = vmatpush.msra.mxu3 %v813_v45 }
  0x6c   :  { %377 = vmatmul.f32.gmra.mxu2 %v151_v60  ;;  %389 = vmatmul.f32.vlgmr.msra.gmra.mxu3 %v816_v46 }
  0x70   :  { %247 = vmatmul.f32.gmra.mxu0 %v151_v60  ;;  %312 = vmatmul.f32.gmra.mxu1 %v151_v60 }
  0x74   :  { %380 = vmatmul.f32.gmra.mxu2 %v152_v61  ;;  %392 = vmatmul.f32.gmra.mxu3 %v823_v50 }
  0x78   :  { %250 = vmatmul.f32.gmra.mxu0 %v152_v61  ;;  %315 = vmatmul.f32.gmra.mxu1 %v152_v61 }
  0x7c   :  { %383 = vmatmul.f32.gmra.mxu2 %v153_v62  ;;  %395 = vmatmul.f32.gmra.mxu3 %v830_v52 }
  0x80   :  { %253 = vmatmul.f32.gmra.mxu0 %v153_v62  ;;  %318 = vmatmul.f32.gmra.mxu1 %v153_v62 }
  0x84   :  { %386 = vmatmul.f32.gmra.mxu2 %v154_v63  ;;  %398 = vmatmul.f32.gmra.mxu3 %v837_v54 }
  0x88   :  { %256 = vmatmul.f32.gmra.mxu0 %v154_v63  ;;  %321 = vmatmul.f32.gmra.mxu1 %v154_v63 }
  0xad   :  { %v224_v0 = vpop.f32.mrf.mxu0  ;;  %v289_v1 = vpop.f32.mrf.mxu1 }
  0xae   :  { %549 = vst [vmem:[%s1010_s2] sm:$0xff] %v224_v0 }
  0xaf   :  { %v260_v2 = vpop.f32.mrf.mxu3  ;;  %550 = vst [vmem:[%s1010_s2 + $0x8] sm:$0xff] %v289_v1  ;;  %v354_v3 = vpop.f32.mrf.mxu2 }
  0xb0   :  { %585 = vst [vmem:[%s1010_s2 + $0x120] sm:$0xff] %v260_v2 }
  0xb1   :  { %551 = vst [vmem:[%s1010_s2 + $0x10] sm:$0xff] %v354_v3 }
  0xb5   :  { %v227_v4 = vpop.f32.mrf.mxu0  ;;  %v292_v5 = vpop.f32.mrf.mxu1 }
  0xb6   :  { %552 = vst [vmem:[%s1010_s2 + $0x18] sm:$0xff] %v227_v4 }
  0xb7   :  { %v263_v6 = vpop.f32.mrf.mxu3  ;;  %553 = vst [vmem:[%s1010_s2 + $0x20] sm:$0xff] %v292_v5  ;;  %v357_v7 = vpop.f32.mrf.mxu2 }
  0xb8   :  { %588 = vst [vmem:[%s1010_s2 + $0x138] sm:$0xff] %v263_v6 }
  0xb9   :  { %554 = vst [vmem:[%s1010_s2 + $0x28] sm:$0xff] %v357_v7 }
  0xbd   :  { %v230_v8 = vpop.f32.mrf.mxu0  ;;  %v295_v9 = vpop.f32.mrf.mxu1 }
  0xbe   :  { %555 = vst [vmem:[%s1010_s2 + $0x30] sm:$0xff] %v230_v8 }
  0xbf   :  { %v266_v10 = vpop.f32.mrf.mxu3  ;;  %556 = vst [vmem:[%s1010_s2 + $0x38] sm:$0xff] %v295_v9  ;;  %v360_v11 = vpop.f32.mrf.mxu2 }
  0xc0   :  { %591 = vst [vmem:[%s1010_s2 + $0x150] sm:$0xff] %v266_v10 }
  0xc1   :  { %557 = vst [vmem:[%s1010_s2 + $0x40] sm:$0xff] %v360_v11 }
  0xc5   :  { %v233_v12 = vpop.f32.mrf.mxu0  ;;  %v298_v13 = vpop.f32.mrf.mxu1 }
  0xc6   :  { %558 = vst [vmem:[%s1010_s2 + $0x48] sm:$0xff] %v233_v12 }
  0xc7   :  { %v269_v14 = vpop.f32.mrf.mxu3  ;;  %559 = vst [vmem:[%s1010_s2 + $0x50] sm:$0xff] %v298_v13  ;;  %v363_v15 = vpop.f32.mrf.mxu2 }
  0xc8   :  { %594 = vst [vmem:[%s1010_s2 + $0x168] sm:$0xff] %v269_v14 }
  0xc9   :  { %560 = vst [vmem:[%s1010_s2 + $0x58] sm:$0xff] %v363_v15 }
  0xcd   :  { %v236_v16 = vpop.f32.mrf.mxu0  ;;  %v301_v17 = vpop.f32.mrf.mxu1 }
  0xce   :  { %561 = vst [vmem:[%s1010_s2 + $0x60] sm:$0xff] %v236_v16 }
  0xcf   :  { %562 = vst [vmem:[%s1010_s2 + $0x68] sm:$0xff] %v301_v17  ;;  %v325_v18 = vpop.f32.mrf.mxu3  ;;  %v366_v19 = vpop.f32.mrf.mxu2 }
  0xd0   :  { %586 = vst [vmem:[%s1010_s2 + $0x128] sm:$0xff] %v325_v18 }
  0xd1   :  { %563 = vst [vmem:[%s1010_s2 + $0x70] sm:$0xff] %v366_v19 }
  0xd5   :  { %v239_v20 = vpop.f32.mrf.mxu0  ;;  %v304_v21 = vpop.f32.mrf.mxu1 }
  0xd6   :  { %564 = vst [vmem:[%s1010_s2 + $0x78] sm:$0xff] %v239_v20 }
  0xd7   :  { %565 = vst [vmem:[%s1010_s2 + $0x80] sm:$0xff] %v304_v21  ;;  %v328_v22 = vpop.f32.mrf.mxu3  ;;  %v369_v23 = vpop.f32.mrf.mxu2 }
  0xd8   :  { %589 = vst [vmem:[%s1010_s2 + $0x140] sm:$0xff] %v328_v22 }
  0xd9   :  { %566 = vst [vmem:[%s1010_s2 + $0x88] sm:$0xff] %v369_v23 }
  0xdd   :  { %v242_v24 = vpop.f32.mrf.mxu0  ;;  %v307_v25 = vpop.f32.mrf.mxu1 }
  0xde   :  { %567 = vst [vmem:[%s1010_s2 + $0x90] sm:$0xff] %v242_v24 }
  0xdf   :  { %568 = vst [vmem:[%s1010_s2 + $0x98] sm:$0xff] %v307_v25  ;;  %v331_v26 = vpop.f32.mrf.mxu3  ;;  %v372_v27 = vpop.f32.mrf.mxu2 }
  0xe0   :  { %592 = vst [vmem:[%s1010_s2 + $0x158] sm:$0xff] %v331_v26 }
  0xe1   :  { %569 = vst [vmem:[%s1010_s2 + $0xa0] sm:$0xff] %v372_v27 }
  0xe5   :  { %v245_v28 = vpop.f32.mrf.mxu0  ;;  %v310_v29 = vpop.f32.mrf.mxu1 }
  0xe6   :  { %570 = vst [vmem:[%s1010_s2 + $0xa8] sm:$0xff] %v245_v28 }
  0xe7   :  { %571 = vst [vmem:[%s1010_s2 + $0xb0] sm:$0xff] %v310_v29  ;;  %v334_v30 = vpop.f32.mrf.mxu3  ;;  %v375_v31 = vpop.f32.mrf.mxu2 }
  0xe8   :  { %595 = vst [vmem:[%s1010_s2 + $0x170] sm:$0xff] %v334_v30 }
  0xe9   :  { %572 = vst [vmem:[%s1010_s2 + $0xb8] sm:$0xff] %v375_v31 }
  0xed   :  { %v248_v32 = vpop.f32.mrf.mxu0  ;;  %v313_v33 = vpop.f32.mrf.mxu1 }
  0xee   :  { %573 = vst [vmem:[%s1010_s2 + $0xc0] sm:$0xff] %v248_v32 }
  0xef   :  { %574 = vst [vmem:[%s1010_s2 + $0xc8] sm:$0xff] %v313_v33  ;;  %v378_v34 = vpop.f32.mrf.mxu2  ;;  %v390_v35 = vpop.f32.mrf.mxu3 }
  0xf0   :  { %575 = vst [vmem:[%s1010_s2 + $0xd0] sm:$0xff] %v378_v34 }
  0xf1   :  { %587 = vst [vmem:[%s1010_s2 + $0x130] sm:$0xff] %v390_v35 }
  0xf5   :  { %v251_v36 = vpop.f32.mrf.mxu0  ;;  %v316_v37 = vpop.f32.mrf.mxu1 }
  0xf6   :  { %576 = vst [vmem:[%s1010_s2 + $0xd8] sm:$0xff] %v251_v36 }
  0xf7   :  { %577 = vst [vmem:[%s1010_s2 + $0xe0] sm:$0xff] %v316_v37  ;;  %v381_v38 = vpop.f32.mrf.mxu2  ;;  %v393_v39 = vpop.f32.mrf.mxu3 }
  0xf8   :  { %578 = vst [vmem:[%s1010_s2 + $0xe8] sm:$0xff] %v381_v38 }
  0xf9   :  { %590 = vst [vmem:[%s1010_s2 + $0x148] sm:$0xff] %v393_v39 }
  0xfd   :  { %v254_v40 = vpop.f32.mrf.mxu0  ;;  %v319_v41 = vpop.f32.mrf.mxu1 }
  0xfe   :  { %579 = vst [vmem:[%s1010_s2 + $0xf0] sm:$0xff] %v254_v40 }
  0xff   :  { %580 = vst [vmem:[%s1010_s2 + $0xf8] sm:$0xff] %v319_v41  ;;  %v384_v42 = vpop.f32.mrf.mxu2  ;;  %v396_v43 = vpop.f32.mrf.mxu3 }
 0x100   :  { %581 = vst [vmem:[%s1010_s2 + $0x100] sm:$0xff] %v384_v42 }
 0x101   :  { %593 = vst [vmem:[%s1010_s2 + $0x160] sm:$0xff] %v396_v43 }
 0x105   :  { %v257_v44 = vpop.f32.mrf.mxu0  ;;  %v322_v45 = vpop.f32.mrf.mxu1 }
 0x106   :  { %582 = vst [vmem:[%s1010_s2 + $0x108] sm:$0xff] %v257_v44 }
 0x107   :  { %583 = vst [vmem:[%s1010_s2 + $0x110] sm:$0xff] %v322_v45  ;;  %v387_v46 = vpop.f32.mrf.mxu2  ;;  %v399_v47 = vpop.f32.mrf.mxu3 }
 0x108   :  { %584 = vst [vmem:[%s1010_s2 + $0x118] sm:$0xff] %v387_v46 }
 0x109   :  { %596 = vst [vmem:[%s1010_s2 + $0x178] sm:$0xff] %v399_v47 }
 0x10a   :  { %601 = vsyncpa [#allocation4], 1 }
 0x10b   :  { %602 = vsyncpa [#allocation6], 1 }

// kernel: _lambda_.4
= control target key start
LH: loop header
LB: loop body
LE: loop exit
PB: predicated region body
PF: predicated region fallthrough
CT: control target
= control target key end

     0   :  { %10 = vsyncpa [#allocation6], 0  ;;  %s9721_s0 = inlined_call_operand.vmem [shape: f32[64,2,3,4,32], index: 0, kind: input, shape index: {}, may-alias: {0,1,2}]   ;;  %s9722_s1 = inlined_call_operand.vmem [shape: f32[64,2,3,4,32], index: 1, kind: input, shape index: {}, may-alias: {0,1,2}]   ;;  %s9723_s2 = inlined_call_operand.vmem [shape: f32[64,2,3,4,32], index: 2, kind: input, shape index: {}, may-alias: {0,1,2}]   ;;  %s9724_s3 = inlined_call_operand.vmem [shape: f32[2,64,128], index: 3, kind: output, shape index: {0}]   ;;  %s9725_s4 = inlined_call_operand.hbm [shape: f32[2,64,64], index: 4, kind: output, shape index: {1}]  }
   0x1   :  { %12 = vsyncpa [#allocation6 + $0x1], 0  ;;  %s6472_s15 = smov 0   ;;  %s6474_s16 = smov 0  }
   0x2   :  { %s6476_s17 = smov 0   ;;  %s6478_s18 = smov 0  }
   0x3   :  { %s6480_s19 = smov 0   ;;  %s6482_s20 = smov 0  }
   0x4 LB: > { %s5907_s21 = sadd.s32 4294967295, %s6439_s20   ;;  %s5908_s22 = sadd.s32 4294967294, %s6439_s20   ;;  %s6439_s20 = sphi %s6482_s20, %s18_s20   ;;  %s6435_s19 = sphi %s6480_s19, %s9767_s19   ;;  %s6431_s18 = sphi %s6478_s18, %s9766_s18   ;;  %s6427_s17 = sphi %s6476_s17, %s9765_s17   ;;  %s6423_s16 = sphi %s6474_s16, %s9764_s16   ;;  %s6419_s15 = sphi %s6472_s15, %s9763_s15  }
   0x5   : > { %s37_s23 = sadd.s32 1, %s6435_s19  ;;  %s48_s24 = sadd.s32 1, %s6427_s17 }
   0x6   : > { %p39_p0 = scmp.ge.s32.totalorder %s37_s23, 2  ;;  %p55_p1 = scmp.ne.s32.totalorder %s6427_s17, %s6423_s16 }
   0x7   : > { %p56_p2 = scmp.eq.s32.totalorder %s6439_s20, 0  ;;  %p173_p3 = scmp.eq.s32.totalorder %s5907_s21, 1 }
   0x8   : > { %s9769_s23 = smov (%p39_p0, %s37_s23), 0  ;;  %p178_p6 = scmp.ne.s32.totalorder %s6423_s16, %s6419_s15 }
   0x9   : > { %p6511_p4 = por %p56_p2, %p55_p1  ;;  %p6515_p5 = por %p173_p3, %p55_p1 }
   0xa   : > { %s42_s27 = ssub.s32 %s6435_s19, %s9769_s23  ;;  %p179_p8 = scmp.eq.s32.totalorder %s5908_s22, 1 }
   0xb   : > { %p46_p7 = scmp.eq.s32.totalorder %s42_s27, 0  ;;  %p5910_p10 = scmp.ge.s32.totalorder %s6439_s20, 2 }
   0xc   : > { %p6526_p9 = por %p179_p8, %p178_p6 }
   0xd   : > { %s6524_s28 = scalar_select %p46_p7, %s6427_s17, %s48_s24  }
   0xe   : > { %195 = sbr.rel (%p5910_p10) target bundleno = 226 (0xe2), region = 16 }
  0x13   : > { %198 = sbr.rel (!%p6511_p4) target bundleno = 88 (0x58), region = 20  ;;  %s200_s30 = sand.u32 (%p6511_p4), 1, %s6427_s17  }
  0x14   : > { %s6171_s5 = smul.u32 (%p6511_p4), 12, %s6435_s19  ;;  %s5911_s6 = sshll.u32 (%p6511_p4), %s200_s30, 8 }
  0x15   : > { %s6545_s10 = scalar_lea.vmem (%p6511_p4), [#allocation2], %s5911_s6 }
  0x16   : > { %s6540_s9 = scalar_lea.vmem (%p6511_p4), %s9721_s0, %s6171_s5 }
  0x17   : > { %v226_v0 = vld [vmem:[%s6540_s9] sm:$0xf] (%p6511_p4)  ;;  %v228_v1 = vld [vmem:[%s6540_s9 + $0x18] sm:$0xf] (%p6511_p4)  ;;  %v230_v2 = vld [vmem:[%s6540_s9 + $0x30] sm:$0xf] (%p6511_p4) }
  0x18   : > { %227 = vst [vmem:[%s6545_s10] sm:$0xf] %v226_v0  ;;  %v232_v3 = vld [vmem:[%s6540_s9 + $0x48] sm:$0xf]  ;;  %v234_v4 = vld [vmem:[%s6540_s9 + $0x60] sm:$0xf] }
  0x19   : > { %229 = vst [vmem:[%s6545_s10 + $0x4] sm:$0xf] %v228_v1  ;;  %v236_v5 = vld [vmem:[%s6540_s9 + $0x78] sm:$0xf]  ;;  %v238_v6 = vld [vmem:[%s6540_s9 + $0x90] sm:$0xf] }
  0x1a   : > { %231 = vst [vmem:[%s6545_s10 + $0x8] sm:$0xf] %v230_v2  ;;  %v240_v7 = vld [vmem:[%s6540_s9 + $0xa8] sm:$0xf]  ;;  %v242_v8 = vld [vmem:[%s6540_s9 + $0xc0] sm:$0xf] }
  0x1b   : > { %233 = vst [vmem:[%s6545_s10 + $0xc] sm:$0xf] %v232_v3  ;;  %v244_v9 = vld [vmem:[%s6540_s9 + $0xd8] sm:$0xf]  ;;  %v246_v10 = vld [vmem:[%s6540_s9 + $0xf0] sm:$0xf] }
  0x1c   : > { %235 = vst [vmem:[%s6545_s10 + $0x10] sm:$0xf] %v234_v4  ;;  %v248_v11 = vld [vmem:[%s6540_s9 + $0x108] sm:$0xf]  ;;  %v250_v12 = vld [vmem:[%s6540_s9 + $0x120] sm:$0xf] }
  0x1d   : > { %237 = vst [vmem:[%s6545_s10 + $0x14] sm:$0xf] %v236_v5  ;;  %v252_v13 = vld [vmem:[%s6540_s9 + $0x138] sm:$0xf]  ;;  %v254_v14 = vld [vmem:[%s6540_s9 + $0x150] sm:$0xf] }
  0x1e   : > { %239 = vst [vmem:[%s6545_s10 + $0x18] sm:$0xf] %v238_v6  ;;  %v256_v15 = vld [vmem:[%s6540_s9 + $0x168] sm:$0xf]  ;;  %v258_v16 = vld [vmem:[%s6540_s9 + $0x180] sm:$0xf] }
  0x1f   : > { %241 = vst [vmem:[%s6545_s10 + $0x1c] sm:$0xf] %v240_v7  ;;  %v260_v17 = vld [vmem:[%s6540_s9 + $0x198] sm:$0xf]  ;;  %v262_v18 = vld [vmem:[%s6540_s9 + $0x1b0] sm:$0xf] }
  0x20   : > { %243 = vst [vmem:[%s6545_s10 + $0x20] sm:$0xf] %v242_v8  ;;  %v264_v19 = vld [vmem:[%s6540_s9 + $0x1c8] sm:$0xf]  ;;  %v266_v20 = vld [vmem:[%s6540_s9 + $0x1e0] sm:$0xf] }
  0x21   : > { %245 = vst [vmem:[%s6545_s10 + $0x24] sm:$0xf] %v244_v9  ;;  %v268_v21 = vld [vmem:[%s6540_s9 + $0x1f8] sm:$0xf]  ;;  %v270_v22 = vld [vmem:[%s6540_s9 + $0x210] sm:$0xf] }
  0x22   : > { %247 = vst [vmem:[%s6545_s10 + $0x28] sm:$0xf] %v246_v10  ;;  %v272_v23 = vld [vmem:[%s6540_s9 + $0x228] sm:$0xf]  ;;  %v274_v24 = vld [vmem:[%s6540_s9 + $0x240] sm:$0xf] }
  0x23   : > { %249 = vst [vmem:[%s6545_s10 + $0x2c] sm:$0xf] %v248_v11  ;;  %v276_v25 = vld [vmem:[%s6540_s9 + $0x258] sm:$0xf]  ;;  %v278_v26 = vld [vmem:[%s6540_s9 + $0x270] sm:$0xf] }
  0x24   : > { %251 = vst [vmem:[%s6545_s10 + $0x30] sm:$0xf] %v250_v12  ;;  %v280_v27 = vld [vmem:[%s6540_s9 + $0x288] sm:$0xf]  ;;  %v282_v28 = vld [vmem:[%s6540_s9 + $0x2a0] sm:$0xf] }
  0x25   : > { %253 = vst [vmem:[%s6545_s10 + $0x34] sm:$0xf] %v252_v13  ;;  %v284_v29 = vld [vmem:[%s6540_s9 + $0x2b8] sm:$0xf]  ;;  %v286_v30 = vld [vmem:[%s6540_s9 + $0x2d0] sm:$0xf] }
  0x26   : > { %255 = vst [vmem:[%s6545_s10 + $0x38] sm:$0xf] %v254_v14  ;;  %v288_v31 = vld [vmem:[%s6540_s9 + $0x2e8] sm:$0xf]  ;;  %v290_v32 = vld [vmem:[%s6540_s9 + $0x300] sm:$0xf] }
  0x27   : > { %257 = vst [vmem:[%s6545_s10 + $0x3c] sm:$0xf] %v256_v15  ;;  %v292_v33 = vld [vmem:[%s6540_s9 + $0x318] sm:$0xf]  ;;  %v294_v34 = vld [vmem:[%s6540_s9 + $0x330] sm:$0xf] }
  0x28   : > { %259 = vst [vmem:[%s6545_s10 + $0x40] sm:$0xf] %v258_v16  ;;  %v296_v35 = vld [vmem:[%s6540_s9 + $0x348] sm:$0xf]  ;;  %v298_v36 = vld [vmem:[%s6540_s9 + $0x360] sm:$0xf] }
  0x29   : > { %261 = vst [vmem:[%s6545_s10 + $0x44] sm:$0xf] %v260_v17  ;;  %v300_v37 = vld [vmem:[%s6540_s9 + $0x378] sm:$0xf]  ;;  %v302_v38 = vld [vmem:[%s6540_s9 + $0x390] sm:$0xf] }
  0x2a   : > { %263 = vst [vmem:[%s6545_s10 + $0x48] sm:$0xf] %v262_v18  ;;  %v304_v39 = vld [vmem:[%s6540_s9 + $0x3a8] sm:$0xf]  ;;  %v306_v40 = vld [vmem:[%s6540_s9 + $0x3c0] sm:$0xf] }
  0x2b   : > { %265 = vst [vmem:[%s6545_s10 + $0x4c] sm:$0xf] %v264_v19  ;;  %v308_v41 = vld [vmem:[%s6540_s9 + $0x3d8] sm:$0xf]  ;;  %v310_v42 = vld [vmem:[%s6540_s9 + $0x3f0] sm:$0xf] }
  0x2c   : > { %267 = vst [vmem:[%s6545_s10 + $0x50] sm:$0xf] %v266_v20  ;;  %v312_v43 = vld [vmem:[%s6540_s9 + $0x408] sm:$0xf]  ;;  %v314_v44 = vld [vmem:[%s6540_s9 + $0x420] sm:$0xf] }
  0x2d   : > { %269 = vst [vmem:[%s6545_s10 + $0x54] sm:$0xf] %v268_v21  ;;  %v316_v45 = vld [vmem:[%s6540_s9 + $0x438] sm:$0xf]  ;;  %v318_v46 = vld [vmem:[%s6540_s9 + $0x450] sm:$0xf] }
  0x2e   : > { %271 = vst [vmem:[%s6545_s10 + $0x58] sm:$0xf] %v270_v22  ;;  %v320_v47 = vld [vmem:[%s6540_s9 + $0x468] sm:$0xf]  ;;  %v322_v48 = vld [vmem:[%s6540_s9 + $0x480] sm:$0xf] }
  0x2f   : > { %273 = vst [vmem:[%s6545_s10 + $0x5c] sm:$0xf] %v272_v23  ;;  %v324_v49 = vld [vmem:[%s6540_s9 + $0x498] sm:$0xf]  ;;  %v326_v50 = vld [vmem:[%s6540_s9 + $0x4b0] sm:$0xf] }
  0x30   : > { %275 = vst [vmem:[%s6545_s10 + $0x60] sm:$0xf] %v274_v24  ;;  %v328_v51 = vld [vmem:[%s6540_s9 + $0x4c8] sm:$0xf]  ;;  %v330_v52 = vld [vmem:[%s6540_s9 + $0x4e0] sm:$0xf] }
  0x31   : > { %277 = vst [vmem:[%s6545_s10 + $0x64] sm:$0xf] %v276_v25  ;;  %v332_v53 = vld [vmem:[%s6540_s9 + $0x4f8] sm:$0xf]  ;;  %v334_v54 = vld [vmem:[%s6540_s9 + $0x510] sm:$0xf] }
  0x32   : > { %279 = vst [vmem:[%s6545_s10 + $0x68] sm:$0xf] %v278_v26  ;;  %v336_v55 = vld [vmem:[%s6540_s9 + $0x528] sm:$0xf]  ;;  %v338_v56 = vld [vmem:[%s6540_s9 + $0x540] sm:$0xf] }
  0x33   : > { %281 = vst [vmem:[%s6545_s10 + $0x6c] sm:$0xf] %v280_v27  ;;  %v340_v57 = vld [vmem:[%s6540_s9 + $0x558] sm:$0xf]  ;;  %v342_v58 = vld [vmem:[%s6540_s9 + $0x570] sm:$0xf] }
  0x34   : > { %283 = vst [vmem:[%s6545_s10 + $0x70] sm:$0xf] %v282_v28  ;;  %v344_v59 = vld [vmem:[%s6540_s9 + $0x588] sm:$0xf]  ;;  %v346_v60 = vld [vmem:[%s6540_s9 + $0x5a0] sm:$0xf] }
  0x35   : > { %285 = vst [vmem:[%s6545_s10 + $0x74] sm:$0xf] %v284_v29  ;;  %v348_v61 = vld [vmem:[%s6540_s9 + $0x5b8] sm:$0xf]  ;;  %v350_v62 = vld [vmem:[%s6540_s9 + $0x5d0] sm:$0xf] }
  0x36   : > { %287 = vst [vmem:[%s6545_s10 + $0x78] sm:$0xf] %v286_v30  ;;  %v352_v63 = vld [vmem:[%s6540_s9 + $0x5e8] sm:$0xf] }
  0x37   : > { %289 = vst [vmem:[%s6545_s10 + $0x7c] sm:$0xf] %v288_v31 }
  0x38   : > { %291 = vst [vmem:[%s6545_s10 + $0x80] sm:$0xf] %v290_v32 }
  0x39   : > { %293 = vst [vmem:[%s6545_s10 + $0x84] sm:$0xf] %v292_v33 }
  0x3a   : > { %295 = vst [vmem:[%s6545_s10 + $0x88] sm:$0xf] %v294_v34 }
  0x3b   : > { %297 = vst [vmem:[%s6545_s10 + $0x8c] sm:$0xf] %v296_v35 }
  0x3c   : > { %299 = vst [vmem:[%s6545_s10 + $0x90] sm:$0xf] %v298_v36 }
  0x3d   : > { %301 = vst [vmem:[%s6545_s10 + $0x94] sm:$0xf] %v300_v37 }
  0x3e   : > { %303 = vst [vmem:[%s6545_s10 + $0x98] sm:$0xf] %v302_v38 }
  0x3f   : > { %305 = vst [vmem:[%s6545_s10 + $0x9c] sm:$0xf] %v304_v39 }
  0x40   : > { %307 = vst [vmem:[%s6545_s10 + $0xa0] sm:$0xf] %v306_v40 }
  0x41   : > { %309 = vst [vmem:[%s6545_s10 + $0xa4] sm:$0xf] %v308_v41 }
  0x42   : > { %311 = vst [vmem:[%s6545_s10 + $0xa8] sm:$0xf] %v310_v42 }
  0x43   : > { %313 = vst [vmem:[%s6545_s10 + $0xac] sm:$0xf] %v312_v43 }
  0x44   : > { %315 = vst [vmem:[%s6545_s10 + $0xb0] sm:$0xf] %v314_v44 }
  0x45   : > { %317 = vst [vmem:[%s6545_s10 + $0xb4] sm:$0xf] %v316_v45 }
  0x46   : > { %319 = vst [vmem:[%s6545_s10 + $0xb8] sm:$0xf] %v318_v46 }
  0x47   : > { %321 = vst [vmem:[%s6545_s10 + $0xbc] sm:$0xf] %v320_v47 }
  0x48   : > { %323 = vst [vmem:[%s6545_s10 + $0xc0] sm:$0xf] %v322_v48 }
  0x49   : > { %325 = vst [vmem:[%s6545_s10 + $0xc4] sm:$0xf] %v324_v49 }
  0x4a   : > { %327 = vst [vmem:[%s6545_s10 + $0xc8] sm:$0xf] %v326_v50 }
  0x4b   : > { %329 = vst [vmem:[%s6545_s10 + $0xcc] sm:$0xf] %v328_v51 }
  0x4c   : > { %331 = vst [vmem:[%s6545_s10 + $0xd0] sm:$0xf] %v330_v52 }
  0x4d   : > { %333 = vst [vmem:[%s6545_s10 + $0xd4] sm:$0xf] %v332_v53 }
  0x4e   : > { %335 = vst [vmem:[%s6545_s10 + $0xd8] sm:$0xf] %v334_v54 }
  0x4f   : > { %337 = vst [vmem:[%s6545_s10 + $0xdc] sm:$0xf] %v336_v55 }
  0x50   : > { %339 = vst [vmem:[%s6545_s10 + $0xe0] sm:$0xf] %v338_v56 }
  0x51   : > { %341 = vst [vmem:[%s6545_s10 + $0xe4] sm:$0xf] %v340_v57 }
  0x52   : > { %343 = vst [vmem:[%s6545_s10 + $0xe8] sm:$0xf] %v342_v58 }
  0x53   : > { %345 = vst [vmem:[%s6545_s10 + $0xec] sm:$0xf] %v344_v59 }
  0x54   : > { %347 = vst [vmem:[%s6545_s10 + $0xf0] sm:$0xf] %v346_v60 }
  0x55   : > { %349 = vst [vmem:[%s6545_s10 + $0xf4] sm:$0xf] %v348_v61 }
  0x56   : > { %351 = vst [vmem:[%s6545_s10 + $0xf8] sm:$0xf] %v350_v62 }
  0x57   : > { %353 = vst [vmem:[%s6545_s10 + $0xfc] sm:$0xf] %v352_v63 }
  0x58 PF: > { %505 = sbr.rel (!%p6511_p4) target bundleno = 157 (0x9d), region = 61  ;;  %s507_s11 = sand.u32 (%p6511_p4), 1, %s6427_s17  }
  0x59   : > { %s5914_s12 = smul.u32 (%p6511_p4), 12, %s6435_s19  ;;  %s5913_s13 = sshll.u32 (%p6511_p4), %s507_s11, 8 }
  0x5a   : > { %s6684_s24 = scalar_lea.vmem (%p6511_p4), [#allocation3], %s5913_s13 }
  0x5b   : > { %s6679_s22 = scalar_lea.vmem (%p6511_p4), %s9722_s1, %s5914_s12 }
  0x5c   : > { %v5915_v0 = vld [vmem:[%s6679_s22 + $0x4] sm:$0xf] (%p6511_p4)  ;;  %v5916_v1 = vld [vmem:[%s6679_s22 + $0x1c] sm:$0xf] (%p6511_p4)  ;;  %v5917_v2 = vld [vmem:[%s6679_s22 + $0x34] sm:$0xf] (%p6511_p4) }
  0x5d   : > { %532 = vst [vmem:[%s6684_s24] sm:$0xf] %v5915_v0  ;;  %v5918_v3 = vld [vmem:[%s6679_s22 + $0x4c] sm:$0xf]  ;;  %v5919_v4 = vld [vmem:[%s6679_s22 + $0x64] sm:$0xf] }
  0x5e   : > { %534 = vst [vmem:[%s6684_s24 + $0x4] sm:$0xf] %v5916_v1  ;;  %v5920_v5 = vld [vmem:[%s6679_s22 + $0x7c] sm:$0xf]  ;;  %v5921_v6 = vld [vmem:[%s6679_s22 + $0x94] sm:$0xf] }
  0x5f   : > { %536 = vst [vmem:[%s6684_s24 + $0x8] sm:$0xf] %v5917_v2  ;;  %v5922_v7 = vld [vmem:[%s6679_s22 + $0xac] sm:$0xf]  ;;  %v5923_v8 = vld [vmem:[%s6679_s22 + $0xc4] sm:$0xf] }
  0x60   : > { %538 = vst [vmem:[%s6684_s24 + $0xc] sm:$0xf] %v5918_v3  ;;  %v5924_v9 = vld [vmem:[%s6679_s22 + $0xdc] sm:$0xf]  ;;  %v5925_v10 = vld [vmem:[%s6679_s22 + $0xf4] sm:$0xf] }
  0x61   : > { %540 = vst [vmem:[%s6684_s24 + $0x10] sm:$0xf] %v5919_v4  ;;  %v5926_v11 = vld [vmem:[%s6679_s22 + $0x10c] sm:$0xf]  ;;  %v5927_v12 = vld [vmem:[%s6679_s22 + $0x124] sm:$0xf] }
  0x62   : > { %542 = vst [vmem:[%s6684_s24 + $0x14] sm:$0xf] %v5920_v5  ;;  %v5928_v13 = vld [vmem:[%s6679_s22 + $0x13c] sm:$0xf]  ;;  %v5929_v14 = vld [vmem:[%s6679_s22 + $0x154] sm:$0xf] }
  0x63   : > { %544 = vst [vmem:[%s6684_s24 + $0x18] sm:$0xf] %v5921_v6  ;;  %v5930_v15 = vld [vmem:[%s6679_s22 + $0x16c] sm:$0xf]  ;;  %v5931_v16 = vld [vmem:[%s6679_s22 + $0x184] sm:$0xf] }
  0x64   : > { %546 = vst [vmem:[%s6684_s24 + $0x1c] sm:$0xf] %v5922_v7  ;;  %v5932_v17 = vld [vmem:[%s6679_s22 + $0x19c] sm:$0xf]  ;;  %v5933_v18 = vld [vmem:[%s6679_s22 + $0x1b4] sm:$0xf] }
  0x65   : > { %548 = vst [vmem:[%s6684_s24 + $0x20] sm:$0xf] %v5923_v8  ;;  %v5934_v19 = vld [vmem:[%s6679_s22 + $0x1cc] sm:$0xf]  ;;  %v5935_v20 = vld [vmem:[%s6679_s22 + $0x1e4] sm:$0xf] }
  0x66   : > { %550 = vst [vmem:[%s6684_s24 + $0x24] sm:$0xf] %v5924_v9  ;;  %v5936_v21 = vld [vmem:[%s6679_s22 + $0x1fc] sm:$0xf]  ;;  %v5937_v22 = vld [vmem:[%s6679_s22 + $0x214] sm:$0xf] }
  0x67   : > { %552 = vst [vmem:[%s6684_s24 + $0x28] sm:$0xf] %v5925_v10  ;;  %v5938_v23 = vld [vmem:[%s6679_s22 + $0x22c] sm:$0xf]  ;;  %v5939_v24 = vld [vmem:[%s6679_s22 + $0x244] sm:$0xf] }
  0x68   : > { %554 = vst [vmem:[%s6684_s24 + $0x2c] sm:$0xf] %v5926_v11  ;;  %v5940_v25 = vld [vmem:[%s6679_s22 + $0x25c] sm:$0xf]  ;;  %v5941_v26 = vld [vmem:[%s6679_s22 + $0x274] sm:$0xf] }
  0x69   : > { %556 = vst [vmem:[%s6684_s24 + $0x30] sm:$0xf] %v5927_v12  ;;  %v5942_v27 = vld [vmem:[%s6679_s22 + $0x28c] sm:$0xf]  ;;  %v5943_v28 = vld [vmem:[%s6679_s22 + $0x2a4] sm:$0xf] }
  0x6a   : > { %558 = vst [vmem:[%s6684_s24 + $0x34] sm:$0xf] %v5928_v13  ;;  %v5944_v29 = vld [vmem:[%s6679_s22 + $0x2bc] sm:$0xf]  ;;  %v5945_v30 = vld [vmem:[%s6679_s22 + $0x2d4] sm:$0xf] }
  0x6b   : > { %560 = vst [vmem:[%s6684_s24 + $0x38] sm:$0xf] %v5929_v14  ;;  %v5946_v31 = vld [vmem:[%s6679_s22 + $0x2ec] sm:$0xf]  ;;  %v5947_v32 = vld [vmem:[%s6679_s22 + $0x304] sm:$0xf] }
  0x6c   : > { %562 = vst [vmem:[%s6684_s24 + $0x3c] sm:$0xf] %v5930_v15  ;;  %v5948_v33 = vld [vmem:[%s6679_s22 + $0x31c] sm:$0xf]  ;;  %v5949_v34 = vld [vmem:[%s6679_s22 + $0x334] sm:$0xf] }
  0x6d   : > { %564 = vst [vmem:[%s6684_s24 + $0x40] sm:$0xf] %v5931_v16  ;;  %v5950_v35 = vld [vmem:[%s6679_s22 + $0x34c] sm:$0xf]  ;;  %v5951_v36 = vld [vmem:[%s6679_s22 + $0x364] sm:$0xf] }
  0x6e   : > { %566 = vst [vmem:[%s6684_s24 + $0x44] sm:$0xf] %v5932_v17  ;;  %v5952_v37 = vld [vmem:[%s6679_s22 + $0x37c] sm:$0xf]  ;;  %v5953_v38 = vld [vmem:[%s6679_s22 + $0x394] sm:$0xf] }
  0x6f   : > { %568 = vst [vmem:[%s6684_s24 + $0x48] sm:$0xf] %v5933_v18  ;;  %v5954_v39 = vld [vmem:[%s6679_s22 + $0x3ac] sm:$0xf]  ;;  %v5955_v40 = vld [vmem:[%s6679_s22 + $0x3c4] sm:$0xf] }
  0x70   : > { %570 = vst [vmem:[%s6684_s24 + $0x4c] sm:$0xf] %v5934_v19  ;;  %v5956_v41 = vld [vmem:[%s6679_s22 + $0x3dc] sm:$0xf]  ;;  %v5957_v42 = vld [vmem:[%s6679_s22 + $0x3f4] sm:$0xf] }
  0x71   : > { %572 = vst [vmem:[%s6684_s24 + $0x50] sm:$0xf] %v5935_v20  ;;  %v5958_v43 = vld [vmem:[%s6679_s22 + $0x40c] sm:$0xf]  ;;  %v5959_v44 = vld [vmem:[%s6679_s22 + $0x424] sm:$0xf] }
  0x72   : > { %574 = vst [vmem:[%s6684_s24 + $0x54] sm:$0xf] %v5936_v21  ;;  %v5960_v45 = vld [vmem:[%s6679_s22 + $0x43c] sm:$0xf]  ;;  %v5961_v46 = vld [vmem:[%s6679_s22 + $0x454] sm:$0xf] }
  0x73   : > { %576 = vst [vmem:[%s6684_s24 + $0x58] sm:$0xf] %v5937_v22  ;;  %v5962_v47 = vld [vmem:[%s6679_s22 + $0x46c] sm:$0xf]  ;;  %v5963_v48 = vld [vmem:[%s6679_s22 + $0x484] sm:$0xf] }
  0x74   : > { %578 = vst [vmem:[%s6684_s24 + $0x5c] sm:$0xf] %v5938_v23  ;;  %v5964_v49 = vld [vmem:[%s6679_s22 + $0x49c] sm:$0xf]  ;;  %v5965_v50 = vld [vmem:[%s6679_s22 + $0x4b4] sm:$0xf] }
  0x75   : > { %580 = vst [vmem:[%s6684_s24 + $0x60] sm:$0xf] %v5939_v24  ;;  %v5966_v51 = vld [vmem:[%s6679_s22 + $0x4cc] sm:$0xf]  ;;  %v5967_v52 = vld [vmem:[%s6679_s22 + $0x4e4] sm:$0xf] }
  0x76   : > { %582 = vst [vmem:[%s6684_s24 + $0x64] sm:$0xf] %v5940_v25  ;;  %v5968_v53 = vld [vmem:[%s6679_s22 + $0x4fc] sm:$0xf]  ;;  %v5969_v54 = vld [vmem:[%s6679_s22 + $0x514] sm:$0xf] }
  0x77   : > { %584 = vst [vmem:[%s6684_s24 + $0x68] sm:$0xf] %v5941_v26  ;;  %v5970_v55 = vld [vmem:[%s6679_s22 + $0x52c] sm:$0xf]  ;;  %v5971_v56 = vld [vmem:[%s6679_s22 + $0x544] sm:$0xf] }
  0x78   : > { %586 = vst [vmem:[%s6684_s24 + $0x6c] sm:$0xf] %v5942_v27  ;;  %v5972_v57 = vld [vmem:[%s6679_s22 + $0x55c] sm:$0xf]  ;;  %v5973_v58 = vld [vmem:[%s6679_s22 + $0x574] sm:$0xf] }
  0x79   : > { %588 = vst [vmem:[%s6684_s24 + $0x70] sm:$0xf] %v5943_v28  ;;  %v5974_v59 = vld [vmem:[%s6679_s22 + $0x58c] sm:$0xf]  ;;  %v5975_v60 = vld [vmem:[%s6679_s22 + $0x5a4] sm:$0xf] }
  0x7a   : > { %590 = vst [vmem:[%s6684_s24 + $0x74] sm:$0xf] %v5944_v29  ;;  %v5976_v61 = vld [vmem:[%s6679_s22 + $0x5bc] sm:$0xf]  ;;  %v5977_v62 = vld [vmem:[%s6679_s22 + $0x5d4] sm:$0xf] }
  0x7b   : > { %592 = vst [vmem:[%s6684_s24 + $0x78] sm:$0xf] %v5945_v30  ;;  %v5978_v63 = vld [vmem:[%s6679_s22 + $0x5ec] sm:$0xf] }
  0x7c   : > { %594 = vst [vmem:[%s6684_s24 + $0x7c] sm:$0xf] %v5946_v31 }
  0x7d   : > { %596 = vst [vmem:[%s6684_s24 + $0x80] sm:$0xf] %v5947_v32 }
  0x7e   : > { %598 = vst [vmem:[%s6684_s24 + $0x84] sm:$0xf] %v5948_v33 }
  0x7f   : > { %600 = vst [vmem:[%s6684_s24 + $0x88] sm:$0xf] %v5949_v34 }
  0x80   : > { %602 = vst [vmem:[%s6684_s24 + $0x8c] sm:$0xf] %v5950_v35 }
  0x81   : > { %604 = vst [vmem:[%s6684_s24 + $0x90] sm:$0xf] %v5951_v36 }
  0x82   : > { %606 = vst [vmem:[%s6684_s24 + $0x94] sm:$0xf] %v5952_v37 }
  0x83   : > { %608 = vst [vmem:[%s6684_s24 + $0x98] sm:$0xf] %v5953_v38 }
  0x84   : > { %610 = vst [vmem:[%s6684_s24 + $0x9c] sm:$0xf] %v5954_v39 }
  0x85   : > { %612 = vst [vmem:[%s6684_s24 + $0xa0] sm:$0xf] %v5955_v40 }
  0x86   : > { %614 = vst [vmem:[%s6684_s24 + $0xa4] sm:$0xf] %v5956_v41 }
  0x87   : > { %616 = vst [vmem:[%s6684_s24 + $0xa8] sm:$0xf] %v5957_v42 }
  0x88   : > { %618 = vst [vmem:[%s6684_s24 + $0xac] sm:$0xf] %v5958_v43 }
  0x89   : > { %620 = vst [vmem:[%s6684_s24 + $0xb0] sm:$0xf] %v5959_v44 }
  0x8a   : > { %622 = vst [vmem:[%s6684_s24 + $0xb4] sm:$0xf] %v5960_v45 }
  0x8b   : > { %624 = vst [vmem:[%s6684_s24 + $0xb8] sm:$0xf] %v5961_v46 }
  0x8c   : > { %626 = vst [vmem:[%s6684_s24 + $0xbc] sm:$0xf] %v5962_v47 }
  0x8d   : > { %628 = vst [vmem:[%s6684_s24 + $0xc0] sm:$0xf] %v5963_v48 }
  0x8e   : > { %630 = vst [vmem:[%s6684_s24 + $0xc4] sm:$0xf] %v5964_v49 }
  0x8f   : > { %632 = vst [vmem:[%s6684_s24 + $0xc8] sm:$0xf] %v5965_v50 }
  0x90   : > { %634 = vst [vmem:[%s6684_s24 + $0xcc] sm:$0xf] %v5966_v51 }
  0x91   : > { %636 = vst [vmem:[%s6684_s24 + $0xd0] sm:$0xf] %v5967_v52 }
  0x92   : > { %638 = vst [vmem:[%s6684_s24 + $0xd4] sm:$0xf] %v5968_v53 }
  0x93   : > { %640 = vst [vmem:[%s6684_s24 + $0xd8] sm:$0xf] %v5969_v54 }
  0x94   : > { %642 = vst [vmem:[%s6684_s24 + $0xdc] sm:$0xf] %v5970_v55 }
  0x95   : > { %644 = vst [vmem:[%s6684_s24 + $0xe0] sm:$0xf] %v5971_v56 }
  0x96   : > { %646 = vst [vmem:[%s6684_s24 + $0xe4] sm:$0xf] %v5972_v57 }
  0x97   : > { %648 = vst [vmem:[%s6684_s24 + $0xe8] sm:$0xf] %v5973_v58 }
  0x98   : > { %650 = vst [vmem:[%s6684_s24 + $0xec] sm:$0xf] %v5974_v59 }
  0x99   : > { %652 = vst [vmem:[%s6684_s24 + $0xf0] sm:$0xf] %v5975_v60 }
  0x9a   : > { %654 = vst [vmem:[%s6684_s24 + $0xf4] sm:$0xf] %v5976_v61 }
  0x9b   : > { %656 = vst [vmem:[%s6684_s24 + $0xf8] sm:$0xf] %v5977_v62 }
  0x9c   : > { %658 = vst [vmem:[%s6684_s24 + $0xfc] sm:$0xf] %v5978_v63 }
  0x9d PF: > { %810 = sbr.rel (!%p6511_p4) target bundleno = 226 (0xe2), region = 102  ;;  %s812_s27 = sand.u32 (%p6511_p4), 1, %s6427_s17  }
  0x9e   : > { %s5980_s30 = smul.u32 (%p6511_p4), 12, %s6435_s19  ;;  %s5979_s5 = sshll.u32 (%p6511_p4), %s812_s27, 8 }
  0x9f   : > { %s6823_s25 = scalar_lea.vmem (%p6511_p4), [#allocation4], %s5979_s5 }
  0xa0   : > { %s6818_s8 = scalar_lea.vmem (%p6511_p4), %s9723_s2, %s5980_s30 }
  0xa1   : > { %v5981_v0 = vld [vmem:[%s6818_s8 + $0x8] sm:$0xf] (%p6511_p4)  ;;  %v5982_v1 = vld [vmem:[%s6818_s8 + $0x20] sm:$0xf] (%p6511_p4)  ;;  %v5983_v2 = vld [vmem:[%s6818_s8 + $0x38] sm:$0xf] (%p6511_p4) }
  0xa2   : > { %837 = vst [vmem:[%s6823_s25] sm:$0xf] %v5981_v0  ;;  %v5984_v3 = vld [vmem:[%s6818_s8 + $0x50] sm:$0xf]  ;;  %v5985_v4 = vld [vmem:[%s6818_s8 + $0x68] sm:$0xf] }
  0xa3   : > { %839 = vst [vmem:[%s6823_s25 + $0x4] sm:$0xf] %v5982_v1  ;;  %v5986_v5 = vld [vmem:[%s6818_s8 + $0x80] sm:$0xf]  ;;  %v5987_v6 = vld [vmem:[%s6818_s8 + $0x98] sm:$0xf] }
  0xa4   : > { %841 = vst [vmem:[%s6823_s25 + $0x8] sm:$0xf] %v5983_v2  ;;  %v5988_v7 = vld [vmem:[%s6818_s8 + $0xb0] sm:$0xf]  ;;  %v5989_v8 = vld [vmem:[%s6818_s8 + $0xc8] sm:$0xf] }
  0xa5   : > { %843 = vst [vmem:[%s6823_s25 + $0xc] sm:$0xf] %v5984_v3  ;;  %v5990_v9 = vld [vmem:[%s6818_s8 + $0xe0] sm:$0xf]  ;;  %v5991_v10 = vld [vmem:[%s6818_s8 + $0xf8] sm:$0xf] }
  0xa6   : > { %845 = vst [vmem:[%s6823_s25 + $0x10] sm:$0xf] %v5985_v4  ;;  %v5992_v11 = vld [vmem:[%s6818_s8 + $0x110] sm:$0xf]  ;;  %v5993_v12 = vld [vmem:[%s6818_s8 + $0x128] sm:$0xf] }
  0xa7   : > { %847 = vst [vmem:[%s6823_s25 + $0x14] sm:$0xf] %v5986_v5  ;;  %v5994_v13 = vld [vmem:[%s6818_s8 + $0x140] sm:$0xf]  ;;  %v5995_v14 = vld [vmem:[%s6818_s8 + $0x158] sm:$0xf] }
  0xa8   : > { %849 = vst [vmem:[%s6823_s25 + $0x18] sm:$0xf] %v5987_v6  ;;  %v5996_v15 = vld [vmem:[%s6818_s8 + $0x170] sm:$0xf]  ;;  %v5997_v16 = vld [vmem:[%s6818_s8 + $0x188] sm:$0xf] }
  0xa9   : > { %851 = vst [vmem:[%s6823_s25 + $0x1c] sm:$0xf] %v5988_v7  ;;  %v5998_v17 = vld [vmem:[%s6818_s8 + $0x1a0] sm:$0xf]  ;;  %v5999_v18 = vld [vmem:[%s6818_s8 + $0x1b8] sm:$0xf] }
  0xaa   : > { %853 = vst [vmem:[%s6823_s25 + $0x20] sm:$0xf] %v5989_v8  ;;  %v6000_v19 = vld [vmem:[%s6818_s8 + $0x1d0] sm:$0xf]  ;;  %v6001_v20 = vld [vmem:[%s6818_s8 + $0x1e8] sm:$0xf] }
  0xab   : > { %855 = vst [vmem:[%s6823_s25 + $0x24] sm:$0xf] %v5990_v9  ;;  %v6002_v21 = vld [vmem:[%s6818_s8 + $0x200] sm:$0xf]  ;;  %v6003_v22 = vld [vmem:[%s6818_s8 + $0x218] sm:$0xf] }
  0xac   : > { %857 = vst [vmem:[%s6823_s25 + $0x28] sm:$0xf] %v5991_v10  ;;  %v6004_v23 = vld [vmem:[%s6818_s8 + $0x230] sm:$0xf]  ;;  %v6005_v24 = vld [vmem:[%s6818_s8 + $0x248] sm:$0xf] }
  0xad   : > { %859 = vst [vmem:[%s6823_s25 + $0x2c] sm:$0xf] %v5992_v11  ;;  %v6006_v25 = vld [vmem:[%s6818_s8 + $0x260] sm:$0xf]  ;;  %v6007_v26 = vld [vmem:[%s6818_s8 + $0x278] sm:$0xf] }
  0xae   : > { %861 = vst [vmem:[%s6823_s25 + $0x30] sm:$0xf] %v5993_v12  ;;  %v6008_v27 = vld [vmem:[%s6818_s8 + $0x290] sm:$0xf]  ;;  %v6009_v28 = vld [vmem:[%s6818_s8 + $0x2a8] sm:$0xf] }
  0xaf   : > { %863 = vst [vmem:[%s6823_s25 + $0x34] sm:$0xf] %v5994_v13  ;;  %v6010_v29 = vld [vmem:[%s6818_s8 + $0x2c0] sm:$0xf]  ;;  %v6011_v30 = vld [vmem:[%s6818_s8 + $0x2d8] sm:$0xf] }
  0xb0   : > { %865 = vst [vmem:[%s6823_s25 + $0x38] sm:$0xf] %v5995_v14  ;;  %v6012_v31 = vld [vmem:[%s6818_s8 + $0x2f0] sm:$0xf]  ;;  %v6013_v32 = vld [vmem:[%s6818_s8 + $0x308] sm:$0xf] }
  0xb1   : > { %867 = vst [vmem:[%s6823_s25 + $0x3c] sm:$0xf] %v5996_v15  ;;  %v6014_v33 = vld [vmem:[%s6818_s8 + $0x320] sm:$0xf]  ;;  %v6015_v34 = vld [vmem:[%s6818_s8 + $0x338] sm:$0xf] }
  0xb2   : > { %869 = vst [vmem:[%s6823_s25 + $0x40] sm:$0xf] %v5997_v16  ;;  %v6016_v35 = vld [vmem:[%s6818_s8 + $0x350] sm:$0xf]  ;;  %v6017_v36 = vld [vmem:[%s6818_s8 + $0x368] sm:$0xf] }
  0xb3   : > { %871 = vst [vmem:[%s6823_s25 + $0x44] sm:$0xf] %v5998_v17  ;;  %v6018_v37 = vld [vmem:[%s6818_s8 + $0x380] sm:$0xf]  ;;  %v6019_v38 = vld [vmem:[%s6818_s8 + $0x398] sm:$0xf] }
  0xb4   : > { %873 = vst [vmem:[%s6823_s25 + $0x48] sm:$0xf] %v5999_v18  ;;  %v6020_v39 = vld [vmem:[%s6818_s8 + $0x3b0] sm:$0xf]  ;;  %v6021_v40 = vld [vmem:[%s6818_s8 + $0x3c8] sm:$0xf] }
  0xb5   : > { %875 = vst [vmem:[%s6823_s25 + $0x4c] sm:$0xf] %v6000_v19  ;;  %v6022_v41 = vld [vmem:[%s6818_s8 + $0x3e0] sm:$0xf]  ;;  %v6023_v42 = vld [vmem:[%s6818_s8 + $0x3f8] sm:$0xf] }
  0xb6   : > { %877 = vst [vmem:[%s6823_s25 + $0x50] sm:$0xf] %v6001_v20  ;;  %v6024_v43 = vld [vmem:[%s6818_s8 + $0x410] sm:$0xf]  ;;  %v6025_v44 = vld [vmem:[%s6818_s8 + $0x428] sm:$0xf] }
  0xb7   : > { %879 = vst [vmem:[%s6823_s25 + $0x54] sm:$0xf] %v6002_v21  ;;  %v6026_v45 = vld [vmem:[%s6818_s8 + $0x440] sm:$0xf]  ;;  %v6027_v46 = vld [vmem:[%s6818_s8 + $0x458] sm:$0xf] }
  0xb8   : > { %881 = vst [vmem:[%s6823_s25 + $0x58] sm:$0xf] %v6003_v22  ;;  %v6028_v47 = vld [vmem:[%s6818_s8 + $0x470] sm:$0xf]  ;;  %v6029_v48 = vld [vmem:[%s6818_s8 + $0x488] sm:$0xf] }
  0xb9   : > { %883 = vst [vmem:[%s6823_s25 + $0x5c] sm:$0xf] %v6004_v23  ;;  %v6030_v49 = vld [vmem:[%s6818_s8 + $0x4a0] sm:$0xf]  ;;  %v6031_v50 = vld [vmem:[%s6818_s8 + $0x4b8] sm:$0xf] }
  0xba   : > { %885 = vst [vmem:[%s6823_s25 + $0x60] sm:$0xf] %v6005_v24  ;;  %v6032_v51 = vld [vmem:[%s6818_s8 + $0x4d0] sm:$0xf]  ;;  %v6033_v52 = vld [vmem:[%s6818_s8 + $0x4e8] sm:$0xf] }
  0xbb   : > { %887 = vst [vmem:[%s6823_s25 + $0x64] sm:$0xf] %v6006_v25  ;;  %v6034_v53 = vld [vmem:[%s6818_s8 + $0x500] sm:$0xf]  ;;  %v6035_v54 = vld [vmem:[%s6818_s8 + $0x518] sm:$0xf] }
  0xbc   : > { %889 = vst [vmem:[%s6823_s25 + $0x68] sm:$0xf] %v6007_v26  ;;  %v6036_v55 = vld [vmem:[%s6818_s8 + $0x530] sm:$0xf]  ;;  %v6037_v56 = vld [vmem:[%s6818_s8 + $0x548] sm:$0xf] }
  0xbd   : > { %891 = vst [vmem:[%s6823_s25 + $0x6c] sm:$0xf] %v6008_v27  ;;  %v6038_v57 = vld [vmem:[%s6818_s8 + $0x560] sm:$0xf]  ;;  %v6039_v58 = vld [vmem:[%s6818_s8 + $0x578] sm:$0xf] }
  0xbe   : > { %893 = vst [vmem:[%s6823_s25 + $0x70] sm:$0xf] %v6009_v28  ;;  %v6040_v59 = vld [vmem:[%s6818_s8 + $0x590] sm:$0xf]  ;;  %v6041_v60 = vld [vmem:[%s6818_s8 + $0x5a8] sm:$0xf] }
  0xbf   : > { %895 = vst [vmem:[%s6823_s25 + $0x74] sm:$0xf] %v6010_v29  ;;  %v6042_v61 = vld [vmem:[%s6818_s8 + $0x5c0] sm:$0xf]  ;;  %v6043_v62 = vld [vmem:[%s6818_s8 + $0x5d8] sm:$0xf] }
  0xc0   : > { %897 = vst [vmem:[%s6823_s25 + $0x78] sm:$0xf] %v6011_v30  ;;  %v6044_v63 = vld [vmem:[%s6818_s8 + $0x5f0] sm:$0xf] }
  0xc1   : > { %899 = vst [vmem:[%s6823_s25 + $0x7c] sm:$0xf] %v6012_v31 }
  0xc2   : > { %901 = vst [vmem:[%s6823_s25 + $0x80] sm:$0xf] %v6013_v32 }
  0xc3   : > { %903 = vst [vmem:[%s6823_s25 + $0x84] sm:$0xf] %v6014_v33 }
  0xc4   : > { %905 = vst [vmem:[%s6823_s25 + $0x88] sm:$0xf] %v6015_v34 }
  0xc5   : > { %907 = vst [vmem:[%s6823_s25 + $0x8c] sm:$0xf] %v6016_v35 }
  0xc6   : > { %909 = vst [vmem:[%s6823_s25 + $0x90] sm:$0xf] %v6017_v36 }
  0xc7   : > { %911 = vst [vmem:[%s6823_s25 + $0x94] sm:$0xf] %v6018_v37 }
  0xc8   : > { %913 = vst [vmem:[%s6823_s25 + $0x98] sm:$0xf] %v6019_v38 }
  0xc9   : > { %915 = vst [vmem:[%s6823_s25 + $0x9c] sm:$0xf] %v6020_v39 }
  0xca   : > { %917 = vst [vmem:[%s6823_s25 + $0xa0] sm:$0xf] %v6021_v40 }
  0xcb   : > { %919 = vst [vmem:[%s6823_s25 + $0xa4] sm:$0xf] %v6022_v41 }
  0xcc   : > { %921 = vst [vmem:[%s6823_s25 + $0xa8] sm:$0xf] %v6023_v42 }
  0xcd   : > { %923 = vst [vmem:[%s6823_s25 + $0xac] sm:$0xf] %v6024_v43 }
  0xce   : > { %925 = vst [vmem:[%s6823_s25 + $0xb0] sm:$0xf] %v6025_v44 }
  0xcf   : > { %927 = vst [vmem:[%s6823_s25 + $0xb4] sm:$0xf] %v6026_v45 }
  0xd0   : > { %929 = vst [vmem:[%s6823_s25 + $0xb8] sm:$0xf] %v6027_v46 }
  0xd1   : > { %931 = vst [vmem:[%s6823_s25 + $0xbc] sm:$0xf] %v6028_v47 }
  0xd2   : > { %933 = vst [vmem:[%s6823_s25 + $0xc0] sm:$0xf] %v6029_v48 }
  0xd3   : > { %935 = vst [vmem:[%s6823_s25 + $0xc4] sm:$0xf] %v6030_v49 }
  0xd4   : > { %937 = vst [vmem:[%s6823_s25 + $0xc8] sm:$0xf] %v6031_v50 }
  0xd5   : > { %939 = vst [vmem:[%s6823_s25 + $0xcc] sm:$0xf] %v6032_v51 }
  0xd6   : > { %941 = vst [vmem:[%s6823_s25 + $0xd0] sm:$0xf] %v6033_v52 }
  0xd7   : > { %943 = vst [vmem:[%s6823_s25 + $0xd4] sm:$0xf] %v6034_v53 }
  0xd8   : > { %945 = vst [vmem:[%s6823_s25 + $0xd8] sm:$0xf] %v6035_v54 }
  0xd9   : > { %947 = vst [vmem:[%s6823_s25 + $0xdc] sm:$0xf] %v6036_v55 }
  0xda   : > { %949 = vst [vmem:[%s6823_s25 + $0xe0] sm:$0xf] %v6037_v56 }
  0xdb   : > { %951 = vst [vmem:[%s6823_s25 + $0xe4] sm:$0xf] %v6038_v57 }
  0xdc   : > { %953 = vst [vmem:[%s6823_s25 + $0xe8] sm:$0xf] %v6039_v58 }
  0xdd   : > { %955 = vst [vmem:[%s6823_s25 + $0xec] sm:$0xf] %v6040_v59 }
  0xde   : > { %957 = vst [vmem:[%s6823_s25 + $0xf0] sm:$0xf] %v6041_v60 }
  0xdf   : > { %959 = vst [vmem:[%s6823_s25 + $0xf4] sm:$0xf] %v6042_v61 }
  0xe0   : > { %961 = vst [vmem:[%s6823_s25 + $0xf8] sm:$0xf] %v6043_v62 }
  0xe1   : > { %963 = vst [vmem:[%s6823_s25 + $0xfc] sm:$0xf] %v6044_v63 }
  0xe2 PF: > { %p6045_p11 = scmp.ge.s32.totalorder %s6439_s20, 1  ;;  %p1114_p12 = scmp.lt.s32.totalorder %s6439_s20, 3 }
  0xe4   : > { %p1115_p13 = pnand %p6045_p11, %p1114_p12 }
  0xe5   : > { %s6953_s9 = sand.u32 (!%p1115_p13), 1, %s6423_s16   ;;  %s6442_s22 = smov (!%p1115_p13), 32  }
  0xe6   : > { %1118 = sbr.rel (%p1115_p13) target bundleno = 1463 (0x5b7), region = 143  ;;  %s6956_s10 = sshll.u32 (!%p1115_p13), %s6953_s9, 8 }
  0xe7   : > { %s6959_s11 = scalar_lea.vmem (!%p1115_p13), [#allocation3], %s6956_s10  ;;  %s7078_s12 = scalar_lea.vmem (!%p1115_p13), [#allocation2], %s6956_s10 }
  0xe8   : > { %s7561_s13 = scalar_lea.vmem (!%p1115_p13), [#allocation4], %s6956_s10  ;;  %s6049_s14 = sshll.u32 (!%p1115_p13), %s6953_s9, 6 }
  0xe9   : > { %s7662_s21 = scalar_lea.vmem (!%p1115_p13), [#allocation5], %s6049_s14  ;;  %s9726_s24 = smov (!%p1115_p13), 96  }
  0xea   : > { %s6444_s27 = smov (!%p1115_p13), 64   ;;  %s6154_s30 = sshll.u32 (!%p1115_p13), %s6431_s18, 6 }
  0xeb   : > { %vm1465_vm0 = vcmask 1041409   ;;  %vm1468_vm1 = vcmask 1042434   ;;  %vm1471_vm2 = vcmask 1043459   ;;  %vm1474_vm3 = vcmask 1044484   ;;  %v1328_v0 = vld [vmem:[%s6959_s11 + $0xe0] sm:$0x1]  ;;  %s5731_s7 = scalar_lea.hbm %s9725_s4, %s6154_s30 }
  0xec   : > { %vm1477_vm4 = vcmask 1045509   ;;  %vm1480_vm5 = vcmask 1046534   ;;  %vm1483_vm6 = vcmask 1047559   ;;  %v1329_v1 = vld [vmem:[%s6959_s11 + $0xe4] sm:$0x1]  ;;  %vm1759_vm7 = vcmask 261120  }
  0xed   : > { %v1330_v2 = vld [vmem:[%s6959_s11 + $0xe8] sm:$0x1]  ;;  %v1331_v3 = vld [vmem:[%s6959_s11 + $0xec] sm:$0x1]  ;;  %v1332_v4 = vld [vmem:[%s6959_s11 + $0xf0] sm:$0x1] }
  0xee   : > { %v1333_v5 = vld [vmem:[%s6959_s11 + $0xf4] sm:$0x1]  ;;  %v1334_v6 = vld [vmem:[%s6959_s11 + $0xf8] sm:$0x1]  ;;  %v1335_v7 = vld [vmem:[%s6959_s11 + $0xfc] sm:$0x1] }
  0xef   : > { %v1745_v8 = vrot.slane %v1329_v1, 7  ;;  %v1747_v9 = vrot.slane %v1330_v2, 6  ;;  %v1749_v10 = vrot.slane %v1331_v3, 5  ;;  %v1751_v11 = vrot.slane %v1332_v4, 4  ;;  %v1320_v13 = vld [vmem:[%s6959_s11 + $0xc0] sm:$0x1] }
  0xf0   : > { %v1753_v12 = vrot.slane %v1333_v5, 3  ;;  %v1755_v15 = vrot.slane %v1334_v6, 2  ;;  %v1757_v16 = vrot.slane %v1335_v7, 1  ;;  %v1321_v17 = vld [vmem:[%s6959_s11 + $0xc4] sm:$0x1]  ;;  %vm1199_vm8 = vcmask 523264  }
  0xf1   : > { %v1746_v14 = vsel %vm1465_vm0, %v1745_v8, %v1328_v0  ;;  %v1322_v18 = vld [vmem:[%s6959_s11 + $0xc8] sm:$0x1]  ;;  %v1323_v20 = vld [vmem:[%s6959_s11 + $0xcc] sm:$0x1]  ;;  %v1324_v21 = vld [vmem:[%s6959_s11 + $0xd0] sm:$0x1] }
  0xf2   : > { %v1748_v19 = vsel %vm1468_vm1, %v1747_v9, %v1746_v14  ;;  %v1325_v22 = vld [vmem:[%s6959_s11 + $0xd4] sm:$0x1]  ;;  %v1326_v24 = vld [vmem:[%s6959_s11 + $0xd8] sm:$0x1]  ;;  %v1327_v25 = vld [vmem:[%s6959_s11 + $0xdc] sm:$0x1] }
  0xf3   : > { %v1750_v23 = vsel %vm1471_vm2, %v1749_v10, %v1748_v19  ;;  %v1731_v26 = vrot.slane %v1321_v17, 7  ;;  %v1733_v27 = vrot.slane %v1322_v18, 6  ;;  %v1735_v29 = vrot.slane %v1323_v20, 5  ;;  %v1312_v32 = vld [vmem:[%s6959_s11 + $0xa0] sm:$0x1]  ;;  %s5732_s8 = sshll.u32 %s7662_s21, 4  ;;  %s5733_s8 = int_to_ptr.vmem [resolvable:$true] %s5732_s8 }
  0xf4   : > { %v1752_v28 = vsel %vm1474_vm3, %v1751_v11, %v1750_v23  ;;  %v1737_v30 = vrot.slane %v1324_v21, 4  ;;  %v1739_v31 = vrot.slane %v1325_v22, 3  ;;  %v1741_v35 = vrot.slane %v1326_v24, 2  ;;  %v1313_v37 = vld [vmem:[%s6959_s11 + $0xa4] sm:$0x1]  ;;  %s5734_s25 = sshll.u32 %s5731_s7, 4  ;;  %s5735_s25 = int_to_ptr.hbm [resolvable:$true] %s5734_s25 }
  0xf5   : > { %v1754_v33 = vsel %vm1477_vm4, %v1753_v12, %v1752_v28  ;;  %v1732_v34 = vsel %vm1465_vm0, %v1731_v26, %v1320_v13  ;;  %v1743_v36 = vrot.slane %v1327_v25, 1  ;;  %v1314_v38 = vld [vmem:[%s6959_s11 + $0xa8] sm:$0x1]  ;;  %v1315_v41 = vld [vmem:[%s6959_s11 + $0xac] sm:$0x1]  ;;  %v1717_v48 = vrot.slane %v1313_v37, 7 }
  0xf6   : > { %v1756_v39 = vsel %vm1480_vm5, %v1755_v15, %v1754_v33  ;;  %v1734_v40 = vsel %vm1468_vm1, %v1733_v27, %v1732_v34  ;;  %v1316_v42 = vld [vmem:[%s6959_s11 + $0xb0] sm:$0x1]  ;;  %v1317_v43 = vld [vmem:[%s6959_s11 + $0xb4] sm:$0x1]  ;;  %v1318_v46 = vld [vmem:[%s6959_s11 + $0xb8] sm:$0x1] }
  0xf7   : > { %v1758_v44 = vsel %vm1483_vm6, %v1757_v16, %v1756_v39  ;;  %v1736_v45 = vsel %vm1471_vm2, %v1735_v29, %v1734_v40  ;;  %v1319_v47 = vld [vmem:[%s6959_s11 + $0xbc] sm:$0x1]  ;;  %v1719_v49 = vrot.slane %v1314_v38, 6  ;;  %v1721_v51 = vrot.slane %v1315_v41, 5  ;;  %v1304_v54 = vld [vmem:[%s6959_s11 + $0x80] sm:$0x1] }
  0xf8   : > { %6052 = vmatpush.xpose.msk.msra.mxu0 %vm1759_vm7, %v1758_v44  ;;  %v1738_v50 = vsel %vm1474_vm3, %v1737_v30, %v1736_v45  ;;  %v1723_v52 = vrot.slane %v1316_v42, 4  ;;  %v1725_v53 = vrot.slane %v1317_v43, 3  ;;  %v1718_v56 = vsel %vm1465_vm0, %v1717_v48, %v1312_v32  ;;  %v1305_v59 = vld [vmem:[%s6959_s11 + $0x84] sm:$0x1]  ;;  %v1306_v60 = vld [vmem:[%s6959_s11 + $0x88] sm:$0x1] }
  0xf9   : > { %v1740_v55 = vsel %vm1477_vm4, %v1739_v31, %v1738_v50  ;;  %v1727_v57 = vrot.slane %v1318_v46, 2  ;;  %v1729_v58 = vrot.slane %v1319_v47, 1  ;;  %v1720_v62 = vsel %vm1468_vm1, %v1719_v49, %v1718_v56  ;;  %v1307_v63 = vld [vmem:[%s6959_s11 + $0x8c] sm:$0x1]  ;;  %v1308_v0 = vld [vmem:[%s6959_s11 + $0x90] sm:$0x1] }
  0xfa   : > { %v1742_v61 = vsel %vm1480_vm5, %v1741_v35, %v1740_v55  ;;  %v1309_v1 = vld [vmem:[%s6959_s11 + $0x94] sm:$0x1]  ;;  %v1722_v3 = vsel %vm1471_vm2, %v1721_v51, %v1720_v62  ;;  %v1310_v4 = vld [vmem:[%s6959_s11 + $0x98] sm:$0x1]  ;;  %v1311_v5 = vld [vmem:[%s6959_s11 + $0x9c] sm:$0x1] }
  0xfb   : > { %v1744_v2 = vsel %vm1483_vm6, %v1743_v36, %v1742_v61  ;;  %v1703_v6 = vrot.slane %v1305_v59, 7  ;;  %v1705_v7 = vrot.slane %v1306_v60, 6  ;;  %v1724_v8 = vsel %vm1474_vm3, %v1723_v52, %v1722_v3  ;;  %v1296_v12 = vld [vmem:[%s6959_s11 + $0x60] sm:$0x1]  ;;  %v1297_v17 = vld [vmem:[%s6959_s11 + $0x64] sm:$0x1] }
  0xfc   : > { %6053 = vmatpush.xpose.msk.msra.mxu0 %vm1759_vm7, %v1744_v2  ;;  %v1707_v9 = vrot.slane %v1307_v63, 5  ;;  %v1709_v10 = vrot.slane %v1308_v0, 4  ;;  %v1711_v11 = vrot.slane %v1309_v1, 3  ;;  %v1726_v13 = vsel %vm1477_vm4, %v1725_v53, %v1724_v8  ;;  %v1298_v18 = vld [vmem:[%s6959_s11 + $0x68] sm:$0x1]  ;;  %s5714_s10 = scalar_lea.sflag [#allocation6], %s6953_s9 }
  0xfd   : > { %v1704_v14 = vsel %vm1465_vm0, %v1703_v6, %v1304_v54  ;;  %v1713_v15 = vrot.slane %v1310_v4, 2  ;;  %v1715_v16 = vrot.slane %v1311_v5, 1  ;;  %v1728_v19 = vsel %vm1480_vm5, %v1727_v57, %v1726_v13  ;;  %v1299_v21 = vld [vmem:[%s6959_s11 + $0x6c] sm:$0x1]  ;;  %v1300_v22 = vld [vmem:[%s6959_s11 + $0x70] sm:$0x1] }
  0xfe   : > { %v1706_v20 = vsel %vm1468_vm1, %v1705_v7, %v1704_v14  ;;  %v1301_v23 = vld [vmem:[%s6959_s11 + $0x74] sm:$0x1]  ;;  %v1730_v24 = vsel %vm1483_vm6, %v1729_v58, %v1728_v19  ;;  %v1302_v26 = vld [vmem:[%s6959_s11 + $0x78] sm:$0x1]  ;;  %v1303_v27 = vld [vmem:[%s6959_s11 + $0x7c] sm:$0x1] }
  0xff   : > { %v1708_v25 = vsel %vm1471_vm2, %v1707_v9, %v1706_v20  ;;  %v1689_v28 = vrot.slane %v1297_v17, 7  ;;  %v1691_v29 = vrot.slane %v1298_v18, 6  ;;  %v1693_v31 = vrot.slane %v1299_v21, 5  ;;  %v1288_v34 = vld [vmem:[%s6959_s11 + $0x40] sm:$0x1] }
 0x100   : > { %6054 = vmatpush.xpose.msk.msra.mxu0 %vm1759_vm7, %v1730_v24  ;;  %v1710_v30 = vsel %vm1474_vm3, %v1709_v10, %v1708_v25  ;;  %v1695_v32 = vrot.slane %v1300_v22, 4  ;;  %v1697_v33 = vrot.slane %v1301_v23, 3  ;;  %v1699_v37 = vrot.slane %v1302_v26, 2  ;;  %v1289_v39 = vld [vmem:[%s6959_s11 + $0x44] sm:$0x1] }
 0x101   : > { %v1712_v35 = vsel %vm1477_vm4, %v1711_v11, %v1710_v30  ;;  %v1690_v36 = vsel %vm1465_vm0, %v1689_v28, %v1296_v12  ;;  %v1701_v38 = vrot.slane %v1303_v27, 1  ;;  %v1290_v40 = vld [vmem:[%s6959_s11 + $0x48] sm:$0x1]  ;;  %v1291_v43 = vld [vmem:[%s6959_s11 + $0x4c] sm:$0x1]  ;;  %v1675_v50 = vrot.slane %v1289_v39, 7 }
 0x102   : > { %v1714_v41 = vsel %vm1480_vm5, %v1713_v15, %v1712_v35  ;;  %v1692_v42 = vsel %vm1468_vm1, %v1691_v29, %v1690_v36  ;;  %v1292_v44 = vld [vmem:[%s6959_s11 + $0x50] sm:$0x1]  ;;  %v1293_v45 = vld [vmem:[%s6959_s11 + $0x54] sm:$0x1]  ;;  %v1294_v48 = vld [vmem:[%s6959_s11 + $0x58] sm:$0x1] }
 0x103   : > { %v1716_v46 = vsel %vm1483_vm6, %v1715_v16, %v1714_v41  ;;  %v1694_v47 = vsel %vm1471_vm2, %v1693_v31, %v1692_v42  ;;  %v1295_v49 = vld [vmem:[%s6959_s11 + $0x5c] sm:$0x1]  ;;  %v1677_v51 = vrot.slane %v1290_v40, 6  ;;  %v1679_v53 = vrot.slane %v1291_v43, 5  ;;  %v1280_v56 = vld [vmem:[%s6959_s11 + $0x20] sm:$0x1] }
 0x104   : > { %6055 = vmatpush.xpose.msk.msra.mxu0 %vm1759_vm7, %v1716_v46  ;;  %v1696_v52 = vsel %vm1474_vm3, %v1695_v32, %v1694_v47  ;;  %v1681_v54 = vrot.slane %v1292_v44, 4  ;;  %v1683_v55 = vrot.slane %v1293_v45, 3  ;;  %v1676_v58 = vsel %vm1465_vm0, %v1675_v50, %v1288_v34  ;;  %v1281_v61 = vld [vmem:[%s6959_s11 + $0x24] sm:$0x1]  ;;  %v1282_v62 = vld [vmem:[%s6959_s11 + $0x28] sm:$0x1] }
 0x105   : > { %v1698_v57 = vsel %vm1477_vm4, %v1697_v33, %v1696_v52  ;;  %v1685_v59 = vrot.slane %v1294_v48, 2  ;;  %v1687_v60 = vrot.slane %v1295_v49, 1  ;;  %v1678_v0 = vsel %vm1468_vm1, %v1677_v51, %v1676_v58  ;;  %v1283_v1 = vld [vmem:[%s6959_s11 + $0x2c] sm:$0x1]  ;;  %v1284_v2 = vld [vmem:[%s6959_s11 + $0x30] sm:$0x1] }
 0x106   : > { %v1700_v63 = vsel %vm1480_vm5, %v1699_v37, %v1698_v57  ;;  %v1285_v3 = vld [vmem:[%s6959_s11 + $0x34] sm:$0x1]  ;;  %v1680_v5 = vsel %vm1471_vm2, %v1679_v53, %v1678_v0  ;;  %v1286_v6 = vld [vmem:[%s6959_s11 + $0x38] sm:$0x1]  ;;  %v1287_v7 = vld [vmem:[%s6959_s11 + $0x3c] sm:$0x1] }
 0x107   : > { %v1702_v4 = vsel %vm1483_vm6, %v1701_v38, %v1700_v63  ;;  %v1661_v8 = vrot.slane %v1281_v61, 7  ;;  %v1663_v9 = vrot.slane %v1282_v62, 6  ;;  %v1682_v10 = vsel %vm1474_vm3, %v1681_v54, %v1680_v5  ;;  %v1272_v14 = vld [vmem:[%s6959_s11] sm:$0x1]  ;;  %v1273_v19 = vld [vmem:[%s6959_s11 + $0x4] sm:$0x1] }
 0x108   : > { %6056 = vmatpush.xpose.msk.msra.mxu0 %vm1759_vm7, %v1702_v4  ;;  %v1665_v11 = vrot.slane %v1283_v1, 5  ;;  %v1667_v12 = vrot.slane %v1284_v2, 4  ;;  %v1669_v13 = vrot.slane %v1285_v3, 3  ;;  %v1684_v15 = vsel %vm1477_vm4, %v1683_v55, %v1682_v10  ;;  %v1274_v20 = vld [vmem:[%s6959_s11 + $0x8] sm:$0x1] }
 0x109   : > { %v1662_v16 = vsel %vm1465_vm0, %v1661_v8, %v1280_v56  ;;  %v1671_v17 = vrot.slane %v1286_v6, 2  ;;  %v1673_v18 = vrot.slane %v1287_v7, 1  ;;  %v1686_v21 = vsel %vm1480_vm5, %v1685_v59, %v1684_v15  ;;  %v1275_v23 = vld [vmem:[%s6959_s11 + $0xc] sm:$0x1]  ;;  %v1276_v24 = vld [vmem:[%s6959_s11 + $0x10] sm:$0x1] }
 0x10a   : > { %v1664_v22 = vsel %vm1468_vm1, %v1663_v9, %v1662_v16  ;;  %v1277_v25 = vld [vmem:[%s6959_s11 + $0x14] sm:$0x1]  ;;  %v1688_v26 = vsel %vm1483_vm6, %v1687_v60, %v1686_v21  ;;  %v1278_v28 = vld [vmem:[%s6959_s11 + $0x18] sm:$0x1]  ;;  %v1279_v29 = vld [vmem:[%s6959_s11 + $0x1c] sm:$0x1] }
 0x10b   : > { %v1666_v27 = vsel %vm1471_vm2, %v1665_v11, %v1664_v22  ;;  %v1647_v30 = vrot.slane %v1273_v19, 7  ;;  %v1649_v31 = vrot.slane %v1274_v20, 6  ;;  %v1651_v33 = vrot.slane %v1275_v23, 5  ;;  %v1208_v36 = vld [vmem:[%s7078_s12] sm:$0x1] }
 0x10c   : > { %6057 = vmatpush.xpose.msk.msra.mxu0 %vm1759_vm7, %v1688_v26  ;;  %v1668_v32 = vsel %vm1474_vm3, %v1667_v12, %v1666_v27  ;;  %v1653_v34 = vrot.slane %v1276_v24, 4  ;;  %v1655_v35 = vrot.slane %v1277_v25, 3  ;;  %v1657_v39 = vrot.slane %v1278_v28, 2  ;;  %v1209_v41 = vld [vmem:[%s7078_s12 + $0x4] sm:$0x1] }
 0x10d   : > { %v1670_v37 = vsel %vm1477_vm4, %v1669_v13, %v1668_v32  ;;  %v1648_v38 = vsel %vm1465_vm0, %v1647_v30, %v1272_v14  ;;  %v1659_v40 = vrot.slane %v1279_v29, 1  ;;  %v1210_v42 = vld [vmem:[%s7078_s12 + $0x8] sm:$0x1]  ;;  %v1211_v45 = vld [vmem:[%s7078_s12 + $0xc] sm:$0x1]  ;;  %v1464_v52 = vrot.slane %v1209_v41, 7 }
 0x10e   : > { %v1672_v43 = vsel %vm1480_vm5, %v1671_v17, %v1670_v37  ;;  %v1650_v44 = vsel %vm1468_vm1, %v1649_v31, %v1648_v38  ;;  %v1212_v46 = vld [vmem:[%s7078_s12 + $0x10] sm:$0x1]  ;;  %v1213_v47 = vld [vmem:[%s7078_s12 + $0x14] sm:$0x1]  ;;  %v1214_v50 = vld [vmem:[%s7078_s12 + $0x18] sm:$0x1] }
 0x10f   : > { %v1674_v48 = vsel %vm1483_vm6, %v1673_v18, %v1672_v43  ;;  %v1652_v49 = vsel %vm1471_vm2, %v1651_v33, %v1650_v44  ;;  %v1215_v51 = vld [vmem:[%s7078_s12 + $0x1c] sm:$0x1]  ;;  %v1467_v53 = vrot.slane %v1210_v42, 6  ;;  %v1470_v55 = vrot.slane %v1211_v45, 5  ;;  %v1216_v58 = vld [vmem:[%s7078_s12 + $0x20] sm:$0x1] }
 0x110   : > { %6058 = vmatpush.xpose.msk.msra.mxu0 %vm1759_vm7, %v1674_v48  ;;  %v1654_v54 = vsel %vm1474_vm3, %v1653_v34, %v1652_v49  ;;  %v1473_v56 = vrot.slane %v1212_v46, 4  ;;  %v1476_v57 = vrot.slane %v1213_v47, 3  ;;  %v1466_v60 = vsel %vm1465_vm0, %v1464_v52, %v1208_v36  ;;  %v1217_v63 = vld [vmem:[%s7078_s12 + $0x24] sm:$0x1]  ;;  %v1218_v0 = vld [vmem:[%s7078_s12 + $0x28] sm:$0x1] }
 0x111   : > { %v1656_v59 = vsel %vm1477_vm4, %v1655_v35, %v1654_v54  ;;  %v1479_v61 = vrot.slane %v1214_v50, 2  ;;  %v1482_v62 = vrot.slane %v1215_v51, 1  ;;  %v1469_v2 = vsel %vm1468_vm1, %v1467_v53, %v1466_v60  ;;  %v1219_v3 = vld [vmem:[%s7078_s12 + $0x2c] sm:$0x1]  ;;  %v1220_v4 = vld [vmem:[%s7078_s12 + $0x30] sm:$0x1] }
 0x112   : > { %v1658_v1 = vsel %vm1480_vm5, %v1657_v39, %v1656_v59  ;;  %v1221_v5 = vld [vmem:[%s7078_s12 + $0x34] sm:$0x1]  ;;  %v1472_v7 = vsel %vm1471_vm2, %v1470_v55, %v1469_v2  ;;  %v1222_v8 = vld [vmem:[%s7078_s12 + $0x38] sm:$0x1]  ;;  %v1485_v9 = vrot.slane %v1217_v63, 7  ;;  %v1487_v10 = vrot.slane %v1218_v0, 6 }
 0x113   : > { %v1660_v6 = vsel %vm1483_vm6, %v1659_v40, %v1658_v1  ;;  %v1475_v11 = vsel %vm1474_vm3, %v1473_v56, %v1472_v7  ;;  %v1223_v12 = vld [vmem:[%s7078_s12 + $0x3c] sm:$0x1]  ;;  %v1489_v13 = vrot.slane %v1219_v3, 5  ;;  %v1491_v14 = vrot.slane %v1220_v4, 4  ;;  %v1224_v18 = vld [vmem:[%s7078_s12 + $0x40] sm:$0x1] }
 0x114   : > { %6059 = vmatpush.xpose.msk.msra.mxu0 %vm1759_vm7, %v1660_v6  ;;  %v1493_v15 = vrot.slane %v1221_v5, 3  ;;  %v1478_v16 = vsel %vm1477_vm4, %v1476_v57, %v1475_v11  ;;  %v1486_v17 = vsel %vm1465_vm0, %v1485_v9, %v1216_v58  ;;  %v1225_v19 = vld [vmem:[%s7078_s12 + $0x44] sm:$0x1]  ;;  %v1226_v20 = vld [vmem:[%s7078_s12 + $0x48] sm:$0x1]  ;;  %v1495_v23 = vrot.slane %v1222_v8, 2 }
 0x115   : > { %v1481_v21 = vsel %vm1480_vm5, %v1479_v61, %v1478_v16  ;;  %v1488_v22 = vsel %vm1468_vm1, %v1487_v10, %v1486_v17  ;;  %v1227_v24 = vld [vmem:[%s7078_s12 + $0x4c] sm:$0x1]  ;;  %v1228_v25 = vld [vmem:[%s7078_s12 + $0x50] sm:$0x1]  ;;  %v1499_v28 = vrot.slane %v1225_v19, 7  ;;  %v1501_v29 = vrot.slane %v1226_v20, 6 }
 0x116   : > { %v1484_v26 = vsel %vm1483_vm6, %v1482_v62, %v1481_v21  ;;  %v1490_v27 = vsel %vm1471_vm2, %v1489_v13, %v1488_v22  ;;  %v1229_v31 = vld [vmem:[%s7078_s12 + $0x54] sm:$0x1]  ;;  %v1503_v32 = vrot.slane %v1227_v24, 5  ;;  %v1505_v33 = vrot.slane %v1228_v25, 4  ;;  %v1233_v37 = vld [vmem:[%s7078_s12 + $0x64] sm:$0x1] }
 0x117   : > { %6060 = vmatmul.msk.f32.vlgmr.msra.gmra.mxu0 %vm1759_vm7, %v1484_v26  ;;  %v1492_v30 = vsel %vm1474_vm3, %v1491_v14, %v1490_v27  ;;  %v1497_v35 = vrot.slane %v1223_v12, 1  ;;  %v1500_v36 = vsel %vm1465_vm0, %v1499_v28, %v1224_v18  ;;  %v1234_v38 = vld [vmem:[%s7078_s12 + $0x68] sm:$0x1]  ;;  %v1232_v41 = vld [vmem:[%s7078_s12 + $0x60] sm:$0x1]  ;;  %v1507_v45 = vrot.slane %v1229_v31, 3 }
 0x118   : > { %v1494_v34 = vsel %vm1477_vm4, %v1493_v15, %v1492_v30  ;;  %v1502_v40 = vsel %vm1468_vm1, %v1501_v29, %v1500_v36  ;;  %v1235_v42 = vld [vmem:[%s7078_s12 + $0x6c] sm:$0x1]  ;;  %v1230_v43 = vld [vmem:[%s7078_s12 + $0x58] sm:$0x1]  ;;  %v1513_v46 = vrot.slane %v1233_v37, 7  ;;  %v1515_v47 = vrot.slane %v1234_v38, 6 }
 0x119   : > { %v1496_v39 = vsel %vm1480_vm5, %v1495_v23, %v1494_v34  ;;  %v1504_v44 = vsel %vm1471_vm2, %v1503_v32, %v1502_v40  ;;  %v1236_v50 = vld [vmem:[%s7078_s12 + $0x70] sm:$0x1]  ;;  %v1517_v52 = vrot.slane %v1235_v42, 5  ;;  %v1241_v53 = vld [vmem:[%s7078_s12 + $0x84] sm:$0x1]  ;;  %v1509_v55 = vrot.slane %v1230_v43, 2 }
 0x11a   : > { %v1506_v48 = vsel %vm1474_vm3, %v1505_v33, %v1504_v44  ;;  %v1498_v49 = vsel %vm1483_vm6, %v1497_v35, %v1496_v39  ;;  %v1514_v51 = vsel %vm1465_vm0, %v1513_v46, %v1232_v41  ;;  %v1231_v54 = vld [vmem:[%s7078_s12 + $0x5c] sm:$0x1]  ;;  %v1242_v58 = vld [vmem:[%s7078_s12 + $0x88] sm:$0x1]  ;;  %v1527_v59 = vrot.slane %v1241_v53, 7 }
 0x11b   : > { %v1516_v56 = vsel %vm1468_vm1, %v1515_v47, %v1514_v51  ;;  %v1508_v57 = vsel %vm1477_vm4, %v1507_v45, %v1506_v48  ;;  %v1237_v60 = vld [vmem:[%s7078_s12 + $0x74] sm:$0x1]  ;;  %v1519_v61 = vrot.slane %v1236_v50, 4  ;;  %v1240_v62 = vld [vmem:[%s7078_s12 + $0x80] sm:$0x1]  ;;  %v1511_v63 = vrot.slane %v1231_v54, 1 }
 0x11c   : > { %v1518_v0 = vsel %vm1471_vm2, %v1517_v52, %v1516_v56  ;;  %v1510_v1 = vsel %vm1480_vm5, %v1509_v55, %v1508_v57  ;;  %v1243_v2 = vld [vmem:[%s7078_s12 + $0x8c] sm:$0x1]  ;;  %v1529_v3 = vrot.slane %v1242_v58, 6  ;;  %v1238_v4 = vld [vmem:[%s7078_s12 + $0x78] sm:$0x1]  ;;  %v1521_v5 = vrot.slane %v1237_v60, 3 }
 0x11d   : > { %v1528_v6 = vsel %vm1465_vm0, %v1527_v59, %v1240_v62  ;;  %v1520_v7 = vsel %vm1474_vm3, %v1519_v61, %v1518_v0  ;;  %v1249_v8 = vld [vmem:[%s7078_s12 + $0xa4] sm:$0x1]  ;;  %v1512_v9 = vsel %vm1483_vm6, %v1511_v63, %v1510_v1  ;;  %v1244_v10 = vld [vmem:[%s7078_s12 + $0x90] sm:$0x1]  ;;  %v1531_v11 = vrot.slane %v1243_v2, 5 }
 0x11e   : > { %v1239_v12 = vld [vmem:[%s7078_s12 + $0x7c] sm:$0x1]  ;;  %v1523_v13 = vrot.slane %v1238_v4, 2  ;;  %v1530_v14 = vsel %vm1468_vm1, %v1529_v3, %v1528_v6  ;;  %v1522_v15 = vsel %vm1477_vm4, %v1521_v5, %v1520_v7  ;;  %v1250_v16 = vld [vmem:[%s7078_s12 + $0xa8] sm:$0x1]  ;;  %v1541_v17 = vrot.slane %v1249_v8, 7 }
 0x11f   : > { %6061 = vmatmul.msk.f32.gmra.mxu0 %vm1759_vm7, %v1498_v49  ;;  %v1245_v18 = vld [vmem:[%s7078_s12 + $0x94] sm:$0x1]  ;;  %v1533_v19 = vrot.slane %v1244_v10, 4  ;;  %v1248_v20 = vld [vmem:[%s7078_s12 + $0xa0] sm:$0x1]  ;;  %v1525_v21 = vrot.slane %v1239_v12, 1  ;;  %v1532_v22 = vsel %vm1471_vm2, %v1531_v11, %v1530_v14 }
 0x120   : > { %v1524_v23 = vsel %vm1480_vm5, %v1523_v13, %v1522_v15  ;;  %v1251_v24 = vld [vmem:[%s7078_s12 + $0xac] sm:$0x1]  ;;  %v1543_v25 = vrot.slane %v1250_v16, 6  ;;  %v1246_v26 = vld [vmem:[%s7078_s12 + $0x98] sm:$0x1]  ;;  %v1535_v27 = vrot.slane %v1245_v18, 3  ;;  %v1542_v28 = vsel %vm1465_vm0, %v1541_v17, %v1248_v20 }
 0x121   : > { %v1534_v29 = vsel %vm1474_vm3, %v1533_v19, %v1532_v22  ;;  %v1257_v30 = vld [vmem:[%s7078_s12 + $0xc4] sm:$0x1]  ;;  %v1526_v31 = vsel %vm1483_vm6, %v1525_v21, %v1524_v23  ;;  %v1252_v32 = vld [vmem:[%s7078_s12 + $0xb0] sm:$0x1]  ;;  %v1545_v33 = vrot.slane %v1251_v24, 5  ;;  %v1537_v35 = vrot.slane %v1246_v26, 2 }
 0x122   : > { %v1247_v34 = vld [vmem:[%s7078_s12 + $0x9c] sm:$0x1]  ;;  %v1544_v36 = vsel %vm1468_vm1, %v1543_v25, %v1542_v28  ;;  %v1536_v37 = vsel %vm1477_vm4, %v1535_v27, %v1534_v29  ;;  %v1258_v38 = vld [vmem:[%s7078_s12 + $0xc8] sm:$0x1]  ;;  %v1555_v39 = vrot.slane %v1257_v30, 7  ;;  %v1547_v41 = vrot.slane %v1252_v32, 4 }
 0x123   : > { %v1253_v40 = vld [vmem:[%s7078_s12 + $0xb4] sm:$0x1]  ;;  %v1256_v42 = vld [vmem:[%s7078_s12 + $0xc0] sm:$0x1]  ;;  %v1539_v43 = vrot.slane %v1247_v34, 1  ;;  %v1546_v44 = vsel %vm1471_vm2, %v1545_v33, %v1544_v36  ;;  %v1538_v45 = vsel %vm1480_vm5, %v1537_v35, %v1536_v37  ;;  %v1557_v47 = vrot.slane %v1258_v38, 6 }
 0x124   : > { %v1259_v46 = vld [vmem:[%s7078_s12 + $0xcc] sm:$0x1]  ;;  %v1254_v48 = vld [vmem:[%s7078_s12 + $0xb8] sm:$0x1]  ;;  %v1549_v49 = vrot.slane %v1253_v40, 3  ;;  %v1556_v50 = vsel %vm1465_vm0, %v1555_v39, %v1256_v42  ;;  %v1548_v51 = vsel %vm1474_vm3, %v1547_v41, %v1546_v44 }
 0x125   : > { %v1265_v52 = vld [vmem:[%s7078_s12 + $0xe4] sm:$0x1]  ;;  %v1540_v53 = vsel %vm1483_vm6, %v1539_v43, %v1538_v45  ;;  %v1260_v54 = vld [vmem:[%s7078_s12 + $0xd0] sm:$0x1]  ;;  %v1559_v55 = vrot.slane %v1259_v46, 5  ;;  %v1551_v57 = vrot.slane %v1254_v48, 2  ;;  %v1558_v58 = vsel %vm1468_vm1, %v1557_v47, %v1556_v50 }
 0x126   : > { %v1255_v56 = vld [vmem:[%s7078_s12 + $0xbc] sm:$0x1]  ;;  %v1550_v59 = vsel %vm1477_vm4, %v1549_v49, %v1548_v51  ;;  %v1266_v60 = vld [vmem:[%s7078_s12 + $0xe8] sm:$0x1]  ;;  %v1569_v61 = vrot.slane %v1265_v52, 7  ;;  %v1561_v63 = vrot.slane %v1260_v54, 4 }
 0x127   : > { %6062 = vmatmul.msk.f32.gmra.mxu0 %vm1759_vm7, %v1512_v9  ;;  %v1261_v62 = vld [vmem:[%s7078_s12 + $0xd4] sm:$0x1]  ;;  %v1264_v0 = vld [vmem:[%s7078_s12 + $0xe0] sm:$0x1]  ;;  %v1553_v1 = vrot.slane %v1255_v56, 1  ;;  %v1560_v2 = vsel %vm1471_vm2, %v1559_v55, %v1558_v58  ;;  %v1552_v3 = vsel %vm1480_vm5, %v1551_v57, %v1550_v59  ;;  %v1571_v5 = vrot.slane %v1266_v60, 6 }
 0x128   : > { %v1267_v4 = vld [vmem:[%s7078_s12 + $0xec] sm:$0x1]  ;;  %v1262_v6 = vld [vmem:[%s7078_s12 + $0xd8] sm:$0x1]  ;;  %v1563_v7 = vrot.slane %v1261_v62, 3  ;;  %v1570_v8 = vsel %vm1465_vm0, %v1569_v61, %v1264_v0  ;;  %v1562_v9 = vsel %vm1474_vm3, %v1561_v63, %v1560_v2 }
 0x129   : > { %v1554_v10 = vsel %vm1483_vm6, %v1553_v1, %v1552_v3  ;;  %v1268_v11 = vld [vmem:[%s7078_s12 + $0xf0] sm:$0x1]  ;;  %v1573_v12 = vrot.slane %v1267_v4, 5  ;;  %v1263_v13 = vld [vmem:[%s7078_s12 + $0xdc] sm:$0x1]  ;;  %v1565_v14 = vrot.slane %v1262_v6, 2  ;;  %v1572_v15 = vsel %vm1468_vm1, %v1571_v5, %v1570_v8 }
 0x12a   : > { %v1564_v16 = vsel %vm1477_vm4, %v1563_v7, %v1562_v9  ;;  %v1269_v17 = vld [vmem:[%s7078_s12 + $0xf4] sm:$0x1]  ;;  %v1575_v18 = vrot.slane %v1268_v11, 4  ;;  %v1567_v19 = vrot.slane %v1263_v13, 1  ;;  %v1270_v22 = vld [vmem:[%s7078_s12 + $0xf8] sm:$0x1] }
 0x12b   : > { %v1574_v20 = vsel %vm1471_vm2, %v1573_v12, %v1572_v15  ;;  %v1566_v21 = vsel %vm1480_vm5, %v1565_v14, %v1564_v16  ;;  %v1577_v23 = vrot.slane %v1269_v17, 3  ;;  %v1271_v26 = vld [vmem:[%s7078_s12 + $0xfc] sm:$0x1]  ;;  %v1579_v27 = vrot.slane %v1270_v22, 2  ;;  %v2420_v32 = vld [vmem:[%s6959_s11 + $0xe5] sm:$0x1] }
 0x12c   : > { %v1576_v24 = vsel %vm1474_vm3, %v1575_v18, %v1574_v20  ;;  %v1568_v25 = vsel %vm1483_vm6, %v1567_v19, %v1566_v21  ;;  %v1581_v29 = vrot.slane %v1271_v26, 1  ;;  %v2421_v33 = vld [vmem:[%s6959_s11 + $0xe9] sm:$0x1]  ;;  %v2829_v34 = vrot.slane %v2420_v32, 7  ;;  %v2419_v35 = vld [vmem:[%s6959_s11 + $0xe1] sm:$0x1] }
 0x12d   : > { %v1578_v28 = vsel %vm1477_vm4, %v1577_v23, %v1576_v24  ;;  %v2422_v36 = vld [vmem:[%s6959_s11 + $0xed] sm:$0x1]  ;;  %v2831_v37 = vrot.slane %v2421_v33, 6  ;;  %v2423_v38 = vld [vmem:[%s6959_s11 + $0xf1] sm:$0x1] }
 0x12e   : > { %v1580_v30 = vsel %vm1480_vm5, %v1579_v27, %v1578_v28  ;;  %v2830_v39 = vsel %vm1465_vm0, %v2829_v34, %v2419_v35  ;;  %v2833_v40 = vrot.slane %v2422_v36, 5  ;;  %v2424_v41 = vld [vmem:[%s6959_s11 + $0xf5] sm:$0x1]  ;;  %v2835_v43 = vrot.slane %v2423_v38, 4  ;;  %v2412_v44 = vld [vmem:[%s6959_s11 + $0xc5] sm:$0x1] }
 0x12f   : > { %6063 = vmatmul.msk.f32.gmra.mxu0 %vm1759_vm7, %v1526_v31  ;;  %v1582_v31 = vsel %vm1483_vm6, %v1581_v29, %v1580_v30  ;;  %v2832_v42 = vsel %vm1468_vm1, %v2831_v37, %v2830_v39  ;;  %v2425_v45 = vld [vmem:[%s6959_s11 + $0xf9] sm:$0x1]  ;;  %v2837_v47 = vrot.slane %v2424_v41, 3  ;;  %v2413_v48 = vld [vmem:[%s6959_s11 + $0xc9] sm:$0x1]  ;;  %v2815_v49 = vrot.slane %v2412_v44, 7 }
 0x130   : > { %v2834_v46 = vsel %vm1471_vm2, %v2833_v40, %v2832_v42  ;;  %v2426_v50 = vld [vmem:[%s6959_s11 + $0xfd] sm:$0x1]  ;;  %v2839_v52 = vrot.slane %v2425_v45, 2  ;;  %v2817_v54 = vrot.slane %v2413_v48, 6  ;;  %v2414_v57 = vld [vmem:[%s6959_s11 + $0xcd] sm:$0x1] }
 0x131   : > { %v2836_v51 = vsel %vm1474_vm3, %v2835_v43, %v2834_v46  ;;  %v2841_v56 = vrot.slane %v2426_v50, 1  ;;  %v2415_v58 = vld [vmem:[%s6959_s11 + $0xd1] sm:$0x1]  ;;  %v2416_v61 = vld [vmem:[%s6959_s11 + $0xd5] sm:$0x1]  ;;  %v2819_v63 = vrot.slane %v2414_v57, 5 }
 0x132   : > { %v2838_v55 = vsel %vm1477_vm4, %v2837_v47, %v2836_v51  ;;  %v2821_v0 = vrot.slane %v2415_v58, 4  ;;  %v2404_v1 = vld [vmem:[%s6959_s11 + $0xa5] sm:$0x1]  ;;  %v2417_v3 = vld [vmem:[%s6959_s11 + $0xd9] sm:$0x1]  ;;  %v2823_v4 = vrot.slane %v2416_v61, 3 }
 0x133   : > { %v2840_v60 = vsel %vm1480_vm5, %v2839_v52, %v2838_v55  ;;  %v2405_v5 = vld [vmem:[%s6959_s11 + $0xa9] sm:$0x1]  ;;  %v2801_v6 = vrot.slane %v2404_v1, 7  ;;  %v2418_v7 = vld [vmem:[%s6959_s11 + $0xdd] sm:$0x1]  ;;  %v2825_v9 = vrot.slane %v2417_v3, 2 }
 0x134   : > { %v2842_v2 = vsel %vm1483_vm6, %v2841_v56, %v2840_v60  ;;  %v2803_v11 = vrot.slane %v2405_v5, 6  ;;  %v2827_v13 = vrot.slane %v2418_v7, 1  ;;  %v2406_v14 = vld [vmem:[%s6959_s11 + $0xad] sm:$0x1]  ;;  %v2407_v15 = vld [vmem:[%s6959_s11 + $0xb1] sm:$0x1] }
 0x135   : > { %6076 = vmatpush.xpose.msk.msra.mxu2 %vm1759_vm7, %v2842_v2  ;;  %v2408_v18 = vld [vmem:[%s6959_s11 + $0xb5] sm:$0x1]  ;;  %v2805_v20 = vrot.slane %v2406_v14, 5  ;;  %v2807_v21 = vrot.slane %v2407_v15, 4  ;;  %v2396_v22 = vld [vmem:[%s6959_s11 + $0x85] sm:$0x1] }
 0x136   : > { %v2409_v24 = vld [vmem:[%s6959_s11 + $0xb9] sm:$0x1]  ;;  %v2397_v26 = vld [vmem:[%s6959_s11 + $0x89] sm:$0x1]  ;;  %v2787_v27 = vrot.slane %v2396_v22, 7 }
 0x137   : > { %6064 = vmatmul.msk.f32.gmra.mxu0 %vm1759_vm7, %v1540_v53  ;;  %v2411_v53 = vld [vmem:[%s6959_s11 + $0xc1] sm:$0x1]  ;;  %v2410_v29 = vld [vmem:[%s6959_s11 + $0xbd] sm:$0x1]  ;;  %v2789_v33 = vrot.slane %v2397_v26, 6 }
 0x138   : > { %v2816_v59 = vsel %vm1465_vm0, %v2815_v49, %v2411_v53  ;;  %v2395_v32 = vld [vmem:[%s6959_s11 + $0x81] sm:$0x1]  ;;  %v2813_v35 = vrot.slane %v2410_v29, 1  ;;  %v2398_v36 = vld [vmem:[%s6959_s11 + $0x8d] sm:$0x1] }
 0x139   : > { %v2818_v62 = vsel %vm1468_vm1, %v2817_v54, %v2816_v59  ;;  %v2399_v37 = vld [vmem:[%s6959_s11 + $0x91] sm:$0x1]  ;;  %v2788_v38 = vsel %vm1465_vm0, %v2787_v27, %v2395_v32  ;;  %v2400_v40 = vld [vmem:[%s6959_s11 + $0x95] sm:$0x1]  ;;  %v2791_v42 = vrot.slane %v2398_v36, 5 }
 0x13a   : > { %v2820_v8 = vsel %vm1471_vm2, %v2819_v63, %v2818_v62  ;;  %v2790_v41 = vsel %vm1468_vm1, %v2789_v33, %v2788_v38  ;;  %v2793_v43 = vrot.slane %v2399_v37, 4  ;;  %v2388_v44 = vld [vmem:[%s6959_s11 + $0x65] sm:$0x1]  ;;  %v2401_v46 = vld [vmem:[%s6959_s11 + $0x99] sm:$0x1]  ;;  %v2795_v47 = vrot.slane %v2400_v40, 3 }
 0x13b   : > { %v2822_v12 = vsel %vm1474_vm3, %v2821_v0, %v2820_v8  ;;  %v2389_v48 = vld [vmem:[%s6959_s11 + $0x69] sm:$0x1]  ;;  %v2773_v49 = vrot.slane %v2388_v44, 7  ;;  %v2402_v51 = vld [vmem:[%s6959_s11 + $0x9d] sm:$0x1]  ;;  %v2792_v52 = vsel %vm1471_vm2, %v2791_v42, %v2790_v41  ;;  %v2797_v53 = vrot.slane %v2401_v46, 2 }
 0x13c   : > { %v2824_v17 = vsel %vm1477_vm4, %v2823_v4, %v2822_v12  ;;  %v2387_v54 = vld [vmem:[%s6959_s11 + $0x61] sm:$0x1]  ;;  %v2775_v55 = vrot.slane %v2389_v48, 6  ;;  %v2794_v56 = vsel %vm1474_vm3, %v2793_v43, %v2792_v52  ;;  %v2799_v57 = vrot.slane %v2402_v51, 1  ;;  %v2390_v58 = vld [vmem:[%s6959_s11 + $0x6d] sm:$0x1] }
 0x13d   : > { %v2826_v23 = vsel %vm1480_vm5, %v2825_v9, %v2824_v17  ;;  %v2391_v59 = vld [vmem:[%s6959_s11 + $0x71] sm:$0x1]  ;;  %v2774_v60 = vsel %vm1465_vm0, %v2773_v49, %v2387_v54  ;;  %v2796_v61 = vsel %vm1477_vm4, %v2795_v47, %v2794_v56  ;;  %v2392_v62 = vld [vmem:[%s6959_s11 + $0x75] sm:$0x1]  ;;  %v2777_v0 = vrot.slane %v2390_v58, 5 }
 0x13e   : > { %v2828_v28 = vsel %vm1483_vm6, %v2827_v13, %v2826_v23  ;;  %v2776_v63 = vsel %vm1468_vm1, %v2775_v55, %v2774_v60  ;;  %v2779_v1 = vrot.slane %v2391_v59, 4  ;;  %v2380_v2 = vld [vmem:[%s6959_s11 + $0x45] sm:$0x1]  ;;  %v2798_v3 = vsel %vm1480_vm5, %v2797_v53, %v2796_v61  ;;  %v2393_v4 = vld [vmem:[%s6959_s11 + $0x79] sm:$0x1] }
 0x13f   : > { %6065 = vmatmul.msk.f32.gmra.mxu0 %vm1759_vm7, %v1554_v10  ;;  %v2403_v10 = vld [vmem:[%s6959_s11 + $0xa1] sm:$0x1]  ;;  %6077 = vmatpush.xpose.msk.msra.mxu2 %vm1759_vm7, %v2828_v28  ;;  %v2781_v5 = vrot.slane %v2392_v62, 3  ;;  %v2759_v7 = vrot.slane %v2380_v2, 7  ;;  %v2800_v8 = vsel %vm1483_vm6, %v2799_v57, %v2798_v3  ;;  %v2394_v9 = vld [vmem:[%s6959_s11 + $0x7d] sm:$0x1] }
 0x140   : > { %v2802_v16 = vsel %vm1465_vm0, %v2801_v6, %v2403_v10  ;;  %v2381_v6 = vld [vmem:[%s6959_s11 + $0x49] sm:$0x1]  ;;  %v2778_v10 = vsel %vm1471_vm2, %v2777_v0, %v2776_v63  ;;  %v2379_v12 = vld [vmem:[%s6959_s11 + $0x41] sm:$0x1]  ;;  %v2785_v15 = vrot.slane %v2394_v9, 1 }
 0x141   : > { %v2804_v19 = vsel %vm1468_vm1, %v2803_v11, %v2802_v16  ;;  %v2783_v11 = vrot.slane %v2393_v4, 2  ;;  %v2761_v13 = vrot.slane %v2381_v6, 6  ;;  %v2780_v14 = vsel %vm1474_vm3, %v2779_v1, %v2778_v10  ;;  %v2382_v16 = vld [vmem:[%s6959_s11 + $0x4d] sm:$0x1]  ;;  %v2383_v17 = vld [vmem:[%s6959_s11 + $0x51] sm:$0x1] }
 0x142   : > { %v2806_v30 = vsel %vm1471_vm2, %v2805_v20, %v2804_v19  ;;  %v2782_v19 = vsel %vm1477_vm4, %v2781_v5, %v2780_v14  ;;  %v2384_v20 = vld [vmem:[%s6959_s11 + $0x55] sm:$0x1]  ;;  %v2763_v22 = vrot.slane %v2382_v16, 5  ;;  %v2765_v23 = vrot.slane %v2383_v17, 4  ;;  %v2385_v26 = vld [vmem:[%s6959_s11 + $0x59] sm:$0x1] }
 0x143   : > { %v2808_v34 = vsel %vm1474_vm3, %v2807_v21, %v2806_v30  ;;  %v2767_v27 = vrot.slane %v2384_v20, 3  ;;  %v2373_v28 = vld [vmem:[%s6959_s11 + $0x29] sm:$0x1]  ;;  %v2769_v33 = vrot.slane %v2385_v26, 2  ;;  %v2374_v38 = vld [vmem:[%s6959_s11 + $0x2d] sm:$0x1] }
 0x144   : > { %v2376_v43 = vld [vmem:[%s6959_s11 + $0x35] sm:$0x1]  ;;  %v2364_v47 = vld [vmem:[%s6959_s11 + $0x5] sm:$0x1]  ;;  %v2365_v52 = vld [vmem:[%s6959_s11 + $0x9] sm:$0x1] }
 0x145   : > { %v2753_v51 = vrot.slane %v2376_v43, 3  ;;  %v2378_v54 = vld [vmem:[%s6959_s11 + $0x3d] sm:$0x1]  ;;  %v2363_v57 = vld [vmem:[%s6959_s11 + $0x1] sm:$0x1]  ;;  %v2731_v58 = vrot.slane %v2364_v47, 7 }
 0x146   : > { %v2757_v60 = vrot.slane %v2378_v54, 1  ;;  %v2366_v61 = vld [vmem:[%s6959_s11 + $0xd] sm:$0x1]  ;;  %v2367_v62 = vld [vmem:[%s6959_s11 + $0x11] sm:$0x1]  ;;  %v2733_v63 = vrot.slane %v2365_v52, 6 }
 0x147   : > { %6066 = vmatmul.msk.f32.gmra.mxu0 %vm1759_vm7, %v1568_v25  ;;  %v2809_v25 = vrot.slane %v2408_v18, 3  ;;  %v2760_v18 = vsel %vm1465_vm0, %v2759_v7, %v2379_v12  ;;  %v2368_v1 = vld [vmem:[%s6959_s11 + $0x15] sm:$0x1]  ;;  %v2732_v2 = vsel %vm1465_vm0, %v2731_v58, %v2363_v57  ;;  %v2735_v3 = vrot.slane %v2366_v61, 5  ;;  %v2300_v5 = vld [vmem:[%s7078_s12 + $0x5] sm:$0x1] }
 0x148   : > { %v2762_v21 = vsel %vm1468_vm1, %v2761_v13, %v2760_v18  ;;  %v2737_v4 = vrot.slane %v2367_v62, 4  ;;  %v2369_v7 = vld [vmem:[%s6959_s11 + $0x19] sm:$0x1]  ;;  %v2739_v9 = vrot.slane %v2368_v1, 3  ;;  %v2299_v10 = vld [vmem:[%s7078_s12 + $0x1] sm:$0x1] }
 0x149   : > { %v2810_v39 = vsel %vm1477_vm4, %v2809_v25, %v2808_v34  ;;  %v2784_v25 = vsel %vm1480_vm5, %v2783_v11, %v2782_v19  ;;  %v2764_v32 = vsel %vm1471_vm2, %v2763_v22, %v2762_v21  ;;  %v2371_v34 = vld [vmem:[%s6959_s11 + $0x21] sm:$0x1]  ;;  %v2555_v11 = vrot.slane %v2300_v5, 7  ;;  %v2370_v13 = vld [vmem:[%s6959_s11 + $0x1d] sm:$0x1] }
 0x14a   : > { %v2786_v30 = vsel %vm1483_vm6, %v2785_v15, %v2784_v25  ;;  %v2766_v36 = vsel %vm1474_vm3, %v2765_v23, %v2764_v32  ;;  %v2741_v15 = vrot.slane %v2369_v7, 2  ;;  %v2301_v16 = vld [vmem:[%s7078_s12 + $0x9] sm:$0x1]  ;;  %v2743_v18 = vrot.slane %v2370_v13, 1  ;;  %v2302_v19 = vld [vmem:[%s7078_s12 + $0xd] sm:$0x1] }
 0x14b   : > { %v2768_v42 = vsel %vm1477_vm4, %v2767_v27, %v2766_v36  ;;  %v2303_v20 = vld [vmem:[%s7078_s12 + $0x11] sm:$0x1]  ;;  %v2556_v21 = vsel %vm1465_vm0, %v2555_v11, %v2299_v10  ;;  %v2557_v22 = vrot.slane %v2301_v16, 6  ;;  %v2304_v25 = vld [vmem:[%s7078_s12 + $0x15] sm:$0x1]  ;;  %v2559_v27 = vrot.slane %v2302_v19, 5 }
 0x14c   : > { %v2770_v49 = vsel %vm1480_vm5, %v2769_v33, %v2768_v42  ;;  %v2305_v26 = vld [vmem:[%s7078_s12 + $0x19] sm:$0x1]  ;;  %v2563_v33 = vrot.slane %v2304_v25, 3  ;;  %v2309_v42 = vld [vmem:[%s7078_s12 + $0x29] sm:$0x1] }
 0x14d   : > { %v2558_v32 = vsel %vm1468_vm1, %v2557_v22, %v2556_v21  ;;  %v2565_v36 = vrot.slane %v2305_v26, 2  ;;  %v2571_v47 = vrot.slane %v2309_v42, 6  ;;  %v2312_v52 = vld [vmem:[%s7078_s12 + $0x35] sm:$0x1]  ;;  %v2318_v7 = vld [vmem:[%s7078_s12 + $0x4d] sm:$0x1] }
 0x14e   : > { %v2577_v58 = vrot.slane %v2312_v52, 3  ;;  %v2587_v11 = vrot.slane %v2318_v7, 5  ;;  %v2321_v16 = vld [vmem:[%s7078_s12 + $0x59] sm:$0x1]  ;;  %v2330_v52 = vld [vmem:[%s7078_s12 + $0x7d] sm:$0x1] }
 0x14f   : > { %6067 = vmatmul.msk.f32.gmra.mxu0 %vm1759_vm7, %v1582_v31  ;;  %v2811_v31 = vrot.slane %v2409_v24, 2  ;;  %v2372_v24 = vld [vmem:[%s6959_s11 + $0x25] sm:$0x1]  ;;  %v2593_v22 = vrot.slane %v2321_v16, 2  ;;  %v2336_v7 = vld [vmem:[%s7078_s12 + $0x95] sm:$0x1] }
 0x150   : > { %v2745_v29 = vrot.slane %v2372_v24, 7 }
 0x151   : > { %v2812_v45 = vsel %vm1480_vm5, %v2811_v31, %v2810_v39  ;;  %v2386_v31 = vld [vmem:[%s6959_s11 + $0x5d] sm:$0x1]  ;;  %v2375_v39 = vld [vmem:[%s6959_s11 + $0x31] sm:$0x1] }
 0x152   : > { %v2814_v50 = vsel %vm1483_vm6, %v2813_v35, %v2812_v45  ;;  %v2747_v35 = vrot.slane %v2373_v28, 6  ;;  %v2771_v37 = vrot.slane %v2386_v31, 1  ;;  %v2746_v40 = vsel %vm1465_vm0, %v2745_v29, %v2371_v34  ;;  %v2306_v31 = vld [vmem:[%s7078_s12 + $0x1d] sm:$0x1] }
 0x153   : > { %6078 = vmatpush.xpose.msk.msra.mxu2 %vm1759_vm7, %v2814_v50  ;;  %v2749_v45 = vrot.slane %v2374_v38, 5  ;;  %v2751_v46 = vrot.slane %v2375_v39, 4  ;;  %v2377_v50 = vld [vmem:[%s6959_s11 + $0x39] sm:$0x1]  ;;  %v2561_v28 = vrot.slane %v2303_v20, 4 }
 0x154   : > { %v2748_v44 = vsel %vm1468_vm1, %v2747_v35, %v2746_v40  ;;  %v2772_v53 = vsel %vm1483_vm6, %v2771_v37, %v2770_v49  ;;  %v2755_v56 = vrot.slane %v2377_v50, 2  ;;  %v2560_v35 = vsel %vm1471_vm2, %v2559_v27, %v2558_v32  ;;  %v2308_v39 = vld [vmem:[%s7078_s12 + $0x25] sm:$0x1]  ;;  %v2311_v49 = vld [vmem:[%s7078_s12 + $0x31] sm:$0x1] }
 0x155   : > { %v2750_v55 = vsel %vm1471_vm2, %v2749_v45, %v2748_v44  ;;  %v2567_v37 = vrot.slane %v2306_v31, 1  ;;  %v2562_v38 = vsel %vm1474_vm3, %v2561_v28, %v2560_v35  ;;  %v2569_v43 = vrot.slane %v2308_v39, 7  ;;  %v2307_v45 = vld [vmem:[%s7078_s12 + $0x21] sm:$0x1]  ;;  %v2322_v20 = vld [vmem:[%s7078_s12 + $0x5d] sm:$0x1] }
 0x156   : > { %v2752_v59 = vsel %vm1474_vm3, %v2751_v46, %v2750_v55  ;;  %v2564_v40 = vsel %vm1477_vm4, %v2563_v33, %v2562_v38  ;;  %v2310_v46 = vld [vmem:[%s7078_s12 + $0x2d] sm:$0x1]  ;;  %v2575_v54 = vrot.slane %v2311_v49, 4  ;;  %v2595_v25 = vrot.slane %v2322_v20, 1  ;;  %v2323_v39 = vld [vmem:[%s7078_s12 + $0x61] sm:$0x1] }
 0x157   : > { %6079 = vmatpush.xpose.msk.msra.mxu2 %vm1759_vm7, %v2800_v8  ;;  %v2754_v0 = vsel %vm1477_vm4, %v2753_v51, %v2752_v59  ;;  %v2734_v8 = vsel %vm1468_vm1, %v2733_v63, %v2732_v2  ;;  %v2566_v44 = vsel %vm1480_vm5, %v2565_v36, %v2564_v40  ;;  %v2570_v50 = vsel %vm1465_vm0, %v2569_v43, %v2307_v45  ;;  %v2316_v2 = vld [vmem:[%s7078_s12 + $0x45] sm:$0x1]  ;;  %v2326_v40 = vld [vmem:[%s7078_s12 + $0x6d] sm:$0x1]  ;;  %v2327_v43 = vld [vmem:[%s7078_s12 + $0x71] sm:$0x1] }
 0x158   : > { %v2756_v6 = vsel %vm1480_vm5, %v2755_v56, %v2754_v0  ;;  %v2736_v14 = vsel %vm1471_vm2, %v2735_v3, %v2734_v8  ;;  %v2573_v51 = vrot.slane %v2310_v46, 5  ;;  %v2313_v56 = vld [vmem:[%s7078_s12 + $0x39] sm:$0x1]  ;;  %v2583_v5 = vrot.slane %v2316_v2, 7  ;;  %v2324_v36 = vld [vmem:[%s7078_s12 + $0x65] sm:$0x1] }
 0x159   : > { %v2758_v12 = vsel %vm1483_vm6, %v2757_v60, %v2756_v6  ;;  %v2738_v17 = vsel %vm1474_vm3, %v2737_v4, %v2736_v14  ;;  %v2314_v60 = vld [vmem:[%s7078_s12 + $0x3d] sm:$0x1]  ;;  %v2579_v62 = vrot.slane %v2313_v56, 2  ;;  %v2317_v4 = vld [vmem:[%s7078_s12 + $0x49] sm:$0x1]  ;;  %v2597_v38 = vrot.slane %v2324_v36, 7 }
 0x15a   : > { %v2740_v24 = vsel %vm1477_vm4, %v2739_v9, %v2738_v17  ;;  %v2581_v0 = vrot.slane %v2314_v60, 1  ;;  %v2315_v6 = vld [vmem:[%s7078_s12 + $0x41] sm:$0x1]  ;;  %v2585_v8 = vrot.slane %v2317_v4, 6  ;;  %v2319_v9 = vld [vmem:[%s7078_s12 + $0x51] sm:$0x1] }
 0x15b   : > { %6080 = vmatpush.xpose.msk.msra.mxu2 %vm1759_vm7, %v2786_v30  ;;  %v2742_v30 = vsel %vm1480_vm5, %v2741_v15, %v2740_v24  ;;  %v2584_v10 = vsel %vm1465_vm0, %v2583_v5, %v2315_v6  ;;  %v2589_v14 = vrot.slane %v2319_v9, 4  ;;  %v2601_v45 = vrot.slane %v2326_v40, 5  ;;  %v2328_v46 = vld [vmem:[%s7078_s12 + $0x75] sm:$0x1]  ;;  %v2329_v49 = vld [vmem:[%s7078_s12 + $0x79] sm:$0x1] }
 0x15c   : > { %v2744_v34 = vsel %vm1483_vm6, %v2743_v18, %v2742_v30  ;;  %v2586_v13 = vsel %vm1468_vm1, %v2585_v8, %v2584_v10  ;;  %v2335_v4 = vld [vmem:[%s7078_s12 + $0x91] sm:$0x1]  ;;  %v2340_v20 = vld [vmem:[%s7078_s12 + $0xa5] sm:$0x1] }
 0x15d   : > { %v2588_v17 = vsel %vm1471_vm2, %v2587_v11, %v2586_v13  ;;  %v2617_v9 = vrot.slane %v2335_v4, 4  ;;  %v2337_v11 = vld [vmem:[%s7078_s12 + $0x99] sm:$0x1]  ;;  %v2619_v13 = vrot.slane %v2336_v7, 3 }
 0x15e   : > { %v2590_v21 = vsel %vm1474_vm3, %v2589_v14, %v2588_v17  ;;  %v2338_v14 = vld [vmem:[%s7078_s12 + $0x9d] sm:$0x1]  ;;  %v2621_v16 = vrot.slane %v2337_v11, 2 }
 0x15f   : > { %6081 = vmatpush.xpose.msk.msra.mxu2 %vm1759_vm7, %v2772_v53  ;;  %v2572_v53 = vsel %vm1468_vm1, %v2571_v47, %v2570_v50 }
 0x160   : > { %v2574_v57 = vsel %vm1471_vm2, %v2573_v51, %v2572_v53  ;;  %v2605_v51 = vrot.slane %v2328_v46, 3  ;;  %v2346_v46 = vld [vmem:[%s7078_s12 + $0xbd] sm:$0x1] }
 0x161   : > { %v2576_v61 = vsel %vm1474_vm3, %v2575_v54, %v2574_v57  ;;  %v2607_v54 = vrot.slane %v2329_v49, 2  ;;  %v2609_v57 = vrot.slane %v2330_v52, 1  ;;  %v2348_v52 = vld [vmem:[%s7078_s12 + $0xc5] sm:$0x1] }
 0x162   : > { %v2578_v63 = vsel %vm1477_vm4, %v2577_v58, %v2576_v61  ;;  %v2333_v61 = vld [vmem:[%s7078_s12 + $0x89] sm:$0x1] }
 0x163   : > { %6082 = vmatpush.xpose.msk.msra.mxu2 %vm1759_vm7, %v2758_v12  ;;  %v2580_v1 = vsel %vm1480_vm5, %v2579_v62, %v2578_v63  ;;  %v2320_v12 = vld [vmem:[%s7078_s12 + $0x55] sm:$0x1]  ;;  %v2613_v2 = vrot.slane %v2333_v61, 6 }
 0x164   : > { %v2582_v3 = vsel %vm1483_vm6, %v2581_v0, %v2580_v1  ;;  %v2591_v18 = vrot.slane %v2320_v12, 3  ;;  %v2331_v0 = vld [vmem:[%s7078_s12 + $0x81] sm:$0x1]  ;;  %v2334_v1 = vld [vmem:[%s7078_s12 + $0x8d] sm:$0x1] }
 0x165   : > { %v2615_v6 = vrot.slane %v2334_v1, 5  ;;  %v2352_v1 = vld [vmem:[%s7078_s12 + $0xd5] sm:$0x1] }
 0x166   : > { %v2592_v24 = vsel %vm1477_vm4, %v2591_v18, %v2590_v21  ;;  %v2623_v18 = vrot.slane %v2338_v14, 1 }
 0x167   : > { %6083 = vmatpush.xpose.msk.msra.mxu2 %vm1759_vm7, %v2744_v34  ;;  %v2594_v26 = vsel %vm1480_vm5, %v2593_v22, %v2592_v24  ;;  %v2341_v22 = vld [vmem:[%s7078_s12 + $0xa9] sm:$0x1]  ;;  %v2625_v24 = vrot.slane %v2340_v20, 7  ;;  %v2355_v20 = vld [vmem:[%s7078_s12 + $0xe1] sm:$0x1] }
 0x168   : > { %v2596_v27 = vsel %vm1483_vm6, %v2595_v25, %v2594_v26  ;;  %v2339_v26 = vld [vmem:[%s7078_s12 + $0xa1] sm:$0x1] }
 0x194   : > { %v7318_v41 = vpop.f32.mrf.mxu0 }
 0x195   : > { %v1834_v48 = vsel %vm1199_vm8, %v7318_v41, -inf }
 0x196   : > { %1835 = vmax.xlane.f32.xlu0 %v1834_v48  ;;  %v2568_v48 = vsel %vm1483_vm6, %v2567_v37, %v2566_v44  ;;  %v2325_v37 = vld [vmem:[%s7078_s12 + $0x69] sm:$0x1]  ;;  %v2598_v44 = vsel %vm1465_vm0, %v2597_v38, %v2323_v39 }
 0x197   : > { %6084 = vmatmul.msk.f32.vlgmr.msra.gmra.mxu2 %vm1759_vm7, %v2568_v48  ;;  %v2599_v42 = vrot.slane %v2325_v37, 6  ;;  %v2603_v48 = vrot.slane %v2327_v43, 4  ;;  %v2344_v37 = vld [vmem:[%s7078_s12 + $0xb5] sm:$0x1]  ;;  %v2345_v43 = vld [vmem:[%s7078_s12 + $0xb9] sm:$0x1] }
 0x199   : > { %v2600_v47 = vsel %vm1468_vm1, %v2599_v42, %v2598_v44 }
 0x19a   : > { %v2602_v50 = vsel %vm1471_vm2, %v2601_v45, %v2600_v47  ;;  %v2633_v45 = vrot.slane %v2344_v37, 3  ;;  %v2361_v37 = vld [vmem:[%s7078_s12 + $0xf9] sm:$0x1] }
 0x19b   : > { %v2604_v53 = vsel %vm1474_vm3, %v2603_v48, %v2602_v50  ;;  %v2635_v48 = vrot.slane %v2345_v43, 2  ;;  %v2637_v50 = vrot.slane %v2346_v46, 1  ;;  %v2362_v43 = vld [vmem:[%s7078_s12 + $0xfd] sm:$0x1] }
 0x19c   : > { %v7354_v23 = vpop.f32.mrf.mxu0  ;;  %v2606_v56 = vsel %vm1477_vm4, %v2605_v51, %v2604_v53 }
 0x19d   : > { %v1837_v29 = vsel %vm1199_vm8, %v7354_v23, -inf  ;;  %v2608_v58 = vsel %vm1480_vm5, %v2607_v54, %v2606_v56  ;;  %v2349_v54 = vld [vmem:[%s7078_s12 + $0xc9] sm:$0x1]  ;;  %v2639_v56 = vrot.slane %v2348_v52, 7 }
 0x19e   : > { %1838 = vmax.xlane.f32.xlu0 %v1837_v29  ;;  %v2610_v60 = vsel %vm1483_vm6, %v2609_v57, %v2608_v58  ;;  %v2347_v58 = vld [vmem:[%s7078_s12 + $0xc1] sm:$0x1] }
 0x19f   : > { %6085 = vmatmul.msk.f32.gmra.mxu2 %vm1759_vm7, %v2582_v3 }
 0x1a4   : > { %v7380_v55 = vpop.f32.mrf.mxu0 }
 0x1a5   : > { %v1840_v59 = vsel %vm1199_vm8, %v7380_v55, -inf }
 0x1a6   : > { %1841 = vmax.xlane.f32.xlu1 %v1840_v59  ;;  %v2332_v59 = vld [vmem:[%s7078_s12 + $0x85] sm:$0x1] }
 0x1a7   : > { %6086 = vmatmul.msk.f32.gmra.mxu2 %vm1759_vm7, %v2596_v27  ;;  %v2611_v62 = vrot.slane %v2332_v59, 7  ;;  %v2342_v27 = vld [vmem:[%s7078_s12 + $0xad] sm:$0x1] }
 0x1a8   : > { %v2629_v36 = vrot.slane %v2342_v27, 5  ;;  %v2350_v59 = vld [vmem:[%s7078_s12 + $0xcd] sm:$0x1] }
 0x1a9   : > { %v2612_v5 = vsel %vm1465_vm0, %v2611_v62, %v2331_v0  ;;  %v2351_v62 = vld [vmem:[%s7078_s12 + $0xd1] sm:$0x1]  ;;  %v2643_v0 = vrot.slane %v2350_v59, 5 }
 0x1aa   : > { %v2614_v8 = vsel %vm1468_vm1, %v2613_v2, %v2612_v5 }
 0x1ab   : > { %v2616_v12 = vsel %vm1471_vm2, %v2615_v6, %v2614_v8  ;;  %v2353_v6 = vld [vmem:[%s7078_s12 + $0xd9] sm:$0x1]  ;;  %v2647_v8 = vrot.slane %v2352_v1, 3 }
 0x1ac   : > { %v7400_v15 = vpop.f32.mrf.mxu0  ;;  %v2649_v11 = vrot.slane %v2353_v6, 2 }
 0x1ad   : > { %v1843_v19 = vsel %vm1199_vm8, %v7400_v15, -inf }
 0x1ae   : > { %1844 = vmax.xlane.f32.xlu1 %v1843_v19 }
 0x1af   : > { %6087 = vmatmul.msk.f32.gmra.mxu2 %vm1759_vm7, %v2610_v60  ;;  %v2641_v60 = vrot.slane %v2349_v54, 6 }
 0x1b4   : > { %v7412_v28 = vpop.f32.mrf.mxu0 }
 0x1b5   : > { %v1846_v29 = vsel %vm1199_vm8, %v7412_v28, -inf }
 0x1b6   : > { %1847 = vmax.xlane.f32.xlu2 %v1846_v29  ;;  %v2627_v29 = vrot.slane %v2341_v22, 6 }
 0x1bc   : > { %v7416_v30 = vpop.f32.mrf.mxu0 }
 0x1bd   : > { %v1849_v31 = vsel %vm1199_vm8, %v7416_v30, -inf }
 0x1be   : > { %1850 = vmax.xlane.f32.xlu2 %v1849_v31 }
 0x1c4   : > { %v7420_v32 = vpop.f32.mrf.mxu0 }
 0x1c5   : > { %v1852_v33 = vsel %vm1199_vm8, %v7420_v32, -inf }
 0x1c6   : > { %1853 = vmax.xlane.f32.xlu0 %v1852_v33  ;;  %v2343_v33 = vld [vmem:[%s7078_s12 + $0xb1] sm:$0x1] }
 0x1c7   : > { %v2631_v39 = vrot.slane %v2343_v33, 4 }
 0x1cc   : > { %v7424_v34 = vpop.f32.mrf.mxu0 }
 0x1cd   : > { %v1855_v35 = vsel %vm1199_vm8, %v7424_v34, -inf }
 0x1ce   : > { %1856 = vmax.xlane.f32.xlu2 %v1855_v35  ;;  %v2626_v35 = vsel %vm1465_vm0, %v2625_v24, %v2339_v26 }
 0x1cf   : > { %v2628_v38 = vsel %vm1468_vm1, %v2627_v29, %v2626_v35  ;;  %v2360_v29 = vld [vmem:[%s7078_s12 + $0xf5] sm:$0x1] }
 0x1d0   : > { %v2630_v44 = vsel %vm1471_vm2, %v2629_v36, %v2628_v38 }
 0x1d1   : > { %v2632_v47 = vsel %vm1474_vm3, %v2631_v39, %v2630_v44  ;;  %v2661_v39 = vrot.slane %v2360_v29, 3  ;;  %v2663_v44 = vrot.slane %v2361_v37, 2  ;;  %v1386_v29 = vld [vmem:[%s7561_s13 + $0xc8] sm:$0x1]  ;;  %v1387_v37 = vld [vmem:[%s7561_s13 + $0xcc] sm:$0x1] }
 0x1d2   : > { %v2634_v49 = vsel %vm1477_vm4, %v2633_v45, %v2632_v47 }
 0x1d3   : > { %v2636_v51 = vsel %vm1480_vm5, %v2635_v48, %v2634_v49 }
 0x1d4   : > { %v2638_v53 = vsel %vm1483_vm6, %v2637_v50, %v2636_v51 }
 0x209   : > { %v1836_v63 = vpop.xlane.xlu0 %1835 }
 0x20a   : > { %v1858_v3 = vsub.f32 %v7318_v41, %v1836_v63  ;;  %v2618_v41 = vsel %vm1474_vm3, %v2617_v9, %v2616_v12  ;;  %v2640_v63 = vsel %vm1465_vm0, %v2639_v56, %v2347_v58  ;;  %v2354_v9 = vld [vmem:[%s7078_s12 + $0xdd] sm:$0x1] }
 0x20b   : > { %v2620_v17 = vsel %vm1477_vm4, %v2619_v13, %v2618_v41  ;;  %v2642_v2 = vsel %vm1468_vm1, %v2641_v60, %v2640_v63  ;;  %v2651_v13 = vrot.slane %v2354_v9, 1  ;;  %v2356_v41 = vld [vmem:[%s7078_s12 + $0xe5] sm:$0x1]  ;;  %v1393_v9 = vld [vmem:[%s7561_s13 + $0xe4] sm:$0x1] }
 0x20c   : > { %v1866_v10 = vmul.f32 1.442695, %v1858_v3  ;;  %v2622_v19 = vsel %vm1480_vm5, %v2621_v16, %v2620_v17  ;;  %v2645_v3 = vrot.slane %v2351_v62, 4  ;;  %v2644_v7 = vsel %vm1471_vm2, %v2643_v0, %v2642_v2  ;;  %v2357_v17 = vld [vmem:[%s7078_s12 + $0xe9] sm:$0x1] }
 0x20d   : > { %v2624_v21 = vsel %vm1483_vm6, %v2623_v18, %v2622_v19  ;;  %v2653_v18 = vrot.slane %v2356_v41, 7  ;;  %v2655_v22 = vrot.slane %v2357_v17, 6  ;;  %v1396_v41 = vld [vmem:[%s7561_s13 + $0xf0] sm:$0x1] }
 0x20e   : > { %6233 = vpow2.f32 %v1866_v10  ;;  %6088 = vmatmul.msk.f32.gmra.mxu2 %vm1759_vm7, %v2624_v21  ;;  %v2646_v10 = vsel %vm1474_vm3, %v2645_v3, %v2644_v7  ;;  %v2358_v21 = vld [vmem:[%s7078_s12 + $0xed] sm:$0x1] }
 0x20f   : > { %v2648_v12 = vsel %vm1477_vm4, %v2647_v8, %v2646_v10  ;;  %v2654_v26 = vsel %vm1465_vm0, %v2653_v18, %v2355_v20  ;;  %v2657_v27 = vrot.slane %v2358_v21, 5  ;;  %v1394_v10 = vld [vmem:[%s7561_s13 + $0xe8] sm:$0x1]  ;;  %v1385_v18 = vld [vmem:[%s7561_s13 + $0xc4] sm:$0x1]  ;;  %v2218_v21 = vrot.slane %v1396_v41, 4 }
 0x210   : > { %v2650_v14 = vsel %vm1480_vm5, %v2649_v11, %v2648_v12  ;;  %v2212_v11 = vrot.slane %v1393_v9, 7  ;;  %v1392_v12 = vld [vmem:[%s7561_s13 + $0xe0] sm:$0x1]  ;;  %v1369_v41 = vld [vmem:[%s7561_s13 + $0x84] sm:$0x1] }
 0x211   : > { %v1839_v25 = vpop.xlane.xlu0 %1838  ;;  %v2652_v16 = vsel %vm1483_vm6, %v2651_v13, %v2650_v14  ;;  %v1395_v13 = vld [vmem:[%s7561_s13 + $0xec] sm:$0x1]  ;;  %v2214_v14 = vrot.slane %v1394_v10, 6  ;;  %v1368_v10 = vld [vmem:[%s7561_s13 + $0x80] sm:$0x1] }
 0x212   : > { %v1859_v31 = vsub.f32 %v7354_v23, %v1839_v25  ;;  %v2359_v25 = vld [vmem:[%s7078_s12 + $0xf1] sm:$0x1]  ;;  %v2216_v17 = vrot.slane %v1395_v13, 5 }
 0x213   : > { %v2659_v33 = vrot.slane %v2359_v25, 4  ;;  %v1398_v25 = vld [vmem:[%s7561_s13 + $0xf8] sm:$0x1] }
 0x214   : > { %v7470_v40 = vpop.eup %6233  ;;  %v1868_v42 = vmul.f32 1.442695, %v1859_v31  ;;  %v2656_v31 = vsel %vm1468_vm1, %v2655_v22, %v2654_v26  ;;  %v1384_v22 = vld [vmem:[%s7561_s13 + $0xc0] sm:$0x1] }
 0x215   : > { %v1882_v23 = vsel %vm1199_vm8, %v7470_v40, 0.0  ;;  %v2658_v38 = vsel %vm1471_vm2, %v2657_v27, %v2656_v31  ;;  %v1399_v31 = vld [vmem:[%s7561_s13 + $0xfc] sm:$0x1] }
 0x216   : > { %6235 = vpow2.f32 %v1868_v42  ;;  %1883 = vadd.xlane.f32.xlu1 %v1882_v23  ;;  %6089 = vmatmul.msk.f32.gmra.mxu2 %vm1759_vm7, %v2638_v53  ;;  %v2665_v23 = vrot.slane %v2362_v43, 1  ;;  %v2224_v43 = vrot.slane %v1399_v31, 1 }
 0x219   : > { %v1842_v57 = vpop.xlane.xlu1 %1841 }
 0x21a   : > { %v1860_v61 = vsub.f32 %v7380_v55, %v1842_v57  ;;  %v7537_v62 = vpop.f32.mrf.mxu2 }
 0x21b   : > { %v2916_v1 = vsel %vm1199_vm8, %v7537_v62, -inf }
 0x21c   : > { %v7491_v4 = vpop.eup %6235  ;;  %v1870_v5 = vmul.f32 1.442695, %v1860_v61 }
 0x21d   : > { %v1885_v55 = vsel %vm1199_vm8, %v7491_v4, 0.0 }
 0x21e   : > { %6237 = vpow2.f32 %v1870_v5  ;;  %1886 = vadd.xlane.f32.xlu0 %v1885_v55  ;;  %6090 = vmatmul.msk.f32.gmra.mxu2 %vm1759_vm7, %v2652_v16  ;;  %v2213_v16 = vsel %vm1465_vm0, %v2212_v11, %v1392_v12 }
 0x21f   : > { %v2215_v20 = vsel %vm1468_vm1, %v2214_v14, %v2213_v16 }
 0x220   : > { %v2217_v26 = vsel %vm1471_vm2, %v2216_v17, %v2215_v20  ;;  %v2170_v20 = vrot.slane %v1369_v41, 7  ;;  %v1358_v41 = vld [vmem:[%s7561_s13 + $0x58] sm:$0x1] }
 0x221   : > { %v1845_v19 = vpop.xlane.xlu1 %1844 }
 0x222   : > { %v1861_v24 = vsub.f32 %v7400_v15, %v1845_v19  ;;  %v2660_v15 = vsel %vm1474_vm3, %v2659_v33, %v2658_v38  ;;  %v7548_v5 = vpop.f32.mrf.mxu2  ;;  %v1397_v19 = vld [vmem:[%s7561_s13 + $0xf4] sm:$0x1]  ;;  %v2219_v33 = vsel %vm1474_vm3, %v2218_v21, %v2217_v26 }
 0x223   : > { %v2662_v45 = vsel %vm1477_vm4, %v2661_v39, %v2660_v15  ;;  %v2919_v6 = vsel %vm1199_vm8, %v7548_v5, -inf  ;;  %v2220_v27 = vrot.slane %v1397_v19, 3  ;;  %v2200_v39 = vrot.slane %v1386_v29, 6  ;;  %v1388_v15 = vld [vmem:[%s7561_s13 + $0xd0] sm:$0x1] }
 0x224   : > { %v7512_v35 = vpop.eup %6237  ;;  %v1872_v36 = vmul.f32 1.442695, %v1861_v24  ;;  %v2664_v46 = vsel %vm1480_vm5, %v2663_v44, %v2662_v45  ;;  %v2198_v24 = vrot.slane %v1385_v18, 7  ;;  %v1389_v44 = vld [vmem:[%s7561_s13 + $0xd4] sm:$0x1]  ;;  %v2202_v45 = vrot.slane %v1387_v37, 5 }
 0x225   : > { %v1888_v42 = vsel %vm1199_vm8, %v7512_v35, 0.0  ;;  %v2666_v47 = vsel %vm1483_vm6, %v2665_v23, %v2664_v46  ;;  %v1390_v46 = vld [vmem:[%s7561_s13 + $0xd8] sm:$0x1]  ;;  %v1370_v18 = vld [vmem:[%s7561_s13 + $0x88] sm:$0x1]  ;;  %v2171_v29 = vsel %vm1465_vm0, %v2170_v20, %v1368_v10 }
 0x226   : > { %6239 = vpow2.f32 %v1872_v36  ;;  %1889 = vadd.xlane.f32.xlu1 %v1888_v42  ;;  %6091 = vmatmul.msk.f32.gmra.mxu2 %vm1759_vm7, %v2666_v47  ;;  %v2222_v36 = vrot.slane %v1398_v25, 2  ;;  %v2199_v38 = vsel %vm1465_vm0, %v2198_v24, %v1384_v22  ;;  %v2221_v42 = vsel %vm1477_vm4, %v2220_v27, %v2219_v33  ;;  %v1391_v47 = vld [vmem:[%s7561_s13 + $0xdc] sm:$0x1]  ;;  %v1371_v19 = vld [vmem:[%s7561_s13 + $0x8c] sm:$0x1] }
 0x227   : > { %v1372_v22 = vld [vmem:[%s7561_s13 + $0x90] sm:$0x1]  ;;  %v1373_v24 = vld [vmem:[%s7561_s13 + $0x94] sm:$0x1]  ;;  %v1374_v25 = vld [vmem:[%s7561_s13 + $0x98] sm:$0x1] }
 0x228   : > { %v2223_v23 = vsel %vm1480_vm5, %v2222_v36, %v2221_v42  ;;  %v1375_v27 = vld [vmem:[%s7561_s13 + $0x9c] sm:$0x1]  ;;  %v2172_v31 = vrot.slane %v1370_v18, 6  ;;  %v2174_v33 = vrot.slane %v1371_v19, 5  ;;  %v1360_v36 = vld [vmem:[%s7561_s13 + $0x60] sm:$0x1] }
 0x229   : > { %v1848_v48 = vpop.xlane.xlu2 %1847  ;;  %v2180_v42 = vrot.slane %v1374_v25, 2  ;;  %v1355_v10 = vld [vmem:[%s7561_s13 + $0x4c] sm:$0x1]  ;;  %v2152_v25 = vrot.slane %v1358_v41, 2 }
 0x22a   : > { %v1862_v49 = vsub.f32 %v7412_v28, %v1848_v48  ;;  %v7556_v8 = vpop.f32.mrf.mxu2  ;;  %v2201_v48 = vsel %vm1468_vm1, %v2200_v39, %v2199_v38  ;;  %v2176_v38 = vrot.slane %v1372_v22, 4  ;;  %v2178_v39 = vrot.slane %v1373_v24, 3 }
 0x22b   : > { %v2922_v55 = vsel %vm1199_vm8, %v7556_v8, -inf  ;;  %v2146_v20 = vrot.slane %v1355_v10, 5 }
 0x22c   : > { %v7525_v50 = vpop.eup %6239  ;;  %v1874_v51 = vmul.f32 1.442695, %v1862_v49  ;;  %v2204_v49 = vrot.slane %v1388_v15, 4 }
 0x22d   : > { %v1891_v52 = vsel %vm1199_vm8, %v7525_v50, 0.0 }
 0x22e   : > { %6241 = vpow2.f32 %v1874_v51  ;;  %1892 = vadd.xlane.f32.xlu2 %v1891_v52  ;;  %v2206_v51 = vrot.slane %v1389_v44, 3  ;;  %v2225_v52 = vsel %vm1483_vm6, %v2224_v43, %v2223_v23  ;;  %v1361_v43 = vld [vmem:[%s7561_s13 + $0x64] sm:$0x1]  ;;  %v2173_v44 = vsel %vm1468_vm1, %v2172_v31, %v2171_v29  ;;  %v1362_v23 = vld [vmem:[%s7561_s13 + $0x68] sm:$0x1] }
 0x22f   : > { %2266 = vmatpush.msra.mxu1 %v2225_v52  ;;  %v1365_v52 = vld [vmem:[%s7561_s13 + $0x74] sm:$0x1] }
 0x231   : > { %v1851_v53 = vpop.xlane.xlu2 %1850 }
 0x232   : > { %v1863_v54 = vsub.f32 %v7416_v30, %v1851_v53  ;;  %v2203_v53 = vsel %vm1471_vm2, %v2202_v45, %v2201_v48  ;;  %v2182_v45 = vrot.slane %v1375_v27, 1 }
 0x234   : > { %v7530_v56 = vpop.eup %6241  ;;  %v1876_v57 = vmul.f32 1.442695, %v1863_v54  ;;  %v2208_v54 = vrot.slane %v1390_v46, 2  ;;  %v1363_v46 = vld [vmem:[%s7561_s13 + $0x6c] sm:$0x1] }
 0x235   : > { %v1894_v58 = vsel %vm1199_vm8, %v7530_v56, 0.0 }
 0x236   : > { %6243 = vpow2.f32 %v1876_v57  ;;  %1895 = vadd.xlane.f32.xlu0 %v1894_v58  ;;  %v2210_v57 = vrot.slane %v1391_v47, 1  ;;  %v1376_v58 = vld [vmem:[%s7561_s13 + $0xa0] sm:$0x1]  ;;  %v2156_v47 = vrot.slane %v1361_v43, 7  ;;  %v1349_v43 = vld [vmem:[%s7561_s13 + $0x34] sm:$0x1] }
 0x239   : > { %v1854_v28 = vpop.xlane.xlu0 %1853 }
 0x23a   : > { %v1864_v59 = vsub.f32 %v7420_v32, %v1854_v28  ;;  %v1377_v28 = vld [vmem:[%s7561_s13 + $0xa4] sm:$0x1] }
 0x23c   : > { %v7535_v60 = vpop.eup %6243  ;;  %v1878_v61 = vmul.f32 1.442695, %v1864_v59  ;;  %v2205_v59 = vsel %vm1474_vm3, %v2204_v49, %v2203_v53  ;;  %v2175_v49 = vsel %vm1471_vm2, %v2174_v33, %v2173_v44  ;;  %v1366_v53 = vld [vmem:[%s7561_s13 + $0x78] sm:$0x1]  ;;  %v1345_v33 = vld [vmem:[%s7561_s13 + $0x24] sm:$0x1] }
 0x23d   : > { %v1897_v63 = vsel %vm1199_vm8, %v7535_v60, 0.0  ;;  %v1350_v44 = vld [vmem:[%s7561_s13 + $0x38] sm:$0x1] }
 0x23e   : > { %6245 = vpow2.f32 %v1878_v61  ;;  %1898 = vadd.xlane.f32.xlu1 %v1897_v63  ;;  %v1378_v61 = vld [vmem:[%s7561_s13 + $0xa8] sm:$0x1]  ;;  %v1379_v63 = vld [vmem:[%s7561_s13 + $0xac] sm:$0x1] }
 0x23f   : > { %v2188_v9 = vrot.slane %v1379_v63, 5  ;;  %v2160_v63 = vrot.slane %v1363_v46, 5 }
 0x241   : > { %v1857_v30 = vpop.xlane.xlu2 %1856 }
 0x242   : > { %v1865_v0 = vsub.f32 %v7424_v34, %v1857_v30  ;;  %v1380_v30 = vld [vmem:[%s7561_s13 + $0xb0] sm:$0x1] }
 0x243   : > { %v2190_v12 = vrot.slane %v1380_v30, 4 }
 0x244   : > { %v7544_v2 = vpop.eup %6245  ;;  %v1880_v32 = vmul.f32 1.442695, %v1865_v0  ;;  %v2207_v0 = vsel %vm1477_vm4, %v2206_v51, %v2205_v59  ;;  %v1364_v51 = vld [vmem:[%s7561_s13 + $0x70] sm:$0x1]  ;;  %v2158_v59 = vrot.slane %v1362_v23, 6  ;;  %v2128_v23 = vrot.slane %v1345_v33, 7 }
 0x245   : > { %v1900_v3 = vsel %vm1199_vm8, %v7544_v2, 0.0  ;;  %v2162_v30 = vrot.slane %v1364_v51, 4  ;;  %v2136_v51 = vrot.slane %v1349_v43, 3  ;;  %v3507_v43 = vld [vmem:[%s6959_s11 + $0xfa] sm:$0x1] }
 0x246   : > { %6247 = vpow2.f32 %v1880_v32  ;;  %2917 = vmax.xlane.f32.xlu1 %v2916_v1  ;;  %1901 = vadd.xlane.f32.xlu2 %v1900_v3  ;;  %v1381_v1 = vld [vmem:[%s7561_s13 + $0xb4] sm:$0x1]  ;;  %v1382_v32 = vld [vmem:[%s7561_s13 + $0xb8] sm:$0x1]  ;;  %v1383_v3 = vld [vmem:[%s7561_s13 + $0xbc] sm:$0x1] }
 0x247   : > { %v2192_v13 = vrot.slane %v1381_v1, 3  ;;  %v2194_v14 = vrot.slane %v1382_v32, 2  ;;  %v2196_v17 = vrot.slane %v1383_v3, 1  ;;  %v1352_v1 = vld [vmem:[%s7561_s13 + $0x40] sm:$0x1] }
 0x248   : > { %v1353_v32 = vld [vmem:[%s7561_s13 + $0x44] sm:$0x1] }
 0x249   : > { %v2142_v18 = vrot.slane %v1353_v32, 7  ;;  %v1341_v32 = vld [vmem:[%s7561_s13 + $0x14] sm:$0x1] }
 0x24b   : > { %v2143_v29 = vsel %vm1465_vm0, %v2142_v18, %v1352_v1  ;;  %v1340_v1 = vld [vmem:[%s7561_s13 + $0x10] sm:$0x1]  ;;  %v3502_v18 = vld [vmem:[%s6959_s11 + $0xe6] sm:$0x1] }
 0x24c   : > { %v7552_v7 = vpop.eup %6247 }
 0x24d   : > { %v1903_v34 = vsel %vm1199_vm8, %v7552_v7, 0.0 }
 0x24e   : > { %2920 = vmax.xlane.f32.xlu2 %v2919_v6  ;;  %1904 = vadd.xlane.f32.xlu0 %v1903_v34  ;;  %v2209_v6 = vsel %vm1480_vm5, %v2208_v54, %v2207_v0  ;;  %v2184_v34 = vrot.slane %v1377_v28, 7  ;;  %v2157_v28 = vsel %vm1465_vm0, %v2156_v47, %v1360_v36  ;;  %v2164_v0 = vrot.slane %v1365_v52, 3  ;;  %v1346_v36 = vld [vmem:[%s7561_s13 + $0x28] sm:$0x1]  ;;  %v1336_v52 = vld [vmem:[%s7561_s13] sm:$0x1] }
 0x24f   : > { %v2211_v11 = vsel %vm1483_vm6, %v2210_v57, %v2209_v6  ;;  %v2177_v57 = vsel %vm1474_vm3, %v2176_v38, %v2175_v49  ;;  %v2159_v6 = vsel %vm1468_vm1, %v2158_v59, %v2157_v28  ;;  %v2130_v46 = vrot.slane %v1346_v36, 6  ;;  %v1337_v59 = vld [vmem:[%s7561_s13 + $0x4] sm:$0x1]  ;;  %v3505_v36 = vld [vmem:[%s6959_s11 + $0xf2] sm:$0x1] }
 0x250   : > { %2267 = vmatpush.msra.mxu1 %v2211_v11  ;;  %v2185_v16 = vsel %vm1465_vm0, %v2184_v34, %v1376_v58  ;;  %v1367_v58 = vld [vmem:[%s7561_s13 + $0x7c] sm:$0x1]  ;;  %v2166_v34 = vrot.slane %v1366_v53, 2  ;;  %v6441_v53 = vmov 0.0  }
 0x251   : > { %1200 = vst.msk [vmem:[%s7662_s21] sm:$0xff] %vm1199_vm8, %v6441_v53 }
 0x252   : > { %1201 = vst.msk [vmem:[%s7662_s21 + $0x8] sm:$0xff] %vm1199_vm8, %v6441_v53 }
 0x253   : > { %1202 = vst.msk [vmem:[%s7662_s21 + $0x10] sm:$0xff] %vm1199_vm8, %v6441_v53 }
 0x254   : > { %1203 = vst.msk [vmem:[%s7662_s21 + $0x18] sm:$0xff] %vm1199_vm8, %v6441_v53 }
 0x255   : > { %1204 = vst.msk [vmem:[%s7662_s21 + $0x20] sm:$0xff] %vm1199_vm8, %v6441_v53 }
 0x256   : > { %2923 = vmax.xlane.f32.xlu0 %v2922_v55  ;;  %v2186_v55 = vrot.slane %v1378_v61, 6  ;;  %v2179_v61 = vsel %vm1477_vm4, %v2178_v39, %v2177_v57  ;;  %v1347_v39 = vld [vmem:[%s7561_s13 + $0x2c] sm:$0x1]  ;;  %1205 = vst.msk [vmem:[%s7662_s21 + $0x28] sm:$0xff] %vm1199_vm8, %v6441_v53 }
 0x257   : > { %v2181_v3 = vsel %vm1480_vm5, %v2180_v42, %v2179_v61  ;;  %v1348_v42 = vld [vmem:[%s7561_s13 + $0x30] sm:$0x1]  ;;  %v1338_v61 = vld [vmem:[%s7561_s13 + $0x8] sm:$0x1]  ;;  %1206 = vst.msk [vmem:[%s7662_s21 + $0x30] sm:$0xff] %vm1199_vm8, %v6441_v53 }
 0x258   : > { %v2187_v21 = vsel %vm1468_vm1, %v2186_v55, %v2185_v16  ;;  %v2168_v55 = vrot.slane %v1367_v58, 1  ;;  %v2183_v11 = vsel %vm1483_vm6, %v2182_v45, %v2181_v3  ;;  %v1351_v45 = vld [vmem:[%s7561_s13 + $0x3c] sm:$0x1]  ;;  %v2134_v49 = vrot.slane %v1348_v42, 4  ;;  %1207 = vst.msk [vmem:[%s7662_s21 + $0x38] sm:$0xff] %vm1199_vm8, %v6441_v53 }
 0x259   : > { %v2189_v26 = vsel %vm1471_vm2, %v2188_v9, %v2187_v21  ;;  %v1354_v9 = vld [vmem:[%s7561_s13 + $0x48] sm:$0x1]  ;;  %v2138_v58 = vrot.slane %v1350_v44, 2  ;;  %v2140_v28 = vrot.slane %v1351_v45, 1  ;;  %v3496_v53 = vld [vmem:[%s6959_s11 + $0xce] sm:$0x1] }
 0x25a   : > { %v2191_v37 = vsel %vm1474_vm3, %v2190_v12, %v2189_v26  ;;  %v2161_v12 = vsel %vm1471_vm2, %v2160_v63, %v2159_v6  ;;  %v2144_v19 = vrot.slane %v1354_v9, 6  ;;  %v1344_v26 = vld [vmem:[%s7561_s13 + $0x20] sm:$0x1]  ;;  %v2116_v9 = vrot.slane %v1338_v61, 6 }
 0x25b   : > { %v2193_v15 = vsel %vm1477_vm4, %v2192_v13, %v2191_v37  ;;  %v1356_v13 = vld [vmem:[%s7561_s13 + $0x50] sm:$0x1]  ;;  %v2163_v16 = vsel %vm1474_vm3, %v2162_v30, %v2161_v12  ;;  %v2129_v57 = vsel %vm1465_vm0, %v2128_v23, %v1344_v26 }
 0x25c   : > { %v2195_v48 = vsel %vm1480_vm5, %v2194_v14, %v2193_v15  ;;  %v1357_v14 = vld [vmem:[%s7561_s13 + $0x54] sm:$0x1]  ;;  %v2165_v21 = vsel %vm1477_vm4, %v2164_v0, %v2163_v16  ;;  %v2148_v22 = vrot.slane %v1356_v13, 4  ;;  %v2145_v38 = vsel %vm1468_vm1, %v2144_v19, %v2143_v29  ;;  %v1339_v0 = vld [vmem:[%s7561_s13 + $0xc] sm:$0x1] }
 0x25d   : > { %v2197_v54 = vsel %vm1483_vm6, %v2196_v17, %v2195_v48  ;;  %v1359_v17 = vld [vmem:[%s7561_s13 + $0x5c] sm:$0x1]  ;;  %v2150_v24 = vrot.slane %v1357_v14, 3  ;;  %v2167_v27 = vsel %vm1480_vm5, %v2166_v34, %v2165_v21  ;;  %v2147_v15 = vsel %vm1471_vm2, %v2146_v20, %v2145_v38  ;;  %v1342_v34 = vld [vmem:[%s7561_s13 + $0x18] sm:$0x1] }
 0x25e   : > { %2268 = vmatpush.msra.mxu1 %v2197_v54  ;;  %v2154_v31 = vrot.slane %v1359_v17, 1  ;;  %v2169_v37 = vsel %vm1483_vm6, %v2168_v55, %v2167_v27  ;;  %v2149_v47 = vsel %vm1474_vm3, %v2148_v22, %v2147_v15  ;;  %v2132_v48 = vrot.slane %v1347_v39, 5  ;;  %v3501_v17 = vld [vmem:[%s6959_s11 + $0xe2] sm:$0x1]  ;;  %v3503_v22 = vld [vmem:[%s6959_s11 + $0xea] sm:$0x1] }
 0x25f   : > { %v2151_v54 = vsel %vm1477_vm4, %v2150_v24, %v2149_v47  ;;  %v2131_v30 = vsel %vm1468_vm1, %v2130_v46, %v2129_v57  ;;  %v2114_v55 = vrot.slane %v1337_v59, 7  ;;  %v2118_v12 = vrot.slane %v1339_v0, 5  ;;  %v3504_v29 = vld [vmem:[%s6959_s11 + $0xee] sm:$0x1]  ;;  %v3508_v15 = vld [vmem:[%s6959_s11 + $0xfe] sm:$0x1] }
 0x260   : > { %2269 = vmatpush.msra.mxu1 %v2183_v11  ;;  %v2153_v63 = vsel %vm1480_vm5, %v2152_v25, %v2151_v54  ;;  %v2133_v6 = vsel %vm1471_vm2, %v2132_v48, %v2131_v30  ;;  %v1343_v11 = vld [vmem:[%s7561_s13 + $0x1c] sm:$0x1]  ;;  %v2120_v13 = vrot.slane %v1340_v1, 4  ;;  %v2122_v16 = vrot.slane %v1341_v32, 3  ;;  %v3494_v57 = vld [vmem:[%s6959_s11 + $0xc6] sm:$0x1] }
 0x261   : > { %v2155_v3 = vsel %vm1483_vm6, %v2154_v31, %v2153_v63  ;;  %v2135_v10 = vsel %vm1474_vm3, %v2134_v49, %v2133_v6  ;;  %v2115_v41 = vsel %vm1465_vm0, %v2114_v55, %v1336_v52  ;;  %v2124_v21 = vrot.slane %v1342_v34, 2  ;;  %v3497_v59 = vld [vmem:[%s6959_s11 + $0xd2] sm:$0x1]  ;;  %v3493_v30 = vld [vmem:[%s6959_s11 + $0xc2] sm:$0x1] }
 0x262   : > { %2270 = vmatpush.msra.mxu1 %v2169_v37  ;;  %v2137_v14 = vsel %vm1477_vm4, %v2136_v51, %v2135_v10  ;;  %v2117_v20 = vsel %vm1468_vm1, %v2116_v9, %v2115_v41  ;;  %v3911_v24 = vrot.slane %v3502_v18, 7  ;;  %v2126_v27 = vrot.slane %v1343_v11, 1  ;;  %v3506_v37 = vld [vmem:[%s6959_s11 + $0xf6] sm:$0x1]  ;;  %v3499_v55 = vld [vmem:[%s6959_s11 + $0xda] sm:$0x1] }
 0x263   : > { %v2139_v19 = vsel %vm1480_vm5, %v2138_v58, %v2137_v14  ;;  %v2119_v26 = vsel %vm1471_vm2, %v2118_v12, %v2117_v20  ;;  %v3913_v39 = vrot.slane %v3503_v22, 6  ;;  %v3915_v23 = vrot.slane %v3504_v29, 5  ;;  %v3495_v58 = vld [vmem:[%s6959_s11 + $0xca] sm:$0x1]  ;;  %v3498_v0 = vld [vmem:[%s6959_s11 + $0xd6] sm:$0x1] }
 0x264   : > { %2271 = vmatpush.msra.mxu1 %v2155_v3  ;;  %v2141_v25 = vsel %vm1483_vm6, %v2140_v28, %v2139_v19  ;;  %v2121_v33 = vsel %vm1474_vm3, %v2120_v13, %v2119_v26  ;;  %v3912_v38 = vsel %vm1465_vm0, %v3911_v24, %v3501_v17  ;;  %v3917_v47 = vrot.slane %v3505_v36, 4  ;;  %v3500_v12 = vld [vmem:[%s6959_s11 + $0xde] sm:$0x1]  ;;  %v3486_v22 = vld [vmem:[%s6959_s11 + $0xa6] sm:$0x1] }
 0x265   : > { %v2123_v42 = vsel %vm1477_vm4, %v2122_v16, %v2121_v33  ;;  %v3914_v45 = vsel %vm1468_vm1, %v3913_v39, %v3912_v38  ;;  %v3919_v48 = vrot.slane %v3506_v37, 3  ;;  %v3921_v51 = vrot.slane %v3507_v43, 2  ;;  %v3487_v24 = vld [vmem:[%s6959_s11 + $0xaa] sm:$0x1]  ;;  %v3488_v29 = vld [vmem:[%s6959_s11 + $0xae] sm:$0x1] }
 0x266   : > { %2272 = vmatpush.msra.mxu1 %v2141_v25  ;;  %v2125_v44 = vsel %vm1480_vm5, %v2124_v21, %v2123_v42  ;;  %v3916_v49 = vsel %vm1471_vm2, %v3915_v23, %v3914_v45  ;;  %v3923_v52 = vrot.slane %v3508_v15, 1  ;;  %v3897_v1 = vrot.slane %v3494_v57, 7  ;;  %v3489_v37 = vld [vmem:[%s6959_s11 + $0xb2] sm:$0x1]  ;;  %v3490_v38 = vld [vmem:[%s6959_s11 + $0xb6] sm:$0x1] }
 0x267   : > { %v2127_v46 = vsel %vm1483_vm6, %v2126_v27, %v2125_v44  ;;  %v3918_v54 = vsel %vm1474_vm3, %v3917_v47, %v3916_v49  ;;  %v3899_v32 = vrot.slane %v3495_v58, 6  ;;  %v3901_v9 = vrot.slane %v3496_v53, 5  ;;  %v3485_v44 = vld [vmem:[%s6959_s11 + $0xa2] sm:$0x1]  ;;  %v3491_v49 = vld [vmem:[%s6959_s11 + $0xba] sm:$0x1] }
 0x268   : > { %2273 = vmatpush.msra.mxu1 %v2127_v46  ;;  %v3920_v28 = vsel %vm1477_vm4, %v3919_v48, %v3918_v54  ;;  %v3903_v13 = vrot.slane %v3497_v59, 4  ;;  %v3898_v41 = vsel %vm1465_vm0, %v3897_v1, %v3493_v30  ;;  %v3905_v16 = vrot.slane %v3498_v0, 3  ;;  %v2026_v54 = vld [vmem:[%s7662_s21] sm:$0xff]  ;;  %v3492_v57 = vld [vmem:[%s6959_s11 + $0xbe] sm:$0x1] }
 0x269   : > { %v3922_v63 = vsel %vm1480_vm5, %v3921_v51, %v3920_v28  ;;  %v3900_v17 = vsel %vm1468_vm1, %v3899_v32, %v3898_v41  ;;  %v3907_v18 = vrot.slane %v3499_v55, 2  ;;  %v3909_v21 = vrot.slane %v3500_v12, 1  ;;  %v4587_v41 = vld [vmem:[%s6959_s11 + $0xf3] sm:$0x1]  ;;  %v4590_v26 = vld [vmem:[%s6959_s11 + $0xff] sm:$0x1] }
 0x26a   : > { %v3924_v34 = vsel %vm1483_vm6, %v3923_v52, %v3922_v63  ;;  %v3902_v20 = vsel %vm1471_vm2, %v3901_v9, %v3900_v17  ;;  %v3883_v39 = vrot.slane %v3486_v22, 7  ;;  %v3885_v45 = vrot.slane %v3487_v24, 6  ;;  %v4584_v63 = vld [vmem:[%s6959_s11 + $0xe7] sm:$0x1] }
 0x26b   : > { %6100 = vmatpush.xpose.msk.msrb.mxu1 %vm1759_vm7, %v3924_v34  ;;  %v3904_v27 = vsel %vm1474_vm3, %v3903_v13, %v3902_v20  ;;  %v3887_v51 = vrot.slane %v3488_v29, 5  ;;  %v3889_v58 = vrot.slane %v3489_v37, 4  ;;  %v3891_v53 = vrot.slane %v3490_v38, 3  ;;  %v4589_v20 = vld [vmem:[%s6959_s11 + $0xfb] sm:$0x1] }
 0x26c   : > { %v3906_v36 = vsel %vm1477_vm4, %v3905_v16, %v3904_v27  ;;  %v3893_v32 = vrot.slane %v3491_v49, 2  ;;  %v3895_v9 = vrot.slane %v3492_v57, 1  ;;  %v4993_v16 = vrot.slane %v4584_v63, 7 }
 0x26d   : > { %v3908_v15 = vsel %vm1480_vm5, %v3907_v18, %v3906_v36 }
 0x26e   : > { %v3910_v48 = vsel %vm1483_vm6, %v3909_v21, %v3908_v15 }
 0x26f   : > { %6101 = vmatpush.xpose.msk.msrb.mxu1 %vm1759_vm7, %v3910_v48 }
 0x289   : > { %v7698_v31 = vpop.xlane.xlu1 %1883 }
 0x28a   : > { %6249 = vrcp.f32 %v7698_v31  ;;  %v1917_v10 = vand.u32 2147483648, %v7698_v31  ;;  %v1915_v11 = vand.u32 2147483647, %v7698_v31  ;;  %vm1911_vm10 = vweird.f32 %v7698_v31 }
 0x28c   : > { %v1918_v25 = vor.u32 1.1754944e-38, %v1917_v10  ;;  %vm7743_vm11 = vcmp.eq.f32.partialorder %v1915_v11, 8.507059e+37  ;;  %v4583_v10 = vld [vmem:[%s6959_s11 + $0xe3] sm:$0x1]  ;;  %v4586_v11 = vld [vmem:[%s6959_s11 + $0xef] sm:$0x1] }
 0x28d   : > { %v4994_v27 = vsel %vm1465_vm0, %v4993_v16, %v4583_v10  ;;  %v4997_v29 = vrot.slane %v4586_v11, 5 }
 0x290   : > { %v6250_v61 = vpop.eup %6249 }
 0x291   : > { %v1907_v3 = vmul.f32 %v6250_v61, %v7698_v31  ;;  %v7728_v6 = vpop.xlane.xlu0 %1886  ;;  %vm1912_vm9 = vweird.f32 %v6250_v61 }
 0x292   : > { %6251 = vrcp.f32 %v7728_v6  ;;  %vm1925_vm12 = vweird.f32 %v7728_v6  ;;  %v1931_v42 = vand.u32 2147483648, %v7728_v6  ;;  %vm1913_vm13 = vmor %vm1911_vm10, %vm1912_vm9  ;;  %v1929_v43 = vand.u32 2147483647, %v7728_v6 }
 0x293   : > { %v1908_v14 = vsub.f32 1.0, %v1907_v3  ;;  %v4585_v3 = vld [vmem:[%s6959_s11 + $0xeb] sm:$0x1] }
 0x294   : > { %v1932_v12 = vor.u32 1.1754944e-38, %v1931_v42  ;;  %vm7785_vm15 = vcmp.eq.f32.partialorder %v1929_v43, 8.507059e+37  ;;  %v4995_v21 = vrot.slane %v4585_v3, 6  ;;  %v3478_v42 = vld [vmem:[%s6959_s11 + $0x86] sm:$0x1] }
 0x295   : > { %v1909_v19 = vmul.f32 %v6250_v61, %v1908_v14  ;;  %v3479_v43 = vld [vmem:[%s6959_s11 + $0x8a] sm:$0x1] }
 0x296   : > { %v4996_v49 = vsel %vm1468_vm1, %v4995_v21, %v4994_v27  ;;  %v4578_v27 = vld [vmem:[%s6959_s11 + $0xcf] sm:$0x1] }
 0x297   : > { %v1910_v33 = vadd.f32 %v6250_v61, %v1909_v19  ;;  %v4588_v19 = vld [vmem:[%s6959_s11 + $0xf7] sm:$0x1]  ;;  %v4998_v57 = vsel %vm1471_vm2, %v4997_v29, %v4996_v49  ;;  %v4582_v49 = vld [vmem:[%s6959_s11 + $0xdf] sm:$0x1] }
 0x298   : > { %v7753_v31 = vpop.eup %6251 }
 0x299   : > { %v1921_v23 = vmul.f32 %v7753_v31, %v7728_v6  ;;  %v7762_v46 = vpop.xlane.xlu1 %1889  ;;  %v1914_v47 = vsel %vm1913_vm13, %v6250_v61, %v1910_v33  ;;  %vm1926_vm14 = vweird.f32 %v7753_v31  ;;  %v3884_v61 = vsel %vm1465_vm0, %v3883_v39, %v3485_v44  ;;  %v2027_v44 = vld [vmem:[%s7662_s21 + $0x8] sm:$0xff] }
 0x29a   : > { %6253 = vrcp.f32 %v7762_v46  ;;  %v1919_v52 = vsel %vm7743_vm11, %v1918_v25, %v1914_v47  ;;  %v1945_v30 = vand.u32 2147483648, %v7762_v46  ;;  %v1943_v0 = vand.u32 2147483647, %v7762_v46  ;;  %vm1927_vm10 = vmor %vm1925_vm12, %vm1926_vm14 }
 0x29b   : > { %v1922_v28 = vsub.f32 1.0, %v1921_v23  ;;  %v2018_v59 = vmul.f32 %v7470_v40, %v1919_v52  ;;  %v3886_v1 = vsel %vm1468_vm1, %v3885_v45, %v3884_v61  ;;  %vm1939_vm9 = vweird.f32 %v7762_v46  ;;  %v3477_v23 = vld [vmem:[%s6959_s11 + $0x82] sm:$0x1]  ;;  %v3480_v52 = vld [vmem:[%s6959_s11 + $0x8e] sm:$0x1] }
 0x29c   : > { %v3888_v40 = vsel %vm1471_vm2, %v3887_v51, %v3886_v1  ;;  %v7800_v24 = vor.u32 1.1754944e-38, %v1945_v30  ;;  %vm7814_vm11 = vcmp.eq.f32.partialorder %v1943_v0, 8.507059e+37  ;;  %v4999_v39 = vrot.slane %v4587_v41, 4  ;;  %v3483_v30 = vld [vmem:[%s6959_s11 + $0x9a] sm:$0x1] }
 0x29d   : > { %v1923_v34 = vmul.f32 %v7753_v31, %v1922_v28  ;;  %v2034_v55 = vadd.f32 %v2026_v54, %v2018_v59  ;;  %6068 = vmatmul.msk.f32.vlgmr.msra.gmra.mxu1 %vm1199_vm8, %v2018_v59  ;;  %v3890_v14 = vsel %vm1474_vm3, %v3889_v58, %v3888_v40  ;;  %v5003_v45 = vrot.slane %v4589_v20, 2  ;;  %v3481_v54 = vld [vmem:[%s6959_s11 + $0x92] sm:$0x1]  ;;  %v3482_v58 = vld [vmem:[%s6959_s11 + $0x96] sm:$0x1] }
 0x29e   : > { %v3892_v18 = vsel %vm1477_vm4, %v3891_v53, %v3890_v14  ;;  %v5005_v51 = vrot.slane %v4590_v26, 1  ;;  %v3869_v53 = vrot.slane %v3478_v42, 7  ;;  %v3871_v28 = vrot.slane %v3479_v43, 6  ;;  %v3484_v1 = vld [vmem:[%s6959_s11 + $0x9e] sm:$0x1] }
 0x29f   : > { %2042 = vst.msk [vmem:[%s7662_s21] sm:$0xff] %vm1199_vm8, %v2034_v55  ;;  %v1924_v17 = vadd.f32 %v7753_v31, %v1923_v34  ;;  %v3894_v25 = vsel %vm1480_vm5, %v3893_v32, %v3892_v18  ;;  %v3873_v3 = vrot.slane %v3480_v52, 5  ;;  %v3875_v34 = vrot.slane %v3481_v54, 4  ;;  %v4577_v26 = vld [vmem:[%s6959_s11 + $0xcb] sm:$0x1] }
 0x2a0   : > { %v7798_v22 = vpop.eup %6253  ;;  %v3896_v6 = vsel %vm1483_vm6, %v3895_v9, %v3894_v25  ;;  %v3870_v32 = vsel %vm1465_vm0, %v3869_v53, %v3477_v23  ;;  %v3877_v10 = vrot.slane %v3482_v58, 3  ;;  %v3879_v16 = vrot.slane %v3483_v30, 2  ;;  %v4579_v43 = vld [vmem:[%s6959_s11 + $0xd3] sm:$0x1]  ;;  %v3470_v52 = vld [vmem:[%s6959_s11 + $0x66] sm:$0x1] }
 0x2a1   : > { %v1935_v33 = vmul.f32 %v7798_v22, %v7762_v46  ;;  %v7811_v36 = vpop.xlane.xlu2 %1892  ;;  %v1928_v37 = vsel %vm1927_vm10, %v7753_v31, %v1924_v17  ;;  %6102 = vmatpush.xpose.msk.msrb.mxu1 %vm1759_vm7, %v3896_v6  ;;  %v5001_v31 = vrot.slane %v4588_v19, 3  ;;  %vm1940_vm12 = vweird.f32 %v7798_v22  ;;  %v4576_v17 = vld [vmem:[%s6959_s11 + $0xc7] sm:$0x1]  ;;  %v7868_v46 = vpop.f32.mrf.mxu2  ;;  %v3472_v30 = vld [vmem:[%s6959_s11 + $0x6e] sm:$0x1] }
 0x2a2   : > { %6255 = vrcp.f32 %v7811_v36  ;;  %v1933_v15 = vsel %vm7785_vm15, %v1932_v12, %v1928_v37  ;;  %v1959_v61 = vand.u32 2147483648, %v7811_v36  ;;  %vm1953_vm13 = vweird.f32 %v7811_v36  ;;  %vm7854_vm14 = vmor %vm1939_vm9, %vm1940_vm12  ;;  %v2028_v37 = vld [vmem:[%s7662_s21 + $0x10] sm:$0xff] }
 0x2a3   : > { %v1936_v47 = vsub.f32 1.0, %v1935_v33  ;;  %v2019_v48 = vmul.f32 %v7491_v4, %v1933_v15  ;;  %v5000_v4 = vsel %vm1474_vm3, %v4999_v39, %v4998_v57  ;;  %v3872_v9 = vsel %vm1468_vm1, %v3871_v28, %v3870_v32  ;;  %v4580_v15 = vld [vmem:[%s6959_s11 + $0xd7] sm:$0x1]  ;;  %v3471_v28 = vld [vmem:[%s6959_s11 + $0x6a] sm:$0x1] }
 0x2a4   : > { %v5002_v0 = vsel %vm1477_vm4, %v5001_v31, %v5000_v4  ;;  %v1957_v14 = vand.u32 2147483647, %v7811_v36  ;;  %v3874_v41 = vsel %vm1471_vm2, %v3873_v3, %v3872_v9  ;;  %v3881_v25 = vrot.slane %v3484_v1, 1  ;;  %v3469_v4 = vld [vmem:[%s6959_s11 + $0x62] sm:$0x1] }
 0x2a5   : > { %v1937_v59 = vmul.f32 %v7798_v22, %v1936_v47  ;;  %v2035_v63 = vadd.f32 %v2027_v44, %v2019_v48  ;;  %6069 = vmatmul.msk.f32.gmra.mxu1 %vm1199_vm8, %v2019_v48  ;;  %v5004_v40 = vsel %vm1480_vm5, %v5003_v45, %v5002_v0  ;;  %v3876_v21 = vsel %vm1474_vm3, %v3875_v34, %v3874_v41  ;;  %v3473_v34 = vld [vmem:[%s6959_s11 + $0x72] sm:$0x1] }
 0x2a6   : > { %v7859_v13 = vsel %vm1483_vm6, %v5005_v51, %v5004_v40  ;;  %v1960_v29 = vor.u32 1.1754944e-38, %v1959_v61  ;;  %v3878_v42 = vsel %vm1477_vm4, %v3877_v10, %v3876_v21  ;;  %v4979_v44 = vrot.slane %v4576_v17, 7  ;;  %v2029_v17 = vld [vmem:[%s7662_s21 + $0x18] sm:$0xff] }
 0x2a7   : > { %2043 = vst.msk [vmem:[%s7662_s21 + $0x8] sm:$0xff] %vm1199_vm8, %v2035_v63  ;;  %v1938_v55 = vadd.f32 %v7798_v22, %v1937_v59  ;;  %6124 = vmatpush.xpose.msk.msrb.mxu0 %vm1759_vm7, %v7859_v13  ;;  %v3880_v45 = vsel %vm1480_vm5, %v3879_v16, %v3878_v42  ;;  %v4981_v38 = vrot.slane %v4577_v26, 6  ;;  %v4983_v23 = vrot.slane %v4578_v27, 5  ;;  %v4569_v42 = vld [vmem:[%s6959_s11 + $0xab] sm:$0x1] }
 0x2a8   : > { %v7848_v11 = vpop.eup %6255  ;;  %vm7898_vm9 = vcmp.eq.f32.partialorder %v1957_v14, 8.507059e+37  ;;  %v4985_v58 = vrot.slane %v4579_v43, 4  ;;  %v4987_v53 = vrot.slane %v4580_v15, 3  ;;  %v4991_v3 = vrot.slane %v4582_v49, 1  ;;  %v3474_v14 = vld [vmem:[%s6959_s11 + $0x76] sm:$0x1] }
 0x2a9   : > { %v1949_v18 = vmul.f32 %v7848_v11, %v7811_v36  ;;  %v7866_v19 = vpop.xlane.xlu0 %1895  ;;  %v1942_v20 = vsel %vm7854_vm14, %v7798_v22, %v1938_v55  ;;  %vm1954_vm15 = vweird.f32 %v7848_v11  ;;  %v4575_v22 = vld [vmem:[%s6959_s11 + $0xc3] sm:$0x1]  ;;  %v3855_v55 = vrot.slane %v3470_v52, 7  ;;  %v3475_v36 = vld [vmem:[%s6959_s11 + $0x7a] sm:$0x1] }
 0x2aa   : > { %6257 = vrcp.f32 %v7866_v19  ;;  %v1947_v33 = vsel %vm7814_vm11, %v7800_v24, %v1942_v20  ;;  %v1973_v31 = vand.u32 2147483648, %v7866_v19  ;;  %v4581_v24 = vld [vmem:[%s6959_s11 + $0xdb] sm:$0x1]  ;;  %v4980_v51 = vsel %vm1465_vm0, %v4979_v44, %v4575_v22  ;;  %vm1955_vm11 = vmor %vm1953_vm13, %vm1954_vm15  ;;  %v3476_v20 = vld [vmem:[%s6959_s11 + $0x7e] sm:$0x1] }
 0x2ab   : > { %v1950_v6 = vsub.f32 1.0, %v1949_v18  ;;  %v2020_v39 = vmul.f32 %v7512_v35, %v1947_v33  ;;  %v3882_v35 = vsel %vm1483_vm6, %v3881_v25, %v3880_v45  ;;  %v4982_v57 = vsel %vm1468_vm1, %v4981_v38, %v4980_v51  ;;  %v7936_v25 = vpop.f32.mrf.mxu2  ;;  %v4567_v33 = vld [vmem:[%s6959_s11 + $0xa3] sm:$0x1]  ;;  %v4570_v43 = vld [vmem:[%s6959_s11 + $0xaf] sm:$0x1] }
 0x2ac   : > { %6103 = vmatpush.xpose.msk.msrb.mxu1 %vm1759_vm7, %v3882_v35  ;;  %vm1967_vm10 = vweird.f32 %v7866_v19  ;;  %v4984_v61 = vsel %vm1471_vm2, %v4983_v23, %v4982_v57  ;;  %v4989_v63 = vrot.slane %v4581_v24, 2  ;;  %v7914_v1 = vor.u32 1.1754944e-38, %v1973_v31  ;;  %v4571_v45 = vld [vmem:[%s6959_s11 + $0xb3] sm:$0x1]  ;;  %v4572_v24 = vld [vmem:[%s6959_s11 + $0xb7] sm:$0x1] }
 0x2ad   : > { %v1951_v47 = vmul.f32 %v7848_v11, %v1950_v6  ;;  %v2036_v48 = vadd.f32 %v2028_v37, %v2020_v39  ;;  %6070 = vmatmul.msk.f32.gmra.mxu1 %vm1199_vm8, %v2020_v39  ;;  %v4986_v32 = vsel %vm1474_vm3, %v4985_v58, %v4984_v61  ;;  %v3857_v41 = vrot.slane %v3471_v28, 6 }
 0x2ae   : > { %v4988_v12 = vsel %vm1477_vm4, %v4987_v53, %v4986_v32  ;;  %v1971_v18 = vand.u32 2147483647, %v7866_v19  ;;  %v3859_v21 = vrot.slane %v3472_v30, 5  ;;  %v3856_v6 = vsel %vm1465_vm0, %v3855_v55, %v3469_v4  ;;  %v4573_v55 = vld [vmem:[%s6959_s11 + $0xbb] sm:$0x1] }
 0x2af   : > { %2044 = vst.msk [vmem:[%s7662_s21 + $0x10] sm:$0xff] %vm1199_vm8, %v2036_v48  ;;  %v1952_v59 = vadd.f32 %v7848_v11, %v1951_v47  ;;  %v4990_v27 = vsel %vm1480_vm5, %v4989_v63, %v4988_v12  ;;  %v3861_v39 = vrot.slane %v3473_v34, 4  ;;  %v3858_v44 = vsel %vm1468_vm1, %v3857_v41, %v3856_v6  ;;  %v3464_v6 = vld [vmem:[%s6959_s11 + $0x4e] sm:$0x1] }
 0x2b0   : > { %v7912_v0 = vpop.eup %6257  ;;  %v7945_v22 = vsel %vm1483_vm6, %v4991_v3, %v4990_v27  ;;  %v3863_v31 = vrot.slane %v3474_v14, 3  ;;  %v3860_v38 = vsel %vm1471_vm2, %v3859_v21, %v3858_v44  ;;  %v3865_v23 = vrot.slane %v3475_v36, 2  ;;  %v2030_v14 = vld [vmem:[%s7662_s21 + $0x20] sm:$0xff]  ;;  %v3463_v27 = vld [vmem:[%s6959_s11 + $0x4a] sm:$0x1] }
 0x2b1   : > { %v1963_v40 = vmul.f32 %v7912_v0, %v7866_v19  ;;  %v7924_v9 = vpop.xlane.xlu1 %1898  ;;  %v1956_v10 = vsel %vm1955_vm11, %v7848_v11, %v1952_v59  ;;  %vm1968_vm12 = vweird.f32 %v7912_v0  ;;  %6125 = vmatpush.xpose.msk.msrb.mxu0 %vm1759_vm7, %v7945_v22  ;;  %v3867_v47 = vrot.slane %v3476_v20, 1 }
 0x2b2   : > { %6259 = vrcp.f32 %v7924_v9  ;;  %v1961_v16 = vsel %vm7898_vm9, %v1960_v29, %v1956_v10  ;;  %v4568_v29 = vld [vmem:[%s6959_s11 + $0xa7] sm:$0x1]  ;;  %v1987_v37 = vand.u32 2147483648, %v7924_v9  ;;  %vm1981_vm13 = vweird.f32 %v7924_v9  ;;  %vm7969_vm14 = vmor %vm1967_vm10, %vm1968_vm12 }
 0x2b3   : > { %v1964_v11 = vsub.f32 1.0, %v1963_v40  ;;  %v2021_v26 = vmul.f32 %v7525_v50, %v1961_v16  ;;  %v4965_v48 = vrot.slane %v4568_v29, 7  ;;  %v3862_v49 = vsel %vm1474_vm3, %v3861_v39, %v3860_v38  ;;  %v4574_v40 = vld [vmem:[%s6959_s11 + $0xbf] sm:$0x1]  ;;  %v7997_v20 = vpop.f32.mrf.mxu2 }
 0x2b4   : > { %v4967_v51 = vrot.slane %v4569_v42, 6  ;;  %v4969_v52 = vrot.slane %v4570_v43, 5  ;;  %v3864_v58 = vsel %vm1477_vm4, %v3863_v31, %v3862_v49  ;;  %v4971_v28 = vrot.slane %v4571_v45, 4  ;;  %v2031_v49 = vld [vmem:[%s7662_s21 + $0x28] sm:$0xff] }
 0x2b5   : > { %v1965_v50 = vmul.f32 %v7912_v0, %v1964_v11  ;;  %v2037_v15 = vadd.f32 %v2029_v17, %v2021_v26  ;;  %6071 = vmatmul.msk.f32.gmra.mxu1 %vm1199_vm8, %v2021_v26  ;;  %v4966_v53 = vsel %vm1465_vm0, %v4965_v48, %v4567_v33  ;;  %v4973_v59 = vrot.slane %v4572_v24, 3  ;;  %v3462_v26 = vld [vmem:[%s6959_s11 + $0x46] sm:$0x1]  ;;  %v3466_v24 = vld [vmem:[%s6959_s11 + $0x56] sm:$0x1] }
 0x2b6   : > { %v3866_v30 = vsel %vm1480_vm5, %v3865_v23, %v3864_v58  ;;  %v4968_v32 = vsel %vm1468_vm1, %v4967_v51, %v4966_v53  ;;  %vm1972_vm15 = vcmp.eq.f32.partialorder %v1971_v18, 8.507059e+37  ;;  %v1988_v41 = vor.u32 1.1754944e-38, %v1987_v37  ;;  %v3467_v51 = vld [vmem:[%s6959_s11 + $0x5a] sm:$0x1]  ;;  %v3468_v53 = vld [vmem:[%s6959_s11 + $0x5e] sm:$0x1] }
 0x2b7   : > { %2045 = vst.msk [vmem:[%s7662_s21 + $0x18] sm:$0xff] %vm1199_vm8, %v2037_v15  ;;  %v1966_v35 = vadd.f32 %v7912_v0, %v1965_v50  ;;  %v4970_v36 = vsel %vm1471_vm2, %v4969_v52, %v4968_v32  ;;  %v4975_v21 = vrot.slane %v4573_v55, 2  ;;  %v4977_v11 = vrot.slane %v4574_v40, 1  ;;  %v3461_v50 = vld [vmem:[%s6959_s11 + $0x42] sm:$0x1] }
 0x2b8   : > { %v7963_v54 = vpop.eup %6259  ;;  %v4972_v17 = vsel %vm1474_vm3, %v4971_v28, %v4970_v36  ;;  %v2925_v29 = vsel %vm1199_vm8, %v7868_v46, -inf  ;;  %v2928_v37 = vsel %vm1199_vm8, %v7936_v25, -inf  ;;  %v1985_v43 = vand.u32 2147483647, %v7924_v9  ;;  %v3465_v15 = vld [vmem:[%s6959_s11 + $0x52] sm:$0x1] }
 0x2b9   : > { %v1977_v61 = vmul.f32 %v7963_v54, %v7924_v9  ;;  %v2918_v63 = vpop.xlane.xlu1 %2917  ;;  %v7977_v4 = vpop.xlane.xlu2 %1901  ;;  %v1970_v19 = vsel %vm7969_vm14, %v7912_v0, %v1966_v35  ;;  %v3868_v0 = vsel %vm1483_vm6, %v3867_v47, %v3866_v30  ;;  %2926 = vmax.xlane.f32.xlu1 %v2925_v29  ;;  %2929 = vmax.xlane.f32.xlu2 %v2928_v37  ;;  %vm1982_vm9 = vweird.f32 %v7963_v54  ;;  %v4559_v30 = vld [vmem:[%s6959_s11 + $0x83] sm:$0x1]  ;;  %v4561_v32 = vld [vmem:[%s6959_s11 + $0x8b] sm:$0x1] }
 0x2ba   : > { %v2940_v3 = vsub.f32 %v7537_v62, %v2918_v63  ;;  %6261 = vrcp.f32 %v7977_v4  ;;  %v2001_v34 = vand.u32 2147483648, %v7977_v4  ;;  %v1975_v12 = vsel %vm1972_vm15, %v7914_v1, %v1970_v19  ;;  %6104 = vmatpush.xpose.msk.msrb.mxu1 %vm1759_vm7, %v3868_v0  ;;  %vm8025_vm10 = vmor %vm1981_vm13, %vm1982_vm9 }
 0x2bb   : > { %v1978_v10 = vsub.f32 1.0, %v1977_v61  ;;  %v2022_v62 = vmul.f32 %v7530_v56, %v1975_v12  ;;  %v4974_v1 = vsel %vm1477_vm4, %v4973_v59, %v4972_v17  ;;  %v3841_v38 = vrot.slane %v3462_v26, 7  ;;  %v4560_v59 = vld [vmem:[%s6959_s11 + $0x87] sm:$0x1] }
 0x2bc   : > { %v2948_v16 = vmul.f32 1.442695, %v2940_v3  ;;  %v8002_v33 = vor.u32 1.1754944e-38, %v2001_v34  ;;  %v4976_v39 = vsel %vm1480_vm5, %v4975_v21, %v4974_v1  ;;  %v3843_v23 = vrot.slane %v3463_v27, 6  ;;  %v4562_v3 = vld [vmem:[%s6959_s11 + $0x8f] sm:$0x1]  ;;  %v8065_v21 = vpop.f32.mrf.mxu2 }
 0x2bd   : > { %v1979_v18 = vmul.f32 %v7963_v54, %v1978_v10  ;;  %v2038_v56 = vadd.f32 %v2030_v14, %v2022_v62  ;;  %6072 = vmatmul.msk.f32.gmra.mxu1 %vm1199_vm8, %v2022_v62  ;;  %v8021_v31 = vsel %vm1483_vm6, %v4977_v11, %v4976_v39  ;;  %vm1986_vm11 = vcmp.eq.f32.partialorder %v1985_v43, 8.507059e+37  ;;  %v4563_v10 = vld [vmem:[%s6959_s11 + $0x93] sm:$0x1] }
 0x2be   : > { %6263 = vpow2.f32 %v2948_v16  ;;  %6126 = vmatpush.xpose.msk.msrb.mxu0 %vm1759_vm7, %v8021_v31  ;;  %v3845_v52 = vrot.slane %v3464_v6, 5  ;;  %v3847_v28 = vrot.slane %v3465_v15, 4  ;;  %v3849_v19 = vrot.slane %v3466_v24, 3  ;;  %v4565_v16 = vld [vmem:[%s6959_s11 + $0x9b] sm:$0x1] }
 0x2bf   : > { %v1980_v42 = vadd.f32 %v7963_v54, %v1979_v18  ;;  %2046 = vst.msk [vmem:[%s7662_s21 + $0x20] sm:$0xff] %vm1199_vm8, %v2038_v56  ;;  %vm1995_vm12 = vweird.f32 %v7977_v4  ;;  %v3851_v0 = vrot.slane %v3467_v51, 2  ;;  %v3853_v36 = vrot.slane %v3468_v53, 1  ;;  %v4566_v18 = vld [vmem:[%s6959_s11 + $0x9f] sm:$0x1] }
 0x2c0   : > { %v8016_v44 = vpop.eup %6261  ;;  %v4951_v1 = vrot.slane %v4560_v59, 7  ;;  %v4953_v26 = vrot.slane %v4561_v32, 6  ;;  %v4955_v27 = vrot.slane %v4562_v3, 5  ;;  %v4957_v56 = vrot.slane %v4563_v10, 4  ;;  %v3457_v59 = vld [vmem:[%s6959_s11 + $0x32] sm:$0x1] }
 0x2c1   : > { %v1991_v47 = vmul.f32 %v8016_v44, %v7977_v4  ;;  %v8034_v48 = vpop.xlane.xlu0 %1904  ;;  %v2921_v35 = vpop.xlane.xlu2 %2920  ;;  %v1984_v9 = vsel %vm8025_vm10, %v7963_v54, %v1980_v42  ;;  %v3842_v54 = vsel %vm1465_vm0, %v3841_v38, %v3461_v50  ;;  %v4961_v42 = vrot.slane %v4565_v16, 2  ;;  %v3453_v38 = vld [vmem:[%s6959_s11 + $0x22] sm:$0x1]  ;;  %v3460_v32 = vld [vmem:[%s6959_s11 + $0x3e] sm:$0x1] }
 0x2c2   : > { %6265 = vrcp.f32 %v8034_v48  ;;  %v2015_v57 = vand.u32 2147483648, %v8034_v48  ;;  %v2941_v58 = vsub.f32 %v7548_v5, %v2921_v35  ;;  %v1989_v63 = vsel %vm1986_vm11, %v1988_v41, %v1984_v9  ;;  %v4564_v41 = vld [vmem:[%s6959_s11 + $0x97] sm:$0x1]  ;;  %v4552_v10 = vld [vmem:[%s6959_s11 + $0x67] sm:$0x1] }
 0x2c3   : > { %v1992_v61 = vsub.f32 1.0, %v1991_v47  ;;  %v2023_v55 = vmul.f32 %v7535_v60, %v1989_v63  ;;  %v3844_v40 = vsel %vm1468_vm1, %v3843_v23, %v3842_v54  ;;  %v4952_v6 = vsel %vm1465_vm0, %v4951_v1, %v4559_v30  ;;  %v3454_v23 = vld [vmem:[%s6959_s11 + $0x26] sm:$0x1]  ;;  %v3455_v47 = vld [vmem:[%s6959_s11 + $0x2a] sm:$0x1] }
 0x2c4   : > { %v8051_v34 = vor.u32 1.1754944e-38, %v2015_v57  ;;  %v2950_v5 = vmul.f32 1.442695, %v2941_v58  ;;  %v3846_v14 = vsel %vm1471_vm2, %v3845_v52, %v3844_v40  ;;  %v8060_v62 = vpop.eup %6263  ;;  %v4959_v39 = vrot.slane %v4564_v41, 3  ;;  %v3456_v52 = vld [vmem:[%s6959_s11 + $0x2e] sm:$0x1] }
 0x2c5   : > { %v1993_v12 = vmul.f32 %v8016_v44, %v1992_v61  ;;  %v2039_v17 = vadd.f32 %v2031_v49, %v2023_v55  ;;  %6073 = vmatmul.msk.f32.gmra.mxu1 %vm1199_vm8, %v2023_v55  ;;  %v3848_v60 = vsel %vm1474_vm3, %v3847_v28, %v3846_v14  ;;  %v4954_v15 = vsel %vm1468_vm1, %v4953_v26, %v4952_v6  ;;  %v3458_v61 = vld [vmem:[%s6959_s11 + $0x36] sm:$0x1]  ;;  %v3459_v63 = vld [vmem:[%s6959_s11 + $0x3a] sm:$0x1]  ;;  %v4553_v41 = vld [vmem:[%s6959_s11 + $0x6b] sm:$0x1]  ;;  %v8125_v6 = vpop.f32.mrf.mxu2 }
 0x2c6   : > { %6267 = vpow2.f32 %v2950_v5  ;;  %v3850_v11 = vsel %vm1477_vm4, %v3849_v19, %v3848_v60  ;;  %v4963_v45 = vrot.slane %v4566_v18, 1  ;;  %v4956_v35 = vsel %vm1471_vm2, %v4955_v27, %v4954_v15  ;;  %v4554_v16 = vld [vmem:[%s6959_s11 + $0x6f] sm:$0x1]  ;;  %v4555_v1 = vld [vmem:[%s6959_s11 + $0x73] sm:$0x1] }
 0x2c7   : > { %2047 = vst.msk [vmem:[%s7662_s21 + $0x28] sm:$0xff] %vm1199_vm8, %v2039_v17  ;;  %v3852_v37 = vsel %vm1480_vm5, %v3851_v0, %v3850_v11  ;;  %v2934_v9 = vsel %vm1199_vm8, %v8065_v21, -inf  ;;  %v2964_v49 = vsel %vm1199_vm8, %v8060_v62, 0.0  ;;  %v2931_v51 = vsel %vm1199_vm8, %v7997_v20, -inf  ;;  %v2032_v17 = vld [vmem:[%s7662_s21 + $0x30] sm:$0xff] }
 0x2c8   : > { %v8068_v29 = vpop.eup %6265  ;;  %v3854_v50 = vsel %vm1483_vm6, %v3853_v36, %v3852_v37  ;;  %v4958_v58 = vsel %vm1474_vm3, %v4957_v56, %v4956_v35  ;;  %2935 = vmax.xlane.f32.xlu1 %v2934_v9  ;;  %2965 = vadd.xlane.f32.xlu2 %v2964_v49  ;;  %v1994_v28 = vadd.f32 %v8016_v44, %v1993_v12  ;;  %vm1996_vm13 = vweird.f32 %v8016_v44  ;;  %v4551_v36 = vld [vmem:[%s6959_s11 + $0x63] sm:$0x1]  ;;  %v4557_v37 = vld [vmem:[%s6959_s11 + $0x7b] sm:$0x1] }
 0x2c9   : > { %v2005_v43 = vmul.f32 %v8068_v29, %v8034_v48  ;;  %v2924_v24 = vpop.xlane.xlu0 %2923  ;;  %6105 = vmatpush.xpose.msk.msrb.mxu1 %vm1759_vm7, %v3854_v50  ;;  %v4960_v19 = vsel %vm1477_vm4, %v4959_v39, %v4958_v58  ;;  %2932 = vmax.xlane.f32.xlu0 %v2931_v51  ;;  %v1999_v30 = vand.u32 2147483647, %v7977_v4  ;;  %vm1997_vm14 = vmor %vm1995_vm12, %vm1996_vm13  ;;  %v3829_v40 = vrot.slane %v3455_v47, 6  ;;  %v3445_v51 = vld [vmem:[%s6959_s11 + $0x2] sm:$0x1] }
 0x2ca   : > { %v2942_v53 = vsub.f32 %v7556_v8, %v2924_v24  ;;  %v3827_v8 = vrot.slane %v3454_v23, 7  ;;  %v4962_v5 = vsel %vm1480_vm5, %v4961_v42, %v4960_v19  ;;  %vm2009_vm15 = vweird.f32 %v8034_v48  ;;  %v4558_v42 = vld [vmem:[%s6959_s11 + $0x7f] sm:$0x1]  ;;  %v3447_v23 = vld [vmem:[%s6959_s11 + $0xa] sm:$0x1] }
 0x2cb   : > { %v2006_v57 = vsub.f32 1.0, %v2005_v43  ;;  %v8109_v12 = vsel %vm1483_vm6, %v4963_v45, %v4962_v5  ;;  %v1998_v14 = vsel %vm1997_vm14, %v8016_v44, %v1994_v28  ;;  %vm2000_vm9 = vcmp.eq.f32.partialorder %v1999_v30, 8.507059e+37  ;;  %v4556_v44 = vld [vmem:[%s6959_s11 + $0x77] sm:$0x1]  ;;  %v3451_v5 = vld [vmem:[%s6959_s11 + $0x1a] sm:$0x1] }
 0x2cc   : > { %v8096_v54 = vpop.eup %6267  ;;  %v2952_v55 = vmul.f32 1.442695, %v2942_v53  ;;  %v3828_v0 = vsel %vm1465_vm0, %v3827_v8, %v3453_v38  ;;  %6127 = vmatpush.xpose.msk.msrb.mxu0 %vm1759_vm7, %v8109_v12  ;;  %v2003_v4 = vsel %vm2000_vm9, %v8002_v33, %v1998_v14  ;;  %v3831_v18 = vrot.slane %v3456_v52, 5  ;;  %v3446_v38 = vld [vmem:[%s6959_s11 + $0x6] sm:$0x1] }
 0x2cd   : > { %v2007_v3 = vmul.f32 %v8068_v29, %v2006_v57  ;;  %v3830_v60 = vsel %vm1468_vm1, %v3829_v40, %v3828_v0  ;;  %v2024_v11 = vmul.f32 %v7544_v2, %v2003_v4  ;;  %v3833_v26 = vrot.slane %v3457_v59, 4  ;;  %v3448_v52 = vld [vmem:[%s6959_s11 + $0xe] sm:$0x1]  ;;  %v3449_v57 = vld [vmem:[%s6959_s11 + $0x12] sm:$0x1] }
 0x2ce   : > { %6269 = vpow2.f32 %v2952_v55  ;;  %v3835_v27 = vrot.slane %v3458_v61, 3  ;;  %v3837_v56 = vrot.slane %v3459_v63, 2  ;;  %v3832_v39 = vsel %vm1471_vm2, %v3831_v18, %v3830_v60  ;;  %v3450_v61 = vld [vmem:[%s6959_s11 + $0x16] sm:$0x1]  ;;  %v3452_v55 = vld [vmem:[%s6959_s11 + $0x1e] sm:$0x1] }
 0x2cf   : > { %v3839_v33 = vrot.slane %v3460_v32, 1  ;;  %v4937_v43 = vrot.slane %v4552_v10, 7  ;;  %v4939_v50 = vrot.slane %v4553_v41, 6  ;;  %v2040_v15 = vadd.f32 %v2032_v17, %v2024_v11  ;;  %6074 = vmatmul.msk.f32.gmra.mxu1 %vm1199_vm8, %v2024_v11  ;;  %v4544_v0 = vld [vmem:[%s6959_s11 + $0x47] sm:$0x1] }
 0x2d0   : > { %v3834_v2 = vsel %vm1474_vm3, %v3833_v26, %v3832_v39  ;;  %v4941_v45 = vrot.slane %v4554_v16, 5  ;;  %v4943_v24 = vrot.slane %v4555_v1, 4  ;;  %v4945_v9 = vrot.slane %v4556_v44, 3  ;;  %v4546_v41 = vld [vmem:[%s6959_s11 + $0x4f] sm:$0x1] }
 0x2d1   : > { %v3836_v47 = vsel %vm1477_vm4, %v3835_v27, %v3834_v2  ;;  %v4938_v35 = vsel %vm1465_vm0, %v4937_v43, %v4551_v36  ;;  %v4947_v49 = vrot.slane %v4557_v37, 2  ;;  %2048 = vst.msk [vmem:[%s7662_s21 + $0x30] sm:$0xff] %vm1199_vm8, %v2040_v15  ;;  %v4949_v28 = vrot.slane %v4558_v42, 1  ;;  %v4545_v36 = vld [vmem:[%s6959_s11 + $0x4b] sm:$0x1]  ;;  %v2033_v37 = vld [vmem:[%s7662_s21 + $0x38] sm:$0xff] }
 0x2d2   : > { %v3838_v58 = vsel %vm1480_vm5, %v3837_v56, %v3836_v47  ;;  %v4940_v53 = vsel %vm1468_vm1, %v4939_v50, %v4938_v35  ;;  %v2937_v59 = vsel %vm1199_vm8, %v8125_v6, -inf  ;;  %v2967_v32 = vsel %vm1199_vm8, %v8096_v54, 0.0  ;;  %v4547_v60 = vld [vmem:[%s6959_s11 + $0x53] sm:$0x1]  ;;  %v4543_v11 = vld [vmem:[%s6959_s11 + $0x43] sm:$0x1] }
 0x2d3   : > { %v3840_v19 = vsel %vm1483_vm6, %v3839_v33, %v3838_v58  ;;  %v4942_v30 = vsel %vm1471_vm2, %v4941_v45, %v4940_v53  ;;  %2938 = vmax.xlane.f32.xlu0 %v2937_v59  ;;  %v2008_v8 = vadd.f32 %v8068_v29, %v2007_v3  ;;  %2968 = vadd.xlane.f32.xlu1 %v2967_v32  ;;  %vm2010_vm10 = vweird.f32 %v8068_v29  ;;  %v4548_v26 = vld [vmem:[%s6959_s11 + $0x57] sm:$0x1]  ;;  %v8180_v33 = vld [vmem:[%s6959_s11 + $0x5f] sm:$0x1]  ;;  %v3382_v42 = vld [vmem:[%s7078_s12 + $0x6] sm:$0x1] }
 0x2d4   : > { %v8145_v63 = vpop.eup %6269  ;;  %6106 = vmatpush.xpose.msk.msrb.mxu1 %vm1759_vm7, %v3840_v19  ;;  %v4944_v40 = vsel %vm1474_vm3, %v4943_v24, %v4942_v30  ;;  %v2013_v10 = vand.u32 2147483647, %v8034_v48  ;;  %v3813_v14 = vrot.slane %v3446_v38, 7  ;;  %vm2011_vm11 = vmor %vm2009_vm15, %vm2010_vm10  ;;  %v3815_v16 = vrot.slane %v3447_v23, 6  ;;  %v8171_v48 = vld [vmem:[%s6959_s11 + $0x5b] sm:$0x1] }
 0x2d5   : > { %v4946_v3 = vsel %vm1477_vm4, %v4945_v9, %v4944_v40  ;;  %v3817_v4 = vrot.slane %v3448_v52, 5  ;;  %v3819_v17 = vrot.slane %v3449_v57, 4  ;;  %v2012_v1 = vsel %vm2011_vm11, %v8068_v29, %v2008_v8  ;;  %v3384_v45 = vld [vmem:[%s7078_s12 + $0xe] sm:$0x1]  ;;  %v3385_v24 = vld [vmem:[%s7078_s12 + $0x12] sm:$0x1] }
 0x2d6   : > { %v4948_v18 = vsel %vm1480_vm5, %v4947_v49, %v4946_v3  ;;  %vm2014_vm12 = vcmp.eq.f32.partialorder %v2013_v10, 8.507059e+37  ;;  %v3814_v44 = vsel %vm1465_vm0, %v3813_v14, %v3445_v51  ;;  %v3821_v29 = vrot.slane %v3450_v61, 3  ;;  %v3381_v9 = vld [vmem:[%s7078_s12 + $0x2] sm:$0x1]  ;;  %v3386_v49 = vld [vmem:[%s7078_s12 + $0x16] sm:$0x1] }
 0x2d7   : > { %v8174_v27 = vsel %vm1483_vm6, %v4949_v28, %v4948_v18  ;;  %v2017_v56 = vsel %vm2014_vm12, %v8051_v34, %v2012_v1  ;;  %v3816_v39 = vsel %vm1468_vm1, %v3815_v16, %v3814_v44  ;;  %v3823_v15 = vrot.slane %v3451_v5, 2  ;;  %v3383_v34 = vld [vmem:[%s7078_s12 + $0xa] sm:$0x1]  ;;  %v8199_v53 = vld [vmem:[%s7078_s12 + $0x1e] sm:$0x1] }
 0x2d8   : > { %6128 = vmatpush.xpose.msk.msrb.mxu0 %vm1759_vm7, %v8174_v27  ;;  %v2025_v43 = vmul.f32 %v7552_v7, %v2017_v56  ;;  %v3818_v50 = vsel %vm1471_vm2, %v3817_v4, %v3816_v39  ;;  %v3825_v2 = vrot.slane %v3452_v55, 1  ;;  %v4923_v23 = vrot.slane %v4544_v0, 7  ;;  %v8194_v7 = vld [vmem:[%s7078_s12 + $0x1a] sm:$0x1]  ;;  %v4536_v28 = vld [vmem:[%s6959_s11 + $0x27] sm:$0x1] }
 0x2d9   : > { %v3820_v38 = vsel %vm1474_vm3, %v3819_v17, %v3818_v50  ;;  %v4925_v47 = vrot.slane %v4545_v36, 6  ;;  %v4927_v35 = vrot.slane %v4546_v41, 5  ;;  %v4929_v57 = vrot.slane %v4547_v60, 4  ;;  %v4537_v32 = vld [vmem:[%s6959_s11 + $0x2b] sm:$0x1] }
 0x2da   : > { %v2041_v51 = vadd.f32 %v2033_v37, %v2025_v43  ;;  %6075 = vmatmul.msk.f32.gmra.mxu1 %vm1199_vm8, %v2025_v43  ;;  %v3822_v52 = vsel %vm1477_vm4, %v3821_v29, %v3820_v38  ;;  %v4931_v58 = vrot.slane %v4548_v26, 3  ;;  %v4924_v61 = vsel %vm1465_vm0, %v4923_v23, %v4543_v11  ;;  %v4538_v8 = vld [vmem:[%s6959_s11 + $0x2f] sm:$0x1]  ;;  %v4535_v14 = vld [vmem:[%s6959_s11 + $0x23] sm:$0x1] }
 0x2db   : > { %v3824_v59 = vsel %vm1480_vm5, %v3823_v15, %v3822_v52  ;;  %v4933_v19 = vrot.slane %v8171_v48, 2  ;;  %v4935_v30 = vrot.slane %v8180_v33, 1  ;;  %v4926_v55 = vsel %vm1468_vm1, %v4925_v47, %v4924_v61  ;;  %v4539_v0 = vld [vmem:[%s6959_s11 + $0x33] sm:$0x1]  ;;  %v4540_v4 = vld [vmem:[%s6959_s11 + $0x37] sm:$0x1] }
 0x2dc   : > { %2049 = vst.msk [vmem:[%s7662_s21 + $0x38] sm:$0xff] %vm1199_vm8, %v2041_v51  ;;  %v3826_v5 = vsel %vm1483_vm6, %v3825_v2, %v3824_v59  ;;  %v2970_v40 = vsel %vm1199_vm8, %v8145_v63, 0.0  ;;  %v3637_v10 = vrot.slane %v3382_v42, 7  ;;  %v4928_v36 = vsel %vm1471_vm2, %v4927_v35, %v4926_v55  ;;  %v4541_v17 = vld [vmem:[%s6959_s11 + $0x3b] sm:$0x1] }
 0x2dd   : > { %6107 = vmatpush.xpose.msk.msrb.mxu1 %vm1759_vm7, %v3826_v5  ;;  %2971 = vadd.xlane.f32.xlu0 %v2970_v40  ;;  %v3639_v41 = vrot.slane %v3383_v34, 6  ;;  %v3641_v3 = vrot.slane %v3384_v45, 5  ;;  %v3643_v16 = vrot.slane %v3385_v24, 4  ;;  %v4930_v60 = vsel %vm1474_vm3, %v4929_v57, %v4928_v36  ;;  %v4542_v11 = vld [vmem:[%s6959_s11 + $0x3f] sm:$0x1] }
 0x2de   : > { %v3638_v18 = vsel %vm1465_vm0, %v3637_v10, %v3381_v9  ;;  %v3645_v1 = vrot.slane %v3386_v49, 3  ;;  %v3647_v44 = vrot.slane %v8194_v7, 2  ;;  %v3390_v26 = vld [vmem:[%s7078_s12 + $0x26] sm:$0x1]  ;;  %v4932_v48 = vsel %vm1477_vm4, %v4931_v58, %v4930_v60  ;;  %v3391_v29 = vld [vmem:[%s7078_s12 + $0x2a] sm:$0x1] }
 0x2df   : > { %v3640_v56 = vsel %vm1468_vm1, %v3639_v41, %v3638_v18  ;;  %v3649_v37 = vrot.slane %v8199_v53, 1  ;;  %v4909_v39 = vrot.slane %v4536_v28, 7  ;;  %v3392_v33 = vld [vmem:[%s7078_s12 + $0x2e] sm:$0x1]  ;;  %v4934_v42 = vsel %vm1480_vm5, %v4933_v19, %v4932_v48  ;;  %v3393_v2 = vld [vmem:[%s7078_s12 + $0x32] sm:$0x1] }
 0x2e0   : > { %v3642_v43 = vsel %vm1471_vm2, %v3641_v3, %v3640_v56  ;;  %v4911_v50 = vrot.slane %v4537_v32, 6  ;;  %v4913_v15 = vrot.slane %v4538_v8, 5  ;;  %v3394_v34 = vld [vmem:[%s7078_s12 + $0x36] sm:$0x1]  ;;  %v8238_v45 = vsel %vm1483_vm6, %v4935_v30, %v4934_v42  ;;  %v3395_v47 = vld [vmem:[%s7078_s12 + $0x3a] sm:$0x1] }
 0x2e1   : > { %6155 = vmatpush.xpose.msk.msra.mxu1 %vm1759_vm7, %v7859_v13  ;;  %v3389_v13 = vld [vmem:[%s7078_s12 + $0x22] sm:$0x1]  ;;  %v3644_v24 = vsel %vm1474_vm3, %v3643_v16, %v3642_v43  ;;  %v4910_v38 = vsel %vm1465_vm0, %v4909_v39, %v4535_v14  ;;  %v4915_v23 = vrot.slane %v4539_v0, 4  ;;  %v8244_v35 = vld [vmem:[%s7078_s12 + $0x3e] sm:$0x1]  ;;  %6129 = vmatpush.xpose.msk.msrb.mxu0 %vm1759_vm7, %v8238_v45  ;;  %v4917_v7 = vrot.slane %v4540_v4, 3 }
 0x2e2   : > { %v3646_v9 = vsel %vm1477_vm4, %v3645_v1, %v3644_v24  ;;  %v4912_v49 = vsel %vm1468_vm1, %v4911_v50, %v4910_v38  ;;  %v4919_v51 = vrot.slane %v4541_v17, 2  ;;  %v4528_v52 = vld [vmem:[%s6959_s11 + $0x7] sm:$0x1]  ;;  %v4529_v57 = vld [vmem:[%s6959_s11 + $0xb] sm:$0x1]  ;;  %v4921_v28 = vrot.slane %v4542_v11, 1 }
 0x2e3   : > { %v3648_v58 = vsel %vm1480_vm5, %v3647_v44, %v3646_v9  ;;  %v4914_v53 = vsel %vm1471_vm2, %v4913_v15, %v4912_v49  ;;  %v3651_v59 = vrot.slane %v3390_v26, 7  ;;  %v4530_v61 = vld [vmem:[%s6959_s11 + $0xf] sm:$0x1]  ;;  %v4531_v19 = vld [vmem:[%s6959_s11 + $0x13] sm:$0x1]  ;;  %v3653_v8 = vrot.slane %v3391_v29, 6 }
 0x2e4   : > { %v3650_v30 = vsel %vm1483_vm6, %v3649_v37, %v3648_v58  ;;  %v4916_v32 = vsel %vm1474_vm3, %v4915_v23, %v4914_v53  ;;  %v3655_v5 = vrot.slane %v3392_v33, 5  ;;  %v4527_v55 = vld [vmem:[%s6959_s11 + $0x3] sm:$0x1]  ;;  %v8263_v40 = vld [vmem:[%s6959_s11 + $0x1b] sm:$0x1]  ;;  %v3657_v0 = vrot.slane %v3393_v2, 4 }
 0x2e5   : > { %6156 = vmatpush.xpose.msk.msra.mxu1 %vm1759_vm7, %v7945_v22  ;;  %v4532_v22 = vld [vmem:[%s6959_s11 + $0x17] sm:$0x1]  ;;  %v4918_v10 = vsel %vm1477_vm4, %v4917_v7, %v4916_v32  ;;  %v3652_v14 = vsel %vm1465_vm0, %v3651_v59, %v3389_v13  ;;  %v3659_v36 = vrot.slane %v3394_v34, 3  ;;  %v8269_v41 = vld [vmem:[%s6959_s11 + $0x1f] sm:$0x1]  ;;  %v3661_v17 = vrot.slane %v3395_v47, 2 }
 0x2e6   : > { %6108 = vmatmul.msk.f32.vlgmr.msrb.gmra.mxu1 %vm1759_vm7, %v3650_v30  ;;  %v3398_v3 = vld [vmem:[%s7078_s12 + $0x46] sm:$0x1]  ;;  %v4920_v16 = vsel %vm1480_vm5, %v4919_v51, %v4918_v10  ;;  %v3654_v4 = vsel %vm1468_vm1, %v3653_v8, %v3652_v14  ;;  %v3663_v60 = vrot.slane %v8244_v35, 1  ;;  %v3399_v18 = vld [vmem:[%s7078_s12 + $0x4a] sm:$0x1]  ;;  %v4895_v26 = vrot.slane %v4528_v52, 7 }
 0x2e7   : > { %v3400_v1 = vld [vmem:[%s7078_s12 + $0x4e] sm:$0x1]  ;;  %v8280_v44 = vsel %vm1483_vm6, %v4921_v28, %v4920_v16  ;;  %v3656_v11 = vsel %vm1471_vm2, %v3655_v5, %v3654_v4  ;;  %v4897_v48 = vrot.slane %v4529_v57, 6  ;;  %v3397_v56 = vld [vmem:[%s7078_s12 + $0x42] sm:$0x1]  ;;  %v4901_v33 = vrot.slane %v4531_v19, 4 }
 0x2e8   : > { %v3401_v37 = vld [vmem:[%s7078_s12 + $0x52] sm:$0x1]  ;;  %v3402_v39 = vld [vmem:[%s7078_s12 + $0x56] sm:$0x1]  ;;  %6130 = vmatpush.xpose.msk.msrb.mxu0 %vm1759_vm7, %v8280_v44  ;;  %v3658_v29 = vsel %vm1474_vm3, %v3657_v0, %v3656_v11  ;;  %v4903_v42 = vrot.slane %v4532_v22, 3  ;;  %v4896_v15 = vsel %vm1465_vm0, %v4895_v26, %v4527_v55  ;;  %v4905_v13 = vrot.slane %v8263_v40, 2 }
 0x2e9   : > { %6157 = vmatpush.xpose.msk.msra.mxu1 %vm1759_vm7, %v8021_v31  ;;  %v4899_v31 = vrot.slane %v4530_v61, 5  ;;  %v3403_v43 = vld [vmem:[%s7078_s12 + $0x5a] sm:$0x1]  ;;  %v3660_v50 = vsel %vm1477_vm4, %v3659_v36, %v3658_v29  ;;  %v4907_v2 = vrot.slane %v8269_v41, 1  ;;  %v3404_v34 = vld [vmem:[%s7078_s12 + $0x5e] sm:$0x1]  ;;  %v4898_v23 = vsel %vm1468_vm1, %v4897_v48, %v4896_v15 }
 0x2ea   : > { %v4464_v24 = vld [vmem:[%s7078_s12 + $0x7] sm:$0x1]  ;;  %v3662_v38 = vsel %vm1480_vm5, %v3661_v17, %v3660_v50  ;;  %v3665_v47 = vrot.slane %v3398_v3, 7  ;;  %v3667_v35 = vrot.slane %v3399_v18, 6  ;;  %v4463_v9 = vld [vmem:[%s7078_s12 + $0x3] sm:$0x1] }
 0x2eb   : > { %v4465_v49 = vld [vmem:[%s7078_s12 + $0xb] sm:$0x1]  ;;  %v4466_v7 = vld [vmem:[%s7078_s12 + $0xf] sm:$0x1]  ;;  %v3664_v51 = vsel %vm1483_vm6, %v3663_v60, %v3662_v38  ;;  %v4900_v52 = vsel %vm1471_vm2, %v4899_v31, %v4898_v23  ;;  %v3669_v57 = vrot.slane %v3400_v1, 5  ;;  %v3671_v58 = vrot.slane %v3401_v37, 4 }
 0x2ec   : > { %v4467_v53 = vld [vmem:[%s7078_s12 + $0x13] sm:$0x1]  ;;  %v4468_v28 = vld [vmem:[%s7078_s12 + $0x17] sm:$0x1]  ;;  %v4902_v59 = vsel %vm1474_vm3, %v4901_v33, %v4900_v52  ;;  %v3666_v61 = vsel %vm1465_vm0, %v3665_v47, %v3397_v56  ;;  %v3673_v19 = vrot.slane %v3402_v39, 3  ;;  %v3675_v30 = vrot.slane %v3403_v43, 2 }
 0x2ed   : > { %6158 = vmatpush.xpose.msk.msra.mxu1 %vm1759_vm7, %v8109_v12  ;;  %v4469_v12 = vld [vmem:[%s7078_s12 + $0x1b] sm:$0x1]  ;;  %v4470_v32 = vld [vmem:[%s7078_s12 + $0x1f] sm:$0x1]  ;;  %v4904_v8 = vsel %vm1477_vm4, %v4903_v42, %v4902_v59  ;;  %v3668_v5 = vsel %vm1468_vm1, %v3667_v35, %v3666_v61  ;;  %v3677_v55 = vrot.slane %v3404_v34, 1  ;;  %v4719_v22 = vrot.slane %v4464_v24, 7 }
 0x2ee   : > { %6109 = vmatmul.msk.f32.gmra.mxu1 %vm1759_vm7, %v3664_v51  ;;  %v3406_v40 = vld [vmem:[%s7078_s12 + $0x66] sm:$0x1]  ;;  %v3407_v10 = vld [vmem:[%s7078_s12 + $0x6a] sm:$0x1]  ;;  %v4906_v14 = vsel %vm1480_vm5, %v4905_v13, %v4904_v8  ;;  %v3670_v0 = vsel %vm1471_vm2, %v3669_v57, %v3668_v5  ;;  %v4721_v36 = vrot.slane %v4465_v49, 6  ;;  %v4723_v41 = vrot.slane %v4466_v7, 5 }
 0x2ef   : > { %v3405_v3 = vld [vmem:[%s7078_s12 + $0x62] sm:$0x1]  ;;  %v3408_v16 = vld [vmem:[%s7078_s12 + $0x6e] sm:$0x1]  ;;  %v3409_v4 = vld [vmem:[%s7078_s12 + $0x72] sm:$0x1]  ;;  %v8324_v17 = vsel %vm1483_vm6, %v4907_v2, %v4906_v14  ;;  %v3672_v60 = vsel %vm1474_vm3, %v3671_v58, %v3670_v0  ;;  %v4720_v18 = vsel %vm1465_vm0, %v4719_v22, %v4463_v9 }
 0x2f0   : > { %v4725_v1 = vrot.slane %v4467_v53, 4  ;;  %v3410_v11 = vld [vmem:[%s7078_s12 + $0x76] sm:$0x1]  ;;  %v3411_v26 = vld [vmem:[%s7078_s12 + $0x7a] sm:$0x1]  ;;  %6131 = vmatpush.xpose.msk.msrb.mxu0 %vm1759_vm7, %v8324_v17  ;;  %v3674_v48 = vsel %vm1477_vm4, %v3673_v19, %v3672_v60  ;;  %v4727_v56 = vrot.slane %v4468_v28, 3 }
 0x2f1   : > { %6159 = vmatpush.xpose.msk.msra.mxu1 %vm1759_vm7, %v8174_v27  ;;  %v4722_v27 = vsel %vm1468_vm1, %v4721_v36, %v4720_v18  ;;  %v4729_v37 = vrot.slane %v4469_v12, 2  ;;  %v3412_v39 = vld [vmem:[%s7078_s12 + $0x7e] sm:$0x1]  ;;  %v4472_v29 = vld [vmem:[%s7078_s12 + $0x27] sm:$0x1]  ;;  %v3676_v31 = vsel %vm1480_vm5, %v3675_v30, %v3674_v48  ;;  %v4731_v42 = vrot.slane %v4470_v32, 1 }
 0x2f2   : > { %v4724_v33 = vsel %vm1471_vm2, %v4723_v41, %v4722_v27  ;;  %v3679_v43 = vrot.slane %v3406_v40, 7  ;;  %v4473_v50 = vld [vmem:[%s7078_s12 + $0x2b] sm:$0x1]  ;;  %v4474_v15 = vld [vmem:[%s7078_s12 + $0x2f] sm:$0x1]  ;;  %v3678_v13 = vsel %vm1483_vm6, %v3677_v55, %v3676_v31  ;;  %v3681_v34 = vrot.slane %v3407_v10, 6 }
 0x2f3   : > { %v4726_v2 = vsel %vm1474_vm3, %v4725_v1, %v4724_v33  ;;  %v3683_v24 = vrot.slane %v3408_v16, 5  ;;  %v4471_v38 = vld [vmem:[%s7078_s12 + $0x23] sm:$0x1]  ;;  %v4475_v23 = vld [vmem:[%s7078_s12 + $0x33] sm:$0x1]  ;;  %v3685_v49 = vrot.slane %v3409_v4, 4 }
 0x2f4   : > { %v4476_v47 = vld [vmem:[%s7078_s12 + $0x37] sm:$0x1]  ;;  %v4728_v35 = vsel %vm1477_vm4, %v4727_v56, %v4726_v2  ;;  %v3680_v9 = vsel %vm1465_vm0, %v3679_v43, %v3405_v3  ;;  %v3687_v7 = vrot.slane %v3410_v11, 3  ;;  %v4477_v51 = vld [vmem:[%s7078_s12 + $0x3b] sm:$0x1]  ;;  %v3689_v53 = vrot.slane %v3411_v26, 2 }
 0x2f5   : > { %6160 = vmatpush.xpose.msk.msra.mxu1 %vm1759_vm7, %v8238_v45  ;;  %v8351_v52 = vld [vmem:[%s7078_s12 + $0x3f] sm:$0x1]  ;;  %v4730_v57 = vsel %vm1480_vm5, %v4729_v37, %v4728_v35  ;;  %v3682_v58 = vsel %vm1468_vm1, %v3681_v34, %v3680_v9  ;;  %v3691_v28 = vrot.slane %v3412_v39, 1  ;;  %v3414_v45 = vld [vmem:[%s7078_s12 + $0x86] sm:$0x1]  ;;  %v4733_v30 = vrot.slane %v4472_v29, 7 }
 0x2f6   : > { %v3415_v59 = vld [vmem:[%s7078_s12 + $0x8a] sm:$0x1]  ;;  %6110 = vmatmul.msk.f32.gmra.mxu1 %vm1759_vm7, %v3678_v13  ;;  %v4732_v61 = vsel %vm1483_vm6, %v4731_v42, %v4730_v57  ;;  %v3684_v19 = vsel %vm1471_vm2, %v3683_v24, %v3682_v58  ;;  %v4735_v12 = vrot.slane %v4473_v50, 6  ;;  %v3413_v32 = vld [vmem:[%s7078_s12 + $0x82] sm:$0x1]  ;;  %v4737_v22 = vrot.slane %v4474_v15, 5 }
 0x2f7   : > { %v3416_v8 = vld [vmem:[%s7078_s12 + $0x8e] sm:$0x1]  ;;  %v3417_v5 = vld [vmem:[%s7078_s12 + $0x92] sm:$0x1]  ;;  %6132 = vmatmul.msk.f32.vlgmr.msrb.gmra.mxu0 %vm1759_vm7, %v4732_v61  ;;  %v3686_v55 = vsel %vm1474_vm3, %v3685_v49, %v3684_v19  ;;  %v4739_v40 = vrot.slane %v4475_v23, 4  ;;  %v4741_v10 = vrot.slane %v4476_v47, 3  ;;  %v4734_v36 = vsel %vm1465_vm0, %v4733_v30, %v4471_v38 }
 0x2f8   : > { %v3418_v14 = vld [vmem:[%s7078_s12 + $0x96] sm:$0x1]  ;;  %v3688_v0 = vsel %vm1477_vm4, %v3687_v7, %v3686_v55  ;;  %v4743_v41 = vrot.slane %v4477_v51, 2  ;;  %v4745_v3 = vrot.slane %v8351_v52, 1  ;;  %v3419_v16 = vld [vmem:[%s7078_s12 + $0x9a] sm:$0x1]  ;;  %v4736_v18 = vsel %vm1468_vm1, %v4735_v12, %v4734_v36 }
 0x2f9   : > { %6161 = vmatpush.xpose.msk.msra.mxu1 %vm1759_vm7, %v8280_v44  ;;  %v8373_v4 = vld [vmem:[%s7078_s12 + $0x9e] sm:$0x1]  ;;  %v3690_v60 = vsel %vm1480_vm5, %v3689_v53, %v3688_v0  ;;  %v3693_v1 = vrot.slane %v3414_v45, 7  ;;  %v3695_v44 = vrot.slane %v3415_v59, 6  ;;  %v4479_v11 = vld [vmem:[%s7078_s12 + $0x43] sm:$0x1]  ;;  %v4738_v27 = vsel %vm1471_vm2, %v4737_v22, %v4736_v18 }
 0x2fa   : > { %v4480_v26 = vld [vmem:[%s7078_s12 + $0x47] sm:$0x1]  ;;  %v3692_v48 = vsel %vm1483_vm6, %v3691_v28, %v3690_v60  ;;  %v3697_v56 = vrot.slane %v3416_v8, 5  ;;  %v3699_v37 = vrot.slane %v3417_v5, 4  ;;  %v4481_v39 = vld [vmem:[%s7078_s12 + $0x4b] sm:$0x1]  ;;  %v4740_v31 = vsel %vm1474_vm3, %v4739_v40, %v4738_v27 }
 0x2fb   : > { %v4482_v29 = vld [vmem:[%s7078_s12 + $0x4f] sm:$0x1]  ;;  %v3694_v33 = vsel %vm1465_vm0, %v3693_v1, %v3413_v32  ;;  %v3701_v42 = vrot.slane %v3418_v14, 3  ;;  %v3703_v43 = vrot.slane %v3419_v16, 2  ;;  %v4483_v50 = vld [vmem:[%s7078_s12 + $0x53] sm:$0x1]  ;;  %v4742_v13 = vsel %vm1477_vm4, %v4741_v10, %v4740_v31 }
 0x2fc   : > { %v4484_v15 = vld [vmem:[%s7078_s12 + $0x57] sm:$0x1]  ;;  %v3696_v2 = vsel %vm1468_vm1, %v3695_v44, %v3694_v33  ;;  %v3705_v34 = vrot.slane %v8373_v4, 1  ;;  %v4485_v24 = vld [vmem:[%s7078_s12 + $0x5b] sm:$0x1]  ;;  %v4747_v23 = vrot.slane %v4480_v26, 7  ;;  %v4744_v47 = vsel %vm1480_vm5, %v4743_v41, %v4742_v13 }
 0x2fd   : > { %6162 = vmatpush.xpose.msk.msra.mxu1 %vm1759_vm7, %v8324_v17  ;;  %v4486_v38 = vld [vmem:[%s7078_s12 + $0x5f] sm:$0x1]  ;;  %v3698_v35 = vsel %vm1471_vm2, %v3697_v56, %v3696_v2  ;;  %v4749_v9 = vrot.slane %v4481_v39, 6  ;;  %v4751_v49 = vrot.slane %v4482_v29, 5  ;;  %v3421_v7 = vld [vmem:[%s7078_s12 + $0xa2] sm:$0x1]  ;;  %v4746_v52 = vsel %vm1483_vm6, %v4745_v3, %v4744_v47 }
 0x2fe   : > { %v3422_v17 = vld [vmem:[%s7078_s12 + $0xa6] sm:$0x1]  ;;  %v3423_v51 = vld [vmem:[%s7078_s12 + $0xaa] sm:$0x1]  ;;  %6111 = vmatmul.msk.f32.gmra.mxu1 %vm1759_vm7, %v3692_v48  ;;  %v3700_v57 = vsel %vm1474_vm3, %v3699_v37, %v3698_v35  ;;  %v4748_v58 = vsel %vm1465_vm0, %v4747_v23, %v4479_v11  ;;  %v4753_v53 = vrot.slane %v4483_v50, 4  ;;  %v4755_v19 = vrot.slane %v4484_v15, 3 }
 0x2ff   : > { %v3424_v28 = vld [vmem:[%s7078_s12 + $0xae] sm:$0x1]  ;;  %v3425_v45 = vld [vmem:[%s7078_s12 + $0xb2] sm:$0x1]  ;;  %6133 = vmatmul.msk.f32.gmra.mxu0 %vm1759_vm7, %v4746_v52  ;;  %v3702_v59 = vsel %vm1477_vm4, %v3701_v42, %v3700_v57  ;;  %v4750_v61 = vsel %vm1468_vm1, %v4749_v9, %v4748_v58  ;;  %v4757_v30 = vrot.slane %v4485_v24, 2  ;;  %v4759_v55 = vrot.slane %v4486_v38, 1 }
 0x300   : > { %v3426_v12 = vld [vmem:[%s7078_s12 + $0xb6] sm:$0x1]  ;;  %v3427_v32 = vld [vmem:[%s7078_s12 + $0xba] sm:$0x1]  ;;  %v3704_v8 = vsel %vm1480_vm5, %v3703_v43, %v3702_v59  ;;  %v4752_v5 = vsel %vm1471_vm2, %v4751_v49, %v4750_v61  ;;  %v3428_v22 = vld [vmem:[%s7078_s12 + $0xbe] sm:$0x1] }
 0x301   : > { %v3707_v40 = vrot.slane %v3422_v17, 7  ;;  %v4488_v10 = vld [vmem:[%s7078_s12 + $0x67] sm:$0x1]  ;;  %v4489_v14 = vld [vmem:[%s7078_s12 + $0x6b] sm:$0x1]  ;;  %v4754_v0 = vsel %vm1474_vm3, %v4753_v53, %v4752_v5  ;;  %v3709_v36 = vrot.slane %v3423_v51, 6  ;;  %v3706_v48 = vsel %vm1483_vm6, %v3705_v34, %v3704_v8 }
 0x302   : > { %v3711_v41 = vrot.slane %v3424_v28, 5  ;;  %v4487_v3 = vld [vmem:[%s7078_s12 + $0x63] sm:$0x1]  ;;  %v4490_v16 = vld [vmem:[%s7078_s12 + $0x6f] sm:$0x1]  ;;  %v4756_v60 = vsel %vm1477_vm4, %v4755_v19, %v4754_v0  ;;  %v3713_v1 = vrot.slane %v3425_v45, 4 }
 0x303   : > { %v4491_v4 = vld [vmem:[%s7078_s12 + $0x73] sm:$0x1]  ;;  %v3708_v18 = vsel %vm1465_vm0, %v3707_v40, %v3421_v7  ;;  %v3715_v44 = vrot.slane %v3426_v12, 3  ;;  %v4492_v11 = vld [vmem:[%s7078_s12 + $0x77] sm:$0x1]  ;;  %v4758_v27 = vsel %vm1480_vm5, %v4757_v30, %v4756_v60  ;;  %v3717_v37 = vrot.slane %v3427_v32, 2 }
 0x304   : > { %v4493_v26 = vld [vmem:[%s7078_s12 + $0x7b] sm:$0x1]  ;;  %v3710_v56 = vsel %vm1468_vm1, %v3709_v36, %v3708_v18  ;;  %v4494_v39 = vld [vmem:[%s7078_s12 + $0x7f] sm:$0x1]  ;;  %v3430_v29 = vld [vmem:[%s7078_s12 + $0xc6] sm:$0x1]  ;;  %v4760_v31 = vsel %vm1483_vm6, %v4759_v55, %v4758_v27 }
 0x305   : > { %v3712_v33 = vsel %vm1471_vm2, %v3711_v41, %v3710_v56  ;;  %v4761_v42 = vrot.slane %v4488_v10, 7  ;;  %v4763_v43 = vrot.slane %v4489_v14, 6  ;;  %v3429_v50 = vld [vmem:[%s7078_s12 + $0xc2] sm:$0x1]  ;;  %v3431_v15 = vld [vmem:[%s7078_s12 + $0xca] sm:$0x1] }
 0x306   : > { %v3432_v13 = vld [vmem:[%s7078_s12 + $0xce] sm:$0x1]  ;;  %v3714_v2 = vsel %vm1474_vm3, %v3713_v1, %v3712_v33  ;;  %v3719_v34 = vrot.slane %v3428_v22, 1  ;;  %v4765_v24 = vrot.slane %v4490_v16, 5  ;;  %v4767_v38 = vrot.slane %v4491_v4, 4  ;;  %6112 = vmatmul.msk.f32.gmra.mxu1 %vm1759_vm7, %v3706_v48  ;;  %s6375_s11 = sshra.s32 %s5735_s25, 4  ;;  %s6376_s11 = int_to_ptr.hbm [resolvable:$true] %s6375_s11 }
 0x307   : > { %v3433_v23 = vld [vmem:[%s7078_s12 + $0xd2] sm:$0x1]  ;;  %v3716_v47 = vsel %vm1477_vm4, %v3715_v44, %v3714_v2  ;;  %v4762_v35 = vsel %vm1465_vm0, %v4761_v42, %v4487_v3  ;;  %v4769_v9 = vrot.slane %v4492_v11, 3  ;;  %v4771_v49 = vrot.slane %v4493_v26, 2  ;;  %v3434_v7 = vld [vmem:[%s7078_s12 + $0xd6] sm:$0x1]  ;;  %6134 = vmatmul.msk.f32.gmra.mxu0 %vm1759_vm7, %v4760_v31  ;;  %p6382_p3 = scmp.lt.s32.totalorder %s6376_s11, %s9725_s4 }
 0x308   : > { %v3435_v17 = vld [vmem:[%s7078_s12 + $0xda] sm:$0x1]  ;;  %v3718_v51 = vsel %vm1480_vm5, %v3717_v37, %v3716_v47  ;;  %v4764_v52 = vsel %vm1468_vm1, %v4763_v43, %v4762_v35  ;;  %v3721_v57 = vrot.slane %v3430_v29, 7  ;;  %v3723_v58 = vrot.slane %v3431_v15, 6  ;;  %v4495_v53 = vld [vmem:[%s7078_s12 + $0x83] sm:$0x1] }
 0x309   : > { %v4496_v28 = vld [vmem:[%s7078_s12 + $0x87] sm:$0x1]  ;;  %v4497_v45 = vld [vmem:[%s7078_s12 + $0x8b] sm:$0x1]  ;;  %v4766_v59 = vsel %vm1471_vm2, %v4765_v24, %v4764_v52  ;;  %v4773_v61 = vrot.slane %v4494_v39, 1  ;;  %v3725_v19 = vrot.slane %v3432_v13, 5  ;;  %v3720_v32 = vsel %vm1483_vm6, %v3719_v34, %v3718_v51 }
 0x30a   : > { %v3727_v30 = vrot.slane %v3433_v23, 4  ;;  %v4498_v12 = vld [vmem:[%s7078_s12 + $0x8f] sm:$0x1]  ;;  %v4768_v8 = vsel %vm1474_vm3, %v4767_v38, %v4766_v59  ;;  %v3436_v5 = vld [vmem:[%s7078_s12 + $0xde] sm:$0x1]  ;;  %v3722_v55 = vsel %vm1465_vm0, %v3721_v57, %v3429_v50  ;;  %v3729_v22 = vrot.slane %v3434_v7, 3 }
 0x30b   : > { %v4499_v40 = vld [vmem:[%s7078_s12 + $0x93] sm:$0x1]  ;;  %v4500_v10 = vld [vmem:[%s7078_s12 + $0x97] sm:$0x1]  ;;  %v4770_v14 = vsel %vm1477_vm4, %v4769_v9, %v4768_v8  ;;  %v3724_v0 = vsel %vm1468_vm1, %v3723_v58, %v3722_v55  ;;  %v3731_v36 = vrot.slane %v3435_v17, 2  ;;  %v4775_v16 = vrot.slane %v4496_v28, 7 }
 0x30c   : > { %v4501_v41 = vld [vmem:[%s7078_s12 + $0x9b] sm:$0x1]  ;;  %v4502_v3 = vld [vmem:[%s7078_s12 + $0x9f] sm:$0x1]  ;;  %v4772_v4 = vsel %vm1480_vm5, %v4771_v49, %v4770_v14  ;;  %v3726_v60 = vsel %vm1471_vm2, %v3725_v19, %v3724_v0  ;;  %v4777_v18 = vrot.slane %v4497_v45, 6  ;;  %v4779_v1 = vrot.slane %v4498_v12, 5 }
 0x30d   : > { %v3437_v44 = vld [vmem:[%s7078_s12 + $0xe2] sm:$0x1]  ;;  %v3438_v11 = vld [vmem:[%s7078_s12 + $0xe6] sm:$0x1]  ;;  %v4774_v26 = vsel %vm1483_vm6, %v4773_v61, %v4772_v4  ;;  %v3728_v48 = vsel %vm1474_vm3, %v3727_v30, %v3726_v60  ;;  %v4776_v27 = vsel %vm1465_vm0, %v4775_v16, %v4495_v53  ;;  %v4781_v56 = vrot.slane %v4499_v40, 4 }
 0x30e   : > { %v3439_v37 = vld [vmem:[%s7078_s12 + $0xea] sm:$0x1]  ;;  %v3440_v39 = vld [vmem:[%s7078_s12 + $0xee] sm:$0x1]  ;;  %v3730_v29 = vsel %vm1477_vm4, %v3729_v22, %v3728_v48  ;;  %v4778_v31 = vsel %vm1468_vm1, %v4777_v18, %v4776_v27  ;;  %v4783_v33 = vrot.slane %v4500_v10, 3  ;;  %v4785_v42 = vrot.slane %v4501_v41, 2  ;;  %6113 = vmatmul.msk.f32.gmra.mxu1 %vm1759_vm7, %v3720_v32 }
 0x30f   : > { %v3441_v43 = vld [vmem:[%s7078_s12 + $0xf2] sm:$0x1]  ;;  %v3442_v50 = vld [vmem:[%s7078_s12 + $0xf6] sm:$0x1]  ;;  %v3732_v15 = vsel %vm1480_vm5, %v3731_v36, %v3730_v29  ;;  %v3733_v13 = vrot.slane %v3436_v5, 1  ;;  %v4780_v2 = vsel %vm1471_vm2, %v4779_v1, %v4778_v31  ;;  %v3735_v24 = vrot.slane %v3438_v11, 7  ;;  %6135 = vmatmul.msk.f32.gmra.mxu0 %vm1759_vm7, %v4774_v26 }
 0x310   : > { %v3443_v34 = vld [vmem:[%s7078_s12 + $0xfa] sm:$0x1]  ;;  %v4504_v38 = vld [vmem:[%s7078_s12 + $0xa7] sm:$0x1]  ;;  %v4782_v23 = vsel %vm1474_vm3, %v4781_v56, %v4780_v2  ;;  %v4787_v47 = vrot.slane %v4502_v3, 1  ;;  %v3737_v35 = vrot.slane %v3439_v37, 6 }
 0x311   : > { %v3739_v9 = vrot.slane %v3440_v39, 5  ;;  %v4505_v49 = vld [vmem:[%s7078_s12 + $0xab] sm:$0x1]  ;;  %v4784_v7 = vsel %vm1477_vm4, %v4783_v33, %v4782_v23  ;;  %v3736_v17 = vsel %vm1465_vm0, %v3735_v24, %v3437_v44  ;;  %v3741_v51 = vrot.slane %v3441_v43, 4  ;;  %v4506_v57 = vld [vmem:[%s7078_s12 + $0xaf] sm:$0x1] }
 0x312   : > { %v3743_v52 = vrot.slane %v3442_v50, 3  ;;  %v4507_v58 = vld [vmem:[%s7078_s12 + $0xb3] sm:$0x1]  ;;  %v4786_v53 = vsel %vm1480_vm5, %v4785_v42, %v4784_v7  ;;  %v3444_v28 = vld [vmem:[%s7078_s12 + $0xfe] sm:$0x1]  ;;  %v3738_v45 = vsel %vm1468_vm1, %v3737_v35, %v3736_v17  ;;  %v3734_v30 = vsel %vm1483_vm6, %v3733_v13, %v3732_v15 }
 0x313   : > { %v4503_v59 = vld [vmem:[%s7078_s12 + $0xa3] sm:$0x1]  ;;  %v4508_v61 = vld [vmem:[%s7078_s12 + $0xb7] sm:$0x1]  ;;  %v4509_v19 = vld [vmem:[%s7078_s12 + $0xbb] sm:$0x1]  ;;  %v3740_v12 = vsel %vm1471_vm2, %v3739_v9, %v3738_v45  ;;  %v4788_v41 = vsel %vm1483_vm6, %v4787_v47, %v4786_v53 }
 0x314   : > { %v4510_v32 = vld [vmem:[%s7078_s12 + $0xbf] sm:$0x1]  ;;  %v4789_v8 = vrot.slane %v4504_v38, 7  ;;  %v4791_v5 = vrot.slane %v4505_v49, 6  ;;  %v4512_v55 = vld [vmem:[%s7078_s12 + $0xc7] sm:$0x1]  ;;  %v3742_v40 = vsel %vm1474_vm3, %v3741_v51, %v3740_v12 }
 0x315   : > { %v4513_v22 = vld [vmem:[%s7078_s12 + $0xcb] sm:$0x1]  ;;  %v3745_v10 = vrot.slane %v3443_v34, 2  ;;  %v4793_v14 = vrot.slane %v4506_v57, 5  ;;  %v4795_v0 = vrot.slane %v4507_v58, 4  ;;  %v3744_v3 = vsel %vm1477_vm4, %v3743_v52, %v3742_v40 }
 0x316   : > { %v4514_v36 = vld [vmem:[%s7078_s12 + $0xcf] sm:$0x1]  ;;  %v4790_v16 = vsel %vm1465_vm0, %v4789_v8, %v4503_v59  ;;  %v4797_v4 = vrot.slane %v4508_v61, 3  ;;  %v4511_v60 = vld [vmem:[%s7078_s12 + $0xc3] sm:$0x1]  ;;  %v4799_v44 = vrot.slane %v4509_v19, 2  ;;  %6114 = vmatmul.msk.f32.gmra.mxu1 %vm1759_vm7, %v3734_v30 }
 0x317   : > { %v4515_v18 = vld [vmem:[%s7078_s12 + $0xd3] sm:$0x1]  ;;  %v4792_v1 = vsel %vm1468_vm1, %v4791_v5, %v4790_v16  ;;  %v4516_v11 = vld [vmem:[%s7078_s12 + $0xd7] sm:$0x1]  ;;  %v4803_v26 = vrot.slane %v4512_v55, 7  ;;  %v4805_v48 = vrot.slane %v4513_v22, 6  ;;  %6136 = vmatmul.msk.f32.gmra.mxu0 %vm1759_vm7, %v4788_v41  ;;  %v3746_v2 = vsel %vm1480_vm5, %v3745_v10, %v3744_v3 }
 0x318   : > { %v4520_v27 = vld [vmem:[%s7078_s12 + $0xe7] sm:$0x1]  ;;  %v3747_v56 = vrot.slane %v3444_v28, 1  ;;  %v4794_v37 = vsel %vm1471_vm2, %v4793_v14, %v4792_v1  ;;  %v4807_v39 = vrot.slane %v4514_v36, 5  ;;  %v4521_v29 = vld [vmem:[%s7078_s12 + $0xeb] sm:$0x1] }
 0x319   : > { %v4522_v31 = vld [vmem:[%s7078_s12 + $0xef] sm:$0x1]  ;;  %v4796_v33 = vsel %vm1474_vm3, %v4795_v0, %v4794_v37  ;;  %v4801_v42 = vrot.slane %v4510_v32, 1  ;;  %v4804_v43 = vsel %vm1465_vm0, %v4803_v26, %v4511_v60  ;;  %v4809_v50 = vrot.slane %v4515_v18, 4  ;;  %v4519_v15 = vld [vmem:[%s7078_s12 + $0xe3] sm:$0x1] }
 0x31a   : > { %v4523_v13 = vld [vmem:[%s7078_s12 + $0xf3] sm:$0x1]  ;;  %v4798_v34 = vsel %vm1477_vm4, %v4797_v4, %v4796_v33  ;;  %v4806_v24 = vsel %vm1468_vm1, %v4805_v48, %v4804_v43  ;;  %v4524_v38 = vld [vmem:[%s7078_s12 + $0xf7] sm:$0x1]  ;;  %v4817_v23 = vrot.slane %v4520_v27, 7  ;;  %v8518_v35 = vpop.f32.mrf.mxu1  ;;  %v4819_v7 = vrot.slane %v4521_v29, 6 }
 0x31b   : > { %v4800_v47 = vsel %vm1480_vm5, %v4799_v44, %v4798_v34  ;;  %v4808_v9 = vsel %vm1471_vm2, %v4807_v39, %v4806_v24  ;;  %v4525_v49 = vld [vmem:[%s7078_s12 + $0xfb] sm:$0x1]  ;;  %v4821_v17 = vrot.slane %v4522_v31, 5  ;;  %v4811_v52 = vrot.slane %v4516_v11, 3  ;;  %v4526_v19 = vld [vmem:[%s7078_s12 + $0xff] sm:$0x1] }
 0x31c   : > { %v4517_v51 = vld [vmem:[%s7078_s12 + $0xdb] sm:$0x1]  ;;  %v4818_v57 = vsel %vm1465_vm0, %v4817_v23, %v4519_v15  ;;  %v4823_v58 = vrot.slane %v4523_v13, 4  ;;  %v3748_v53 = vsel %vm1483_vm6, %v3747_v56, %v3746_v2  ;;  %v4810_v28 = vsel %vm1474_vm3, %v4809_v50, %v4808_v9  ;;  %v4518_v32 = vld [vmem:[%s7078_s12 + $0xdf] sm:$0x1]  ;;  %s6377_s12 = scalar_lea.hbm %s6376_s11, 64 }
 0x31d   : > { %v4820_v45 = vsel %vm1468_vm1, %v4819_v7, %v4818_v57  ;;  %v4825_v59 = vrot.slane %v4524_v38, 3  ;;  %v4802_v61 = vsel %vm1483_vm6, %v4801_v42, %v4800_v47  ;;  %v4827_v12 = vrot.slane %v4525_v49, 2  ;;  %v2484_v16 = vld [vmem:[%s7561_s13 + $0xe5] sm:$0x1]  ;;  %v2485_v4 = vld [vmem:[%s7561_s13 + $0xe9] sm:$0x1]  ;;  %p6378_p0 = scmp.ne.s32.totalorder %s6376_s11, %s6377_s12 }
 0x31e   : > { %v4822_v30 = vsel %vm1471_vm2, %v4821_v17, %v4820_v45  ;;  %v4813_v8 = vrot.slane %v4517_v51, 2  ;;  %6115 = vmatmul.msk.f32.gmra.mxu1 %vm1759_vm7, %v3748_v53  ;;  %v4812_v55 = vsel %vm1477_vm4, %v4811_v52, %v4810_v28  ;;  %v4829_v40 = vrot.slane %v4526_v19, 1  ;;  %v2483_v1 = vld [vmem:[%s7561_s13 + $0xe1] sm:$0x1]  ;;  %v2486_v44 = vld [vmem:[%s7561_s13 + $0xed] sm:$0x1] }
 0x31f   : > { %v4824_v5 = vsel %vm1474_vm3, %v4823_v58, %v4822_v30  ;;  %6137 = vmatmul.msk.f32.gmra.mxu0 %vm1759_vm7, %v4802_v61  ;;  %v4815_v10 = vrot.slane %v4518_v32, 1  ;;  %v3294_v60 = vrot.slane %v2484_v16, 7  ;;  %v2487_v11 = vld [vmem:[%s7561_s13 + $0xf1] sm:$0x1]  ;;  %v2488_v26 = vld [vmem:[%s7561_s13 + $0xf5] sm:$0x1]  ;;  %p6379_p1 = pnand %p6378_p0, %p6515_p5 }
 0x320   : > { %v4826_v22 = vsel %vm1477_vm4, %v4825_v59, %v4824_v5  ;;  %v4814_v0 = vsel %vm1480_vm5, %v4813_v8, %v4812_v55  ;;  %v2489_v48 = vld [vmem:[%s7561_s13 + $0xf9] sm:$0x1]  ;;  %v2490_v27 = vld [vmem:[%s7561_s13 + $0xfd] sm:$0x1]  ;;  %v3296_v37 = vrot.slane %v2485_v4, 6  ;;  %v3298_v39 = vrot.slane %v2486_v44, 5 }
 0x321   : > { %v4828_v14 = vsel %vm1480_vm5, %v4827_v12, %v4826_v22  ;;  %v4816_v3 = vsel %vm1483_vm6, %v4815_v10, %v4814_v0  ;;  %v3295_v56 = vsel %vm1465_vm0, %v3294_v60, %v2483_v1  ;;  %v3300_v29 = vrot.slane %v2487_v11, 4  ;;  %v2475_v31 = vld [vmem:[%s7561_s13 + $0xc1] sm:$0x1]  ;;  %v2476_v43 = vld [vmem:[%s7561_s13 + $0xc5] sm:$0x1]  ;;  %p6380_p2 = pneg %p6379_p1 }
 0x322   : > { %v8538_v36 = vpop.f32.mrf.mxu1  ;;  %v4830_v41 = vsel %vm1483_vm6, %v4829_v40, %v4828_v14  ;;  %v3302_v33 = vrot.slane %v2488_v26, 3  ;;  %v3304_v42 = vrot.slane %v2489_v48, 2  ;;  %v2477_v50 = vld [vmem:[%s7561_s13 + $0xc9] sm:$0x1]  ;;  %v3297_v15 = vsel %vm1468_vm1, %v3296_v37, %v3295_v56  ;;  %v2478_v13 = vld [vmem:[%s7561_s13 + $0xcd] sm:$0x1] }
 0x323   : > { %v2479_v2 = vld [vmem:[%s7561_s13 + $0xd1] sm:$0x1]  ;;  %v2480_v34 = vld [vmem:[%s7561_s13 + $0xd5] sm:$0x1]  ;;  %v3299_v24 = vsel %vm1471_vm2, %v3298_v39, %v3297_v15  ;;  %v3306_v38 = vrot.slane %v2490_v27, 1  ;;  %v3280_v47 = vrot.slane %v2476_v43, 7 }
 0x324   : > { %v2481_v23 = vld [vmem:[%s7561_s13 + $0xd9] sm:$0x1]  ;;  %v3282_v9 = vrot.slane %v2477_v50, 6  ;;  %v3301_v49 = vsel %vm1474_vm3, %v3300_v29, %v3299_v24  ;;  %v2482_v7 = vld [vmem:[%s7561_s13 + $0xdd] sm:$0x1]  ;;  %v3284_v17 = vrot.slane %v2478_v13, 5 }
 0x325   : > { %v3286_v51 = vrot.slane %v2479_v2, 4  ;;  %v3288_v52 = vrot.slane %v2480_v34, 3  ;;  %v3303_v57 = vsel %vm1477_vm4, %v3302_v33, %v3301_v49  ;;  %v3281_v58 = vsel %vm1465_vm0, %v3280_v47, %v2475_v31  ;;  %v2467_v53 = vld [vmem:[%s7561_s13 + $0xa1] sm:$0x1]  ;;  %v2468_v28 = vld [vmem:[%s7561_s13 + $0xa5] sm:$0x1] }
 0x326   : > { %6139 = vmatmul.msk.f32.vlgmr.msra.gmra.mxu1 %vm1759_vm7, %v4830_v41  ;;  %v2469_v45 = vld [vmem:[%s7561_s13 + $0xa9] sm:$0x1]  ;;  %v3305_v59 = vsel %vm1480_vm5, %v3304_v42, %v3303_v57  ;;  %v3283_v61 = vsel %vm1468_vm1, %v3282_v9, %v3281_v58  ;;  %v3290_v19 = vrot.slane %v2481_v23, 2  ;;  %v2470_v30 = vld [vmem:[%s7561_s13 + $0xad] sm:$0x1]  ;;  %v3292_v55 = vrot.slane %v2482_v7, 1 }
 0x327   : > { %6138 = vmatmul.msk.f32.gmra.mxu0 %vm1759_vm7, %v4816_v3  ;;  %v2471_v12 = vld [vmem:[%s7561_s13 + $0xb1] sm:$0x1]  ;;  %v3307_v8 = vsel %vm1483_vm6, %v3306_v38, %v3305_v59  ;;  %v3285_v5 = vsel %vm1471_vm2, %v3284_v17, %v3283_v61  ;;  %v2472_v22 = vld [vmem:[%s7561_s13 + $0xb5] sm:$0x1]  ;;  %v2473_v40 = vld [vmem:[%s7561_s13 + $0xb9] sm:$0x1] }
 0x328   : > { %3348 = vmatpush.msra.mxu3 %v3307_v8  ;;  %v3287_v14 = vsel %vm1474_vm3, %v3286_v51, %v3285_v5  ;;  %v2474_v0 = vld [vmem:[%s7561_s13 + $0xbd] sm:$0x1]  ;;  %v3266_v41 = vrot.slane %v2468_v28, 7  ;;  %v3268_v3 = vrot.slane %v2469_v45, 6  ;;  %v3270_v16 = vrot.slane %v2470_v30, 5 }
 0x329   : > { %v3289_v60 = vsel %vm1477_vm4, %v3288_v52, %v3287_v14  ;;  %v3272_v1 = vrot.slane %v2471_v12, 4  ;;  %v2459_v44 = vld [vmem:[%s7561_s13 + $0x81] sm:$0x1]  ;;  %v2460_v11 = vld [vmem:[%s7561_s13 + $0x85] sm:$0x1]  ;;  %v3274_v27 = vrot.slane %v2472_v22, 3 }
 0x32a   : > { %v8546_v18 = vpop.f32.mrf.mxu1  ;;  %v3291_v26 = vsel %vm1480_vm5, %v3290_v19, %v3289_v60  ;;  %v3267_v48 = vsel %vm1465_vm0, %v3266_v41, %v2467_v53  ;;  %v2461_v56 = vld [vmem:[%s7561_s13 + $0x89] sm:$0x1]  ;;  %v2462_v37 = vld [vmem:[%s7561_s13 + $0x8d] sm:$0x1]  ;;  %v3276_v31 = vrot.slane %v2473_v40, 2  ;;  %v3278_v50 = vrot.slane %v2474_v0, 1 }
 0x32b   : > { %v3293_v39 = vsel %vm1483_vm6, %v3292_v55, %v3291_v26  ;;  %v3269_v29 = vsel %vm1468_vm1, %v3268_v3, %v3267_v48  ;;  %v2463_v33 = vld [vmem:[%s7561_s13 + $0x91] sm:$0x1]  ;;  %v2464_v42 = vld [vmem:[%s7561_s13 + $0x95] sm:$0x1]  ;;  %v2465_v15 = vld [vmem:[%s7561_s13 + $0x99] sm:$0x1] }
 0x32c   : > { %v8581_v10 = vpop.xlane.xlu2 %2929  ;;  %v8585_v4 = vpop.xlane.xlu1 %2926  ;;  %3349 = vmatpush.msra.mxu3 %v3293_v39  ;;  %v3271_v43 = vsel %vm1471_vm2, %v3270_v16, %v3269_v29  ;;  %v3252_v13 = vrot.slane %v2460_v11, 7  ;;  %v3254_v2 = vrot.slane %v2461_v56, 6  ;;  %v2466_v24 = vld [vmem:[%s7561_s13 + $0x9d] sm:$0x1]  ;;  %v3256_v38 = vrot.slane %v2462_v37, 5 }
 0x32d   : > { %v3273_v34 = vsel %vm1474_vm3, %v3272_v1, %v3271_v43  ;;  %v3258_v23 = vrot.slane %v2463_v33, 4  ;;  %v3260_v47 = vrot.slane %v2464_v42, 3  ;;  %v2451_v7 = vld [vmem:[%s7561_s13 + $0x61] sm:$0x1]  ;;  %v2452_v17 = vld [vmem:[%s7561_s13 + $0x65] sm:$0x1] }
 0x32e   : > { %v3275_v9 = vsel %vm1477_vm4, %v3274_v27, %v3273_v34  ;;  %v3253_v49 = vsel %vm1465_vm0, %v3252_v13, %v2459_v44  ;;  %v2453_v51 = vld [vmem:[%s7561_s13 + $0x69] sm:$0x1]  ;;  %v3262_v58 = vrot.slane %v2465_v15, 2  ;;  %v2454_v53 = vld [vmem:[%s7561_s13 + $0x6d] sm:$0x1]  ;;  %v3238_v30 = vrot.slane %v2452_v17, 7 }
 0x32f   : > { %v3277_v52 = vsel %vm1480_vm5, %v3276_v31, %v3275_v9  ;;  %v3255_v57 = vsel %vm1468_vm1, %v3254_v2, %v3253_v49  ;;  %v2455_v28 = vld [vmem:[%s7561_s13 + $0x71] sm:$0x1]  ;;  %v2456_v19 = vld [vmem:[%s7561_s13 + $0x75] sm:$0x1]  ;;  %v3240_v12 = vrot.slane %v2453_v51, 6  ;;  %v3264_v5 = vrot.slane %v2466_v24, 1 }
 0x330   : > { %v3279_v59 = vsel %vm1483_vm6, %v3278_v50, %v3277_v52  ;;  %v3257_v61 = vsel %vm1471_vm2, %v3256_v38, %v3255_v57  ;;  %v2457_v55 = vld [vmem:[%s7561_s13 + $0x79] sm:$0x1]  ;;  %v3242_v22 = vrot.slane %v2454_v53, 5  ;;  %v2458_v0 = vld [vmem:[%s7561_s13 + $0x7d] sm:$0x1]  ;;  %v3239_v41 = vsel %vm1465_vm0, %v3238_v30, %v2451_v7 }
 0x331   : > { %3350 = vmatpush.msra.mxu3 %v3279_v59  ;;  %v3259_v8 = vsel %vm1474_vm3, %v3258_v23, %v3257_v61  ;;  %v3244_v3 = vrot.slane %v2455_v28, 4  ;;  %v3246_v1 = vrot.slane %v2456_v19, 3  ;;  %v2444_v44 = vld [vmem:[%s7561_s13 + $0x45] sm:$0x1]  ;;  %v2445_v11 = vld [vmem:[%s7561_s13 + $0x49] sm:$0x1]  ;;  %v3241_v48 = vsel %vm1468_vm1, %v3240_v12, %v3239_v41 }
 0x332   : > { %v8575_v32 = vpop.f32.mrf.mxu1  ;;  %v3261_v14 = vsel %vm1477_vm4, %v3260_v47, %v3259_v8  ;;  %v3248_v27 = vrot.slane %v2457_v55, 2  ;;  %v2446_v56 = vld [vmem:[%s7561_s13 + $0x4d] sm:$0x1]  ;;  %v2447_v37 = vld [vmem:[%s7561_s13 + $0x51] sm:$0x1]  ;;  %v3243_v29 = vsel %vm1471_vm2, %v3242_v22, %v3241_v48  ;;  %v3250_v31 = vrot.slane %v2458_v0, 1 }
 0x333   : > { %v3263_v26 = vsel %vm1480_vm5, %v3262_v58, %v3261_v14  ;;  %v2443_v33 = vld [vmem:[%s7561_s13 + $0x41] sm:$0x1]  ;;  %v2448_v42 = vld [vmem:[%s7561_s13 + $0x55] sm:$0x1]  ;;  %v3245_v43 = vsel %vm1474_vm3, %v3244_v3, %v3243_v29  ;;  %v2449_v50 = vld [vmem:[%s7561_s13 + $0x59] sm:$0x1] }
 0x334   : > { %v3265_v39 = vsel %vm1483_vm6, %v3264_v5, %v3263_v26  ;;  %v3224_v15 = vrot.slane %v2444_v44, 7  ;;  %v3226_v13 = vrot.slane %v2445_v11, 6  ;;  %v3247_v2 = vsel %vm1477_vm4, %v3246_v1, %v3245_v43  ;;  %v2436_v38 = vld [vmem:[%s7561_s13 + $0x25] sm:$0x1]  ;;  %v2437_v23 = vld [vmem:[%s7561_s13 + $0x29] sm:$0x1] }
 0x335   : > { %3351 = vmatpush.msra.mxu3 %v3265_v39  ;;  %v3228_v34 = vrot.slane %v2446_v56, 5  ;;  %v3230_v24 = vrot.slane %v2447_v37, 4  ;;  %v3249_v47 = vsel %vm1480_vm5, %v3248_v27, %v3247_v2  ;;  %v2450_v9 = vld [vmem:[%s7561_s13 + $0x5d] sm:$0x1]  ;;  %v3232_v7 = vrot.slane %v2448_v42, 3 }
 0x336   : > { %v3225_v49 = vsel %vm1465_vm0, %v3224_v15, %v2443_v33  ;;  %v2438_v17 = vld [vmem:[%s7561_s13 + $0x2d] sm:$0x1]  ;;  %v3251_v52 = vsel %vm1483_vm6, %v3250_v31, %v3249_v47  ;;  %v3234_v58 = vrot.slane %v2449_v50, 2  ;;  %v2435_v53 = vld [vmem:[%s7561_s13 + $0x21] sm:$0x1]  ;;  %v3210_v12 = vrot.slane %v2436_v38, 7 }
 0x337   : > { %v3227_v57 = vsel %vm1468_vm1, %v3226_v13, %v3225_v49  ;;  %v2439_v28 = vld [vmem:[%s7561_s13 + $0x31] sm:$0x1]  ;;  %3352 = vmatpush.msra.mxu3 %v3251_v52  ;;  %v2440_v30 = vld [vmem:[%s7561_s13 + $0x35] sm:$0x1]  ;;  %v3212_v8 = vrot.slane %v2437_v23, 6  ;;  %v3236_v55 = vrot.slane %v2450_v9, 1 }
 0x338   : > { %v3229_v19 = vsel %vm1471_vm2, %v3228_v34, %v3227_v57  ;;  %v2441_v22 = vld [vmem:[%s7561_s13 + $0x39] sm:$0x1]  ;;  %v2442_v14 = vld [vmem:[%s7561_s13 + $0x3d] sm:$0x1]  ;;  %v3214_v0 = vrot.slane %v2438_v17, 5  ;;  %v3211_v44 = vsel %vm1465_vm0, %v3210_v12, %v2435_v53  ;;  %v3216_v11 = vrot.slane %v2439_v28, 4 }
 0x339   : > { %v3231_v5 = vsel %vm1474_vm3, %v3230_v24, %v3229_v19  ;;  %v2428_v26 = vld [vmem:[%s7561_s13 + $0x5] sm:$0x1]  ;;  %v3213_v37 = vsel %vm1468_vm1, %v3212_v8, %v3211_v44  ;;  %v3218_v39 = vrot.slane %v2440_v30, 3  ;;  %v2429_v29 = vld [vmem:[%s7561_s13 + $0x9] sm:$0x1]  ;;  %v3220_v33 = vrot.slane %v2441_v22, 2 }
 0x33a   : > { %v8611_v45 = vpop.f32.mrf.mxu1  ;;  %v3233_v1 = vsel %vm1477_vm4, %v3232_v7, %v3231_v5  ;;  %v2430_v31 = vld [vmem:[%s7561_s13 + $0xd] sm:$0x1]  ;;  %v3222_v42 = vrot.slane %v2442_v14, 1  ;;  %v2427_v43 = vld [vmem:[%s7561_s13 + $0x1] sm:$0x1]  ;;  %v3215_v2 = vsel %vm1471_vm2, %v3214_v0, %v3213_v37  ;;  %v3196_v38 = vrot.slane %v2428_v26, 7 }
 0x33b   : > { %v8618_v40 = vpop.xlane.xlu2 %2965  ;;  %v8623_v16 = vpop.xlane.xlu1 %2935  ;;  %v3235_v56 = vsel %vm1480_vm5, %v3234_v58, %v3233_v1  ;;  %v2431_v50 = vld [vmem:[%s7561_s13 + $0x11] sm:$0x1]  ;;  %v2432_v34 = vld [vmem:[%s7561_s13 + $0x15] sm:$0x1]  ;;  %v2433_v24 = vld [vmem:[%s7561_s13 + $0x19] sm:$0x1]  ;;  %v3217_v23 = vsel %vm1474_vm3, %v3216_v11, %v3215_v2  ;;  %v2943_v2 = vsub.f32 %v7868_v46, %v8585_v4 }
 0x33c   : > { %v8625_v60 = vpop.xlane.xlu0 %2932  ;;  %6271 = vrcp.f32 %v8618_v40  ;;  %v2999_v48 = vand.u32 2147483648, %v8618_v40  ;;  %v3237_v13 = vsel %vm1483_vm6, %v3236_v55, %v3235_v56  ;;  %v3198_v47 = vrot.slane %v2429_v29, 6  ;;  %v2434_v7 = vld [vmem:[%s7561_s13 + $0x1d] sm:$0x1] }
 0x33d   : > { %3353 = vmatpush.msra.mxu3 %v3237_v13  ;;  %v3200_v9 = vrot.slane %v2430_v31, 5  ;;  %vm2993_vm13 = vweird.f32 %v8618_v40  ;;  %v3219_v49 = vsel %vm1477_vm4, %v3218_v39, %v3217_v23  ;;  %v3197_v17 = vsel %vm1465_vm0, %v3196_v38, %v2427_v43  ;;  %v3109_v38 = vld [vmem:[%s7662_s21 + $0x8] sm:$0xff] }
 0x33e   : > { %v3202_v52 = vrot.slane %v2431_v50, 4  ;;  %v3221_v57 = vsel %vm1480_vm5, %v3220_v33, %v3219_v49  ;;  %v3199_v58 = vsel %vm1468_vm1, %v3198_v47, %v3197_v17  ;;  %v3204_v53 = vrot.slane %v2432_v34, 3  ;;  %v3108_v33 = vld [vmem:[%s7662_s21] sm:$0xff] }
 0x33f   : > { %v3206_v28 = vrot.slane %v2433_v24, 2  ;;  %v3223_v19 = vsel %vm1483_vm6, %v3222_v42, %v3221_v57  ;;  %v3201_v30 = vsel %vm1471_vm2, %v3200_v9, %v3199_v58  ;;  %v3208_v22 = vrot.slane %v2434_v7, 1 }
 0x340   : > { %3354 = vmatpush.msra.mxu3 %v3223_v19  ;;  %v3203_v55 = vsel %vm1474_vm3, %v3202_v52, %v3201_v30  ;;  %v2997_v14 = vand.u32 2147483647, %v8618_v40  ;;  %v2954_v7 = vmul.f32 1.442695, %v2943_v2  ;;  %v2944_v17 = vsub.f32 %v7936_v25, %v8581_v10 }
 0x341   : > { %v2945_v25 = vsub.f32 %v7997_v20, %v8625_v60 }
 0x342   : > { %v8647_v51 = vpop.eup %6271  ;;  %v8655_v61 = vpop.f32.mrf.mxu1  ;;  %vm2998_vm10 = vcmp.eq.f32.partialorder %v2997_v14, 8.507059e+37 }
 0x343   : > { %v2989_v59 = vmul.f32 %v8647_v51, %v8618_v40  ;;  %vm2994_vm14 = vweird.f32 %v8647_v51 }
 0x344   : > { %vm2995_vm9 = vmor %vm2993_vm13, %vm2994_vm14 }
 0x345   : > { %v2990_v41 = vsub.f32 1.0, %v2989_v59  ;;  %v3000_v59 = vor.u32 1.1754944e-38, %v2999_v48 }
 0x346   : > { %v8662_v3 = vpop.xlane.xlu0 %2938  ;;  %v8668_v27 = vpop.xlane.xlu1 %2968 }
 0x347   : > { %6273 = vrcp.f32 %v8668_v27  ;;  %v2991_v15 = vmul.f32 %v8647_v51, %v2990_v41  ;;  %vm3007_vm15 = vweird.f32 %v8668_v27  ;;  %v3205_v41 = vsel %vm1477_vm4, %v3204_v53, %v3203_v55  ;;  %v3110_v53 = vld [vmem:[%s7662_s21 + $0x10] sm:$0xff] }
 0x348   : > { %v3013_v1 = vand.u32 2147483648, %v8668_v27  ;;  %v3207_v11 = vsel %vm1480_vm5, %v3206_v28, %v3205_v41  ;;  %v3011_v56 = vand.u32 2147483647, %v8668_v27  ;;  %v2946_v55 = vsub.f32 %v8065_v21, %v8623_v16 }
 0x349   : > { %v2992_v12 = vadd.f32 %v8647_v51, %v2991_v15  ;;  %v3209_v37 = vsel %vm1483_vm6, %v3208_v22, %v3207_v11  ;;  %v2947_v21 = vsub.f32 %v8125_v6, %v8662_v3 }
 0x34a   : > { %3355 = vmatpush.msra.mxu3 %v3209_v37  ;;  %v3014_v31 = vor.u32 1.1754944e-38, %v3013_v1  ;;  %vm3012_vm13 = vcmp.eq.f32.partialorder %v3011_v56, 8.507059e+37  ;;  %v2960_v41 = vmul.f32 1.442695, %v2946_v55 }
 0x34b   : > { %v2996_v26 = vsel %vm2995_vm9, %v8647_v51, %v2992_v12  ;;  %v2958_v12 = vmul.f32 1.442695, %v2945_v25  ;;  %v2962_v56 = vmul.f32 1.442695, %v2947_v21 }
 0x34c   : > { %v8692_v5 = vpop.f32.mrf.mxu1  ;;  %v3001_v39 = vsel %vm2998_vm10, %v3000_v59, %v2996_v26  ;;  %v2956_v59 = vmul.f32 1.442695, %v2944_v17 }
 0x34d   : > { %v6274_v8 = vpop.eup %6273  ;;  %v3100_v29 = vmul.f32 %v8060_v62, %v3001_v39 }
 0x34e   : > { %v3003_v0 = vmul.f32 %v6274_v8, %v8668_v27  ;;  %vm3008_vm11 = vweird.f32 %v6274_v8 }
 0x34f   : > { %vm3009_vm12 = vmor %vm3007_vm15, %vm3008_vm11  ;;  %v3116_v51 = vadd.f32 %v3108_v33, %v3100_v29  ;;  %6092 = vmatmul.msk.f32.vlgmr.msra.gmra.mxu3 %vm1199_vm8, %v3100_v29 }
 0x350   : > { %v2972_v44 = vpop.xlane.xlu0 %2971  ;;  %v3004_v48 = vsub.f32 1.0, %v3003_v0 }
 0x351   : > { %6275 = vrcp.f32 %v2972_v44  ;;  %3124 = vst.msk [vmem:[%s7662_s21] sm:$0xff] %vm1199_vm8, %v3116_v51  ;;  %v3027_v27 = vand.u32 2147483648, %v2972_v44  ;;  %vm3021_vm14 = vweird.f32 %v2972_v44  ;;  %v3025_v23 = vand.u32 2147483647, %v2972_v44 }
 0x352   : > { %v3005_v40 = vmul.f32 %v6274_v8, %v3004_v48  ;;  %6277 = vpow2.f32 %v2954_v7 }
 0x353   : > { %v3028_v49 = vor.u32 1.1754944e-38, %v3027_v27  ;;  %vm3026_vm10 = vcmp.eq.f32.partialorder %v3025_v23, 8.507059e+37  ;;  %6279 = vpow2.f32 %v2956_v59 }
 0x354   : > { %v3006_v42 = vadd.f32 %v6274_v8, %v3005_v40  ;;  %6281 = vpow2.f32 %v2958_v12 }
 0x355   : > { %6283 = vpow2.f32 %v2960_v41 }
 0x356   : > { %v3010_v50 = vsel %vm3009_vm12, %v6274_v8, %v3006_v42  ;;  %6285 = vpow2.f32 %v2962_v56 }
 0x357   : > { %v6276_v43 = vpop.eup %6275  ;;  %v8714_v13 = vpop.f32.mrf.mxu1  ;;  %v3015_v62 = vsel %vm3012_vm13, %v3014_v31, %v3010_v50 }
 0x358   : > { %v3017_v15 = vmul.f32 %v6276_v43, %v2972_v44  ;;  %v3101_v34 = vmul.f32 %v8096_v54, %v3015_v62  ;;  %vm3022_vm15 = vweird.f32 %v6276_v43  ;;  %v8734_v19 = vpop.eup %6277 }
 0x359   : > { %vm3023_vm9 = vmor %vm3021_vm14, %vm3022_vm15  ;;  %v8744_v8 = vpop.eup %6279 }
 0x35a   : > { %v3018_v24 = vsub.f32 1.0, %v3017_v15  ;;  %v3117_v47 = vadd.f32 %v3109_v38, %v3101_v34  ;;  %6093 = vmatmul.msk.f32.gmra.mxu3 %vm1199_vm8, %v3101_v34  ;;  %v2976_v14 = vsel %vm1199_vm8, %v8744_v8, 0.0  ;;  %v8758_v1 = vpop.eup %6281 }
 0x35b   : > { %v2979_v26 = vsel %vm1199_vm8, %v8758_v1, 0.0  ;;  %v8772_v37 = vpop.eup %6283 }
 0x35c   : > { %v3019_v9 = vmul.f32 %v6276_v43, %v3018_v24  ;;  %3125 = vst.msk [vmem:[%s7662_s21 + $0x8] sm:$0xff] %vm1199_vm8, %v3117_v47  ;;  %v2982_v40 = vsel %vm1199_vm8, %v8772_v37, 0.0  ;;  %v8784_v31 = vpop.eup %6285 }
 0x35e   : > { %v3020_v46 = vadd.f32 %v6276_v43, %v3019_v9 }
 0x360   : > { %v3024_v4 = vsel %vm3023_vm9, %v6276_v43, %v3020_v46  ;;  %v2985_v43 = vsel %vm1199_vm8, %v8784_v31, 0.0 }
 0x361   : > { %v3029_v54 = vsel %vm3026_vm10, %v3028_v49, %v3024_v4 }
 0x362   : > { %v3102_v57 = vmul.f32 %v8145_v63, %v3029_v54  ;;  %v2973_v63 = vsel %vm1199_vm8, %v8734_v19, 0.0 }
 0x363   : > { %v8725_v52 = vpop.f32.mrf.mxu1 }
 0x364   : > { %v3998_v58 = vsel %vm1199_vm8, %v8725_v52, -inf  ;;  %v3118_v28 = vadd.f32 %v3110_v53, %v3102_v57  ;;  %6094 = vmatmul.msk.f32.gmra.mxu3 %vm1199_vm8, %v3102_v57 }
 0x365   : > { %3999 = vmax.xlane.f32.xlu2 %v3998_v58 }
 0x366   : > { %3126 = vst.msk [vmem:[%s7662_s21 + $0x10] sm:$0xff] %vm1199_vm8, %v3118_v28 }
 0x36b   : > { %v8738_v10 = vpop.f32.mrf.mxu1 }
 0x36c   : > { %v4001_v30 = vsel %vm1199_vm8, %v8738_v10, -inf }
 0x36d   : > { %2974 = vadd.xlane.f32.xlu2 %v2973_v63  ;;  %4002 = vmax.xlane.f32.xlu1 %v4001_v30 }
 0x373   : > { %v8748_v22 = vpop.f32.mrf.mxu1 }
 0x374   : > { %v8750_v20 = vpop.f32.mrf.mxu0  ;;  %v4004_v60 = vsel %vm1199_vm8, %v8748_v22, -inf }
 0x375   : > { %4005 = vmax.xlane.f32.xlu0 %v4004_v60  ;;  %v5080_v0 = vsel %vm1199_vm8, %v8750_v20, -inf  ;;  %2977 = vadd.xlane.f32.xlu2 %v2976_v14 }
 0x376   : > { %5081 = vmax.xlane.f32.xlu1 %v5080_v0 }
 0x37b   : > { %v8762_v16 = vpop.f32.mrf.mxu1 }
 0x37c   : > { %v8764_v44 = vpop.f32.mrf.mxu0  ;;  %v4007_v11 = vsel %vm1199_vm8, %v8762_v16, -inf }
 0x37d   : > { %4008 = vmax.xlane.f32.xlu0 %v4007_v11  ;;  %v5083_v48 = vsel %vm1199_vm8, %v8764_v44, -inf  ;;  %2980 = vadd.xlane.f32.xlu2 %v2979_v26 }
 0x37e   : > { %5084 = vmax.xlane.f32.xlu1 %v5083_v48 }
 0x383   : > { %v8774_v6 = vpop.f32.mrf.mxu1 }
 0x384   : > { %v8776_v3 = vpop.f32.mrf.mxu0  ;;  %v4010_v39 = vsel %vm1199_vm8, %v8774_v6, -inf }
 0x385   : > { %4011 = vmax.xlane.f32.xlu0 %v4010_v39  ;;  %v5086_v29 = vsel %vm1199_vm8, %v8776_v3, -inf  ;;  %2983 = vadd.xlane.f32.xlu2 %v2982_v40 }
 0x386   : > { %5087 = vmax.xlane.f32.xlu1 %v5086_v29 }
 0x38b   : > { %v8786_v33 = vpop.f32.mrf.mxu1 }
 0x38c   : > { %v8788_v51 = vpop.f32.mrf.mxu0  ;;  %v4013_v42 = vsel %vm1199_vm8, %v8786_v33, -inf }
 0x38d   : > { %4014 = vmax.xlane.f32.xlu0 %v4013_v42  ;;  %v5089_v50 = vsel %vm1199_vm8, %v8788_v51, -inf  ;;  %2986 = vadd.xlane.f32.xlu2 %v2985_v43 }
 0x38e   : > { %5090 = vmax.xlane.f32.xlu1 %v5089_v50 }
 0x393   : > { %v8796_v15 = vpop.f32.mrf.mxu1 }
 0x394   : > { %v8798_v62 = vpop.f32.mrf.mxu0  ;;  %v4016_v2 = vsel %vm1199_vm8, %v8796_v15, -inf }
 0x395   : > { %4017 = vmax.xlane.f32.xlu0 %v4016_v2  ;;  %v5092_v27 = vsel %vm1199_vm8, %v8798_v62, -inf }
 0x396   : > { %5093 = vmax.xlane.f32.xlu1 %v5092_v27 }
 0x39b   : > { %v8804_v34 = vpop.f32.mrf.mxu1 }
 0x39c   : > { %v8806_v24 = vpop.f32.mrf.mxu0  ;;  %v4019_v38 = vsel %vm1199_vm8, %v8804_v34, -inf }
 0x39d   : > { %4020 = vmax.xlane.f32.xlu0 %v4019_v38  ;;  %v5095_v23 = vsel %vm1199_vm8, %v8806_v24, -inf }
 0x39e   : > { %5096 = vmax.xlane.f32.xlu1 %v5095_v23 }
 0x3a3   : > { %v8812_v47 = vpop.f32.mrf.mxu1 }
 0x3a4   : > { %v8814_v9 = vpop.f32.mrf.mxu0  ;;  %v5101_v49 = vsel %vm1199_vm8, %v8812_v47, -inf }
 0x3a5   : > { %v5098_v7 = vsel %vm1199_vm8, %v8814_v9, -inf }
 0x3a6   : > { %5099 = vmax.xlane.f32.xlu0 %v5098_v7  ;;  %5102 = vmax.xlane.f32.xlu1 %v5101_v49 }
 0x3d8   : > { %v4000_v46 = vpop.xlane.xlu2 %3999 }
 0x3d9   : > { %v4022_v4 = vsub.f32 %v8725_v52, %v4000_v46 }
 0x3db   : > { %v4030_v54 = vmul.f32 1.442695, %v4022_v4 }
 0x3dd   : > { %6287 = vpow2.f32 %v4030_v54 }
 0x3e0   : > { %v4003_v17 = vpop.xlane.xlu1 %4002  ;;  %v2975_v57 = vpop.xlane.xlu2 %2974 }
 0x3e1   : > { %v4023_v58 = vsub.f32 %v8738_v10, %v4003_v17  ;;  %6289 = vrcp.f32 %v2975_v57  ;;  %v3041_v0 = vand.u32 2147483648, %v2975_v57  ;;  %v3039_v48 = vand.u32 2147483647, %v2975_v57  ;;  %v3111_v17 = vld [vmem:[%s7662_s21 + $0x18] sm:$0xff] }
 0x3e2   : > { %vm3035_vm12 = vweird.f32 %v2975_v57 }
 0x3e3   : > { %v8822_v53 = vpop.eup %6287  ;;  %v4032_v28 = vmul.f32 1.442695, %v4023_v58  ;;  %v3042_v39 = vor.u32 1.1754944e-38, %v3041_v0  ;;  %vm3040_vm14 = vcmp.eq.f32.partialorder %v3039_v48, 8.507059e+37 }
 0x3e4   : > { %v4046_v59 = vsel %vm1199_vm8, %v8822_v53, 0.0 }
 0x3e5   : > { %6291 = vpow2.f32 %v4032_v28  ;;  %4047 = vadd.xlane.f32.xlu2 %v4046_v59 }
 0x3e7   : > { %v6290_v25 = vpop.eup %6289 }
 0x3e8   : > { %v3031_v63 = vmul.f32 %v6290_v25, %v2975_v57  ;;  %v4006_v30 = vpop.xlane.xlu0 %4005  ;;  %v8826_v12 = vpop.xlane.xlu2 %2977  ;;  %vm3036_vm11 = vweird.f32 %v6290_v25 }
 0x3e9   : > { %v4024_v52 = vsub.f32 %v8748_v22, %v4006_v30  ;;  %v5082_v55 = vpop.xlane.xlu1 %5081  ;;  %6293 = vrcp.f32 %v8826_v12  ;;  %vm3037_vm13 = vmor %vm3035_vm12, %vm3036_vm11  ;;  %v3055_v49 = vand.u32 2147483648, %v8826_v12  ;;  %vm3049_vm9 = vweird.f32 %v8826_v12 }
 0x3ea   : > { %v3032_v10 = vsub.f32 1.0, %v3031_v63  ;;  %v5104_v60 = vsub.f32 %v8750_v20, %v5082_v55 }
 0x3eb   : > { %v8831_v14 = vpop.eup %6291  ;;  %v4034_v41 = vmul.f32 1.442695, %v4024_v52 }
 0x3ec   : > { %v3033_v21 = vmul.f32 %v6290_v25, %v3032_v10  ;;  %v5112_v11 = vmul.f32 1.442695, %v5104_v60  ;;  %v4049_v26 = vsel %vm1199_vm8, %v8831_v14, 0.0 }
 0x3ed   : > { %6295 = vpow2.f32 %v4034_v41  ;;  %4050 = vadd.xlane.f32.xlu2 %v4049_v26 }
 0x3ee   : > { %6297 = vpow2.f32 %v5112_v11  ;;  %v3034_v22 = vadd.f32 %v6290_v25, %v3033_v21 }
 0x3ef   : > { %v6294_v56 = vpop.eup %6293 }
 0x3f0   : > { %v3045_v20 = vmul.f32 %v6294_v56, %v8826_v12  ;;  %v4009_v40 = vpop.xlane.xlu0 %4008  ;;  %v8836_v29 = vpop.xlane.xlu2 %2980  ;;  %v3038_v42 = vsel %vm3037_vm13, %v6290_v25, %v3034_v22  ;;  %vm3050_vm15 = vweird.f32 %v6294_v56  ;;  %v3056_v25 = vor.u32 1.1754944e-38, %v3055_v49 }
 0x3f1   : > { %v4025_v43 = vsub.f32 %v8762_v16, %v4009_v40  ;;  %v5085_v50 = vpop.xlane.xlu1 %5084  ;;  %6299 = vrcp.f32 %v8836_v29  ;;  %v3043_v38 = vsel %vm3040_vm14, %v3042_v39, %v3038_v42  ;;  %vm3051_vm10 = vmor %vm3049_vm9, %vm3050_vm15  ;;  %v3069_v11 = vand.u32 2147483648, %v8836_v29  ;;  %v3112_v39 = vld [vmem:[%s7662_s21 + $0x20] sm:$0xff] }
 0x3f2   : > { %v3046_v2 = vsub.f32 1.0, %v3045_v20  ;;  %v5105_v27 = vsub.f32 %v8764_v44, %v5085_v50  ;;  %v3103_v46 = vmul.f32 %v8734_v19, %v3043_v38  ;;  %v3053_v19 = vand.u32 2147483647, %v8826_v12 }
 0x3f3   : > { %v8841_v23 = vpop.eup %6295  ;;  %v4036_v7 = vmul.f32 1.442695, %v4025_v43  ;;  %vm3063_vm13 = vweird.f32 %v8836_v29  ;;  %v3070_v50 = vor.u32 1.1754944e-38, %v3069_v11 }
 0x3f4   : > { %v8845_v4 = vpop.eup %6297  ;;  %v3047_v54 = vmul.f32 %v6294_v56, %v3046_v2  ;;  %v5114_v16 = vmul.f32 1.442695, %v5105_v27  ;;  %v4052_v57 = vsel %vm1199_vm8, %v8841_v23, 0.0  ;;  %v3119_v44 = vadd.f32 %v3111_v17, %v3103_v46  ;;  %6095 = vmatmul.msk.f32.gmra.mxu3 %vm1199_vm8, %v3103_v46 }
 0x3f5   : > { %6301 = vpow2.f32 %v4036_v7  ;;  %v5128_v58 = vsel %vm1199_vm8, %v8845_v4, 0.0  ;;  %4053 = vadd.xlane.f32.xlu2 %v4052_v57  ;;  %vm3054_vm11 = vcmp.eq.f32.partialorder %v3053_v19, 8.507059e+37 }
 0x3f6   : > { %6303 = vpow2.f32 %v5114_v16  ;;  %5129 = vadd.xlane.f32.xlu0 %v5128_v58  ;;  %v3048_v28 = vadd.f32 %v6294_v56, %v3047_v54  ;;  %3127 = vst.msk [vmem:[%s7662_s21 + $0x18] sm:$0xff] %vm1199_vm8, %v3119_v44 }
 0x3f7   : > { %v6300_v59 = vpop.eup %6299 }
 0x3f8   : > { %v3059_v63 = vmul.f32 %v6300_v59, %v8836_v29  ;;  %v4012_v30 = vpop.xlane.xlu0 %4011  ;;  %v8858_v52 = vpop.xlane.xlu2 %2983  ;;  %v3052_v55 = vsel %vm3051_vm10, %v6294_v56, %v3048_v28  ;;  %vm3064_vm12 = vweird.f32 %v6300_v59 }
 0x3f9   : > { %v4026_v10 = vsub.f32 %v8774_v6, %v4012_v30  ;;  %v5088_v60 = vpop.xlane.xlu1 %5087  ;;  %6305 = vrcp.f32 %v8858_v52  ;;  %v3057_v41 = vsel %vm3054_vm11, %v3056_v25, %v3052_v55  ;;  %vm3065_vm14 = vmor %vm3063_vm13, %vm3064_vm12  ;;  %v3083_v57 = vand.u32 2147483648, %v8858_v52  ;;  %v3113_v25 = vld [vmem:[%s7662_s21 + $0x28] sm:$0xff] }
 0x3fa   : > { %v3060_v12 = vsub.f32 1.0, %v3059_v63  ;;  %v5106_v0 = vsub.f32 %v8776_v3, %v5088_v60  ;;  %v3104_v48 = vmul.f32 %v8744_v8, %v3057_v41  ;;  %v3067_v8 = vand.u32 2147483647, %v8836_v29 }
 0x3fb   : > { %v8863_v21 = vpop.eup %6301  ;;  %v4038_v26 = vmul.f32 1.442695, %v4026_v10  ;;  %v3081_v19 = vand.u32 2147483647, %v8858_v52  ;;  %vm3077_vm10 = vweird.f32 %v8858_v52  ;;  %v3084_v10 = vor.u32 1.1754944e-38, %v3083_v57 }
 0x3fc   : > { %v8867_v22 = vpop.eup %6303  ;;  %v3061_v56 = vmul.f32 %v6300_v59, %v3060_v12  ;;  %v5116_v6 = vmul.f32 1.442695, %v5106_v0  ;;  %v4055_v20 = vsel %vm1199_vm8, %v8863_v21, 0.0  ;;  %v3120_v3 = vadd.f32 %v3112_v39, %v3104_v48  ;;  %6096 = vmatmul.msk.f32.gmra.mxu3 %vm1199_vm8, %v3104_v48 }
 0x3fd   : > { %6307 = vpow2.f32 %v4038_v26  ;;  %4056 = vadd.xlane.f32.xlu1 %v4055_v20  ;;  %v5131_v40 = vsel %vm1199_vm8, %v8867_v22, 0.0  ;;  %vm3068_vm15 = vcmp.eq.f32.partialorder %v3067_v8, 8.507059e+37  ;;  %vm3082_vm12 = vcmp.eq.f32.partialorder %v3081_v19, 8.507059e+37 }
 0x3fe   : > { %6309 = vpow2.f32 %v5116_v6  ;;  %5132 = vadd.xlane.f32.xlu2 %v5131_v40  ;;  %v3062_v42 = vadd.f32 %v6300_v59, %v3061_v56  ;;  %3128 = vst.msk [vmem:[%s7662_s21 + $0x20] sm:$0xff] %vm1199_vm8, %v3120_v3  ;;  %v3114_v3 = vld [vmem:[%s7662_s21 + $0x30] sm:$0xff] }
 0x3ff   : > { %v6306_v43 = vpop.eup %6305 }
 0x400   : > { %v3073_v2 = vmul.f32 %v6306_v43, %v8858_v52  ;;  %v4015_v27 = vpop.xlane.xlu0 %4014  ;;  %v8880_v38 = vpop.xlane.xlu2 %2986  ;;  %v3066_v49 = vsel %vm3065_vm14, %v6300_v59, %v3062_v42  ;;  %vm3078_vm9 = vweird.f32 %v6306_v43 }
 0x401   : > { %v4027_v7 = vsub.f32 %v8786_v33, %v4015_v27  ;;  %v5091_v46 = vpop.xlane.xlu1 %5090  ;;  %6311 = vrcp.f32 %v8880_v38  ;;  %v3071_v16 = vsel %vm3068_vm15, %v3070_v50, %v3066_v49  ;;  %vm3079_vm11 = vmor %vm3077_vm10, %vm3078_vm9  ;;  %v3097_v39 = vand.u32 2147483648, %v8880_v38 }
 0x402   : > { %v3074_v29 = vsub.f32 1.0, %v3073_v2  ;;  %v5107_v54 = vsub.f32 %v8788_v51, %v5091_v46  ;;  %v3105_v58 = vmul.f32 %v8758_v1, %v3071_v16  ;;  %v3095_v40 = vand.u32 2147483647, %v8880_v38 }
 0x403   : > { %v8885_v17 = vpop.eup %6307  ;;  %v4040_v44 = vmul.f32 1.442695, %v4027_v7  ;;  %vm3091_vm14 = vweird.f32 %v8880_v38  ;;  %v3098_v2 = vor.u32 1.1754944e-38, %v3097_v39 }
 0x404   : > { %v8890_v28 = vpop.eup %6309  ;;  %v3075_v33 = vmul.f32 %v6306_v43, %v3074_v29  ;;  %v5118_v59 = vmul.f32 1.442695, %v5107_v54  ;;  %v4058_v63 = vsel %vm1199_vm8, %v8885_v17, 0.0  ;;  %v3121_v51 = vadd.f32 %v3113_v25, %v3105_v58  ;;  %6097 = vmatmul.msk.f32.gmra.mxu3 %vm1199_vm8, %v3105_v58 }
 0x405   : > { %6313 = vpow2.f32 %v4040_v44  ;;  %4059 = vadd.xlane.f32.xlu0 %v4058_v63  ;;  %v5134_v1 = vsel %vm1199_vm8, %v8890_v28, 0.0  ;;  %vm3096_vm9 = vcmp.eq.f32.partialorder %v3095_v40, 8.507059e+37  ;;  %v3115_v44 = vld [vmem:[%s7662_s21 + $0x38] sm:$0xff] }
 0x406   : > { %6315 = vpow2.f32 %v5118_v59  ;;  %5135 = vadd.xlane.f32.xlu1 %v5134_v1  ;;  %v3076_v30 = vadd.f32 %v6306_v43, %v3075_v33  ;;  %3129 = vst.msk [vmem:[%s7662_s21 + $0x28] sm:$0xff] %vm1199_vm8, %v3121_v51  ;;  %v3565_v1 = vld [vmem:[%s7561_s13 + $0xe2] sm:$0x1] }
 0x407   : > { %v6312_v55 = vpop.eup %6311 }
 0x408   : > { %v3087_v60 = vmul.f32 %v6312_v55, %v8880_v38  ;;  %v4018_v12 = vpop.xlane.xlu0 %4017  ;;  %v3080_v0 = vsel %vm3079_vm11, %v6306_v43, %v3076_v30  ;;  %vm3092_vm13 = vweird.f32 %v6312_v55  ;;  %v3566_v30 = vld [vmem:[%s7561_s13 + $0xe6] sm:$0x1] }
 0x409   : > { %v4028_v41 = vsub.f32 %v8796_v15, %v4018_v12  ;;  %v5094_v11 = vpop.xlane.xlu1 %5093  ;;  %v3085_v26 = vsel %vm3082_vm12, %v3084_v10, %v3080_v0  ;;  %vm3093_vm15 = vmor %vm3091_vm14, %vm3092_vm13 }
 0x40a   : > { %v3088_v48 = vsub.f32 1.0, %v3087_v60  ;;  %v5108_v52 = vsub.f32 %v8798_v62, %v5094_v11  ;;  %v3106_v56 = vmul.f32 %v8772_v37, %v3085_v26  ;;  %v3569_v11 = vld [vmem:[%s7561_s13 + $0xf2] sm:$0x1] }
 0x40b   : > { %v8905_v6 = vpop.eup %6313  ;;  %v4042_v20 = vmul.f32 1.442695, %v4028_v41  ;;  %v4376_v41 = vrot.slane %v3566_v30, 7  ;;  %v4382_v40 = vrot.slane %v3569_v11, 4  ;;  %v3561_v11 = vld [vmem:[%s7561_s13 + $0xd2] sm:$0x1] }
 0x40c   : > { %v8910_v8 = vpop.eup %6315  ;;  %v3089_v15 = vmul.f32 %v6312_v55, %v3088_v48  ;;  %v5120_v42 = vmul.f32 1.442695, %v5108_v52  ;;  %v3122_v43 = vadd.f32 %v3114_v3, %v3106_v56  ;;  %v4061_v62 = vsel %vm1199_vm8, %v8905_v6, 0.0  ;;  %6098 = vmatmul.msk.f32.gmra.mxu3 %vm1199_vm8, %v3106_v56  ;;  %v3570_v48 = vld [vmem:[%s7561_s13 + $0xf6] sm:$0x1] }
 0x40d   : > { %6317 = vpow2.f32 %v4042_v20  ;;  %v5137_v37 = vsel %vm1199_vm8, %v8910_v8, 0.0  ;;  %4062 = vadd.xlane.f32.xlu2 %v4061_v62  ;;  %v3571_v52 = vld [vmem:[%s7561_s13 + $0xfa] sm:$0x1]  ;;  %v3572_v56 = vld [vmem:[%s7561_s13 + $0xfe] sm:$0x1]  ;;  %v4377_v39 = vsel %vm1465_vm0, %v4376_v41, %v3565_v1 }
 0x40e   : > { %6319 = vpow2.f32 %v5120_v42  ;;  %3130 = vst.msk [vmem:[%s7662_s21 + $0x30] sm:$0xff] %vm1199_vm8, %v3122_v43  ;;  %5138 = vadd.xlane.f32.xlu0 %v5137_v37  ;;  %v3090_v50 = vadd.f32 %v6312_v55, %v3089_v15  ;;  %v4647_v15 = vld [vmem:[%s7561_s13 + $0xe3] sm:$0x1]  ;;  %v4648_v42 = vld [vmem:[%s7561_s13 + $0xe7] sm:$0x1]  ;;  %v4384_v43 = vrot.slane %v3570_v48, 3  ;;  %v8983_v48 = vpop.f32.mrf.mxu3 }
 0x40f   : > { %v4386_v62 = vrot.slane %v3571_v52, 2  ;;  %v4388_v37 = vrot.slane %v3572_v56, 1 }
 0x410   : > { %v4021_v27 = vpop.xlane.xlu0 %4020  ;;  %v3094_v49 = vsel %vm3093_vm15, %v6312_v55, %v3090_v50  ;;  %v3567_v55 = vld [vmem:[%s7561_s13 + $0xea] sm:$0x1]  ;;  %v4649_v50 = vld [vmem:[%s7561_s13 + $0xeb] sm:$0x1] }
 0x411   : > { %v4029_v7 = vsub.f32 %v8804_v34, %v4021_v27  ;;  %v5097_v46 = vpop.xlane.xlu1 %5096  ;;  %v3099_v29 = vsel %vm3096_vm9, %v3098_v2, %v3094_v49  ;;  %v4378_v26 = vrot.slane %v3567_v55, 6  ;;  %v5458_v2 = vrot.slane %v4648_v42, 7  ;;  %v4650_v49 = vld [vmem:[%s7561_s13 + $0xef] sm:$0x1]  ;;  %v3558_v55 = vld [vmem:[%s7561_s13 + $0xc6] sm:$0x1] }
 0x412   : > { %v5109_v54 = vsub.f32 %v8806_v24, %v5097_v46  ;;  %v3107_v38 = vmul.f32 %v8784_v31, %v3099_v29  ;;  %v4652_v46 = vld [vmem:[%s7561_s13 + $0xf7] sm:$0x1] }
 0x413   : > { %v8924_v16 = vpop.eup %6317  ;;  %v4044_v57 = vmul.f32 1.442695, %v4029_v7  ;;  %v4379_v20 = vsel %vm1468_vm1, %v4378_v26, %v4377_v39  ;;  %v4651_v7 = vld [vmem:[%s7561_s13 + $0xf3] sm:$0x1]  ;;  %v4362_v26 = vrot.slane %v3558_v55, 7 }
 0x414   : > { %v8927_v58 = vpop.eup %6319  ;;  %v5122_v19 = vmul.f32 1.442695, %v5109_v54  ;;  %v3123_v33 = vadd.f32 %v3115_v44, %v3107_v38  ;;  %v4064_v34 = vsel %vm1199_vm8, %v8924_v16, 0.0  ;;  %6099 = vmatmul.msk.f32.gmra.mxu3 %vm1199_vm8, %v3107_v38  ;;  %v4653_v54 = vld [vmem:[%s7561_s13 + $0xfb] sm:$0x1]  ;;  %v5460_v44 = vrot.slane %v4649_v50, 6 }
 0x415   : > { %6321 = vpow2.f32 %v4044_v57  ;;  %4065 = vadd.xlane.f32.xlu1 %v4064_v34  ;;  %v5140_v31 = vsel %vm1199_vm8, %v8927_v58, 0.0  ;;  %v4654_v38 = vld [vmem:[%s7561_s13 + $0xff] sm:$0x1]  ;;  %v5459_v57 = vsel %vm1465_vm0, %v5458_v2, %v4647_v15  ;;  %v5464_v34 = vrot.slane %v4651_v7, 4  ;;  %v3562_v39 = vld [vmem:[%s7561_s13 + $0xd6] sm:$0x1] }
 0x416   : > { %6323 = vpow2.f32 %v5122_v19  ;;  %3131 = vst.msk [vmem:[%s7662_s21 + $0x38] sm:$0xff] %vm1199_vm8, %v3123_v33  ;;  %5141 = vadd.xlane.f32.xlu2 %v5140_v31  ;;  %v5462_v19 = vrot.slane %v4650_v49, 5  ;;  %v5466_v31 = vrot.slane %v4652_v46, 3  ;;  %v5468_v1 = vrot.slane %v4653_v54, 2  ;;  %v3564_v15 = vld [vmem:[%s7561_s13 + $0xde] sm:$0x1] }
 0x417   : > { %v5470_v30 = vrot.slane %v4654_v38, 1  ;;  %v4640_v7 = vld [vmem:[%s7561_s13 + $0xc7] sm:$0x1]  ;;  %v4641_v46 = vld [vmem:[%s7561_s13 + $0xcb] sm:$0x1]  ;;  %v4374_v38 = vrot.slane %v3564_v15, 1 }
 0x418   : > { %v3550_v55 = vld [vmem:[%s7561_s13 + $0xa6] sm:$0x1]  ;;  %v3554_v15 = vld [vmem:[%s7561_s13 + $0xb6] sm:$0x1] }
 0x419   : > { %v5100_v24 = vpop.xlane.xlu0 %5099  ;;  %v5103_v59 = vpop.xlane.xlu1 %5102 }
 0x41a   : > { %v5110_v25 = vsub.f32 %v8814_v9, %v5100_v24  ;;  %v5111_v63 = vsub.f32 %v8812_v47, %v5103_v59  ;;  %v3568_v9 = vld [vmem:[%s7561_s13 + $0xee] sm:$0x1]  ;;  %v3557_v24 = vld [vmem:[%s7561_s13 + $0xc2] sm:$0x1] }
 0x41b   : > { %v8938_v51 = vpop.eup %6321  ;;  %v4380_v3 = vrot.slane %v3568_v9, 5  ;;  %v3560_v9 = vld [vmem:[%s7561_s13 + $0xce] sm:$0x1]  ;;  %v4363_v42 = vsel %vm1465_vm0, %v4362_v26, %v3557_v24 }
 0x41c   : > { %v8943_v10 = vpop.eup %6323  ;;  %v5124_v60 = vmul.f32 1.442695, %v5110_v25  ;;  %v5126_v12 = vmul.f32 1.442695, %v5111_v63  ;;  %v4067_v0 = vsel %vm1199_vm8, %v8938_v51, 0.0  ;;  %v5461_v63 = vsel %vm1468_vm1, %v5460_v44, %v5459_v57 }
 0x41d   : > { %4068 = vadd.xlane.f32.xlu0 %v4067_v0  ;;  %v5143_v47 = vsel %vm1199_vm8, %v8943_v10, 0.0  ;;  %v4381_v27 = vsel %vm1471_vm2, %v4380_v3, %v4379_v20  ;;  %v3563_v20 = vld [vmem:[%s7561_s13 + $0xda] sm:$0x1]  ;;  %v4642_v57 = vld [vmem:[%s7561_s13 + $0xcf] sm:$0x1] }
 0x41e   : > { %6325 = vpow2.f32 %v5124_v60  ;;  %5144 = vadd.xlane.f32.xlu1 %v5143_v47  ;;  %v4383_v29 = vsel %vm1474_vm3, %v4382_v40, %v4381_v27  ;;  %v3559_v60 = vld [vmem:[%s7561_s13 + $0xca] sm:$0x1]  ;;  %v5463_v47 = vsel %vm1471_vm2, %v5462_v19, %v5461_v63  ;;  %v4370_v27 = vrot.slane %v3562_v39, 3  ;;  %v4643_v44 = vld [vmem:[%s7561_s13 + $0xd3] sm:$0x1] }
 0x41f   : > { %6327 = vpow2.f32 %v5126_v12  ;;  %v4385_v33 = vsel %vm1477_vm4, %v4384_v43, %v4383_v29  ;;  %v5465_v56 = vsel %vm1474_vm3, %v5464_v34, %v5463_v47  ;;  %v4364_v3 = vrot.slane %v3559_v60, 6  ;;  %v4644_v34 = vld [vmem:[%s7561_s13 + $0xd7] sm:$0x1]  ;;  %v3549_v47 = vld [vmem:[%s7561_s13 + $0xa2] sm:$0x1] }
 0x420   : > { %v4387_v25 = vsel %vm1480_vm5, %v4386_v62, %v4385_v33  ;;  %v5467_v40 = vsel %vm1477_vm4, %v5466_v31, %v5465_v56  ;;  %v4366_v43 = vrot.slane %v3560_v9, 5  ;;  %v4368_v62 = vrot.slane %v3561_v11, 4  ;;  %v4645_v31 = vld [vmem:[%s7561_s13 + $0xdb] sm:$0x1]  ;;  %v3551_v9 = vld [vmem:[%s7561_s13 + $0xaa] sm:$0x1] }
 0x421   : > { %v4389_v41 = vsel %vm1483_vm6, %v4388_v37, %v4387_v25  ;;  %v4639_v37 = vld [vmem:[%s7561_s13 + $0xc3] sm:$0x1]  ;;  %v5469_v50 = vsel %vm1480_vm5, %v5468_v1, %v5467_v40  ;;  %v4365_v2 = vsel %vm1468_vm1, %v4364_v3, %v4363_v42  ;;  %v4372_v49 = vrot.slane %v3563_v20, 2  ;;  %v4646_v25 = vld [vmem:[%s7561_s13 + $0xdf] sm:$0x1] }
 0x422   : > { %4430 = vmatpush.msrb.mxu3 %v4389_v41  ;;  %v8999_v29 = vsel %vm1483_vm6, %v5470_v30, %v5469_v50  ;;  %v4367_v54 = vsel %vm1471_vm2, %v4366_v43, %v4365_v2  ;;  %v5444_v19 = vrot.slane %v4640_v7, 7  ;;  %v5446_v1 = vrot.slane %v4641_v46, 6  ;;  %v3552_v56 = vld [vmem:[%s7561_s13 + $0xae] sm:$0x1]  ;;  %v3553_v39 = vld [vmem:[%s7561_s13 + $0xb2] sm:$0x1] }
 0x423   : > { %5512 = vmatpush.msrb.mxu2 %v8999_v29  ;;  %v4369_v33 = vsel %vm1474_vm3, %v4368_v62, %v4367_v54  ;;  %v5448_v30 = vrot.slane %v4642_v57, 5  ;;  %v5452_v41 = vrot.slane %v4644_v34, 3  ;;  %v4348_v20 = vrot.slane %v3550_v55, 7  ;;  %v3555_v42 = vld [vmem:[%s7561_s13 + $0xba] sm:$0x1] }
 0x424   : > { %v8969_v59 = vpop.eup %6325  ;;  %v4371_v24 = vsel %vm1477_vm4, %v4370_v27, %v4369_v33  ;;  %v5445_v63 = vsel %vm1465_vm0, %v5444_v19, %v4639_v37  ;;  %v5456_v40 = vrot.slane %v4646_v25, 1  ;;  %v3556_v62 = vld [vmem:[%s7561_s13 + $0xbe] sm:$0x1]  ;;  %v4350_v50 = vrot.slane %v3551_v9, 6  ;;  %v4632_v27 = vld [vmem:[%s7561_s13 + $0xa7] sm:$0x1] }
 0x425   : > { %v8975_v12 = vpop.eup %6327  ;;  %v5146_v0 = vsel %vm1199_vm8, %v8969_v59, 0.0  ;;  %v4373_v60 = vsel %vm1480_vm5, %v4372_v49, %v4371_v24  ;;  %v5447_v26 = vsel %vm1468_vm1, %v5446_v1, %v5445_v63  ;;  %v4349_v37 = vsel %vm1465_vm0, %v4348_v20, %v3549_v47  ;;  %v9026_v49 = vpop.f32.mrf.mxu3  ;;  %v4633_v57 = vld [vmem:[%s7561_s13 + $0xab] sm:$0x1]  ;;  %v4634_v34 = vld [vmem:[%s7561_s13 + $0xaf] sm:$0x1] }
 0x426   : > { %v5149_v52 = vsel %vm1199_vm8, %v8975_v12, 0.0  ;;  %5147 = vadd.xlane.f32.xlu2 %v5146_v0  ;;  %v5450_v0 = vrot.slane %v4643_v44, 4  ;;  %v4375_v11 = vsel %vm1483_vm6, %v4374_v38, %v4373_v60  ;;  %v5449_v3 = vsel %vm1471_vm2, %v5448_v30, %v5447_v26  ;;  %v4631_v38 = vld [vmem:[%s7561_s13 + $0xa3] sm:$0x1]  ;;  %v4636_v30 = vld [vmem:[%s7561_s13 + $0xb7] sm:$0x1] }
 0x427   : > { %5150 = vadd.xlane.f32.xlu0 %v5149_v52  ;;  %v5454_v52 = vrot.slane %v4645_v31, 2  ;;  %4431 = vmatpush.msrb.mxu3 %v4375_v11  ;;  %v4352_v2 = vrot.slane %v3552_v56, 5  ;;  %v4354_v46 = vrot.slane %v3553_v39, 4  ;;  %v4356_v54 = vrot.slane %v3554_v15, 3  ;;  %v4635_v31 = vld [vmem:[%s7561_s13 + $0xb3] sm:$0x1] }
 0x428   : > { %v5451_v43 = vsel %vm1474_vm3, %v5450_v0, %v5449_v3  ;;  %v4351_v19 = vsel %vm1468_vm1, %v4350_v50, %v4349_v37  ;;  %v4358_v33 = vrot.slane %v3555_v42, 2  ;;  %v5430_v24 = vrot.slane %v4632_v27, 7  ;;  %v4637_v55 = vld [vmem:[%s7561_s13 + $0xbb] sm:$0x1]  ;;  %v4638_v0 = vld [vmem:[%s7561_s13 + $0xbf] sm:$0x1] }
 0x429   : > { %v5453_v7 = vsel %vm1477_vm4, %v5452_v41, %v5451_v43  ;;  %v4353_v63 = vsel %vm1471_vm2, %v4352_v2, %v4351_v19  ;;  %v4360_v1 = vrot.slane %v3556_v62, 1  ;;  %v5432_v47 = vrot.slane %v4633_v57, 6  ;;  %v3542_v11 = vld [vmem:[%s7561_s13 + $0x86] sm:$0x1]  ;;  %v3541_v39 = vld [vmem:[%s7561_s13 + $0x82] sm:$0x1] }
 0x42a   : > { %v5455_v44 = vsel %vm1480_vm5, %v5454_v52, %v5453_v7  ;;  %v4355_v60 = vsel %vm1474_vm3, %v4354_v46, %v4353_v63  ;;  %v5431_v41 = vsel %vm1465_vm0, %v5430_v24, %v4631_v38  ;;  %v5434_v9 = vrot.slane %v4634_v34, 5  ;;  %v3543_v20 = vld [vmem:[%s7561_s13 + $0x8a] sm:$0x1]  ;;  %v3544_v42 = vld [vmem:[%s7561_s13 + $0x8e] sm:$0x1] }
 0x42b   : > { %v9036_v25 = vsel %vm1483_vm6, %v5456_v40, %v5455_v44  ;;  %v4357_v26 = vsel %vm1477_vm4, %v4356_v54, %v4355_v60  ;;  %v5436_v52 = vrot.slane %v4635_v31, 4  ;;  %v5438_v56 = vrot.slane %v4636_v30, 3  ;;  %v3545_v43 = vld [vmem:[%s7561_s13 + $0x92] sm:$0x1]  ;;  %v3546_v27 = vld [vmem:[%s7561_s13 + $0x96] sm:$0x1] }
 0x42c   : > { %5513 = vmatpush.msrb.mxu2 %v9036_v25  ;;  %v4359_v3 = vsel %vm1480_vm5, %v4358_v33, %v4357_v26  ;;  %v5433_v40 = vsel %vm1468_vm1, %v5432_v47, %v5431_v41  ;;  %v5440_v15 = vrot.slane %v4637_v55, 2  ;;  %v4334_v62 = vrot.slane %v3542_v11, 7  ;;  %v3547_v7 = vld [vmem:[%s7561_s13 + $0x9a] sm:$0x1]  ;;  %v3548_v54 = vld [vmem:[%s7561_s13 + $0x9e] sm:$0x1] }
 0x42d   : > { %v4361_v37 = vsel %vm1483_vm6, %v4360_v1, %v4359_v3  ;;  %v5435_v50 = vsel %vm1471_vm2, %v5434_v9, %v5433_v40  ;;  %v5442_v2 = vrot.slane %v4638_v0, 1  ;;  %v4336_v57 = vrot.slane %v3543_v20, 6  ;;  %v4624_v19 = vld [vmem:[%s7561_s13 + $0x87] sm:$0x1]  ;;  %v4623_v24 = vld [vmem:[%s7561_s13 + $0x83] sm:$0x1]  ;;  %v3363_v41 = vpop.f32.mrf.mxu3 }
 0x42e   : > { %4432 = vmatpush.msrb.mxu3 %v4361_v37  ;;  %v5437_v46 = vsel %vm1474_vm3, %v5436_v52, %v5435_v50  ;;  %v4335_v38 = vsel %vm1465_vm0, %v4334_v62, %v3541_v39  ;;  %v4338_v44 = vrot.slane %v3544_v42, 5  ;;  %v4340_v34 = vrot.slane %v3545_v43, 4  ;;  %v4625_v63 = vld [vmem:[%s7561_s13 + $0x8b] sm:$0x1]  ;;  %v4626_v55 = vld [vmem:[%s7561_s13 + $0x8f] sm:$0x1] }
 0x42f   : > { %v5439_v33 = vsel %vm1477_vm4, %v5438_v56, %v5437_v46  ;;  %v4342_v31 = vrot.slane %v3546_v27, 3  ;;  %v4337_v1 = vsel %vm1468_vm1, %v4336_v57, %v4335_v38  ;;  %v4344_v30 = vrot.slane %v3547_v7, 2  ;;  %v4627_v60 = vld [vmem:[%s7561_s13 + $0x93] sm:$0x1]  ;;  %v4628_v26 = vld [vmem:[%s7561_s13 + $0x97] sm:$0x1] }
 0x430   : > { %v5416_v0 = vrot.slane %v4624_v19, 7  ;;  %v4339_v9 = vsel %vm1471_vm2, %v4338_v44, %v4337_v1  ;;  %v4346_v11 = vrot.slane %v3548_v54, 1  ;;  %v4629_v52 = vld [vmem:[%s7561_s13 + $0x9b] sm:$0x1]  ;;  %v4630_v39 = vld [vmem:[%s7561_s13 + $0x9f] sm:$0x1] }
 0x431   : > { %v4341_v56 = vsel %vm1474_vm3, %v4340_v34, %v4339_v9  ;;  %v5418_v3 = vrot.slane %v4625_v63, 6  ;;  %v5420_v40 = vrot.slane %v4626_v55, 5  ;;  %v5422_v42 = vrot.slane %v4627_v60, 4  ;;  %v3533_v44 = vld [vmem:[%s7561_s13 + $0x62] sm:$0x1] }
 0x432   : > { %v5417_v20 = vsel %vm1465_vm0, %v5416_v0, %v4623_v24  ;;  %v5424_v43 = vrot.slane %v4628_v26, 3  ;;  %v5426_v50 = vrot.slane %v4629_v52, 2  ;;  %v5428_v7 = vrot.slane %v4630_v39, 1  ;;  %v3535_v19 = vld [vmem:[%s7561_s13 + $0x6a] sm:$0x1] }
 0x433   : > { %v5419_v37 = vsel %vm1468_vm1, %v5418_v3, %v5417_v20  ;;  %v3537_v34 = vld [vmem:[%s7561_s13 + $0x72] sm:$0x1]  ;;  %v3539_v24 = vld [vmem:[%s7561_s13 + $0x7a] sm:$0x1]  ;;  %v3540_v63 = vld [vmem:[%s7561_s13 + $0x7e] sm:$0x1] }
 0x434   : > { %v5421_v27 = vsel %vm1471_vm2, %v5420_v40, %v5419_v37  ;;  %v4322_v1 = vrot.slane %v3535_v19, 6  ;;  %v4326_v55 = vrot.slane %v3537_v34, 4  ;;  %v4330_v0 = vrot.slane %v3539_v24, 2  ;;  %v4615_v9 = vld [vmem:[%s7561_s13 + $0x63] sm:$0x1] }
 0x435   : > { %v5423_v46 = vsel %vm1474_vm3, %v5422_v42, %v5421_v27  ;;  %v4616_v26 = vld [vmem:[%s7561_s13 + $0x67] sm:$0x1]  ;;  %v4617_v52 = vld [vmem:[%s7561_s13 + $0x6b] sm:$0x1]  ;;  %v4619_v20 = vld [vmem:[%s7561_s13 + $0x73] sm:$0x1] }
 0x436   : > { %v5425_v54 = vsel %vm1477_vm4, %v5424_v43, %v5423_v46  ;;  %v4620_v3 = vld [vmem:[%s7561_s13 + $0x77] sm:$0x1]  ;;  %v4621_v40 = vld [vmem:[%s7561_s13 + $0x7b] sm:$0x1]  ;;  %v4622_v42 = vld [vmem:[%s7561_s13 + $0x7f] sm:$0x1] }
 0x437   : > { %5553 = vrot.lane.b32.xlu1 %v8983_v48, %s6442_s22  ;;  %v5441_v48 = vsel %vm1480_vm5, %v5440_v15, %v5439_v33  ;;  %v4343_v15 = vsel %vm1477_vm4, %v4342_v31, %v4341_v56  ;;  %v5427_v38 = vsel %vm1480_vm5, %v5426_v50, %v5425_v54  ;;  %v3536_v33 = vld [vmem:[%s7561_s13 + $0x6e] sm:$0x1]  ;;  %v3538_v31 = vld [vmem:[%s7561_s13 + $0x76] sm:$0x1]  ;;  %v4618_v56 = vld [vmem:[%s7561_s13 + $0x6f] sm:$0x1] }
 0x438   : > { %v9071_v47 = vsel %vm1483_vm6, %v5442_v2, %v5441_v48  ;;  %v4345_v62 = vsel %vm1480_vm5, %v4344_v30, %v4343_v15  ;;  %v9092_v57 = vsel %vm1483_vm6, %v5428_v7, %v5427_v38  ;;  %v4324_v30 = vrot.slane %v3536_v33, 5  ;;  %v3525_v7 = vld [vmem:[%s7561_s13 + $0x42] sm:$0x1]  ;;  %v3527_v19 = vld [vmem:[%s7561_s13 + $0x4a] sm:$0x1] }
 0x439   : > { %5514 = vmatpush.msrb.mxu2 %v9071_v47  ;;  %v4347_v2 = vsel %vm1483_vm6, %v4346_v11, %v4345_v62  ;;  %v4328_v60 = vrot.slane %v3538_v31, 3  ;;  %v5402_v43 = vrot.slane %v4616_v26, 7  ;;  %v5404_v62 = vrot.slane %v4617_v52, 6  ;;  %v3528_v31 = vld [vmem:[%s7561_s13 + $0x4e] sm:$0x1] }
 0x43a   : > { %4433 = vmatpush.msrb.mxu3 %v4347_v2  ;;  %v5406_v37 = vrot.slane %v4618_v56, 5  ;;  %v5408_v2 = vrot.slane %v4619_v20, 4  ;;  %v5410_v27 = vrot.slane %v4620_v3, 3  ;;  %v5412_v38 = vrot.slane %v4621_v40, 2  ;;  %v3529_v24 = vld [vmem:[%s7561_s13 + $0x52] sm:$0x1] }
 0x43b   : > { %5557 = vrot.lane.b32.xlu0 %v3363_v41, %s6442_s22  ;;  %5515 = vmatpush.msrb.mxu2 %v9092_v57  ;;  %v4332_v41 = vrot.slane %v3540_v63, 1  ;;  %v5403_v54 = vsel %vm1465_vm0, %v5402_v43, %v4615_v9  ;;  %v3530_v63 = vld [vmem:[%s7561_s13 + $0x56] sm:$0x1]  ;;  %v4308_v9 = vrot.slane %v3527_v19, 6  ;;  %v4312_v26 = vrot.slane %v3529_v24, 4 }
 0x43c   : > { %v5405_v34 = vsel %vm1468_vm1, %v5404_v62, %v5403_v54  ;;  %v4314_v52 = vrot.slane %v3530_v63, 3  ;;  %v4608_v40 = vld [vmem:[%s7561_s13 + $0x47] sm:$0x1]  ;;  %v4610_v62 = vld [vmem:[%s7561_s13 + $0x4f] sm:$0x1] }
 0x43d   : > { %v5388_v54 = vrot.slane %v4608_v40, 7  ;;  %v5392_v19 = vrot.slane %v4610_v62, 5  ;;  %v3517_v24 = vld [vmem:[%s7561_s13 + $0x22] sm:$0x1]  ;;  %v3518_v63 = vld [vmem:[%s7561_s13 + $0x26] sm:$0x1] }
 0x43e   : > { %5555 = vrot.lane.b32.xlu2 %v9026_v49, %s6442_s22  ;;  %v3534_v49 = vld [vmem:[%s7561_s13 + $0x66] sm:$0x1]  ;;  %v3523_v40 = vld [vmem:[%s7561_s13 + $0x3a] sm:$0x1] }
 0x43f   : > { %v4320_v48 = vrot.slane %v3534_v49, 7  ;;  %v5414_v49 = vrot.slane %v4622_v42, 1 }
 0x441   : > { %v4321_v11 = vsel %vm1465_vm0, %v4320_v48, %v3533_v44  ;;  %v3526_v44 = vld [vmem:[%s7561_s13 + $0x46] sm:$0x1] }
 0x442   : > { %v4323_v39 = vsel %vm1468_vm1, %v4322_v1, %v4321_v11  ;;  %v5407_v1 = vsel %vm1471_vm2, %v5406_v37, %v5405_v34  ;;  %v4310_v11 = vrot.slane %v3528_v31, 5  ;;  %v4611_v37 = vld [vmem:[%s7561_s13 + $0x53] sm:$0x1] }
 0x443   : > { %v4325_v15 = vsel %vm1471_vm2, %v4324_v30, %v4323_v39  ;;  %v3531_v30 = vld [vmem:[%s7561_s13 + $0x5a] sm:$0x1] }
 0x444   : > { %v4327_v50 = vsel %vm1474_vm3, %v4326_v55, %v4325_v15  ;;  %v3532_v55 = vld [vmem:[%s7561_s13 + $0x5e] sm:$0x1]  ;;  %v4316_v20 = vrot.slane %v3531_v30, 2  ;;  %v4609_v15 = vld [vmem:[%s7561_s13 + $0x4b] sm:$0x1] }
 0x445   : > { %v4329_v46 = vsel %vm1477_vm4, %v4328_v60, %v4327_v50  ;;  %v4306_v60 = vrot.slane %v3526_v44, 7  ;;  %v4318_v3 = vrot.slane %v3532_v55, 1  ;;  %v4612_v50 = vld [vmem:[%s7561_s13 + $0x57] sm:$0x1]  ;;  %v5390_v44 = vrot.slane %v4609_v15, 6 }
 0x446   : > { %v4331_v33 = vsel %vm1480_vm5, %v4330_v0, %v4329_v46  ;;  %v5409_v0 = vsel %vm1474_vm3, %v5408_v2, %v5407_v1  ;;  %v4614_v46 = vld [vmem:[%s7561_s13 + $0x5f] sm:$0x1]  ;;  %v5396_v34 = vrot.slane %v4612_v50, 3 }
 0x447   : > { %v4333_v48 = vsel %vm1483_vm6, %v4332_v41, %v4331_v33  ;;  %v4607_v41 = vld [vmem:[%s7561_s13 + $0x43] sm:$0x1]  ;;  %v5411_v56 = vsel %vm1477_vm4, %v5410_v27, %v5409_v0  ;;  %v4307_v39 = vsel %vm1465_vm0, %v4306_v60, %v3525_v7  ;;  %v4613_v7 = vld [vmem:[%s7561_s13 + $0x5b] sm:$0x1]  ;;  %v5394_v33 = vrot.slane %v4611_v37, 4 }
 0x448   : > { %4434 = vmatpush.msrb.mxu3 %v4333_v48  ;;  %v5413_v42 = vsel %vm1480_vm5, %v5412_v38, %v5411_v56  ;;  %v4309_v43 = vsel %vm1468_vm1, %v4308_v9, %v4307_v39  ;;  %v3519_v48 = vld [vmem:[%s7561_s13 + $0x2a] sm:$0x1]  ;;  %v5398_v55 = vrot.slane %v4613_v7, 2  ;;  %v5400_v60 = vrot.slane %v4614_v46, 1  ;;  %v3520_v9 = vld [vmem:[%s7561_s13 + $0x2e] sm:$0x1] }
 0x449   : > { %v9141_v2 = vsel %vm1483_vm6, %v5414_v49, %v5413_v42  ;;  %v4311_v27 = vsel %vm1471_vm2, %v4310_v11, %v4309_v43  ;;  %v5389_v49 = vsel %vm1465_vm0, %v5388_v54, %v4607_v41  ;;  %v3521_v0 = vld [vmem:[%s7561_s13 + $0x32] sm:$0x1]  ;;  %v4292_v41 = vrot.slane %v3518_v63, 7  ;;  %v3524_v42 = vld [vmem:[%s7561_s13 + $0x3e] sm:$0x1] }
 0x44a   : > { %5516 = vmatpush.msrb.mxu2 %v9141_v2  ;;  %v4313_v38 = vsel %vm1474_vm3, %v4312_v26, %v4311_v27  ;;  %v5391_v30 = vsel %vm1468_vm1, %v5390_v44, %v5389_v49  ;;  %v4294_v56 = vrot.slane %v3519_v48, 6  ;;  %v4296_v43 = vrot.slane %v3520_v9, 5  ;;  %v3510_v37 = vld [vmem:[%s7561_s13 + $0x6] sm:$0x1]  ;;  %v3511_v7 = vld [vmem:[%s7561_s13 + $0xa] sm:$0x1] }
 0x44b   : > { %v4315_v31 = vsel %vm1477_vm4, %v4314_v52, %v4313_v38  ;;  %v5393_v52 = vsel %vm1471_vm2, %v5392_v19, %v5391_v30  ;;  %v4298_v62 = vrot.slane %v3521_v0, 4  ;;  %v3512_v46 = vld [vmem:[%s7561_s13 + $0xe] sm:$0x1]  ;;  %v3513_v54 = vld [vmem:[%s7561_s13 + $0x12] sm:$0x1]  ;;  %v4304_v63 = vrot.slane %v3524_v42, 1 }
 0x44c   : > { %v4317_v1 = vsel %vm1480_vm5, %v4316_v20, %v4315_v31  ;;  %v3522_v20 = vld [vmem:[%s7561_s13 + $0x36] sm:$0x1]  ;;  %v5395_v15 = vsel %vm1474_vm3, %v5394_v33, %v5393_v52  ;;  %v4302_v33 = vrot.slane %v3523_v40, 2  ;;  %v3509_v31 = vld [vmem:[%s7561_s13 + $0x2] sm:$0x1]  ;;  %v4282_v9 = vrot.slane %v3512_v46, 5 }
 0x44d   : > { %v4319_v26 = vsel %vm1483_vm6, %v4318_v3, %v4317_v1  ;;  %v4293_v3 = vsel %vm1465_vm0, %v4292_v41, %v3517_v24  ;;  %v5397_v50 = vsel %vm1477_vm4, %v5396_v34, %v5395_v15  ;;  %v4300_v19 = vrot.slane %v3522_v20, 3  ;;  %v3514_v49 = vld [vmem:[%s7561_s13 + $0x16] sm:$0x1]  ;;  %v3515_v48 = vld [vmem:[%s7561_s13 + $0x1a] sm:$0x1] }
 0x44e   : > { %4435 = vmatpush.msrb.mxu3 %v4319_v26  ;;  %v4295_v27 = vsel %vm1468_vm1, %v4294_v56, %v4293_v3  ;;  %v5399_v44 = vsel %vm1480_vm5, %v5398_v55, %v5397_v50  ;;  %v4278_v1 = vrot.slane %v3510_v37, 7  ;;  %v4280_v55 = vrot.slane %v3511_v7, 6  ;;  %v4600_v20 = vld [vmem:[%s7561_s13 + $0x27] sm:$0x1]  ;;  %v4602_v37 = vld [vmem:[%s7561_s13 + $0x2f] sm:$0x1] }
 0x44f   : > { %v4297_v38 = vsel %vm1471_vm2, %v4296_v43, %v4295_v27  ;;  %v9179_v24 = vsel %vm1483_vm6, %v5400_v60, %v5399_v44  ;;  %v4284_v0 = vrot.slane %v3513_v54, 4  ;;  %v3516_v60 = vld [vmem:[%s7561_s13 + $0x1e] sm:$0x1]  ;;  %v4286_v56 = vrot.slane %v3514_v49, 3  ;;  %v4599_v7 = vld [vmem:[%s7561_s13 + $0x23] sm:$0x1] }
 0x450   : > { %v4299_v34 = vsel %vm1474_vm3, %v4298_v62, %v4297_v38  ;;  %5517 = vmatpush.msrb.mxu2 %v9179_v24  ;;  %v4279_v41 = vsel %vm1465_vm0, %v4278_v1, %v3509_v31  ;;  %v4288_v43 = vrot.slane %v3515_v48, 2  ;;  %v4601_v62 = vld [vmem:[%s7561_s13 + $0x2b] sm:$0x1]  ;;  %v4603_v46 = vld [vmem:[%s7561_s13 + $0x33] sm:$0x1]  ;;  %v4290_v38 = vrot.slane %v3516_v60, 1 }
 0x451   : > { %v4301_v30 = vsel %vm1477_vm4, %v4300_v19, %v4299_v34  ;;  %v4281_v3 = vsel %vm1468_vm1, %v4280_v55, %v4279_v41  ;;  %v4604_v19 = vld [vmem:[%s7561_s13 + $0x37] sm:$0x1]  ;;  %v5376_v49 = vrot.slane %v4601_v62, 6  ;;  %v5378_v34 = vrot.slane %v4602_v37, 5  ;;  %v4605_v1 = vld [vmem:[%s7561_s13 + $0x3b] sm:$0x1] }
 0x452   : > { %v4303_v52 = vsel %vm1480_vm5, %v4302_v33, %v4301_v30  ;;  %v4283_v27 = vsel %vm1471_vm2, %v4282_v9, %v4281_v3  ;;  %v5374_v33 = vrot.slane %v4600_v20, 7  ;;  %v5380_v55 = vrot.slane %v4603_v46, 4  ;;  %v4592_v20 = vld [vmem:[%s7561_s13 + $0x7] sm:$0x1]  ;;  %v4593_v37 = vld [vmem:[%s7561_s13 + $0xb] sm:$0x1] }
 0x453   : > { %v4305_v42 = vsel %vm1483_vm6, %v4304_v63, %v4303_v52  ;;  %v4285_v44 = vsel %vm1474_vm3, %v4284_v0, %v4283_v27  ;;  %v4606_v0 = vld [vmem:[%s7561_s13 + $0x3f] sm:$0x1]  ;;  %v5382_v60 = vrot.slane %v4604_v19, 3  ;;  %v5384_v62 = vrot.slane %v4605_v1, 2  ;;  %v4591_v19 = vld [vmem:[%s7561_s13 + $0x3] sm:$0x1] }
 0x454   : > { %4436 = vmatpush.msrb.mxu3 %v4305_v42  ;;  %v4287_v31 = vsel %vm1477_vm4, %v4286_v56, %v4285_v44  ;;  %v5375_v30 = vsel %vm1465_vm0, %v5374_v33, %v4599_v7  ;;  %v5362_v33 = vrot.slane %v4593_v37, 6  ;;  %v4596_v1 = vld [vmem:[%s7561_s13 + $0x17] sm:$0x1] }
 0x455   : > { %v4289_v48 = vsel %vm1480_vm5, %v4288_v43, %v4287_v31  ;;  %v5377_v52 = vsel %vm1468_vm1, %v5376_v49, %v5375_v30 }
 0x456   : > { %v4291_v9 = vsel %vm1483_vm6, %v4290_v38, %v4289_v48  ;;  %v5379_v56 = vsel %vm1471_vm2, %v5378_v34, %v5377_v52  ;;  %v4190_v48 = vld [vmem:[%s7662_s21] sm:$0xff] }
 0x457   : > { %4437 = vmatpush.msrb.mxu3 %v4291_v9  ;;  %v5381_v43 = vsel %vm1474_vm3, %v5380_v55, %v5379_v56 }
 0x458   : > { %v9157_v11 = vpop.xlane.xlu2 %4047 }
 0x459   : > { %6329 = vrcp.f32 %v9157_v11  ;;  %v4079_v39 = vand.u32 2147483647, %v9157_v11  ;;  %v4081_v50 = vand.u32 2147483648, %v9157_v11  ;;  %vm4075_vm11 = vweird.f32 %v9157_v11  ;;  %6163 = vmatpush.msra.mxu3 %v8999_v29 }
 0x45a   : > { %v5360_v29 = vrot.slane %v4592_v20, 7 }
 0x45b   : > { %vm4080_vm13 = vcmp.eq.f32.partialorder %v4079_v39, 8.507059e+37  ;;  %v4082_v3 = vor.u32 1.1754944e-38, %v4081_v50  ;;  %v5386_v39 = vrot.slane %v4606_v0, 1  ;;  %v4594_v50 = vld [vmem:[%s7561_s13 + $0xf] sm:$0x1]  ;;  %6164 = vmatpush.msra.mxu3 %v9036_v25 }
 0x45c   : > { %v5364_v34 = vrot.slane %v4594_v50, 5  ;;  %v5361_v9 = vsel %vm1465_vm0, %v5360_v29, %v4591_v19 }
 0x45d   : > { %6165 = vmatpush.msra.mxu3 %v9071_v47 }
 0x45f   : > { %v6330_v26 = vpop.eup %6329  ;;  %6166 = vmatpush.msra.mxu3 %v9092_v57 }
 0x460   : > { %v4071_v40 = vmul.f32 %v6330_v26, %v9157_v11  ;;  %v9190_v15 = vpop.xlane.xlu2 %4050  ;;  %vm4076_vm10 = vweird.f32 %v6330_v26  ;;  %v5383_v11 = vsel %vm1477_vm4, %v5382_v60, %v5381_v43  ;;  %v4598_v60 = vld [vmem:[%s7561_s13 + $0x1f] sm:$0x1] }
 0x461   : > { %6331 = vrcp.f32 %v9190_v15  ;;  %vm9216_vm12 = vmor %vm4075_vm11, %vm4076_vm10  ;;  %v5385_v49 = vsel %vm1480_vm5, %v5384_v62, %v5383_v11  ;;  %v4095_v30 = vand.u32 2147483648, %v9190_v15  ;;  %vm4089_vm15 = vweird.f32 %v9190_v15  ;;  %6167 = vmatpush.msra.mxu3 %v9141_v2 }
 0x462   : > { %v4072_v54 = vsub.f32 1.0, %v4071_v40  ;;  %v5387_v25 = vsel %vm1483_vm6, %v5386_v39, %v5385_v49  ;;  %v4093_v52 = vand.u32 2147483647, %v9190_v15  ;;  %v5372_v50 = vrot.slane %v4598_v60, 1  ;;  %v4191_v49 = vld [vmem:[%s7662_s21 + $0x8] sm:$0xff] }
 0x463   : > { %5518 = vmatpush.msrb.mxu2 %v5387_v25  ;;  %6168 = vmatpush.msra.mxu3 %v9179_v24 }
 0x464   : > { %v4073_v63 = vmul.f32 %v6330_v26, %v4072_v54  ;;  %vm4094_vm0 = vcmp.eq.f32.partialorder %v4093_v52, 8.507059e+37 }
 0x465   : > { %6169 = vmatpush.msra.mxu3 %v5387_v25 }
 0x466   : > { %v4074_v41 = vadd.f32 %v6330_v26, %v4073_v63 }
 0x467   : > { %v9213_v40 = vpop.eup %6331 }
 0x468   : > { %v4085_v27 = vmul.f32 %v9213_v40, %v9190_v15  ;;  %v9227_v7 = vpop.xlane.xlu2 %4053  ;;  %v4078_v46 = vsel %vm9216_vm12, %v6330_v26, %v4074_v41  ;;  %v4595_v26 = vld [vmem:[%s7561_s13 + $0x13] sm:$0x1]  ;;  %vm4090_vm14 = vweird.f32 %v9213_v40  ;;  %v5363_v41 = vsel %vm1468_vm1, %v5362_v33, %v5361_v9 }
 0x469   : > { %v9233_v54 = vpop.xlane.xlu0 %5129  ;;  %6333 = vrcp.f32 %v9227_v7  ;;  %v4083_v44 = vsel %vm4080_vm13, %v4082_v3, %v4078_v46  ;;  %v5366_v47 = vrot.slane %v4595_v26, 4  ;;  %vm9264_vm9 = vmor %vm4089_vm15, %vm4090_vm14  ;;  %v5365_v42 = vsel %vm1471_vm2, %v5364_v34, %v5363_v41 }
 0x46a   : > { %v4086_v38 = vsub.f32 1.0, %v4085_v27  ;;  %6335 = vrcp.f32 %v9233_v54  ;;  %v4182_v31 = vmul.f32 %v8822_v53, %v4083_v44  ;;  %v4597_v53 = vld [vmem:[%s7561_s13 + $0x1b] sm:$0x1]  ;;  %v5368_v3 = vrot.slane %v4596_v1, 3 }
 0x46b   : > { %v5367_v37 = vsel %vm1474_vm3, %v5366_v47, %v5365_v42  ;;  %v5370_v27 = vrot.slane %v4597_v53, 2  ;;  %v4096_v46 = vor.u32 1.1754944e-38, %v4095_v30  ;;  %vm4103_vm1 = vweird.f32 %v9227_v7 }
 0x46c   : > { %v4087_v63 = vmul.f32 %v9213_v40, %v4086_v38  ;;  %v4198_v55 = vadd.f32 %v4190_v48, %v4182_v31  ;;  %6116 = vmatmul.msk.f32.vlgmr.msrb.gmra.mxu3 %vm1199_vm8, %v4182_v31  ;;  %v5369_v29 = vsel %vm1477_vm4, %v5368_v3, %v5367_v37  ;;  %v5161_v31 = vand.u32 2147483647, %v9233_v54 }
 0x46d   : > { %v5371_v26 = vsel %vm1480_vm5, %v5370_v27, %v5369_v29  ;;  %v4109_v24 = vand.u32 2147483648, %v9227_v7  ;;  %v4107_v25 = vand.u32 2147483647, %v9227_v7  ;;  %vm5157_vm5 = vweird.f32 %v9233_v54 }
 0x46e   : > { %v4088_v0 = vadd.f32 %v9213_v40, %v4087_v63  ;;  %4206 = vst.msk [vmem:[%s7662_s21] sm:$0xff] %vm1199_vm8, %v4198_v55  ;;  %v5373_v34 = vsel %vm1483_vm6, %v5372_v50, %v5371_v26  ;;  %v5163_v63 = vand.u32 2147483648, %v9233_v54  ;;  %vm9326_vm6 = vcmp.eq.f32.partialorder %v5161_v31, 8.507059e+37 }
 0x46f   : > { %v9258_v56 = vpop.eup %6333  ;;  %5519 = vmatpush.msrb.mxu2 %v5373_v34  ;;  %6170 = vmatpush.msra.mxu3 %v5373_v34  ;;  %v4110_v60 = vor.u32 1.1754944e-38, %v4109_v24  ;;  %vm4108_vm11 = vcmp.eq.f32.partialorder %v4107_v25, 8.507059e+37 }
 0x470   : > { %v9269_v43 = vpop.eup %6335  ;;  %v4099_v15 = vmul.f32 %v9258_v56, %v9227_v7  ;;  %v9273_v62 = vpop.xlane.xlu1 %4056  ;;  %v4092_v57 = vsel %vm9264_vm9, %v9213_v40, %v4088_v0  ;;  %vm4104_vm2 = vweird.f32 %v9258_v56  ;;  %v5164_v20 = vor.u32 1.1754944e-38, %v5163_v63 }
 0x471   : > { %v5153_v11 = vmul.f32 %v9269_v43, %v9233_v54  ;;  %6337 = vrcp.f32 %v9273_v62  ;;  %v9283_v39 = vpop.xlane.xlu2 %5132  ;;  %v4097_v2 = vsel %vm4094_vm0, %v4096_v46, %v4092_v57  ;;  %vm5158_vm3 = vweird.f32 %v9269_v43  ;;  %vm9310_vm4 = vmor %vm4103_vm1, %vm4104_vm2 }
 0x472   : > { %v4100_v44 = vsub.f32 1.0, %v4099_v15  ;;  %6339 = vrcp.f32 %v9283_v39  ;;  %v4183_v19 = vmul.f32 %v8831_v14, %v4097_v2  ;;  %vm5159_vm10 = vmor %vm5157_vm5, %vm5158_vm3  ;;  %v4123_v42 = vand.u32 2147483648, %v9273_v62 }
 0x473   : > { %v5154_v40 = vsub.f32 1.0, %v5153_v11  ;;  %v5177_v50 = vand.u32 2147483648, %v9283_v39  ;;  %v4121_v2 = vand.u32 2147483647, %v9273_v62  ;;  %vm4117_vm13 = vweird.f32 %v9273_v62 }
 0x474   : > { %v4101_v38 = vmul.f32 %v9258_v56, %v4100_v44  ;;  %v4199_v48 = vadd.f32 %v4191_v49, %v4183_v19  ;;  %6117 = vmatmul.msk.f32.gmra.mxu3 %vm1199_vm8, %v4183_v19  ;;  %v4192_v44 = vld [vmem:[%s7662_s21 + $0x10] sm:$0xff]  ;;  %v4124_v31 = vor.u32 1.1754944e-38, %v4123_v42  ;;  %vm5171_vm9 = vweird.f32 %v9283_v39 }
 0x475   : > { %v5155_v33 = vmul.f32 %v9269_v43, %v5154_v40  ;;  %vm4122_vm0 = vcmp.eq.f32.partialorder %v4121_v2, 8.507059e+37 }
 0x476   : > { %v4102_v14 = vadd.f32 %v9258_v56, %v4101_v38  ;;  %4207 = vst.msk [vmem:[%s7662_s21 + $0x8] sm:$0xff] %vm1199_vm8, %v4199_v48  ;;  %v5178_v48 = vor.u32 1.1754944e-38, %v5177_v50 }
 0x477   : > { %v9302_v1 = vpop.eup %6337  ;;  %v5156_v30 = vadd.f32 %v9269_v43, %v5155_v33  ;;  %v3366_v47 = vpop.f32.mrf.mxu3 }
 0x478   : > { %v9314_v53 = vpop.eup %6339  ;;  %v4113_v9 = vmul.f32 %v9302_v1, %v9273_v62  ;;  %v9321_v0 = vpop.xlane.xlu0 %4059  ;;  %v4106_v7 = vsel %vm9310_vm4, %v9258_v56, %v4102_v14  ;;  %5559 = vrot.lane.b32.xlu2 %v3366_v47, %s6442_s22  ;;  %vm4118_vm12 = vweird.f32 %v9302_v1  ;;  %v5175_v62 = vand.u32 2147483647, %v9283_v39 }
 0x479   : > { %v5167_v54 = vmul.f32 %v9314_v53, %v9283_v39  ;;  %6341 = vrcp.f32 %v9321_v0  ;;  %v9333_v41 = vpop.xlane.xlu1 %5135  ;;  %v4111_v15 = vsel %vm4108_vm11, %v4110_v60, %v4106_v7  ;;  %v5160_v57 = vsel %vm5159_vm10, %v9269_v43, %v5156_v30  ;;  %vm9358_vm14 = vmor %vm4117_vm13, %vm4118_vm12 }
 0x47a   : > { %v4114_v56 = vsub.f32 1.0, %v4113_v9  ;;  %6343 = vrcp.f32 %v9333_v41  ;;  %v4184_v27 = vmul.f32 %v8841_v23, %v4111_v15  ;;  %v5165_v46 = vsel %vm9326_vm6, %v5164_v20, %v5160_v57  ;;  %v5272_v23 = vld [vmem:[%s7662_s21] sm:$0xff] }
 0x47b   : > { %v5168_v3 = vsub.f32 1.0, %v5167_v54  ;;  %v5264_v40 = vmul.f32 %v8845_v4, %v5165_v46  ;;  %vm5172_vm15 = vweird.f32 %v9314_v53  ;;  %v4137_v55 = vand.u32 2147483648, %v9321_v0 }
 0x47c   : > { %v4115_v37 = vmul.f32 %v9302_v1, %v4114_v56  ;;  %v4200_v43 = vadd.f32 %v4192_v44, %v4184_v27  ;;  %6118 = vmatmul.msk.f32.gmra.mxu3 %vm1199_vm8, %v4184_v27  ;;  %v5191_v9 = vand.u32 2147483648, %v9333_v41  ;;  %vm5173_vm1 = vmor %vm5171_vm9, %vm5172_vm15  ;;  %vm5176_vm2 = vcmp.eq.f32.partialorder %v5175_v62, 8.507059e+37  ;;  %v4193_v56 = vld [vmem:[%s7662_s21 + $0x18] sm:$0xff] }
 0x47d   : > { %v5169_v11 = vmul.f32 %v9314_v53, %v5168_v3  ;;  %v5280_v19 = vadd.f32 %v5272_v23, %v5264_v40  ;;  %6140 = vmatmul.msk.f32.vlgmr.msrb.gmra.mxu2 %vm1199_vm8, %v5264_v40  ;;  %v4135_v39 = vand.u32 2147483647, %v9321_v0  ;;  %vm4131_vm4 = vweird.f32 %v9321_v0 }
 0x47e   : > { %v4116_v29 = vadd.f32 %v9302_v1, %v4115_v37  ;;  %4208 = vst.msk [vmem:[%s7662_s21 + $0x10] sm:$0xff] %vm1199_vm8, %v4200_v43  ;;  %vm5185_vm5 = vweird.f32 %v9333_v41  ;;  %v5189_v37 = vand.u32 2147483647, %v9333_v41  ;;  %v4138_v46 = vor.u32 1.1754944e-38, %v4137_v55 }
 0x47f   : > { %v9355_v38 = vpop.eup %6341  ;;  %v5170_v4 = vadd.f32 %v9314_v53, %v5169_v11  ;;  %v3369_v49 = vpop.f32.mrf.mxu3  ;;  %5288 = vst.msk [vmem:[%s7662_s21] sm:$0xff] %vm1199_vm8, %v5280_v19  ;;  %v5192_v11 = vor.u32 1.1754944e-38, %v5191_v9  ;;  %vm4136_vm11 = vcmp.eq.f32.partialorder %v4135_v39, 8.507059e+37 }
 0x480   : > { %v9365_v33 = vpop.eup %6343  ;;  %v4127_v24 = vmul.f32 %v9355_v38, %v9321_v0  ;;  %v9372_v34 = vpop.xlane.xlu2 %4062  ;;  %v4120_v63 = vsel %vm9358_vm14, %v9302_v1, %v4116_v29  ;;  %5561 = vrot.lane.b32.xlu1 %v3369_v49, %s6442_s22  ;;  %vm4132_vm3 = vweird.f32 %v9355_v38  ;;  %vm5190_vm13 = vcmp.eq.f32.partialorder %v5189_v37, 8.507059e+37 }
 0x481   : > { %v5181_v14 = vmul.f32 %v9365_v33, %v9333_v41  ;;  %v9381_v25 = vpop.xlane.xlu0 %5138  ;;  %6345 = vrcp.f32 %v9372_v34  ;;  %v4125_v47 = vsel %vm4122_vm0, %v4124_v31, %v4120_v63  ;;  %v5174_v7 = vsel %vm5173_vm1, %v9314_v53, %v5170_v4  ;;  %vm9408_vm6 = vmor %vm4131_vm4, %vm4132_vm3 }
 0x482   : > { %v4128_v30 = vsub.f32 1.0, %v4127_v24  ;;  %6347 = vrcp.f32 %v9381_v25  ;;  %v4185_v60 = vmul.f32 %v8863_v21, %v4125_v47  ;;  %v5179_v54 = vsel %vm5176_vm2, %v5178_v48, %v5174_v7  ;;  %v5273_v21 = vld [vmem:[%s7662_s21 + $0x8] sm:$0xff] }
 0x483   : > { %v5182_v1 = vsub.f32 1.0, %v5181_v14  ;;  %v5265_v42 = vmul.f32 %v8867_v22, %v5179_v54  ;;  %vm5186_vm10 = vweird.f32 %v9365_v33  ;;  %v5205_v26 = vand.u32 2147483648, %v9381_v25 }
 0x484   : > { %v4129_v52 = vmul.f32 %v9355_v38, %v4128_v30  ;;  %v4201_v53 = vadd.f32 %v4193_v56, %v4185_v60  ;;  %6119 = vmatmul.msk.f32.gmra.mxu3 %vm1199_vm8, %v4185_v60  ;;  %v4151_v62 = vand.u32 2147483648, %v9372_v34  ;;  %vm5187_vm12 = vmor %vm5185_vm5, %vm5186_vm10  ;;  %v4194_v30 = vld [vmem:[%s7662_s21 + $0x20] sm:$0xff]  ;;  %v4149_v55 = vand.u32 2147483647, %v9372_v34 }
 0x485   : > { %v5183_v20 = vmul.f32 %v9365_v33, %v5182_v1  ;;  %v5281_v57 = vadd.f32 %v5273_v21, %v5265_v42  ;;  %6141 = vmatmul.msk.f32.gmra.mxu2 %vm1199_vm8, %v5265_v42  ;;  %vm4145_vm15 = vweird.f32 %v9372_v34  ;;  %v5203_v1 = vand.u32 2147483647, %v9381_v25 }
 0x486   : > { %v4130_v3 = vadd.f32 %v9355_v38, %v4129_v52  ;;  %v5677_v50 = vld [vmem:[%s7662_s21] sm:$0xff]  ;;  %4209 = vst.msk [vmem:[%s7662_s21 + $0x18] sm:$0xff] %vm1199_vm8, %v4201_v53  ;;  %vm5199_vm9 = vweird.f32 %v9381_v25  ;;  %v5206_v60 = vor.u32 1.1754944e-38, %v5205_v26  ;;  %v4152_v54 = vor.u32 1.1754944e-38, %v4151_v62 }
 0x487   : > { %v9405_v15 = vpop.eup %6345  ;;  %v5184_v0 = vadd.f32 %v9365_v33, %v5183_v20  ;;  %v3372_v40 = vpop.f32.mrf.mxu3  ;;  %v5685_v23 = vmul.f32 0.25, %v5677_v50  ;;  %5289 = vst.msk [vmem:[%s7662_s21 + $0x8] sm:$0xff] %vm1199_vm8, %v5281_v57  ;;  %vm4150_vm2 = vcmp.eq.f32.partialorder %v4149_v55, 8.507059e+37  ;;  %vm5204_vm4 = vcmp.eq.f32.partialorder %v5203_v1, 8.507059e+37 }
 0x488   : > { %v9415_v27 = vpop.eup %6347  ;;  %v4141_v44 = vmul.f32 %v9405_v15, %v9372_v34  ;;  %v9422_v2 = vpop.xlane.xlu1 %4065  ;;  %v4134_v43 = vsel %vm9408_vm6, %v9355_v38, %v4130_v3  ;;  %5563 = vrot.lane.b32.xlu0 %v3372_v40, %s6442_s22  ;;  %vm4146_vm14 = vweird.f32 %v9405_v15 }
 0x489   : > { %v5195_v29 = vmul.f32 %v9415_v27, %v9381_v25  ;;  %6349 = vrcp.f32 %v9422_v2  ;;  %v9433_v19 = vpop.xlane.xlu2 %5141  ;;  %5693 = vst.msk [vmem:[%s7662_s21] sm:$0xff] %vm1199_vm8, %v5685_v23  ;;  %v4139_v31 = vsel %vm4136_vm11, %v4138_v46, %v4134_v43  ;;  %v5188_v24 = vsel %vm5187_vm12, %v9365_v33, %v5184_v0  ;;  %v5274_v33 = vld [vmem:[%s7662_s21 + $0x10] sm:$0xff]  ;;  %vm9463_vm0 = vmor %vm4145_vm15, %vm4146_vm14  ;;  %v4195_v23 = vld [vmem:[%s7662_s21 + $0x28] sm:$0xff] }
 0x48a   : > { %v4142_v4 = vsub.f32 1.0, %v4141_v44  ;;  %6351 = vrcp.f32 %v9433_v19  ;;  %v4186_v63 = vmul.f32 %v8885_v17, %v4139_v31  ;;  %v5193_v48 = vsel %vm5190_vm13, %v5192_v11, %v5188_v24 }
 0x48b   : > { %v5196_v38 = vsub.f32 1.0, %v5195_v29  ;;  %v5266_v41 = vmul.f32 %v8890_v28, %v5193_v48  ;;  %vm5200_vm1 = vweird.f32 %v9415_v27  ;;  %v4165_v0 = vand.u32 2147483648, %v9422_v2 }
 0x48c   : > { %v4143_v49 = vmul.f32 %v9405_v15, %v4142_v4  ;;  %v4202_v9 = vadd.f32 %v4194_v30, %v4186_v63  ;;  %6120 = vmatmul.msk.f32.gmra.mxu3 %vm1199_vm8, %v4186_v63  ;;  %vm5201_vm3 = vmor %vm5199_vm9, %vm5200_vm1  ;;  %v4163_v11 = vand.u32 2147483647, %v9422_v2  ;;  %v5219_v43 = vand.u32 2147483648, %v9433_v19 }
 0x48d   : > { %v5197_v14 = vmul.f32 %v9415_v27, %v5196_v38  ;;  %v5282_v7 = vadd.f32 %v5274_v33, %v5266_v41  ;;  %6142 = vmatmul.msk.f32.gmra.mxu2 %vm1199_vm8, %v5266_v41  ;;  %vm4159_vm6 = vweird.f32 %v9422_v2  ;;  %v5275_v26 = vld [vmem:[%s7662_s21 + $0x18] sm:$0xff]  ;;  %v4166_v62 = vor.u32 1.1754944e-38, %v4165_v0 }
 0x48e   : > { %v4144_v17 = vadd.f32 %v9405_v15, %v4143_v49  ;;  %v5678_v20 = vld [vmem:[%s7662_s21 + $0x8] sm:$0xff]  ;;  %4210 = vst.msk [vmem:[%s7662_s21 + $0x20] sm:$0xff] %vm1199_vm8, %v4202_v9  ;;  %v5217_v31 = vand.u32 2147483647, %v9433_v19  ;;  %vm5213_vm12 = vweird.f32 %v9433_v19  ;;  %vm4164_vm13 = vcmp.eq.f32.partialorder %v4163_v11, 8.507059e+37 }
 0x48f   : > { %v9457_v47 = vpop.eup %6349  ;;  %v5198_v34 = vadd.f32 %v9415_v27, %v5197_v14  ;;  %v3375_v42 = vpop.f32.mrf.mxu3  ;;  %v5686_v21 = vmul.f32 0.25, %v5678_v20  ;;  %5290 = vst.msk [vmem:[%s7662_s21 + $0x10] sm:$0xff] %vm1199_vm8, %v5282_v7  ;;  %v5220_v30 = vor.u32 1.1754944e-38, %v5219_v43 }
 0x490   : > { %v9469_v52 = vpop.eup %6351  ;;  %v4155_v56 = vmul.f32 %v9457_v47, %v9422_v2  ;;  %v9476_v39 = vpop.xlane.xlu0 %4068  ;;  %v4148_v53 = vsel %vm9463_vm0, %v9405_v15, %v4144_v17  ;;  %5565 = vrot.lane.b32.xlu2 %v3375_v42, %s6442_s22  ;;  %vm4160_vm5 = vweird.f32 %v9457_v47  ;;  %vm5218_vm15 = vcmp.eq.f32.partialorder %v5217_v31, 8.507059e+37 }
 0x491   : > { %v5209_v3 = vmul.f32 %v9469_v52, %v9433_v19  ;;  %6353 = vrcp.f32 %v9476_v39  ;;  %v9486_v57 = vpop.xlane.xlu1 %5144  ;;  %5694 = vst.msk [vmem:[%s7662_s21 + $0x8] sm:$0xff] %vm1199_vm8, %v5686_v21  ;;  %v4153_v37 = vsel %vm4150_vm2, %v4152_v54, %v4148_v53  ;;  %v5202_v46 = vsel %vm5201_vm3, %v9415_v27, %v5198_v34  ;;  %vm9516_vm11 = vmor %vm4159_vm6, %vm4160_vm5 }
 0x492   : > { %v4156_v22 = vsub.f32 1.0, %v4155_v56  ;;  %6355 = vrcp.f32 %v9486_v57  ;;  %v4187_v44 = vmul.f32 %v8905_v6, %v4153_v37  ;;  %v5207_v40 = vsel %vm5204_vm4, %v5206_v60, %v5202_v46  ;;  %v4196_v56 = vld [vmem:[%s7662_s21 + $0x30] sm:$0xff] }
 0x493   : > { %v5210_v15 = vsub.f32 1.0, %v5209_v3  ;;  %v5267_v29 = vmul.f32 %v8910_v8, %v5207_v40  ;;  %vm5214_vm10 = vweird.f32 %v9469_v52  ;;  %v4179_v1 = vand.u32 2147483648, %v9476_v39 }
 0x494   : > { %v4157_v50 = vmul.f32 %v9457_v47, %v4156_v22  ;;  %v4203_v27 = vadd.f32 %v4195_v23, %v4187_v44  ;;  %6121 = vmatmul.msk.f32.gmra.mxu3 %vm1199_vm8, %v4187_v44  ;;  %vm9542_vm14 = vmor %vm5213_vm12, %vm5214_vm10  ;;  %v5233_v34 = vand.u32 2147483648, %v9486_v57  ;;  %v4177_v20 = vand.u32 2147483647, %v9476_v39 }
 0x495   : > { %v5211_v25 = vmul.f32 %v9469_v52, %v5210_v15  ;;  %v5283_v38 = vadd.f32 %v5275_v26, %v5267_v29  ;;  %6143 = vmatmul.msk.f32.gmra.mxu2 %vm1199_vm8, %v5267_v29  ;;  %vm4173_vm0 = vweird.f32 %v9476_v39  ;;  %v5231_v3 = vand.u32 2147483647, %v9486_v57 }
 0x496   : > { %v4158_v6 = vadd.f32 %v9457_v47, %v4157_v50  ;;  %v5679_v49 = vld [vmem:[%s7662_s21 + $0x10] sm:$0xff]  ;;  %4211 = vst.msk [vmem:[%s7662_s21 + $0x28] sm:$0xff] %vm1199_vm8, %v4203_v27  ;;  %v4180_v22 = vor.u32 1.1754944e-38, %v4179_v1  ;;  %vm5227_vm2 = vweird.f32 %v9486_v57  ;;  %v5234_v37 = vor.u32 1.1754944e-38, %v5233_v34  ;;  %v4197_v27 = vld [vmem:[%s7662_s21 + $0x38] sm:$0xff] }
 0x497   : > { %v9511_v4 = vpop.eup %6353  ;;  %v5212_v2 = vadd.f32 %v9469_v52, %v5211_v25  ;;  %v3378_v48 = vpop.f32.mrf.mxu3  ;;  %v5687_v41 = vmul.f32 0.25, %v5679_v49  ;;  %5291 = vst.msk [vmem:[%s7662_s21 + $0x18] sm:$0xff] %vm1199_vm8, %v5283_v38  ;;  %vm4178_vm4 = vcmp.eq.f32.partialorder %v4177_v20, 8.507059e+37  ;;  %vm5232_vm6 = vcmp.eq.f32.partialorder %v5231_v3, 8.507059e+37 }
 0x498   : > { %v9522_v24 = vpop.eup %6355  ;;  %v4169_v63 = vmul.f32 %v9511_v4, %v9476_v39  ;;  %v4162_v14 = vsel %vm9516_vm11, %v9457_v47, %v4158_v6  ;;  %5567 = vrot.lane.b32.xlu1 %v3378_v48, %s6442_s22  ;;  %vm4174_vm9 = vweird.f32 %v9511_v4  ;;  %v5276_v39 = vld [vmem:[%s7662_s21 + $0x20] sm:$0xff]  ;;  %s6381_s22 = scalar_lea.hbm %s9725_s4, 128 }
 0x499   : > { %v5223_v55 = vmul.f32 %v9522_v24, %v9486_v57  ;;  %v9538_v19 = vpop.xlane.xlu2 %5147  ;;  %v4167_v9 = vsel %vm4164_vm13, %v4166_v62, %v4162_v14  ;;  %v5216_v7 = vsel %vm9542_vm14, %v9469_v52, %v5212_v2  ;;  %5695 = vst.msk [vmem:[%s7662_s21 + $0x10] sm:$0xff] %vm1199_vm8, %v5687_v41  ;;  %vm5228_vm1 = vweird.f32 %v9522_v24  ;;  %vm4175_vm3 = vmor %vm4173_vm0, %vm4174_vm9  ;;  %p6383_p4 = scmp.lt.s32.totalorder %s6381_s22, %s6377_s12 }
 0x49a   : > { %v4170_v17 = vsub.f32 1.0, %v4169_v63  ;;  %v9547_v47 = vpop.xlane.xlu0 %5150  ;;  %6357 = vrcp.f32 %v9538_v19  ;;  %v4188_v54 = vmul.f32 %v8924_v16, %v4167_v9  ;;  %v5221_v42 = vsel %vm5218_vm15, %v5220_v30, %v5216_v7  ;;  %vm5229_vm5 = vmor %vm5227_vm2, %vm5228_vm1 }
 0x49b   : > { %v5224_v28 = vsub.f32 1.0, %v5223_v55  ;;  %6359 = vrcp.f32 %v9547_v47  ;;  %v5268_v21 = vmul.f32 %v8927_v58, %v5221_v42  ;;  %v5261_v8 = vand.u32 2147483648, %v9547_v47  ;;  %p6384_p6 = por %p6383_p4, %p6382_p3 }
 0x49c   : > { %v4171_v60 = vmul.f32 %v9511_v4, %v4170_v17  ;;  %v4204_v53 = vadd.f32 %v4196_v56, %v4188_v54  ;;  %6122 = vmatmul.msk.f32.gmra.mxu3 %vm1199_vm8, %v4188_v54  ;;  %v5259_v49 = vand.u32 2147483647, %v9547_v47  ;;  %vm5241_vm12 = vweird.f32 %v9538_v19 }
 0x49d   : > { %v5225_v52 = vmul.f32 %v9522_v24, %v5224_v28  ;;  %v5284_v58 = vadd.f32 %v5276_v39, %v5268_v21  ;;  %6144 = vmatmul.msk.f32.gmra.mxu2 %vm1199_vm8, %v5268_v21  ;;  %v5277_v31 = vld [vmem:[%s7662_s21 + $0x28] sm:$0xff]  ;;  %vm5255_vm13 = vweird.f32 %v9547_v47  ;;  %v5262_v30 = vor.u32 1.1754944e-38, %v5261_v8  ;;  %p6385_p7 = pnand %p6384_p6, %p6380_p2 }
 0x49e   : > { %v4172_v16 = vadd.f32 %v9511_v4, %v4171_v60  ;;  %v5680_v46 = vld [vmem:[%s7662_s21 + $0x18] sm:$0xff]  ;;  %4212 = vst.msk [vmem:[%s7662_s21 + $0x30] sm:$0xff] %vm1199_vm8, %v4204_v53  ;;  %vm5260_vm0 = vcmp.eq.f32.partialorder %v5259_v49, 8.507059e+37 }
 0x49f   : > { %v5226_v0 = vadd.f32 %v9522_v24, %v5225_v52  ;;  %v5688_v50 = vmul.f32 0.25, %v5680_v46  ;;  %5292 = vst.msk [vmem:[%s7662_s21 + $0x20] sm:$0xff] %vm1199_vm8, %v5284_v58 }
 0x4a0   : > { %v6358_v15 = vpop.eup %6357  ;;  %v4176_v11 = vsel %vm4175_vm3, %v9511_v4, %v4172_v16  ;;  %v5247_v4 = vand.u32 2147483648, %v9538_v19 }
 0x4a1   : > { %v6360_v57 = vpop.eup %6359  ;;  %v5237_v44 = vmul.f32 %v6358_v15, %v9538_v19  ;;  %v4181_v40 = vsel %vm4178_vm4, %v4180_v22, %v4176_v11  ;;  %v5230_v25 = vsel %vm5229_vm5, %v9522_v24, %v5226_v0  ;;  %5696 = vst.msk [vmem:[%s7662_s21 + $0x18] sm:$0xff] %vm1199_vm8, %v5688_v50  ;;  %vm5242_vm10 = vweird.f32 %v6358_v15 }
 0x4a2   : > { %v5251_v43 = vmul.f32 %v6360_v57, %v9547_v47  ;;  %v4189_v23 = vmul.f32 %v8938_v51, %v4181_v40  ;;  %v5235_v26 = vsel %vm5232_vm6, %v5234_v37, %v5230_v25  ;;  %v5245_v51 = vand.u32 2147483647, %v9538_v19  ;;  %vm5243_vm14 = vmor %vm5241_vm12, %vm5242_vm10 }
 0x4a3   : > { %v5238_v29 = vsub.f32 1.0, %v5237_v44  ;;  %v5269_v38 = vmul.f32 %v8943_v10, %v5235_v26  ;;  %vm5256_vm11 = vweird.f32 %v6360_v57  ;;  %v5248_v14 = vor.u32 1.1754944e-38, %v5247_v4 }
 0x4a4   : > { %v5252_v6 = vsub.f32 1.0, %v5251_v43  ;;  %v4205_v62 = vadd.f32 %v4197_v27, %v4189_v23  ;;  %6123 = vmatmul.msk.f32.gmra.mxu3 %vm1199_vm8, %v4189_v23  ;;  %vm5257_vm15 = vmor %vm5255_vm13, %vm5256_vm11  ;;  %vm5246_vm9 = vcmp.eq.f32.partialorder %v5245_v51, 8.507059e+37 }
 0x4a5   : > { %v5239_v2 = vmul.f32 %v6358_v15, %v5238_v29  ;;  %v5285_v63 = vadd.f32 %v5277_v31, %v5269_v38  ;;  %6145 = vmatmul.msk.f32.gmra.mxu2 %vm1199_vm8, %v5269_v38  ;;  %v5278_v47 = vld [vmem:[%s7662_s21 + $0x30] sm:$0xff] }
 0x4a6   : > { %v5253_v24 = vmul.f32 %v6360_v57, %v5252_v6  ;;  %4213 = vst.msk [vmem:[%s7662_s21 + $0x38] sm:$0xff] %vm1199_vm8, %v4205_v62  ;;  %v5681_v41 = vld [vmem:[%s7662_s21 + $0x20] sm:$0xff] }
 0x4a7   : > { %v5240_v10 = vadd.f32 %v6358_v15, %v5239_v2  ;;  %5293 = vst.msk [vmem:[%s7662_s21 + $0x28] sm:$0xff] %vm1199_vm8, %v5285_v63  ;;  %v5689_v9 = vmul.f32 0.25, %v5681_v41 }
 0x4a8   : > { %v5254_v48 = vadd.f32 %v6360_v57, %v5253_v24 }
 0x4a9   : > { %v5244_v55 = vsel %vm5243_vm14, %v6358_v15, %v5240_v10  ;;  %5697 = vst.msk [vmem:[%s7662_s21 + $0x20] sm:$0xff] %vm1199_vm8, %v5689_v9 }
 0x4aa   : > { %v5258_v19 = vsel %vm5257_vm15, %v6360_v57, %v5254_v48  ;;  %v5249_v33 = vsel %vm5246_vm9, %v5248_v14, %v5244_v55 }
 0x4ab   : > { %v5263_v17 = vsel %vm5260_vm0, %v5262_v30, %v5258_v19  ;;  %v5270_v1 = vmul.f32 %v8969_v59, %v5249_v33 }
 0x4ac   : > { %v5271_v7 = vmul.f32 %v8975_v12, %v5263_v17 }
 0x4ad   : > { %v5286_v28 = vadd.f32 %v5278_v47, %v5270_v1  ;;  %v5279_v34 = vld [vmem:[%s7662_s21 + $0x38] sm:$0xff]  ;;  %6146 = vmatmul.msk.f32.gmra.mxu2 %vm1199_vm8, %v5270_v1 }
 0x4ae   : > { %v5287_v60 = vadd.f32 %v5279_v34, %v5271_v7  ;;  %6147 = vmatmul.msk.f32.vlgmr.msra.gmra.mxu3 %vm1199_vm8, %v5271_v7  ;;  %v5682_v54 = vld [vmem:[%s7662_s21 + $0x28] sm:$0xff] }
 0x4af   : > { %5294 = vst.msk [vmem:[%s7662_s21 + $0x30] sm:$0xff] %vm1199_vm8, %v5286_v28  ;;  %v5690_v20 = vmul.f32 0.25, %v5682_v54 }
 0x4b0   : > { %5295 = vst.msk [vmem:[%s7662_s21 + $0x38] sm:$0xff] %vm1199_vm8, %v5287_v60 }
 0x4b1   : > { %5698 = vst.msk [vmem:[%s7662_s21 + $0x28] sm:$0xff] %vm1199_vm8, %v5690_v20 }
 0x4b6   : > { %v5683_v59 = vld [vmem:[%s7662_s21 + $0x30] sm:$0xff] }
 0x4b7   : > { %v5691_v52 = vmul.f32 0.25, %v5683_v59  ;;  %v5684_v56 = vld [vmem:[%s7662_s21 + $0x38] sm:$0xff] }
 0x4b8   : > { %v5692_v12 = vmul.f32 0.25, %v5684_v56 }
 0x4b9   : > { %5699 = vst.msk [vmem:[%s7662_s21 + $0x30] sm:$0xff] %vm1199_vm8, %v5691_v52 }
 0x4ba   : > { %5700 = vst.msk [vmem:[%s7662_s21 + $0x38] sm:$0xff] %vm1199_vm8, %v5692_v12 }
 0x4ef   : > { %v4439_v42 = vpop.f32.mrf.mxu3 }
 0x4f7   : > { %v4442_v53 = vpop.f32.mrf.mxu3 }
 0x4ff   : > { %v4445_v21 = vpop.f32.mrf.mxu3 }
 0x500   : > { %v5521_v16 = vpop.f32.mrf.mxu2 }
 0x501   : > { %5617 = vrot.lane.b32.xlu1 %v5521_v16, %s9726_s24 }
 0x507   : > { %v4448_v3 = vpop.f32.mrf.mxu3 }
 0x508   : > { %v5524_v22 = vpop.f32.mrf.mxu2 }
 0x509   : > { %5619 = vrot.lane.b32.xlu0 %v5524_v22, %s9726_s24 }
 0x50f   : > { %v4451_v39 = vpop.f32.mrf.mxu3 }
 0x510   : > { %v5527_v0 = vpop.f32.mrf.mxu2 }
 0x511   : > { %5621 = vrot.lane.b32.xlu2 %v5527_v0, %s9726_s24 }
 0x517   : > { %v4454_v15 = vpop.f32.mrf.mxu3 }
 0x518   : > { %v5530_v37 = vpop.f32.mrf.mxu2 }
 0x519   : > { %5587 = vrot.lane.b32.xlu2 %v4442_v53, %s6444_s27  ;;  %5623 = vrot.lane.b32.xlu1 %v5530_v37, %s9726_s24 }
 0x51f   : > { %v4457_v46 = vpop.f32.mrf.mxu3 }
 0x520   : > { %v5533_v58 = vpop.f32.mrf.mxu2 }
 0x521   : > { %5593 = vrot.lane.b32.xlu2 %v4451_v39, %s6444_s27  ;;  %5589 = vrot.lane.b32.xlu1 %v4445_v21, %s6444_s27 }
 0x522   : > { %5625 = vrot.lane.b32.xlu0 %v5533_v58, %s9726_s24 }
 0x527   : > { %v4460_v11 = vpop.f32.mrf.mxu3 }
 0x528   : > { %v5536_v57 = vpop.f32.mrf.mxu2 }
 0x529   : > { %5595 = vrot.lane.b32.xlu1 %v4454_v15, %s6444_s27  ;;  %5599 = vrot.lane.b32.xlu2 %v4460_v11, %s6444_s27 }
 0x52a   : > { %5585 = vrot.lane.b32.xlu0 %v4439_v42, %s6444_s27 }
 0x530   : > { %v5539_v50 = vpop.f32.mrf.mxu2 }
 0x531   : > { %5627 = vrot.lane.b32.xlu2 %v5536_v57, %s9726_s24  ;;  %5629 = vrot.lane.b32.xlu1 %v5539_v50, %s9726_s24 }
 0x532   : > { %5591 = vrot.lane.b32.xlu0 %v4448_v3, %s6444_s27 }
 0x53a   : > { %5597 = vrot.lane.b32.xlu0 %v4457_v46, %s6444_s27 }
 0x53b   : > { %6388 = shalt.err (!%p6385_p7)
}
 0x53c   : > { %s6445_s9 = smov 128   ;;  %s6446_s21 = smov 8   ;;  %v5542_v44 = vpop.f32.mrf.mxu3  ;;  %v5556_v40 = vpop.permute.xlu2 %5555  ;;  %vm5657_vm1 = vcmask 785408  }
 0x53d   : > { %6172 = dma.vmem_to_hbm [thread:$0]  (%p6515_p5), %s5733_s8, 1024, %s5735_s25, %s5714_s10, %s6445_s9, %s6445_s9, %s6446_s21   ;;  %v5554_v23 = vpop.permute.xlu1 %5553  ;;  %v5558_v29 = vpop.permute.xlu0 %5557  ;;  %v5642_v62 = vsel %vm1759_vm7, %v8538_v36, %v5556_v40 }
 0x53e   : > { %s9762_s27 = smov 96   ;;  %p1182_p8 = scmp.lt.s32.totalorder %s6431_s18, 1  ;;  %v5643_v36 = vsel %vm1759_vm7, %v8546_v18, %v5558_v29 }
 0x540   : > { %s9771_s18 = smov (!%p1182_p8, %s6431_s18), 1 }
 0x541   : > { %s6153_s24 = sshll.u32 %s9771_s18, 6 }
 0x542   : > { %5631 = vrot.lane.b32.xlu0 %v5542_v44, %s9762_s27  ;;  %s9658_s6 = scalar_lea.vmem %s9724_s3, %s6153_s24 }
 0x544   : > { %v5560_v25 = vpop.permute.xlu2 %5559 }
 0x545   : > { %v5562_v26 = vpop.permute.xlu1 %5561  ;;  %v5564_v6 = vpop.permute.xlu0 %5563 }
 0x546   : > { %v5645_v10 = vsel %vm1759_vm7, %v8611_v45, %v5562_v26  ;;  %v5646_v18 = vsel %vm1759_vm7, %v8655_v61, %v5564_v6  ;;  %v5641_v45 = vsel %vm1759_vm7, %v8518_v35, %v5554_v23  ;;  %v5644_v61 = vsel %vm1759_vm7, %v8575_v32, %v5560_v25 }
 0x54c   : > { %v5566_v43 = vpop.permute.xlu2 %5565 }
 0x54d   : > { %v5568_v38 = vpop.permute.xlu1 %5567  ;;  %v5647_v54 = vsel %vm1759_vm7, %v8692_v5, %v5566_v43 }
 0x54e   : > { %v5648_v12 = vsel %vm1759_vm7, %v8714_v13, %v5568_v38 }
 0x56b   : > { %v5622_v27 = vpop.permute.xlu2 %5621 }
 0x573   : > { %v5588_v4 = vpop.permute.xlu2 %5587  ;;  %v5618_v51 = vpop.permute.xlu1 %5617 }
 0x574   : > { %v5650_v8 = vsel %vm1199_vm8, %v5642_v62, %v5588_v4 }
 0x57b   : > { %v5620_v2 = vpop.permute.xlu0 %5619  ;;  %v5594_v24 = vpop.permute.xlu2 %5593 }
 0x57c   : > { %v5659_v31 = vsel %vm5657_vm1, %v5650_v8, %v5620_v2  ;;  %v5653_v14 = vsel %vm1199_vm8, %v5645_v10, %v5594_v24 }
 0x57d   : > { %5667 = vst [vmem:[%s9658_s6 + $0x8] sm:$0xff] %v5659_v31 }
 0x583   : > { %v5600_v63 = vpop.permute.xlu2 %5599 }
 0x584   : > { %v5656_v32 = vsel %vm1199_vm8, %v5648_v12, %v5600_v63 }
 0x58b   : > { %v5624_v49 = vpop.permute.xlu1 %5623  ;;  %v5628_v33 = vpop.permute.xlu2 %5627 }
 0x593   : > { %v5590_v48 = vpop.permute.xlu1 %5589 }
 0x594   : > { %v5651_v30 = vsel %vm1199_vm8, %v5643_v36, %v5590_v48  ;;  %v5626_v41 = vpop.permute.xlu0 %5625 }
 0x595   : > { %v5660_v55 = vsel %vm5657_vm1, %v5651_v30, %v5622_v27  ;;  %v5662_v19 = vsel %vm5657_vm1, %v5653_v14, %v5626_v41 }
 0x596   : > { %5668 = vst [vmem:[%s9658_s6 + $0x10] sm:$0xff] %v5660_v55 }
 0x597   : > { %5670 = vst [vmem:[%s9658_s6 + $0x20] sm:$0xff] %v5662_v19 }
 0x59b   : > { %v5596_v9 = vpop.permute.xlu1 %5595 }
 0x59c   : > { %v5654_v17 = vsel %vm1199_vm8, %v5646_v18, %v5596_v9  ;;  %v5586_v1 = vpop.permute.xlu0 %5585 }
 0x59d   : > { %v5663_v47 = vsel %vm5657_vm1, %v5654_v17, %v5628_v33  ;;  %v5649_v7 = vsel %vm1199_vm8, %v5641_v45, %v5586_v1 }
 0x59e   : > { %5671 = vst [vmem:[%s9658_s6 + $0x28] sm:$0xff] %v5663_v47  ;;  %v5658_v28 = vsel %vm5657_vm1, %v5649_v7, %v5618_v51 }
 0x59f   : > { %5666 = vst [vmem:[%s9658_s6] sm:$0xff] %v5658_v28 }
 0x5a3   : > { %v5630_v59 = vpop.permute.xlu1 %5629 }
 0x5a4   : > { %v5592_v34 = vpop.permute.xlu0 %5591 }
 0x5a5   : > { %v5652_v35 = vsel %vm1199_vm8, %v5644_v61, %v5592_v34 }
 0x5a6   : > { %v5661_v60 = vsel %vm5657_vm1, %v5652_v35, %v5624_v49 }
 0x5a7   : > { %5669 = vst [vmem:[%s9658_s6 + $0x18] sm:$0xff] %v5661_v60 }
 0x5ac   : > { %v5598_v20 = vpop.permute.xlu0 %5597 }
 0x5ad   : > { %v5655_v52 = vsel %vm1199_vm8, %v5647_v54, %v5598_v20 }
 0x5ae   : > { %v5664_v56 = vsel %vm5657_vm1, %v5655_v52, %v5630_v59 }
 0x5af   : > { %5672 = vst [vmem:[%s9658_s6 + $0x30] sm:$0xff] %v5664_v56 }
 0x5b4   : > { %v5632_v42 = vpop.permute.xlu0 %5631 }
 0x5b5   : > { %v5665_v53 = vsel %vm5657_vm1, %v5656_v32, %v5632_v42 }
 0x5b6   : > { %5673 = vst [vmem:[%s9658_s6 + $0x38] sm:$0xff] %v5665_v53 }
 0x5b7 PF: > { %s5764_s18 = sand.u32 1, %s6419_s15   ;;  %p6175_p5 = pnand %p5910_p10, %p6526_p9 }
 0x5b8   : > { %s5765_s7 = scalar_lea.sflag [#allocation6], %s5764_s18 }
 0x5b9   : > { %p6176_p11 = pneg %p6175_p5 }
 0x5bb   : > { %6414 = dma.done.wait (%p6176_p11), %s5765_s7, 1024  }
 0x5bc   : > { %6416 = vsyncadd (%p6176_p11), %s5765_s7, 4294966272  ;;  %s18_s20 = sadd.s32 1, %s6439_s20   ;;  %s9763_s15 = smov %s6423_s16 }
 0x5bd   : > { %p15_p12 = scmp.ge.s32.totalorder %s18_s20, 4   ;;  %s9764_s16 = smov %s6427_s17 }
 0x5be   : > { %s9765_s17 = smov %s6524_s28  ;;  %s9766_s18 = smov %s6435_s19 }
 0x5bf   : > { %s9767_s19 = smov %s9769_s23  ;;  %17 = sbr.rel (!%p15_p12) target bundleno = 4 (0x4), region = 231 }
 0x5c4   :  { %5771 = vsyncpa [#allocation6], 1 }
 0x5c5   :  { %5773 = vsyncpa [#allocation6 + $0x1], 1 }

</bundles_post_ra>
